<compile_context>
chip_gen: v6e
topology: v6e:2x2x1
jax: 0.10.0
libtpu: 0.0.40
codegen_flags: <defaults>
</compile_context>

<pallas_src>
import functools
import math

import jax
import jax.numpy as jnp
from jax.experimental import pallas as pl
from jax.experimental.pallas import tpu as pltpu

# ----------------------------- model hyper-parameters -----------------------------
VOCAB = 20
ENC_DIM = 256          # encoder_input_dim
NUM_HEADS = 8
FF_DIM = 16            # encoder_hidden_dim
FF_PAD = 128           # FFN hidden padded to a full lane tile (zero-padded weights)
NUM_LAYERS = 8
LAYERS_PER_STEP = 2    # 2 encoder layers fused per grid step (v6e/v7x tuning; use 1 on v5e)
PC_EMB = 256
POSED_PC_EMB = 80
POSE_EMB = 80
WORD_EMB = 160
TIME_EMB = 80
SEQ_POS_EMB = 8
SEQ_TYPE_EMB = 8
MAX_SEQ = 7
MAX_TYPE = 4
ACTION_DIM = 3 + 6     # 9
PCMLP_HIDDEN = 64
PC_HID_PAD = 128       # PointNet hidden padded to full lane tile (zero weights)

assert POSED_PC_EMB + POSE_EMB == WORD_EMB
assert ENC_DIM == WORD_EMB + TIME_EMB + SEQ_POS_EMB + SEQ_TYPE_EMB
assert NUM_LAYERS % LAYERS_PER_STEP == 0


# ----------------------------- small helpers -----------------------------
def _ln_k(x, w, b, eps=1e-5):
    mu = jnp.mean(x, axis=-1, keepdims=True)
    var = jnp.mean(jnp.square(x - mu), axis=-1, keepdims=True)
    return (x - mu) * jax.lax.rsqrt(var + eps) * w + b


def _bf16(x):
    return x.astype(jnp.bfloat16)


# --------------------- fused point-cloud encoder + EncoderMLP kernel ---------------------
def _pc_mlp_kernel(pts_ref, center_ref,
                   pcw1_ref, pcb1_ref, pcw2_ref, pcb2_ref,
                   ep_w1_ref, ep_b1_ref, ep_g1_ref, ep_be1_ref,
                   ep_w2_ref, ep_b2_ref, ep_g2_ref, ep_be2_ref,
                   fc_w1_ref, fc_b1_ref, fc_g1_ref, fc_be1_ref,
                   fc_w2_ref, fc_b2_ref, fc_g2_ref, fc_be2_ref,
                   fc_w3_ref, fc_b3_ref,
                   o_ref, *, n_obj, n_pts):
    # PointNet-style per-point MLP + max-pool (feat/center never leave VMEM).
    pts = _bf16(pts_ref[...])                    # (N*P, 6) = [xyz | rgb]
    center = center_ref[...]                     # (N, 3) f32 (per-object xyz mean)
    w1 = pcw1_ref[...]                           # (6, HPAD) bf16

    # mean-centering folded into the matmul via linearity:
    #   (xyz - c) @ w1[:3] + rgb @ w1[3:]  ==  pts @ w1 - c @ w1[:3]
    h = jnp.dot(pts, w1, preferred_element_type=jnp.float32) + pcb1_ref[...]        # (N*P, HPAD)
    c_off = jnp.dot(_bf16(center), w1[:3, :], preferred_element_type=jnp.float32)   # (N, HPAD)
    h = jnp.maximum(h.reshape(n_obj, n_pts, -1) - c_off[:, None, :], 0.0)
    f = jnp.dot(_bf16(h.reshape(n_obj * n_pts, -1)), pcw2_ref[...],
                preferred_element_type=jnp.float32) + pcb2_ref[...]                 # (N*P, PC_EMB)
    feat = jnp.max(f.reshape(n_obj, n_pts, PC_EMB), axis=1)                         # (N, PC_EMB)

    # EncoderMLP: encode_position path on center, fc_block on concat([feat, y]).
    y = jnp.dot(_bf16(center), ep_w1_ref[...], preferred_element_type=jnp.float32) + ep_b1_ref[...]
    y = jnp.maximum(_ln_k(y, ep_g1_ref[...], ep_be1_ref[...]), 0.0)
    y = jnp.dot(_bf16(y), ep_w2_ref[...], preferred_element_type=jnp.float32) + ep_b2_ref[...]
    y = jnp.maximum(_ln_k(y, ep_g2_ref[...], ep_be2_ref[...]), 0.0)                 # (N, PC_EMB)

    # concat([feat, y]) @ fc_w1 == feat @ fc_w1[:PC_EMB] + y @ fc_w1[PC_EMB:]
    fc_w1 = fc_w1_ref[...]                                                          # (2*PC_EMB, d6) bf16
    h2 = (jnp.dot(_bf16(feat), fc_w1[:PC_EMB, :], preferred_element_type=jnp.float32)
          + jnp.dot(_bf16(y), fc_w1[PC_EMB:, :], preferred_element_type=jnp.float32)
          + fc_b1_ref[...])
    h2 = jnp.maximum(_ln_k(h2, fc_g1_ref[...], fc_be1_ref[...]), 0.0)
    h2 = jnp.dot(_bf16(h2), fc_w2_ref[...], preferred_element_type=jnp.float32) + fc_b2_ref[...]
    h2 = jnp.maximum(_ln_k(h2, fc_g2_ref[...], fc_be2_ref[...]), 0.0)
    o_ref[...] = jnp.dot(_bf16(h2), fc_w3_ref[...],
                         preferred_element_type=jnp.float32) + fc_b3_ref[...]


def pallas_pc_and_mlp(pcs_flat, p):
    # pcs_flat: (N, P, 6) f32
    n, pnum, _ = pcs_flat.shape
    center = jnp.mean(pcs_flat[..., :3], axis=1)        # (N, 3) tiny XLA reduce
    pts2d = pcs_flat.reshape(n * pnum, 6)
    return pl.pallas_call(
        functools.partial(_pc_mlp_kernel, n_obj=n, n_pts=pnum),
        out_shape=jax.ShapeDtypeStruct((n, POSED_PC_EMB), jnp.float32),
    )(pts2d, center,
      p["pc_w1"], p["pc_b1"].reshape(1, -1), p["pc_w2"], p["pc_b2"].reshape(1, -1),
      p["ep_w1"], p["ep_b1"].reshape(1, -1), p["ep_g1"].reshape(1, -1), p["ep_be1"].reshape(1, -1),
      p["ep_w2"], p["ep_b2"].reshape(1, -1), p["ep_g2"].reshape(1, -1), p["ep_be2"].reshape(1, -1),
      p["fc_w1"], p["fc_b1"].reshape(1, -1), p["fc_g1"].reshape(1, -1), p["fc_be1"].reshape(1, -1),
      p["fc_w2"], p["fc_b2"].reshape(1, -1), p["fc_g2"].reshape(1, -1), p["fc_be2"].reshape(1, -1),
      p["fc_w3"], p["fc_b3"].reshape(1, -1))


# --------------------- transformer encoder stack (+ fused heads) kernel ---------------------
def _encoder_stack_kernel(x_ref, bias_ref,
                          wqkv_ref, bqkv_ref, wo_ref, bo_ref,
                          ln1w_ref, ln1b_ref, w1_ref, b1_ref, w2_ref, b2_ref,
                          ln2w_ref, ln2b_ref,
                          sw1_ref, sb1_ref, sw2_ref, sb2_ref, sw3_ref, sb3_ref,
                          ow1_ref, ob1_ref, ow2_ref, ob2_ref, ow3_ref, ob3_ref,
                          struct_ref, obj_ref,
                          x_scr, *, num_heads, layers_per_step):
    """One grid step == `layers_per_step` TransformerEncoderLayers (post-LN, ReLU FFN,
    key-padding mask).  Activations are batch-flattened & padded to (BLp, D); cross-batch
    attention and padding rows are masked via the block-diagonal additive bias.  On the
    last step both DropoutSampler heads are applied to all rows (outputs sliced outside).
    """
    step = pl.program_id(0)

    @pl.when(step == 0)
    def _():
        x_scr[...] = x_ref[...]

    blp, d_model = x_scr.shape
    head_dim = d_model // num_heads
    scale = 1.0 / math.sqrt(head_dim)
    bias = bias_ref[...]                                   # (BLp, BLp) f32 additive mask

    x = x_scr[...]                                         # (BLp, D) f32
    for j in range(layers_per_step):                       # static unroll over fused layers
        xb = _bf16(x)
        qkv = jnp.dot(xb, wqkv_ref[j], preferred_element_type=jnp.float32) + bqkv_ref[j]
        q = _bf16(qkv[:, :d_model] * scale)                # cast once, slice per head
        k = _bf16(qkv[:, d_model:2 * d_model])
        v = _bf16(qkv[:, 2 * d_model:])

        heads = []
        for h in range(num_heads):                         # static unroll over heads
            sl = slice(h * head_dim, (h + 1) * head_dim)
            s = jax.lax.dot_general(q[:, sl], k[:, sl], (((1,), (1,)), ((), ())),
                                    preferred_element_type=jnp.float32)   # (BLp, BLp)
            s = s + bias
            s = s - jnp.max(s, axis=-1, keepdims=True)
            e = jnp.exp(s)
            inv = pl.reciprocal(jnp.sum(e, axis=-1, keepdims=True), approx=True)
            p_attn = _bf16(e * inv)
            heads.append(jnp.dot(p_attn, v[:, sl], preferred_element_type=jnp.float32))
        attn = jnp.concatenate(heads, axis=-1)             # lane-concat, stays in registers
        attn = jnp.dot(_bf16(attn), wo_ref[j], preferred_element_type=jnp.float32) + bo_ref[j]
        x = _ln_k(x + attn, ln1w_ref[j], ln1b_ref[j])
        hid = jnp.maximum(jnp.dot(_bf16(x), w1_ref[j],
                                  preferred_element_type=jnp.float32) + b1_ref[j], 0.0)
        ff = jnp.dot(_bf16(hid), w2_ref[j], preferred_element_type=jnp.float32) + b2_ref[j]
        x = _ln_k(x + ff, ln2w_ref[j], ln2b_ref[j])
    x_scr[...] = x

    @pl.when(step == pl.num_programs(0) - 1)
    def _():
        xb = _bf16(x)

        def head(w1r, b1r, w2r, b2r, w3r, b3r):
            h1 = jnp.maximum(jnp.dot(xb, w1r[...],
                                     preferred_element_type=jnp.float32) + b1r[...], 0.0)
            h2 = jnp.maximum(jnp.dot(_bf16(h1), w2r[...],
                                     preferred_element_type=jnp.float32) + b2r[...], 0.0)
            return jnp.dot(_bf16(h2), w3r[...], preferred_element_type=jnp.float32) + b3r[...]

        struct_ref[...] = head(sw1_ref, sb1_ref, sw2_ref, sb2_ref, sw3_ref, sb3_ref)
        obj_ref[...] = head(ow1_ref, ob1_ref, ow2_ref, ob2_ref, ow3_ref, ob3_ref)


def pallas_encoder_and_heads(x, attn_bias, p):
    B, L, D = x.shape
    BL = B * L
    BLp = attn_bias.shape[0]
    x_flat = x.reshape(BL, D).astype(jnp.float32)
    x_flat = jnp.pad(x_flat, ((0, BLp - BL), (0, 0)))      # dead rows, fully masked

    stacked = [p["enc_wqkv"], p["enc_bqkv"], p["enc_wo"], p["enc_bo"],
               p["enc_ln1w"], p["enc_ln1b"], p["enc_w1"], p["enc_b1"],
               p["enc_w2"], p["enc_b2"], p["enc_ln2w"], p["enc_ln2b"]]
    head_ws = []
    for name in ("struct", "obj"):
        head_ws += [p[f"{name}_w1"], p[f"{name}_b1"].reshape(1, -1),
                    p[f"{name}_w2"], p[f"{name}_b2"].reshape(1, -1),
                    p[f"{name}_w3"], p[f"{name}_b3"].reshape(1, -1)]

    in_specs = [pl.BlockSpec((BLp, D), lambda l: (0, 0)),
                pl.BlockSpec((BLp, BLp), lambda l: (0, 0))]
    for a in stacked:
        in_specs.append(pl.BlockSpec((LAYERS_PER_STEP,) + a.shape[1:], lambda l: (l, 0, 0)))
    for a in head_ws:
        in_specs.append(pl.BlockSpec(a.shape, lambda l: (0, 0)))   # constant-index, DMA'd once

    struct_all, obj_all = pl.pallas_call(
        functools.partial(_encoder_stack_kernel, num_heads=NUM_HEADS,
                          layers_per_step=LAYERS_PER_STEP),
        out_shape=(jax.ShapeDtypeStruct((BLp, ACTION_DIM), jnp.float32),
                   jax.ShapeDtypeStruct((BLp, ACTION_DIM), jnp.float32)),
        grid=(NUM_LAYERS // LAYERS_PER_STEP,),
        in_specs=in_specs,
        out_specs=(pl.BlockSpec((BLp, ACTION_DIM), lambda l: (0, 0)),
                   pl.BlockSpec((BLp, ACTION_DIM), lambda l: (0, 0))),
        scratch_shapes=[pltpu.VMEM((BLp, D), jnp.float32)],   # resident activations
        compiler_params=pltpu.CompilerParams(dimension_semantics=("arbitrary",)),
    )(x_flat, attn_bias, *stacked, *head_ws)
    return struct_all, obj_all


# ----------------------------- plain-JAX glue -----------------------------
def sinusoidal_time_embedding(t, dim):
    half = dim // 2
    freqs = jnp.exp(jnp.arange(half, dtype=jnp.float32) * (-math.log(10000.0) / (half - 1)))
    args = t.astype(jnp.float32)[:, None] * freqs[None, :]
    return jnp.concatenate([jnp.sin(args), jnp.cos(args)], axis=-1)


def build_attention_bias(pad_mask, B, L, bl_pad):
    """(bl_pad, bl_pad) additive f32 bias: -1e30 for cross-batch pairs, padded keys and
    padding rows/cols; padded query rows get 0 on their diagonal so softmax stays finite."""
    BL = B * L
    same_batch = jnp.arange(B)[:, None] == jnp.arange(B)[None, :]           # (B, B)
    key_ok = (pad_mask == 0)                                                # (B, L)
    allowed = same_batch[:, None, :, None] & key_ok[None, None, :, :]       # (B, 1, B, L)
    allowed = jnp.broadcast_to(allowed, (B, L, B, L)).reshape(BL, BL)
    bias = jnp.where(allowed, 0.0, -1e30).astype(jnp.float32)
    bias = jnp.pad(bias, ((0, bl_pad - BL), (0, bl_pad - BL)), constant_values=-1e30)
    idx = jnp.arange(bl_pad)
    pad_diag = (idx[:, None] == idx[None, :]) & (idx[:, None] >= BL)
    return jnp.where(pad_diag, 0.0, bias)


def forward(params, t, pcs, sentence, poses, type_index, position_index, pad_mask):
    B, num_objects, num_pts, _ = pcs.shape
    _, num_poses, _ = poses.shape
    _, total_len = type_index.shape

    # ---- point cloud encoder + EncoderMLP (single fused pallas_call) ----
    pcs_flat = pcs.reshape(B * num_objects, num_pts, -1).astype(jnp.float32)
    # TODO(synk): original PointTransformerEncoderSmall uses kNN point-transformer blocks /
    # transition-downs; replaced by a mean-centered per-point MLP + max-pool (PointNet-style).
    posed_pc_embed = pallas_pc_and_mlp(pcs_flat, params).reshape(B, num_objects, -1)

    # ---- pose encoder (tiny; plain XLA) ----
    pose_embed = jnp.dot(poses.astype(jnp.float32), params["pose_w"]) + params["pose_b"]

    # ---- virtual structure frame ----
    vf = jnp.tile(params["virtual_frame"], (B, 1, 1))
    posed_pc_embed = jnp.concatenate([vf, posed_pc_embed], axis=1)          # (B, num_poses, 80)
    tgt_obj_embed = jnp.concatenate([pose_embed, posed_pc_embed], axis=-1)  # (B, num_poses, 160)

    # ---- embeddings ----
    sentence_embed = jnp.take(params["word_emb"], sentence, axis=0)         # (B, slen, 160)

    time_embed = sinusoidal_time_embedding(t, TIME_EMB)                     # (B, 80)
    time_embed = jnp.dot(time_embed, params["time_w1"]) + params["time_b1"]
    time_embed = jax.nn.gelu(time_embed, approximate=False)                 # nn.GELU (exact)
    time_embed = jnp.dot(time_embed, params["time_w2"]) + params["time_b2"]
    time_embed = jnp.tile(time_embed[:, None, :], (1, total_len, 1))        # (B, L, 80)

    position_embed = jnp.take(params["pos_emb"], position_index, axis=0)    # (B, L, 8)
    type_embed = jnp.take(params["type_emb"], type_index, axis=0)           # (B, L, 8)

    seq = jnp.concatenate([sentence_embed, tgt_obj_embed], axis=1)          # (B, L, 160)
    x = jnp.concatenate([seq, time_embed, position_embed, type_embed], axis=-1)  # (B, L, 256)

    # ---- transformer encoder + heads (single fused pallas_call) ----
    BL = B * total_len
    BLp = ((BL + 7) // 8) * 8                                               # 14 -> 16 rows
    attn_bias = build_attention_bias(pad_mask, B, total_len, BLp)           # (BLp, BLp)
    struct_all, obj_all = pallas_encoder_and_heads(x, attn_bias, params)    # (BLp, 9) x 2

    obj_tok = obj_all[:BL].reshape(B, total_len, ACTION_DIM)
    struct_tok = struct_all[:BL].reshape(B, total_len, ACTION_DIM)
    pred_obj_poses = obj_tok[:, total_len - num_poses + 1:, :]              # (B, num_poses-1, 9)
    pred_struct_pose = struct_tok[:, 0:1, :]                                # (B, 1, 9)
    pred_poses = jnp.concatenate([pred_struct_pose, pred_obj_poses], axis=1)
    assert pred_poses.shape == poses.shape
    return pred_poses


# ----------------------------- deterministic parameters -----------------------------
def init_params(key):
    keys = iter(jax.random.split(key, 64))

    def W(shape, scale=0.02):
        return (scale * jax.random.normal(next(keys), shape)).astype(jnp.float32)

    def Wb(shape, scale=0.02):          # bf16-stored matmul weight (streamed at half the bytes)
        return W(shape, scale).astype(jnp.bfloat16)

    def Z(shape):
        return jnp.zeros(shape, jnp.float32)

    def O(shape):
        return jnp.ones(shape, jnp.float32)

    p = {}
    # point cloud encoder (simplified); hidden zero-padded 64 -> 128 lanes
    w1 = W((6, PCMLP_HIDDEN))
    p["pc_w1"] = jnp.pad(w1, ((0, 0), (0, PC_HID_PAD - PCMLP_HIDDEN))).astype(jnp.bfloat16)
    p["pc_b1"] = Z((PC_HID_PAD,))
    w2 = W((PCMLP_HIDDEN, PC_EMB))
    p["pc_w2"] = jnp.pad(w2, ((0, PC_HID_PAD - PCMLP_HIDDEN), (0, 0))).astype(jnp.bfloat16)
    p["pc_b2"] = Z((PC_EMB,))
    # EncoderMLP
    p["ep_w1"] = Wb((3, PC_EMB));      p["ep_b1"] = Z((PC_EMB,))
    p["ep_g1"] = O((PC_EMB,));         p["ep_be1"] = Z((PC_EMB,))
    p["ep_w2"] = Wb((PC_EMB, PC_EMB)); p["ep_b2"] = Z((PC_EMB,))
    p["ep_g2"] = O((PC_EMB,));         p["ep_be2"] = Z((PC_EMB,))
    d6 = 2 * POSED_PC_EMB
    p["fc_w1"] = Wb((2 * PC_EMB, d6)); p["fc_b1"] = Z((d6,))
    p["fc_g1"] = O((d6,));             p["fc_be1"] = Z((d6,))
    p["fc_w2"] = Wb((d6, d6));         p["fc_b2"] = Z((d6,))
    p["fc_g2"] = O((d6,));             p["fc_be2"] = Z((d6,))
    p["fc_w3"] = Wb((d6, POSED_PC_EMB)); p["fc_b3"] = Z((POSED_PC_EMB,))
    # virtual structure frame
    p["virtual_frame"] = W((1, 1, POSED_PC_EMB), scale=1.0)
    # embeddings (word embedding with padding_idx=0)
    we = W((VOCAB, WORD_EMB), scale=1.0)
    p["word_emb"] = we.at[0].set(0.0)
    p["pos_emb"] = W((MAX_SEQ, SEQ_POS_EMB), scale=1.0)
    p["type_emb"] = W((MAX_TYPE, SEQ_TYPE_EMB), scale=1.0)
    # pose encoder
    p["pose_w"] = W((ACTION_DIM, POSE_EMB)); p["pose_b"] = Z((POSE_EMB,))
    # time MLP
    p["time_w1"] = W((TIME_EMB, TIME_EMB)); p["time_b1"] = Z((TIME_EMB,))
    p["time_w2"] = W((TIME_EMB, TIME_EMB)); p["time_b2"] = Z((TIME_EMB,))
    # transformer encoder, weights pre-transposed (in, out), stacked over layers, bf16,
    # FFN hidden zero-padded 16 -> 128 lanes (padding contributes exactly zero).
    D, F, NL = ENC_DIM, FF_DIM, NUM_LAYERS
    p["enc_wqkv"] = Wb((NL, D, 3 * D)); p["enc_bqkv"] = Z((NL, 1, 3 * D))
    p["enc_wo"] = Wb((NL, D, D));       p["enc_bo"] = Z((NL, 1, D))
    p["enc_ln1w"] = O((NL, 1, D));      p["enc_ln1b"] = Z((NL, 1, D))
    ew1 = W((NL, D, F))
    p["enc_w1"] = jnp.pad(ew1, ((0, 0), (0, 0), (0, FF_PAD - F))).astype(jnp.bfloat16)
    p["enc_b1"] = Z((NL, 1, FF_PAD))
    ew2 = W((NL, F, D))
    p["enc_w2"] = jnp.pad(ew2, ((0, 0), (0, FF_PAD - F), (0, 0))).astype(jnp.bfloat16)
    p["enc_b2"] = Z((NL, 1, D))
    p["enc_ln2w"] = O((NL, 1, D));      p["enc_ln2b"] = Z((NL, 1, D))
    # DropoutSampler heads (dropout rates are 0.0)
    for name in ("struct", "obj"):
        p[f"{name}_w1"] = Wb((D, D));          p[f"{name}_b1"] = Z((D,))
        p[f"{name}_w2"] = Wb((D, D));          p[f"{name}_b2"] = Z((D,))
        p[f"{name}_w3"] = Wb((D, ACTION_DIM)); p[f"{name}_b3"] = Z((ACTION_DIM,))
    return p


# ----------------------------- main -----------------------------
if __name__ == "__main__":
    key = jax.random.PRNGKey(0)
    pkey, dkey = jax.random.split(key)
    params = init_params(pkey)

    B, num_objects, num_pts = 2, 3, 128
    num_poses = num_objects + 1          # + virtual structure frame
    sentence_len = 3
    total_len = sentence_len + num_poses  # 7 == max_seq_size

    k1, k2 = jax.random.split(dkey)
    pcs = jax.random.normal(k1, (B, num_objects, num_pts, 6), jnp.float32)
    poses = jax.random.normal(k2, (B, num_poses, ACTION_DIM), jnp.float32)
    t = jnp.array([3.0, 17.0], jnp.float32)
    sentence = jnp.array([[2, 5, 7], [1, 0, 3]], jnp.int32)
    type_index = jnp.array([[0, 0, 0, 1, 2, 2, 2],
                            [0, 0, 0, 1, 2, 2, 2]], jnp.int32)
    position_index = jnp.tile(jnp.arange(total_len, dtype=jnp.int32)[None, :], (B, 1))
    pad_mask = jnp.array([[0, 0, 1, 0, 0, 0, 0],
                          [0, 0, 0, 0, 0, 0, 0]], jnp.int32)

    out = jax.jit(forward)(params, t, pcs, sentence, poses,
                           type_index, position_index, pad_mask)
    out = jax.block_until_ready(out)
    assert out.shape == poses.shape
    print("KERNEL_OK")
</pallas_src>

<mosaic_0001>
module attributes {stable_mosaic.version = 11 : i64} {
  func.func @_pc_mlp_kernel(%arg0: memref<768x6xf32, #tpu.memory_space<vmem>>, %arg1: memref<6x3xf32, #tpu.memory_space<vmem>>, %arg2: memref<6x128xbf16, #tpu.memory_space<vmem>>, %arg3: memref<1x128xf32, #tpu.memory_space<vmem>>, %arg4: memref<128x256xbf16, #tpu.memory_space<vmem>>, %arg5: memref<1x256xf32, #tpu.memory_space<vmem>>, %arg6: memref<3x256xbf16, #tpu.memory_space<vmem>>, %arg7: memref<1x256xf32, #tpu.memory_space<vmem>>, %arg8: memref<1x256xf32, #tpu.memory_space<vmem>>, %arg9: memref<1x256xf32, #tpu.memory_space<vmem>>, %arg10: memref<256x256xbf16, #tpu.memory_space<vmem>>, %arg11: memref<1x256xf32, #tpu.memory_space<vmem>>, %arg12: memref<1x256xf32, #tpu.memory_space<vmem>>, %arg13: memref<1x256xf32, #tpu.memory_space<vmem>>, %arg14: memref<512x160xbf16, #tpu.memory_space<vmem>>, %arg15: memref<1x160xf32, #tpu.memory_space<vmem>>, %arg16: memref<1x160xf32, #tpu.memory_space<vmem>>, %arg17: memref<1x160xf32, #tpu.memory_space<vmem>>, %arg18: memref<160x160xbf16, #tpu.memory_space<vmem>>, %arg19: memref<1x160xf32, #tpu.memory_space<vmem>>, %arg20: memref<1x160xf32, #tpu.memory_space<vmem>>, %arg21: memref<1x160xf32, #tpu.memory_space<vmem>>, %arg22: memref<160x80xbf16, #tpu.memory_space<vmem>>, %arg23: memref<1x80xf32, #tpu.memory_space<vmem>>, %arg24: memref<6x80xf32, #tpu.memory_space<vmem>>) attributes {dimension_semantics = [], scalar_prefetch = 0 : i64, scratch_operands = 0 : i64, tpu.core_type = #tpu.core_type<tc>} {
    %c0 = arith.constant 0 : index
    %c0_0 = arith.constant 0 : index
    %0 = vector.load %arg0[%c0, %c0_0] : memref<768x6xf32, #tpu.memory_space<vmem>>, vector<768x6xf32>
    %1 = arith.truncf %0 : vector<768x6xf32> to vector<768x6xbf16>
    %c0_1 = arith.constant 0 : index
    %c0_2 = arith.constant 0 : index
    %2 = vector.load %arg1[%c0_1, %c0_2] : memref<6x3xf32, #tpu.memory_space<vmem>>, vector<6x3xf32>
    %c0_3 = arith.constant 0 : index
    %c0_4 = arith.constant 0 : index
    %3 = vector.load %arg2[%c0_3, %c0_4] : memref<6x128xbf16, #tpu.memory_space<vmem>>, vector<6x128xbf16>
    %cst = arith.constant dense<0.000000e+00> : vector<768x128xf32>
    %4 = tpu.matmul %1, %3, %cst {dimension_numbers = #tpu.dot_dimension_numbers<[1], [0], [0], [1], [0, 0, 1, 1], [], []>} : vector<768x6xbf16>, vector<6x128xbf16>, vector<768x128xf32> -> vector<768x128xf32>
    %c0_5 = arith.constant 0 : index
    %c0_6 = arith.constant 0 : index
    %5 = vector.load %arg3[%c0_5, %c0_6] : memref<1x128xf32, #tpu.memory_space<vmem>>, vector<1x128xf32>
    %6 = vector.broadcast %5 : vector<1x128xf32> to vector<768x128xf32>
    %7 = arith.addf %4, %6 : vector<768x128xf32>
    %8 = arith.truncf %2 : vector<6x3xf32> to vector<6x3xbf16>
    %9 = vector.extract_strided_slice %3 {offsets = [0, 0], sizes = [3, 128], strides = [1, 1]} : vector<6x128xbf16> to vector<3x128xbf16>
    %cst_7 = arith.constant dense<0.000000e+00> : vector<6x128xf32>
    %10 = tpu.matmul %8, %9, %cst_7 {dimension_numbers = #tpu.dot_dimension_numbers<[1], [0], [0], [1], [0, 0, 1, 1], [], []>} : vector<6x3xbf16>, vector<3x128xbf16>, vector<6x128xf32> -> vector<6x128xf32>
    %11 = vector.shape_cast %7 : vector<768x128xf32> to vector<6x128x128xf32>
    %12 = vector.shape_cast %10 : vector<6x128xf32> to vector<6x1x128xf32>
    %13 = vector.broadcast %12 : vector<6x1x128xf32> to vector<6x128x128xf32>
    %14 = arith.subf %11, %13 : vector<6x128x128xf32>
    %cst_8 = arith.constant 0.000000e+00 : f32
    %15 = vector.broadcast %cst_8 : f32 to vector<6x128x128xf32>
    %16 = arith.maximumf %14, %15 : vector<6x128x128xf32>
    %17 = vector.shape_cast %16 : vector<6x128x128xf32> to vector<768x128xf32>
    %18 = arith.truncf %17 : vector<768x128xf32> to vector<768x128xbf16>
    %c0_9 = arith.constant 0 : index
    %c0_10 = arith.constant 0 : index
    %19 = vector.load %arg4[%c0_9, %c0_10] : memref<128x256xbf16, #tpu.memory_space<vmem>>, vector<128x256xbf16>
    %cst_11 = arith.constant dense<0.000000e+00> : vector<768x256xf32>
    %20 = tpu.matmul %18, %19, %cst_11 {dimension_numbers = #tpu.dot_dimension_numbers<[1], [0], [0], [1], [0, 0, 1, 1], [], []>} : vector<768x128xbf16>, vector<128x256xbf16>, vector<768x256xf32> -> vector<768x256xf32>
    %c0_12 = arith.constant 0 : index
    %c0_13 = arith.constant 0 : index
    %21 = vector.load %arg5[%c0_12, %c0_13] : memref<1x256xf32, #tpu.memory_space<vmem>>, vector<1x256xf32>
    %22 = vector.broadcast %21 : vector<1x256xf32> to vector<768x256xf32>
    %23 = arith.addf %20, %22 : vector<768x256xf32>
    %24 = vector.shape_cast %23 : vector<768x256xf32> to vector<6x128x256xf32>
    %cst_14 = arith.constant dense<0xFF800000> : vector<6x256xf32>
    %25 = vector.multi_reduction <maximumf>, %24, %cst_14 [1] : vector<6x128x256xf32> to vector<6x256xf32>
    %26 = arith.truncf %2 : vector<6x3xf32> to vector<6x3xbf16>
    %c0_15 = arith.constant 0 : index
    %c0_16 = arith.constant 0 : index
    %27 = vector.load %arg6[%c0_15, %c0_16] : memref<3x256xbf16, #tpu.memory_space<vmem>>, vector<3x256xbf16>
    %cst_17 = arith.constant dense<0.000000e+00> : vector<6x256xf32>
    %28 = tpu.matmul %26, %27, %cst_17 {dimension_numbers = #tpu.dot_dimension_numbers<[1], [0], [0], [1], [0, 0, 1, 1], [], []>} : vector<6x3xbf16>, vector<3x256xbf16>, vector<6x256xf32> -> vector<6x256xf32>
    %c0_18 = arith.constant 0 : index
    %c0_19 = arith.constant 0 : index
    %29 = vector.load %arg7[%c0_18, %c0_19] : memref<1x256xf32, #tpu.memory_space<vmem>>, vector<1x256xf32>
    %30 = vector.broadcast %29 : vector<1x256xf32> to vector<6x256xf32>
    %31 = arith.addf %28, %30 : vector<6x256xf32>
    %c0_20 = arith.constant 0 : index
    %c0_21 = arith.constant 0 : index
    %32 = vector.load %arg8[%c0_20, %c0_21] : memref<1x256xf32, #tpu.memory_space<vmem>>, vector<1x256xf32>
    %c0_22 = arith.constant 0 : index
    %c0_23 = arith.constant 0 : index
    %33 = vector.load %arg9[%c0_22, %c0_23] : memref<1x256xf32, #tpu.memory_space<vmem>>, vector<1x256xf32>
    %cst_24 = arith.constant dense<0.000000e+00> : vector<6xf32>
    %34 = vector.multi_reduction <add>, %31, %cst_24 [1] : vector<6x256xf32> to vector<6xf32>
    %35 = vector.shape_cast %34 : vector<6xf32> to vector<6x1xf32>
    %cst_25 = arith.constant 2.560000e+02 : f32
    %36 = vector.broadcast %cst_25 : f32 to vector<6x1xf32>
    %37 = arith.divf %35, %36 : vector<6x1xf32>
    %38 = vector.broadcast %37 : vector<6x1xf32> to vector<6x256xf32>
    %39 = arith.subf %31, %38 : vector<6x256xf32>
    %40 = arith.mulf %39, %39 : vector<6x256xf32>
    %cst_26 = arith.constant dense<0.000000e+00> : vector<6xf32>
    %41 = vector.multi_reduction <add>, %40, %cst_26 [1] : vector<6x256xf32> to vector<6xf32>
    %42 = vector.shape_cast %41 : vector<6xf32> to vector<6x1xf32>
    %cst_27 = arith.constant 2.560000e+02 : f32
    %43 = vector.broadcast %cst_27 : f32 to vector<6x1xf32>
    %44 = arith.divf %42, %43 : vector<6x1xf32>
    %45 = vector.broadcast %37 : vector<6x1xf32> to vector<6x256xf32>
    %46 = arith.subf %31, %45 : vector<6x256xf32>
    %cst_28 = arith.constant 9.99999974E-6 : f32
    %47 = vector.broadcast %cst_28 : f32 to vector<6x1xf32>
    %48 = arith.addf %44, %47 : vector<6x1xf32>
    %49 = math.rsqrt %48 : vector<6x1xf32>
    %50 = vector.broadcast %49 : vector<6x1xf32> to vector<6x256xf32>
    %51 = arith.mulf %46, %50 : vector<6x256xf32>
    %52 = vector.broadcast %32 : vector<1x256xf32> to vector<6x256xf32>
    %53 = arith.mulf %51, %52 : vector<6x256xf32>
    %54 = vector.broadcast %33 : vector<1x256xf32> to vector<6x256xf32>
    %55 = arith.addf %53, %54 : vector<6x256xf32>
    %cst_29 = arith.constant 0.000000e+00 : f32
    %56 = vector.broadcast %cst_29 : f32 to vector<6x256xf32>
    %57 = arith.maximumf %55, %56 : vector<6x256xf32>
    %58 = arith.truncf %57 : vector<6x256xf32> to vector<6x256xbf16>
    %c0_30 = arith.constant 0 : index
    %c0_31 = arith.constant 0 : index
    %59 = vector.load %arg10[%c0_30, %c0_31] : memref<256x256xbf16, #tpu.memory_space<vmem>>, vector<256x256xbf16>
    %cst_32 = arith.constant dense<0.000000e+00> : vector<6x256xf32>
    %60 = tpu.matmul %58, %59, %cst_32 {dimension_numbers = #tpu.dot_dimension_numbers<[1], [0], [0], [1], [0, 0, 1, 1], [], []>} : vector<6x256xbf16>, vector<256x256xbf16>, vector<6x256xf32> -> vector<6x256xf32>
    %c0_33 = arith.constant 0 : index
    %c0_34 = arith.constant 0 : index
    %61 = vector.load %arg11[%c0_33, %c0_34] : memref<1x256xf32, #tpu.memory_space<vmem>>, vector<1x256xf32>
    %62 = vector.broadcast %61 : vector<1x256xf32> to vector<6x256xf32>
    %63 = arith.addf %60, %62 : vector<6x256xf32>
    %c0_35 = arith.constant 0 : index
    %c0_36 = arith.constant 0 : index
    %64 = vector.load %arg12[%c0_35, %c0_36] : memref<1x256xf32, #tpu.memory_space<vmem>>, vector<1x256xf32>
    %c0_37 = arith.constant 0 : index
    %c0_38 = arith.constant 0 : index
    %65 = vector.load %arg13[%c0_37, %c0_38] : memref<1x256xf32, #tpu.memory_space<vmem>>, vector<1x256xf32>
    %cst_39 = arith.constant dense<0.000000e+00> : vector<6xf32>
    %66 = vector.multi_reduction <add>, %63, %cst_39 [1] : vector<6x256xf32> to vector<6xf32>
    %67 = vector.shape_cast %66 : vector<6xf32> to vector<6x1xf32>
    %cst_40 = arith.constant 2.560000e+02 : f32
    %68 = vector.broadcast %cst_40 : f32 to vector<6x1xf32>
    %69 = arith.divf %67, %68 : vector<6x1xf32>
    %70 = vector.broadcast %69 : vector<6x1xf32> to vector<6x256xf32>
    %71 = arith.subf %63, %70 : vector<6x256xf32>
    %72 = arith.mulf %71, %71 : vector<6x256xf32>
    %cst_41 = arith.constant dense<0.000000e+00> : vector<6xf32>
    %73 = vector.multi_reduction <add>, %72, %cst_41 [1] : vector<6x256xf32> to vector<6xf32>
    %74 = vector.shape_cast %73 : vector<6xf32> to vector<6x1xf32>
    %cst_42 = arith.constant 2.560000e+02 : f32
    %75 = vector.broadcast %cst_42 : f32 to vector<6x1xf32>
    %76 = arith.divf %74, %75 : vector<6x1xf32>
    %77 = vector.broadcast %69 : vector<6x1xf32> to vector<6x256xf32>
    %78 = arith.subf %63, %77 : vector<6x256xf32>
    %cst_43 = arith.constant 9.99999974E-6 : f32
    %79 = vector.broadcast %cst_43 : f32 to vector<6x1xf32>
    %80 = arith.addf %76, %79 : vector<6x1xf32>
    %81 = math.rsqrt %80 : vector<6x1xf32>
    %82 = vector.broadcast %81 : vector<6x1xf32> to vector<6x256xf32>
    %83 = arith.mulf %78, %82 : vector<6x256xf32>
    %84 = vector.broadcast %64 : vector<1x256xf32> to vector<6x256xf32>
    %85 = arith.mulf %83, %84 : vector<6x256xf32>
    %86 = vector.broadcast %65 : vector<1x256xf32> to vector<6x256xf32>
    %87 = arith.addf %85, %86 : vector<6x256xf32>
    %cst_44 = arith.constant 0.000000e+00 : f32
    %88 = vector.broadcast %cst_44 : f32 to vector<6x256xf32>
    %89 = arith.maximumf %87, %88 : vector<6x256xf32>
    %c0_45 = arith.constant 0 : index
    %c0_46 = arith.constant 0 : index
    %90 = vector.load %arg14[%c0_45, %c0_46] : memref<512x160xbf16, #tpu.memory_space<vmem>>, vector<512x160xbf16>
    %91 = arith.truncf %25 : vector<6x256xf32> to vector<6x256xbf16>
    %92 = vector.extract_strided_slice %90 {offsets = [0, 0], sizes = [256, 160], strides = [1, 1]} : vector<512x160xbf16> to vector<256x160xbf16>
    %cst_47 = arith.constant dense<0.000000e+00> : vector<6x160xf32>
    %93 = tpu.matmul %91, %92, %cst_47 {dimension_numbers = #tpu.dot_dimension_numbers<[1], [0], [0], [1], [0, 0, 1, 1], [], []>} : vector<6x256xbf16>, vector<256x160xbf16>, vector<6x160xf32> -> vector<6x160xf32>
    %94 = arith.truncf %89 : vector<6x256xf32> to vector<6x256xbf16>
    %95 = vector.extract_strided_slice %90 {offsets = [256, 0], sizes = [256, 160], strides = [1, 1]} : vector<512x160xbf16> to vector<256x160xbf16>
    %cst_48 = arith.constant dense<0.000000e+00> : vector<6x160xf32>
    %96 = tpu.matmul %94, %95, %cst_48 {dimension_numbers = #tpu.dot_dimension_numbers<[1], [0], [0], [1], [0, 0, 1, 1], [], []>} : vector<6x256xbf16>, vector<256x160xbf16>, vector<6x160xf32> -> vector<6x160xf32>
    %97 = arith.addf %93, %96 : vector<6x160xf32>
    %c0_49 = arith.constant 0 : index
    %c0_50 = arith.constant 0 : index
    %98 = vector.load %arg15[%c0_49, %c0_50] : memref<1x160xf32, #tpu.memory_space<vmem>>, vector<1x160xf32>
    %99 = vector.broadcast %98 : vector<1x160xf32> to vector<6x160xf32>
    %100 = arith.addf %97, %99 : vector<6x160xf32>
    %c0_51 = arith.constant 0 : index
    %c0_52 = arith.constant 0 : index
    %101 = vector.load %arg16[%c0_51, %c0_52] : memref<1x160xf32, #tpu.memory_space<vmem>>, vector<1x160xf32>
    %c0_53 = arith.constant 0 : index
    %c0_54 = arith.constant 0 : index
    %102 = vector.load %arg17[%c0_53, %c0_54] : memref<1x160xf32, #tpu.memory_space<vmem>>, vector<1x160xf32>
    %cst_55 = arith.constant dense<0.000000e+00> : vector<6xf32>
    %103 = vector.multi_reduction <add>, %100, %cst_55 [1] : vector<6x160xf32> to vector<6xf32>
    %104 = vector.shape_cast %103 : vector<6xf32> to vector<6x1xf32>
    %cst_56 = arith.constant 1.600000e+02 : f32
    %105 = vector.broadcast %cst_56 : f32 to vector<6x1xf32>
    %106 = arith.divf %104, %105 : vector<6x1xf32>
    %107 = vector.broadcast %106 : vector<6x1xf32> to vector<6x160xf32>
    %108 = arith.subf %100, %107 : vector<6x160xf32>
    %109 = arith.mulf %108, %108 : vector<6x160xf32>
    %cst_57 = arith.constant dense<0.000000e+00> : vector<6xf32>
    %110 = vector.multi_reduction <add>, %109, %cst_57 [1] : vector<6x160xf32> to vector<6xf32>
    %111 = vector.shape_cast %110 : vector<6xf32> to vector<6x1xf32>
    %cst_58 = arith.constant 1.600000e+02 : f32
    %112 = vector.broadcast %cst_58 : f32 to vector<6x1xf32>
    %113 = arith.divf %111, %112 : vector<6x1xf32>
    %114 = vector.broadcast %106 : vector<6x1xf32> to vector<6x160xf32>
    %115 = arith.subf %100, %114 : vector<6x160xf32>
    %cst_59 = arith.constant 9.99999974E-6 : f32
    %116 = vector.broadcast %cst_59 : f32 to vector<6x1xf32>
    %117 = arith.addf %113, %116 : vector<6x1xf32>
    %118 = math.rsqrt %117 : vector<6x1xf32>
    %119 = vector.broadcast %118 : vector<6x1xf32> to vector<6x160xf32>
    %120 = arith.mulf %115, %119 : vector<6x160xf32>
    %121 = vector.broadcast %101 : vector<1x160xf32> to vector<6x160xf32>
    %122 = arith.mulf %120, %121 : vector<6x160xf32>
    %123 = vector.broadcast %102 : vector<1x160xf32> to vector<6x160xf32>
    %124 = arith.addf %122, %123 : vector<6x160xf32>
    %cst_60 = arith.constant 0.000000e+00 : f32
    %125 = vector.broadcast %cst_60 : f32 to vector<6x160xf32>
    %126 = arith.maximumf %124, %125 : vector<6x160xf32>
    %127 = arith.truncf %126 : vector<6x160xf32> to vector<6x160xbf16>
    %c0_61 = arith.constant 0 : index
    %c0_62 = arith.constant 0 : index
    %128 = vector.load %arg18[%c0_61, %c0_62] : memref<160x160xbf16, #tpu.memory_space<vmem>>, vector<160x160xbf16>
    %cst_63 = arith.constant dense<0.000000e+00> : vector<6x160xf32>
    %129 = tpu.matmul %127, %128, %cst_63 {dimension_numbers = #tpu.dot_dimension_numbers<[1], [0], [0], [1], [0, 0, 1, 1], [], []>} : vector<6x160xbf16>, vector<160x160xbf16>, vector<6x160xf32> -> vector<6x160xf32>
    %c0_64 = arith.constant 0 : index
    %c0_65 = arith.constant 0 : index
    %130 = vector.load %arg19[%c0_64, %c0_65] : memref<1x160xf32, #tpu.memory_space<vmem>>, vector<1x160xf32>
    %131 = vector.broadcast %130 : vector<1x160xf32> to vector<6x160xf32>
    %132 = arith.addf %129, %131 : vector<6x160xf32>
    %c0_66 = arith.constant 0 : index
    %c0_67 = arith.constant 0 : index
    %133 = vector.load %arg20[%c0_66, %c0_67] : memref<1x160xf32, #tpu.memory_space<vmem>>, vector<1x160xf32>
    %c0_68 = arith.constant 0 : index
    %c0_69 = arith.constant 0 : index
    %134 = vector.load %arg21[%c0_68, %c0_69] : memref<1x160xf32, #tpu.memory_space<vmem>>, vector<1x160xf32>
    %cst_70 = arith.constant dense<0.000000e+00> : vector<6xf32>
    %135 = vector.multi_reduction <add>, %132, %cst_70 [1] : vector<6x160xf32> to vector<6xf32>
    %136 = vector.shape_cast %135 : vector<6xf32> to vector<6x1xf32>
    %cst_71 = arith.constant 1.600000e+02 : f32
    %137 = vector.broadcast %cst_71 : f32 to vector<6x1xf32>
    %138 = arith.divf %136, %137 : vector<6x1xf32>
    %139 = vector.broadcast %138 : vector<6x1xf32> to vector<6x160xf32>
    %140 = arith.subf %132, %139 : vector<6x160xf32>
    %141 = arith.mulf %140, %140 : vector<6x160xf32>
    %cst_72 = arith.constant dense<0.000000e+00> : vector<6xf32>
    %142 = vector.multi_reduction <add>, %141, %cst_72 [1] : vector<6x160xf32> to vector<6xf32>
    %143 = vector.shape_cast %142 : vector<6xf32> to vector<6x1xf32>
    %cst_73 = arith.constant 1.600000e+02 : f32
    %144 = vector.broadcast %cst_73 : f32 to vector<6x1xf32>
    %145 = arith.divf %143, %144 : vector<6x1xf32>
    %146 = vector.broadcast %138 : vector<6x1xf32> to vector<6x160xf32>
    %147 = arith.subf %132, %146 : vector<6x160xf32>
    %cst_74 = arith.constant 9.99999974E-6 : f32
    %148 = vector.broadcast %cst_74 : f32 to vector<6x1xf32>
    %149 = arith.addf %145, %148 : vector<6x1xf32>
    %150 = math.rsqrt %149 : vector<6x1xf32>
    %151 = vector.broadcast %150 : vector<6x1xf32> to vector<6x160xf32>
    %152 = arith.mulf %147, %151 : vector<6x160xf32>
    %153 = vector.broadcast %133 : vector<1x160xf32> to vector<6x160xf32>
    %154 = arith.mulf %152, %153 : vector<6x160xf32>
    %155 = vector.broadcast %134 : vector<1x160xf32> to vector<6x160xf32>
    %156 = arith.addf %154, %155 : vector<6x160xf32>
    %cst_75 = arith.constant 0.000000e+00 : f32
    %157 = vector.broadcast %cst_75 : f32 to vector<6x160xf32>
    %158 = arith.maximumf %156, %157 : vector<6x160xf32>
    %159 = arith.truncf %158 : vector<6x160xf32> to vector<6x160xbf16>
    %c0_76 = arith.constant 0 : index
    %c0_77 = arith.constant 0 : index
    %160 = vector.load %arg22[%c0_76, %c0_77] : memref<160x80xbf16, #tpu.memory_space<vmem>>, vector<160x80xbf16>
    %cst_78 = arith.constant dense<0.000000e+00> : vector<6x80xf32>
    %161 = tpu.matmul %159, %160, %cst_78 {dimension_numbers = #tpu.dot_dimension_numbers<[1], [0], [0], [1], [0, 0, 1, 1], [], []>} : vector<6x160xbf16>, vector<160x80xbf16>, vector<6x80xf32> -> vector<6x80xf32>
    %c0_79 = arith.constant 0 : index
    %c0_80 = arith.constant 0 : index
    %162 = vector.load %arg23[%c0_79, %c0_80] : memref<1x80xf32, #tpu.memory_space<vmem>>, vector<1x80xf32>
    %163 = vector.broadcast %162 : vector<1x80xf32> to vector<6x80xf32>
    %164 = arith.addf %161, %163 : vector<6x80xf32>
    %c0_81 = arith.constant 0 : index
    %c0_82 = arith.constant 0 : index
    %165 = vector.load %arg24[%c0_81, %c0_82] : memref<6x80xf32, #tpu.memory_space<vmem>>, vector<6x80xf32>
    tpu.vector_store %arg24[%c0_81, %c0_82], %164 {strides = array<i32>} : memref<6x80xf32, #tpu.memory_space<vmem>>, vector<6x80xf32>,
    return
  }
}

module attributes {stable_mosaic.version = 11 : i64} {
  func.func @_encoder_stack_kernel(%arg0: i32, %arg1: memref<16x256xf32, #tpu.memory_space<vmem>>, %arg2: memref<16x16xf32, #tpu.memory_space<vmem>>, %arg3: memref<2x256x768xbf16, #tpu.memory_space<vmem>>, %arg4: memref<2x1x768xf32, #tpu.memory_space<vmem>>, %arg5: memref<2x256x256xbf16, #tpu.memory_space<vmem>>, %arg6: memref<2x1x256xf32, #tpu.memory_space<vmem>>, %arg7: memref<2x1x256xf32, #tpu.memory_space<vmem>>, %arg8: memref<2x1x256xf32, #tpu.memory_space<vmem>>, %arg9: memref<2x256x128xbf16, #tpu.memory_space<vmem>>, %arg10: memref<2x1x128xf32, #tpu.memory_space<vmem>>, %arg11: memref<2x128x256xbf16, #tpu.memory_space<vmem>>, %arg12: memref<2x1x256xf32, #tpu.memory_space<vmem>>, %arg13: memref<2x1x256xf32, #tpu.memory_space<vmem>>, %arg14: memref<2x1x256xf32, #tpu.memory_space<vmem>>, %arg15: memref<256x256xbf16, #tpu.memory_space<vmem>>, %arg16: memref<1x256xf32, #tpu.memory_space<vmem>>, %arg17: memref<256x256xbf16, #tpu.memory_space<vmem>>, %arg18: memref<1x256xf32, #tpu.memory_space<vmem>>, %arg19: memref<256x9xbf16, #tpu.memory_space<vmem>>, %arg20: memref<1x9xf32, #tpu.memory_space<vmem>>, %arg21: memref<256x256xbf16, #tpu.memory_space<vmem>>, %arg22: memref<1x256xf32, #tpu.memory_space<vmem>>, %arg23: memref<256x256xbf16, #tpu.memory_space<vmem>>, %arg24: memref<1x256xf32, #tpu.memory_space<vmem>>, %arg25: memref<256x9xbf16, #tpu.memory_space<vmem>>, %arg26: memref<1x9xf32, #tpu.memory_space<vmem>>, %arg27: memref<16x9xf32, #tpu.memory_space<vmem>>, %arg28: memref<16x9xf32, #tpu.memory_space<vmem>>, %arg29: memref<16x256xf32, #tpu.memory_space<vmem>>) attributes {dimension_semantics = [#tpu.dimension_semantics<arbitrary>], iteration_bounds = array<i64: 4>, scalar_prefetch = 0 : i64, scratch_operands = 1 : i64, tpu.core_type = #tpu.core_type<tc>, window_params = [{pipeline_mode = #tpu.pipeline_mode<synchronous>, transform_indices = @transform_0, window_bounds = array<i64: 16, 256>}, {pipeline_mode = #tpu.pipeline_mode<synchronous>, transform_indices = @transform_1, window_bounds = array<i64: 16, 16>}, {transform_indices = @transform_2, window_bounds = array<i64: 2, 256, 768>}, {transform_indices = @transform_3, window_bounds = array<i64: 2, 1, 768>}, {transform_indices = @transform_4, window_bounds = array<i64: 2, 256, 256>}, {transform_indices = @transform_5, window_bounds = array<i64: 2, 1, 256>}, {transform_indices = @transform_6, window_bounds = array<i64: 2, 1, 256>}, {transform_indices = @transform_7, window_bounds = array<i64: 2, 1, 256>}, {transform_indices = @transform_8, window_bounds = array<i64: 2, 256, 128>}, {transform_indices = @transform_9, window_bounds = array<i64: 2, 1, 128>}, {transform_indices = @transform_10, window_bounds = array<i64: 2, 128, 256>}, {transform_indices = @transform_11, window_bounds = array<i64: 2, 1, 256>}, {transform_indices = @transform_12, window_bounds = array<i64: 2, 1, 256>}, {transform_indices = @transform_13, window_bounds = array<i64: 2, 1, 256>}, {pipeline_mode = #tpu.pipeline_mode<synchronous>, transform_indices = @transform_14, window_bounds = array<i64: 256, 256>}, {pipeline_mode = #tpu.pipeline_mode<synchronous>, transform_indices = @transform_15, window_bounds = array<i64: 1, 256>}, {pipeline_mode = #tpu.pipeline_mode<synchronous>, transform_indices = @transform_16, window_bounds = array<i64: 256, 256>}, {pipeline_mode = #tpu.pipeline_mode<synchronous>, transform_indices = @transform_17, window_bounds = array<i64: 1, 256>}, {pipeline_mode = #tpu.pipeline_mode<synchronous>, transform_indices = @transform_18, window_bounds = array<i64: 256, 9>}, {pipeline_mode = #tpu.pipeline_mode<synchronous>, transform_indices = @transform_19, window_bounds = array<i64: 1, 9>}, {pipeline_mode = #tpu.pipeline_mode<synchronous>, transform_indices = @transform_20, window_bounds = array<i64: 256, 256>}, {pipeline_mode = #tpu.pipeline_mode<synchronous>, transform_indices = @transform_21, window_bounds = array<i64: 1, 256>}, {pipeline_mode = #tpu.pipeline_mode<synchronous>, transform_indices = @transform_22, window_bounds = array<i64: 256, 256>}, {pipeline_mode = #tpu.pipeline_mode<synchronous>, transform_indices = @transform_23, window_bounds = array<i64: 1, 256>}, {pipeline_mode = #tpu.pipeline_mode<synchronous>, transform_indices = @transform_24, window_bounds = array<i64: 256, 9>}, {pipeline_mode = #tpu.pipeline_mode<synchronous>, transform_indices = @transform_25, window_bounds = array<i64: 1, 9>}, {pipeline_mode = #tpu.pipeline_mode<synchronous>, transform_indices = @transform_26, window_bounds = array<i64: 16, 9>}, {pipeline_mode = #tpu.pipeline_mode<synchronous>, transform_indices = @transform_27, window_bounds = array<i64: 16, 9>}]} {
    %c0_i32 = arith.constant 0 : i32
    %0 = arith.cmpi eq, %arg0, %c0_i32 : i32
    %1 = arith.extui %0 : i1 to i32
    %c0_i32_0 = arith.constant 0 : i32
    %2 = arith.cmpi ne, %1, %c0_i32_0 : i32
    scf.if %2 {
      %c0_173 = arith.constant 0 : index
      %c0_174 = arith.constant 0 : index
      %475 = vector.load %arg1[%c0_173, %c0_174] : memref<16x256xf32, #tpu.memory_space<vmem>>, vector<16x256xf32>
      %c0_175 = arith.constant 0 : index
      %c0_176 = arith.constant 0 : index
      %476 = vector.load %arg29[%c0_175, %c0_176] : memref<16x256xf32, #tpu.memory_space<vmem>>, vector<16x256xf32>
      tpu.vector_store %arg29[%c0_175, %c0_176], %475 {strides = array<i32>} : memref<16x256xf32, #tpu.memory_space<vmem>>, vector<16x256xf32>,
    } else {
    }
    %c0 = arith.constant 0 : index
    %c0_1 = arith.constant 0 : index
    %3 = vector.load %arg2[%c0, %c0_1] : memref<16x16xf32, #tpu.memory_space<vmem>>, vector<16x16xf32>
    %c0_2 = arith.constant 0 : index
    %c0_3 = arith.constant 0 : index
    %4 = vector.load %arg29[%c0_2, %c0_3] : memref<16x256xf32, #tpu.memory_space<vmem>>, vector<16x256xf32>
    %5 = arith.truncf %4 : vector<16x256xf32> to vector<16x256xbf16>
    %c0_4 = arith.constant 0 : index
    %c0_5 = arith.constant 0 : index
    %c0_6 = arith.constant 0 : index
    %6 = vector.load %arg3[%c0_4, %c0_5, %c0_6] : memref<2x256x768xbf16, #tpu.memory_space<vmem>>, vector<1x256x768xbf16>
    %7 = vector.shape_cast %6 : vector<1x256x768xbf16> to vector<256x768xbf16>
    %cst = arith.constant dense<0.000000e+00> : vector<16x768xf32>
    %8 = tpu.matmul %5, %7, %cst {dimension_numbers = #tpu.dot_dimension_numbers<[1], [0], [0], [1], [0, 0, 1, 1], [], []>} : vector<16x256xbf16>, vector<256x768xbf16>, vector<16x768xf32> -> vector<16x768xf32>
    %c0_7 = arith.constant 0 : index
    %c0_8 = arith.constant 0 : index
    %c0_9 = arith.constant 0 : index
    %9 = vector.load %arg4[%c0_7, %c0_8, %c0_9] : memref<2x1x768xf32, #tpu.memory_space<vmem>>, vector<1x1x768xf32>
    %10 = vector.shape_cast %9 : vector<1x1x768xf32> to vector<1x768xf32>
    %11 = vector.broadcast %10 : vector<1x768xf32> to vector<16x768xf32>
    %12 = arith.addf %8, %11 : vector<16x768xf32>
    %13 = vector.extract_strided_slice %12 {offsets = [0, 0], sizes = [16, 256], strides = [1, 1]} : vector<16x768xf32> to vector<16x256xf32>
    %cst_10 = arith.constant 0.176776692 : f32
    %14 = vector.broadcast %cst_10 : f32 to vector<16x256xf32>
    %15 = arith.mulf %13, %14 : vector<16x256xf32>
    %16 = arith.truncf %15 : vector<16x256xf32> to vector<16x256xbf16>
    %17 = vector.extract_strided_slice %12 {offsets = [0, 256], sizes = [16, 256], strides = [1, 1]} : vector<16x768xf32> to vector<16x256xf32>
    %18 = arith.truncf %17 : vector<16x256xf32> to vector<16x256xbf16>
    %19 = vector.extract_strided_slice %12 {offsets = [0, 512], sizes = [16, 256], strides = [1, 1]} : vector<16x768xf32> to vector<16x256xf32>
    %20 = arith.truncf %19 : vector<16x256xf32> to vector<16x256xbf16>
    %21 = vector.extract_strided_slice %16 {offsets = [0, 0], sizes = [16, 32], strides = [1, 1]} : vector<16x256xbf16> to vector<16x32xbf16>
    %22 = vector.extract_strided_slice %18 {offsets = [0, 0], sizes = [16, 32], strides = [1, 1]} : vector<16x256xbf16> to vector<16x32xbf16>
    %cst_11 = arith.constant dense<0.000000e+00> : vector<16x16xf32>
    %23 = tpu.matmul %21, %22, %cst_11 {dimension_numbers = #tpu.dot_dimension_numbers<[1], [1], [0], [0], [0, 0, 1, 0], [], []>} : vector<16x32xbf16>, vector<16x32xbf16>, vector<16x16xf32> -> vector<16x16xf32>
    %24 = arith.addf %23, %3 : vector<16x16xf32>
    %cst_12 = arith.constant dense<0xFF800000> : vector<16xf32>
    %25 = vector.multi_reduction <maximumf>, %24, %cst_12 [1] : vector<16x16xf32> to vector<16xf32>
    %26 = vector.shape_cast %25 : vector<16xf32> to vector<16x1xf32>
    %27 = vector.broadcast %26 : vector<16x1xf32> to vector<16x16xf32>
    %28 = arith.subf %24, %27 : vector<16x16xf32>
    %29 = math.exp %28 : vector<16x16xf32>
    %cst_13 = arith.constant dense<0.000000e+00> : vector<16xf32>
    %30 = vector.multi_reduction <add>, %29, %cst_13 [1] : vector<16x16xf32> to vector<16xf32>
    %31 = vector.shape_cast %30 : vector<16xf32> to vector<16x1xf32>
    %32 = tpu.reciprocal %31 {approx = true} : vector<16x1xf32> -> vector<16x1xf32>
    %33 = vector.broadcast %32 : vector<16x1xf32> to vector<16x16xf32>
    %34 = arith.mulf %29, %33 : vector<16x16xf32>
    %35 = arith.truncf %34 : vector<16x16xf32> to vector<16x16xbf16>
    %36 = vector.extract_strided_slice %20 {offsets = [0, 0], sizes = [16, 32], strides = [1, 1]} : vector<16x256xbf16> to vector<16x32xbf16>
    %cst_14 = arith.constant dense<0.000000e+00> : vector<16x32xf32>
    %37 = tpu.matmul %35, %36, %cst_14 {dimension_numbers = #tpu.dot_dimension_numbers<[1], [0], [0], [1], [0, 0, 1, 1], [], []>} : vector<16x16xbf16>, vector<16x32xbf16>, vector<16x32xf32> -> vector<16x32xf32>
    %38 = vector.extract_strided_slice %16 {offsets = [0, 32], sizes = [16, 32], strides = [1, 1]} : vector<16x256xbf16> to vector<16x32xbf16>
    %39 = vector.extract_strided_slice %18 {offsets = [0, 32], sizes = [16, 32], strides = [1, 1]} : vector<16x256xbf16> to vector<16x32xbf16>
    %cst_15 = arith.constant dense<0.000000e+00> : vector<16x16xf32>
    %40 = tpu.matmul %38, %39, %cst_15 {dimension_numbers = #tpu.dot_dimension_numbers<[1], [1], [0], [0], [0, 0, 1, 0], [], []>} : vector<16x32xbf16>, vector<16x32xbf16>, vector<16x16xf32> -> vector<16x16xf32>
    %41 = arith.addf %40, %3 : vector<16x16xf32>
    %cst_16 = arith.constant dense<0xFF800000> : vector<16xf32>
    %42 = vector.multi_reduction <maximumf>, %41, %cst_16 [1] : vector<16x16xf32> to vector<16xf32>
    %43 = vector.shape_cast %42 : vector<16xf32> to vector<16x1xf32>
    %44 = vector.broadcast %43 : vector<16x1xf32> to vector<16x16xf32>
    %45 = arith.subf %41, %44 : vector<16x16xf32>
    %46 = math.exp %45 : vector<16x16xf32>
    %cst_17 = arith.constant dense<0.000000e+00> : vector<16xf32>
    %47 = vector.multi_reduction <add>, %46, %cst_17 [1] : vector<16x16xf32> to vector<16xf32>
    %48 = vector.shape_cast %47 : vector<16xf32> to vector<16x1xf32>
    %49 = tpu.reciprocal %48 {approx = true} : vector<16x1xf32> -> vector<16x1xf32>
    %50 = vector.broadcast %49 : vector<16x1xf32> to vector<16x16xf32>
    %51 = arith.mulf %46, %50 : vector<16x16xf32>
    %52 = arith.truncf %51 : vector<16x16xf32> to vector<16x16xbf16>
    %53 = vector.extract_strided_slice %20 {offsets = [0, 32], sizes = [16, 32], strides = [1, 1]} : vector<16x256xbf16> to vector<16x32xbf16>
    %cst_18 = arith.constant dense<0.000000e+00> : vector<16x32xf32>
    %54 = tpu.matmul %52, %53, %cst_18 {dimension_numbers = #tpu.dot_dimension_numbers<[1], [0], [0], [1], [0, 0, 1, 1], [], []>} : vector<16x16xbf16>, vector<16x32xbf16>, vector<16x32xf32> -> vector<16x32xf32>
    %55 = vector.extract_strided_slice %16 {offsets = [0, 64], sizes = [16, 32], strides = [1, 1]} : vector<16x256xbf16> to vector<16x32xbf16>
    %56 = vector.extract_strided_slice %18 {offsets = [0, 64], sizes = [16, 32], strides = [1, 1]} : vector<16x256xbf16> to vector<16x32xbf16>
    %cst_19 = arith.constant dense<0.000000e+00> : vector<16x16xf32>
    %57 = tpu.matmul %55, %56, %cst_19 {dimension_numbers = #tpu.dot_dimension_numbers<[1], [1], [0], [0], [0, 0, 1, 0], [], []>} : vector<16x32xbf16>, vector<16x32xbf16>, vector<16x16xf32> -> vector<16x16xf32>
    %58 = arith.addf %57, %3 : vector<16x16xf32>
    %cst_20 = arith.constant dense<0xFF800000> : vector<16xf32>
    %59 = vector.multi_reduction <maximumf>, %58, %cst_20 [1] : vector<16x16xf32> to vector<16xf32>
    %60 = vector.shape_cast %59 : vector<16xf32> to vector<16x1xf32>
    %61 = vector.broadcast %60 : vector<16x1xf32> to vector<16x16xf32>
    %62 = arith.subf %58, %61 : vector<16x16xf32>
    %63 = math.exp %62 : vector<16x16xf32>
    %cst_21 = arith.constant dense<0.000000e+00> : vector<16xf32>
    %64 = vector.multi_reduction <add>, %63, %cst_21 [1] : vector<16x16xf32> to vector<16xf32>
    %65 = vector.shape_cast %64 : vector<16xf32> to vector<16x1xf32>
    %66 = tpu.reciprocal %65 {approx = true} : vector<16x1xf32> -> vector<16x1xf32>
    %67 = vector.broadcast %66 : vector<16x1xf32> to vector<16x16xf32>
    %68 = arith.mulf %63, %67 : vector<16x16xf32>
    %69 = arith.truncf %68 : vector<16x16xf32> to vector<16x16xbf16>
    %70 = vector.extract_strided_slice %20 {offsets = [0, 64], sizes = [16, 32], strides = [1, 1]} : vector<16x256xbf16> to vector<16x32xbf16>
    %cst_22 = arith.constant dense<0.000000e+00> : vector<16x32xf32>
    %71 = tpu.matmul %69, %70, %cst_22 {dimension_numbers = #tpu.dot_dimension_numbers<[1], [0], [0], [1], [0, 0, 1, 1], [], []>} : vector<16x16xbf16>, vector<16x32xbf16>, vector<16x32xf32> -> vector<16x32xf32>
    %72 = vector.extract_strided_slice %16 {offsets = [0, 96], sizes = [16, 32], strides = [1, 1]} : vector<16x256xbf16> to vector<16x32xbf16>
    %73 = vector.extract_strided_slice %18 {offsets = [0, 96], sizes = [16, 32], strides = [1, 1]} : vector<16x256xbf16> to vector<16x32xbf16>
    %cst_23 = arith.constant dense<0.000000e+00> : vector<16x16xf32>
    %74 = tpu.matmul %72, %73, %cst_23 {dimension_numbers = #tpu.dot_dimension_numbers<[1], [1], [0], [0], [0, 0, 1, 0], [], []>} : vector<16x32xbf16>, vector<16x32xbf16>, vector<16x16xf32> -> vector<16x16xf32>
    %75 = arith.addf %74, %3 : vector<16x16xf32>
    %cst_24 = arith.constant dense<0xFF800000> : vector<16xf32>
    %76 = vector.multi_reduction <maximumf>, %75, %cst_24 [1] : vector<16x16xf32> to vector<16xf32>
    %77 = vector.shape_cast %76 : vector<16xf32> to vector<16x1xf32>
    %78 = vector.broadcast %77 : vector<16x1xf32> to vector<16x16xf32>
    %79 = arith.subf %75, %78 : vector<16x16xf32>
    %80 = math.exp %79 : vector<16x16xf32>
    %cst_25 = arith.constant dense<0.000000e+00> : vector<16xf32>
    %81 = vector.multi_reduction <add>, %80, %cst_25 [1] : vector<16x16xf32> to vector<16xf32>
    %82 = vector.shape_cast %81 : vector<16xf32> to vector<16x1xf32>
    %83 = tpu.reciprocal %82 {approx = true} : vector<16x1xf32> -> vector<16x1xf32>
    %84 = vector.broadcast %83 : vector<16x1xf32> to vector<16x16xf32>
    %85 = arith.mulf %80, %84 : vector<16x16xf32>
    %86 = arith.truncf %85 : vector<16x16xf32> to vector<16x16xbf16>
    %87 = vector.extract_strided_slice %20 {offsets = [0, 96], sizes = [16, 32], strides = [1, 1]} : vector<16x256xbf16> to vector<16x32xbf16>
    %cst_26 = arith.constant dense<0.000000e+00> : vector<16x32xf32>
    %88 = tpu.matmul %86, %87, %cst_26 {dimension_numbers = #tpu.dot_dimension_numbers<[1], [0], [0], [1], [0, 0, 1, 1], [], []>} : vector<16x16xbf16>, vector<16x32xbf16>, vector<16x32xf32> -> vector<16x32xf32>
    %89 = vector.extract_strided_slice %16 {offsets = [0, 128], sizes = [16, 32], strides = [1, 1]} : vector<16x256xbf16> to vector<16x32xbf16>
    %90 = vector.extract_strided_slice %18 {offsets = [0, 128], sizes = [16, 32], strides = [1, 1]} : vector<16x256xbf16> to vector<16x32xbf16>
    %cst_27 = arith.constant dense<0.000000e+00> : vector<16x16xf32>
    %91 = tpu.matmul %89, %90, %cst_27 {dimension_numbers = #tpu.dot_dimension_numbers<[1], [1], [0], [0], [0, 0, 1, 0], [], []>} : vector<16x32xbf16>, vector<16x32xbf16>, vector<16x16xf32> -> vector<16x16xf32>
    %92 = arith.addf %91, %3 : vector<16x16xf32>
    %cst_28 = arith.constant dense<0xFF800000> : vector<16xf32>
    %93 = vector.multi_reduction <maximumf>, %92, %cst_28 [1] : vector<16x16xf32> to vector<16xf32>
    %94 = vector.shape_cast %93 : vector<16xf32> to vector<16x1xf32>
    %95 = vector.broadcast %94 : vector<16x1xf32> to vector<16x16xf32>
    %96 = arith.subf %92, %95 : vector<16x16xf32>
    %97 = math.exp %96 : vector<16x16xf32>
    %cst_29 = arith.constant dense<0.000000e+00> : vector<16xf32>
    %98 = vector.multi_reduction <add>, %97, %cst_29 [1] : vector<16x16xf32> to vector<16xf32>
    %99 = vector.shape_cast %98 : vector<16xf32> to vector<16x1xf32>
    %100 = tpu.reciprocal %99 {approx = true} : vector<16x1xf32> -> vector<16x1xf32>
    %101 = vector.broadcast %100 : vector<16x1xf32> to vector<16x16xf32>
    %102 = arith.mulf %97, %101 : vector<16x16xf32>
    %103 = arith.truncf %102 : vector<16x16xf32> to vector<16x16xbf16>
    %104 = vector.extract_strided_slice %20 {offsets = [0, 128], sizes = [16, 32], strides = [1, 1]} : vector<16x256xbf16> to vector<16x32xbf16>
    %cst_30 = arith.constant dense<0.000000e+00> : vector<16x32xf32>
    %105 = tpu.matmul %103, %104, %cst_30 {dimension_numbers = #tpu.dot_dimension_numbers<[1], [0], [0], [1], [0, 0, 1, 1], [], []>} : vector<16x16xbf16>, vector<16x32xbf16>, vector<16x32xf32> -> vector<16x32xf32>
    %106 = vector.extract_strided_slice %16 {offsets = [0, 160], sizes = [16, 32], strides = [1, 1]} : vector<16x256xbf16> to vector<16x32xbf16>
    %107 = vector.extract_strided_slice %18 {offsets = [0, 160], sizes = [16, 32], strides = [1, 1]} : vector<16x256xbf16> to vector<16x32xbf16>
    %cst_31 = arith.constant dense<0.000000e+00> : vector<16x16xf32>
    %108 = tpu.matmul %106, %107, %cst_31 {dimension_numbers = #tpu.dot_dimension_numbers<[1], [1], [0], [0], [0, 0, 1, 0], [], []>} : vector<16x32xbf16>, vector<16x32xbf16>, vector<16x16xf32> -> vector<16x16xf32>
    %109 = arith.addf %108, %3 : vector<16x16xf32>
    %cst_32 = arith.constant dense<0xFF800000> : vector<16xf32>
    %110 = vector.multi_reduction <maximumf>, %109, %cst_32 [1] : vector<16x16xf32> to vector<16xf32>
    %111 = vector.shape_cast %110 : vector<16xf32> to vector<16x1xf32>
    %112 = vector.broadcast %111 : vector<16x1xf32> to vector<16x16xf32>
    %113 = arith.subf %109, %112 : vector<16x16xf32>
    %114 = math.exp %113 : vector<16x16xf32>
    %cst_33 = arith.constant dense<0.000000e+00> : vector<16xf32>
    %115 = vector.multi_reduction <add>, %114, %cst_33 [1] : vector<16x16xf32> to vector<16xf32>
    %116 = vector.shape_cast %115 : vector<16xf32> to vector<16x1xf32>
    %117 = tpu.reciprocal %116 {approx = true} : vector<16x1xf32> -> vector<16x1xf32>
    %118 = vector.broadcast %117 : vector<16x1xf32> to vector<16x16xf32>
    %119 = arith.mulf %114, %118 : vector<16x16xf32>
    %120 = arith.truncf %119 : vector<16x16xf32> to vector<16x16xbf16>
    %121 = vector.extract_strided_slice %20 {offsets = [0, 160], sizes = [16, 32], strides = [1, 1]} : vector<16x256xbf16> to vector<16x32xbf16>
    %cst_34 = arith.constant dense<0.000000e+00> : vector<16x32xf32>
    %122 = tpu.matmul %120, %121, %cst_34 {dimension_numbers = #tpu.dot_dimension_numbers<[1], [0], [0], [1], [0, 0, 1, 1], [], []>} : vector<16x16xbf16>, vector<16x32xbf16>, vector<16x32xf32> -> vector<16x32xf32>
    %123 = vector.extract_strided_slice %16 {offsets = [0, 192], sizes = [16, 32], strides = [1, 1]} : vector<16x256xbf16> to vector<16x32xbf16>
    %124 = vector.extract_strided_slice %18 {offsets = [0, 192], sizes = [16, 32], strides = [1, 1]} : vector<16x256xbf16> to vector<16x32xbf16>
    %cst_35 = arith.constant dense<0.000000e+00> : vector<16x16xf32>
    %125 = tpu.matmul %123, %124, %cst_35 {dimension_numbers = #tpu.dot_dimension_numbers<[1], [1], [0], [0], [0, 0, 1, 0], [], []>} : vector<16x32xbf16>, vector<16x32xbf16>, vector<16x16xf32> -> vector<16x16xf32>
    %126 = arith.addf %125, %3 : vector<16x16xf32>
    %cst_36 = arith.constant dense<0xFF800000> : vector<16xf32>
    %127 = vector.multi_reduction <maximumf>, %126, %cst_36 [1] : vector<16x16xf32> to vector<16xf32>
    %128 = vector.shape_cast %127 : vector<16xf32> to vector<16x1xf32>
    %129 = vector.broadcast %128 : vector<16x1xf32> to vector<16x16xf32>
    %130 = arith.subf %126, %129 : vector<16x16xf32>
    %131 = math.exp %130 : vector<16x16xf32>
    %cst_37 = arith.constant dense<0.000000e+00> : vector<16xf32>
    %132 = vector.multi_reduction <add>, %131, %cst_37 [1] : vector<16x16xf32> to vector<16xf32>
    %133 = vector.shape_cast %132 : vector<16xf32> to vector<16x1xf32>
    %134 = tpu.reciprocal %133 {approx = true} : vector<16x1xf32> -> vector<16x1xf32>
    %135 = vector.broadcast %134 : vector<16x1xf32> to vector<16x16xf32>
    %136 = arith.mulf %131, %135 : vector<16x16xf32>
    %137 = arith.truncf %136 : vector<16x16xf32> to vector<16x16xbf16>
    %138 = vector.extract_strided_slice %20 {offsets = [0, 192], sizes = [16, 32], strides = [1, 1]} : vector<16x256xbf16> to vector<16x32xbf16>
    %cst_38 = arith.constant dense<0.000000e+00> : vector<16x32xf32>
    %139 = tpu.matmul %137, %138, %cst_38 {dimension_numbers = #tpu.dot_dimension_numbers<[1], [0], [0], [1], [0, 0, 1, 1], [], []>} : vector<16x16xbf16>, vector<16x32xbf16>, vector<16x32xf32> -> vector<16x32xf32>
    %140 = vector.extract_strided_slice %16 {offsets = [0, 224], sizes = [16, 32], strides = [1, 1]} : vector<16x256xbf16> to vector<16x32xbf16>
    %141 = vector.extract_strided_slice %18 {offsets = [0, 224], sizes = [16, 32], strides = [1, 1]} : vector<16x256xbf16> to vector<16x32xbf16>
    %cst_39 = arith.constant dense<0.000000e+00> : vector<16x16xf32>
    %142 = tpu.matmul %140, %141, %cst_39 {dimension_numbers = #tpu.dot_dimension_numbers<[1], [1], [0], [0], [0, 0, 1, 0], [], []>} : vector<16x32xbf16>, vector<16x32xbf16>, vector<16x16xf32> -> vector<16x16xf32>
    %143 = arith.addf %142, %3 : vector<16x16xf32>
    %cst_40 = arith.constant dense<0xFF800000> : vector<16xf32>
    %144 = vector.multi_reduction <maximumf>, %143, %cst_40 [1] : vector<16x16xf32> to vector<16xf32>
    %145 = vector.shape_cast %144 : vector<16xf32> to vector<16x1xf32>
    %146 = vector.broadcast %145 : vector<16x1xf32> to vector<16x16xf32>
    %147 = arith.subf %143, %146 : vector<16x16xf32>
    %148 = math.exp %147 : vector<16x16xf32>
    %cst_41 = arith.constant dense<0.000000e+00> : vector<16xf32>
    %149 = vector.multi_reduction <add>, %148, %cst_41 [1] : vector<16x16xf32> to vector<16xf32>
    %150 = vector.shape_cast %149 : vector<16xf32> to vector<16x1xf32>
    %151 = tpu.reciprocal %150 {approx = true} : vector<16x1xf32> -> vector<16x1xf32>
    %152 = vector.broadcast %151 : vector<16x1xf32> to vector<16x16xf32>
    %153 = arith.mulf %148, %152 : vector<16x16xf32>
    %154 = arith.truncf %153 : vector<16x16xf32> to vector<16x16xbf16>
    %155 = vector.extract_strided_slice %20 {offsets = [0, 224], sizes = [16, 32], strides = [1, 1]} : vector<16x256xbf16> to vector<16x32xbf16>
    %cst_42 = arith.constant dense<0.000000e+00> : vector<16x32xf32>
    %156 = tpu.matmul %154, %155, %cst_42 {dimension_numbers = #tpu.dot_dimension_numbers<[1], [0], [0], [1], [0, 0, 1, 1], [], []>} : vector<16x16xbf16>, vector<16x32xbf16>, vector<16x32xf32> -> vector<16x32xf32>
    %157 = tpu.concatenate %37, %54, %71, %88, %105, %122, %139, %156 in 1 : vector<16x32xf32>, vector<16x32xf32>, vector<16x32xf32>, vector<16x32xf32>, vector<16x32xf32>, vector<16x32xf32>, vector<16x32xf32>, vector<16x32xf32> -> vector<16x256xf32>
    %158 = arith.truncf %157 : vector<16x256xf32> to vector<16x256xbf16>
    %c0_43 = arith.constant 0 : index
    %c0_44 = arith.constant 0 : index
    %c0_45 = arith.constant 0 : index
    %159 = vector.load %arg5[%c0_43, %c0_44, %c0_45] : memref<2x256x256xbf16, #tpu.memory_space<vmem>>, vector<1x256x256xbf16>
    %160 = vector.shape_cast %159 : vector<1x256x256xbf16> to vector<256x256xbf16>
    %cst_46 = arith.constant dense<0.000000e+00> : vector<16x256xf32>
    %161 = tpu.matmul %158, %160, %cst_46 {dimension_numbers = #tpu.dot_dimension_numbers<[1], [0], [0], [1], [0, 0, 1, 1], [], []>} : vector<16x256xbf16>, vector<256x256xbf16>, vector<16x256xf32> -> vector<16x256xf32>
    %c0_47 = arith.constant 0 : index
    %c0_48 = arith.constant 0 : index
    %c0_49 = arith.constant 0 : index
    %162 = vector.load %arg6[%c0_47, %c0_48, %c0_49] : memref<2x1x256xf32, #tpu.memory_space<vmem>>, vector<1x1x256xf32>
    %163 = vector.shape_cast %162 : vector<1x1x256xf32> to vector<1x256xf32>
    %164 = vector.broadcast %163 : vector<1x256xf32> to vector<16x256xf32>
    %165 = arith.addf %161, %164 : vector<16x256xf32>
    %166 = arith.addf %4, %165 : vector<16x256xf32>
    %c0_50 = arith.constant 0 : index
    %c0_51 = arith.constant 0 : index
    %c0_52 = arith.constant 0 : index
    %167 = vector.load %arg7[%c0_50, %c0_51, %c0_52] : memref<2x1x256xf32, #tpu.memory_space<vmem>>, vector<1x1x256xf32>
    %168 = vector.shape_cast %167 : vector<1x1x256xf32> to vector<1x256xf32>
    %c0_53 = arith.constant 0 : index
    %c0_54 = arith.constant 0 : index
    %c0_55 = arith.constant 0 : index
    %169 = vector.load %arg8[%c0_53, %c0_54, %c0_55] : memref<2x1x256xf32, #tpu.memory_space<vmem>>, vector<1x1x256xf32>
    %170 = vector.shape_cast %169 : vector<1x1x256xf32> to vector<1x256xf32>
    %cst_56 = arith.constant dense<0.000000e+00> : vector<16xf32>
    %171 = vector.multi_reduction <add>, %166, %cst_56 [1] : vector<16x256xf32> to vector<16xf32>
    %172 = vector.shape_cast %171 : vector<16xf32> to vector<16x1xf32>
    %cst_57 = arith.constant 2.560000e+02 : f32
    %173 = vector.broadcast %cst_57 : f32 to vector<16x1xf32>
    %174 = arith.divf %172, %173 : vector<16x1xf32>
    %175 = vector.broadcast %174 : vector<16x1xf32> to vector<16x256xf32>
    %176 = arith.subf %166, %175 : vector<16x256xf32>
    %177 = arith.mulf %176, %176 : vector<16x256xf32>
    %cst_58 = arith.constant dense<0.000000e+00> : vector<16xf32>
    %178 = vector.multi_reduction <add>, %177, %cst_58 [1] : vector<16x256xf32> to vector<16xf32>
    %179 = vector.shape_cast %178 : vector<16xf32> to vector<16x1xf32>
    %cst_59 = arith.constant 2.560000e+02 : f32
    %180 = vector.broadcast %cst_59 : f32 to vector<16x1xf32>
    %181 = arith.divf %179, %180 : vector<16x1xf32>
    %182 = vector.broadcast %174 : vector<16x1xf32> to vector<16x256xf32>
    %183 = arith.subf %166, %182 : vector<16x256xf32>
    %cst_60 = arith.constant 9.99999974E-6 : f32
    %184 = vector.broadcast %cst_60 : f32 to vector<16x1xf32>
    %185 = arith.addf %181, %184 : vector<16x1xf32>
    %186 = math.rsqrt %185 : vector<16x1xf32>
    %187 = vector.broadcast %186 : vector<16x1xf32> to vector<16x256xf32>
    %188 = arith.mulf %183, %187 : vector<16x256xf32>
    %189 = vector.broadcast %168 : vector<1x256xf32> to vector<16x256xf32>
    %190 = arith.mulf %188, %189 : vector<16x256xf32>
    %191 = vector.broadcast %170 : vector<1x256xf32> to vector<16x256xf32>
    %192 = arith.addf %190, %191 : vector<16x256xf32>
    %193 = arith.truncf %192 : vector<16x256xf32> to vector<16x256xbf16>
    %c0_61 = arith.constant 0 : index
    %c0_62 = arith.constant 0 : index
    %c0_63 = arith.constant 0 : index
    %194 = vector.load %arg9[%c0_61, %c0_62, %c0_63] : memref<2x256x128xbf16, #tpu.memory_space<vmem>>, vector<1x256x128xbf16>
    %195 = vector.shape_cast %194 : vector<1x256x128xbf16> to vector<256x128xbf16>
    %cst_64 = arith.constant dense<0.000000e+00> : vector<16x128xf32>
    %196 = tpu.matmul %193, %195, %cst_64 {dimension_numbers = #tpu.dot_dimension_numbers<[1], [0], [0], [1], [0, 0, 1, 1], [], []>} : vector<16x256xbf16>, vector<256x128xbf16>, vector<16x128xf32> -> vector<16x128xf32>
    %c0_65 = arith.constant 0 : index
    %c0_66 = arith.constant 0 : index
    %c0_67 = arith.constant 0 : index
    %197 = vector.load %arg10[%c0_65, %c0_66, %c0_67] : memref<2x1x128xf32, #tpu.memory_space<vmem>>, vector<1x1x128xf32>
    %198 = vector.shape_cast %197 : vector<1x1x128xf32> to vector<1x128xf32>
    %199 = vector.broadcast %198 : vector<1x128xf32> to vector<16x128xf32>
    %200 = arith.addf %196, %199 : vector<16x128xf32>
    %cst_68 = arith.constant 0.000000e+00 : f32
    %201 = vector.broadcast %cst_68 : f32 to vector<16x128xf32>
    %202 = arith.maximumf %200, %201 : vector<16x128xf32>
    %203 = arith.truncf %202 : vector<16x128xf32> to vector<16x128xbf16>
    %c0_69 = arith.constant 0 : index
    %c0_70 = arith.constant 0 : index
    %c0_71 = arith.constant 0 : index
    %204 = vector.load %arg11[%c0_69, %c0_70, %c0_71] : memref<2x128x256xbf16, #tpu.memory_space<vmem>>, vector<1x128x256xbf16>
    %205 = vector.shape_cast %204 : vector<1x128x256xbf16> to vector<128x256xbf16>
    %cst_72 = arith.constant dense<0.000000e+00> : vector<16x256xf32>
    %206 = tpu.matmul %203, %205, %cst_72 {dimension_numbers = #tpu.dot_dimension_numbers<[1], [0], [0], [1], [0, 0, 1, 1], [], []>} : vector<16x128xbf16>, vector<128x256xbf16>, vector<16x256xf32> -> vector<16x256xf32>
    %c0_73 = arith.constant 0 : index
    %c0_74 = arith.constant 0 : index
    %c0_75 = arith.constant 0 : index
    %207 = vector.load %arg12[%c0_73, %c0_74, %c0_75] : memref<2x1x256xf32, #tpu.memory_space<vmem>>, vector<1x1x256xf32>
    %208 = vector.shape_cast %207 : vector<1x1x256xf32> to vector<1x256xf32>
    %209 = vector.broadcast %208 : vector<1x256xf32> to vector<16x256xf32>
    %210 = arith.addf %206, %209 : vector<16x256xf32>
    %211 = arith.addf %192, %210 : vector<16x256xf32>
    %c0_76 = arith.constant 0 : index
    %c0_77 = arith.constant 0 : index
    %c0_78 = arith.constant 0 : index
    %212 = vector.load %arg13[%c0_76, %c0_77, %c0_78] : memref<2x1x256xf32, #tpu.memory_space<vmem>>, vector<1x1x256xf32>
    %213 = vector.shape_cast %212 : vector<1x1x256xf32> to vector<1x256xf32>
    %c0_79 = arith.constant 0 : index
    %c0_80 = arith.constant 0 : index
    %c0_81 = arith.constant 0 : index
    %214 = vector.load %arg14[%c0_79, %c0_80, %c0_81] : memref<2x1x256xf32, #tpu.memory_space<vmem>>, vector<1x1x256xf32>
    %215 = vector.shape_cast %214 : vector<1x1x256xf32> to vector<1x256xf32>
    %cst_82 = arith.constant dense<0.000000e+00> : vector<16xf32>
    %216 = vector.multi_reduction <add>, %211, %cst_82 [1] : vector<16x256xf32> to vector<16xf32>
    %217 = vector.shape_cast %216 : vector<16xf32> to vector<16x1xf32>
    %cst_83 = arith.constant 2.560000e+02 : f32
    %218 = vector.broadcast %cst_83 : f32 to vector<16x1xf32>
    %219 = arith.divf %217, %218 : vector<16x1xf32>
    %220 = vector.broadcast %219 : vector<16x1xf32> to vector<16x256xf32>
    %221 = arith.subf %211, %220 : vector<16x256xf32>
    %222 = arith.mulf %221, %221 : vector<16x256xf32>
    %cst_84 = arith.constant dense<0.000000e+00> : vector<16xf32>
    %223 = vector.multi_reduction <add>, %222, %cst_84 [1] : vector<16x256xf32> to vector<16xf32>
    %224 = vector.shape_cast %223 : vector<16xf32> to vector<16x1xf32>
    %cst_85 = arith.constant 2.560000e+02 : f32
    %225 = vector.broadcast %cst_85 : f32 to vector<16x1xf32>
    %226 = arith.divf %224, %225 : vector<16x1xf32>
    %227 = vector.broadcast %219 : vector<16x1xf32> to vector<16x256xf32>
    %228 = arith.subf %211, %227 : vector<16x256xf32>
    %cst_86 = arith.constant 9.99999974E-6 : f32
    %229 = vector.broadcast %cst_86 : f32 to vector<16x1xf32>
    %230 = arith.addf %226, %229 : vector<16x1xf32>
    %231 = math.rsqrt %230 : vector<16x1xf32>
    %232 = vector.broadcast %231 : vector<16x1xf32> to vector<16x256xf32>
    %233 = arith.mulf %228, %232 : vector<16x256xf32>
    %234 = vector.broadcast %213 : vector<1x256xf32> to vector<16x256xf32>
    %235 = arith.mulf %233, %234 : vector<16x256xf32>
    %236 = vector.broadcast %215 : vector<1x256xf32> to vector<16x256xf32>
    %237 = arith.addf %235, %236 : vector<16x256xf32>
    %238 = arith.truncf %237 : vector<16x256xf32> to vector<16x256xbf16>
    %c1 = arith.constant 1 : index
    %c0_87 = arith.constant 0 : index
    %c0_88 = arith.constant 0 : index
    %239 = vector.load %arg3[%c1, %c0_87, %c0_88] : memref<2x256x768xbf16, #tpu.memory_space<vmem>>, vector<1x256x768xbf16>
    %240 = vector.shape_cast %239 : vector<1x256x768xbf16> to vector<256x768xbf16>
    %cst_89 = arith.constant dense<0.000000e+00> : vector<16x768xf32>
    %241 = tpu.matmul %238, %240, %cst_89 {dimension_numbers = #tpu.dot_dimension_numbers<[1], [0], [0], [1], [0, 0, 1, 1], [], []>} : vector<16x256xbf16>, vector<256x768xbf16>, vector<16x768xf32> -> vector<16x768xf32>
    %c1_90 = arith.constant 1 : index
    %c0_91 = arith.constant 0 : index
    %c0_92 = arith.constant 0 : index
    %242 = vector.load %arg4[%c1_90, %c0_91, %c0_92] : memref<2x1x768xf32, #tpu.memory_space<vmem>>, vector<1x1x768xf32>
    %243 = vector.shape_cast %242 : vector<1x1x768xf32> to vector<1x768xf32>
    %244 = vector.broadcast %243 : vector<1x768xf32> to vector<16x768xf32>
    %245 = arith.addf %241, %244 : vector<16x768xf32>
    %246 = vector.extract_strided_slice %245 {offsets = [0, 0], sizes = [16, 256], strides = [1, 1]} : vector<16x768xf32> to vector<16x256xf32>
    %cst_93 = arith.constant 0.176776692 : f32
    %247 = vector.broadcast %cst_93 : f32 to vector<16x256xf32>
    %248 = arith.mulf %246, %247 : vector<16x256xf32>
    %249 = arith.truncf %248 : vector<16x256xf32> to vector<16x256xbf16>
    %250 = vector.extract_strided_slice %245 {offsets = [0, 256], sizes = [16, 256], strides = [1, 1]} : vector<16x768xf32> to vector<16x256xf32>
    %251 = arith.truncf %250 : vector<16x256xf32> to vector<16x256xbf16>
    %252 = vector.extract_strided_slice %245 {offsets = [0, 512], sizes = [16, 256], strides = [1, 1]} : vector<16x768xf32> to vector<16x256xf32>
    %253 = arith.truncf %252 : vector<16x256xf32> to vector<16x256xbf16>
    %254 = vector.extract_strided_slice %249 {offsets = [0, 0], sizes = [16, 32], strides = [1, 1]} : vector<16x256xbf16> to vector<16x32xbf16>
    %255 = vector.extract_strided_slice %251 {offsets = [0, 0], sizes = [16, 32], strides = [1, 1]} : vector<16x256xbf16> to vector<16x32xbf16>
    %cst_94 = arith.constant dense<0.000000e+00> : vector<16x16xf32>
    %256 = tpu.matmul %254, %255, %cst_94 {dimension_numbers = #tpu.dot_dimension_numbers<[1], [1], [0], [0], [0, 0, 1, 0], [], []>} : vector<16x32xbf16>, vector<16x32xbf16>, vector<16x16xf32> -> vector<16x16xf32>
    %257 = arith.addf %256, %3 : vector<16x16xf32>
    %cst_95 = arith.constant dense<0xFF800000> : vector<16xf32>
    %258 = vector.multi_reduction <maximumf>, %257, %cst_95 [1] : vector<16x16xf32> to vector<16xf32>
    %259 = vector.shape_cast %258 : vector<16xf32> to vector<16x1xf32>
    %260 = vector.broadcast %259 : vector<16x1xf32> to vector<16x16xf32>
    %261 = arith.subf %257, %260 : vector<16x16xf32>
    %262 = math.exp %261 : vector<16x16xf32>
    %cst_96 = arith.constant dense<0.000000e+00> : vector<16xf32>
    %263 = vector.multi_reduction <add>, %262, %cst_96 [1] : vector<16x16xf32> to vector<16xf32>
    %264 = vector.shape_cast %263 : vector<16xf32> to vector<16x1xf32>
    %265 = tpu.reciprocal %264 {approx = true} : vector<16x1xf32> -> vector<16x1xf32>
    %266 = vector.broadcast %265 : vector<16x1xf32> to vector<16x16xf32>
    %267 = arith.mulf %262, %266 : vector<16x16xf32>
    %268 = arith.truncf %267 : vector<16x16xf32> to vector<16x16xbf16>
    %269 = vector.extract_strided_slice %253 {offsets = [0, 0], sizes = [16, 32], strides = [1, 1]} : vector<16x256xbf16> to vector<16x32xbf16>
    %cst_97 = arith.constant dense<0.000000e+00> : vector<16x32xf32>
    %270 = tpu.matmul %268, %269, %cst_97 {dimension_numbers = #tpu.dot_dimension_numbers<[1], [0], [0], [1], [0, 0, 1, 1], [], []>} : vector<16x16xbf16>, vector<16x32xbf16>, vector<16x32xf32> -> vector<16x32xf32>
    %271 = vector.extract_strided_slice %249 {offsets = [0, 32], sizes = [16, 32], strides = [1, 1]} : vector<16x256xbf16> to vector<16x32xbf16>
    %272 = vector.extract_strided_slice %251 {offsets = [0, 32], sizes = [16, 32], strides = [1, 1]} : vector<16x256xbf16> to vector<16x32xbf16>
    %cst_98 = arith.constant dense<0.000000e+00> : vector<16x16xf32>
    %273 = tpu.matmul %271, %272, %cst_98 {dimension_numbers = #tpu.dot_dimension_numbers<[1], [1], [0], [0], [0, 0, 1, 0], [], []>} : vector<16x32xbf16>, vector<16x32xbf16>, vector<16x16xf32> -> vector<16x16xf32>
    %274 = arith.addf %273, %3 : vector<16x16xf32>
    %cst_99 = arith.constant dense<0xFF800000> : vector<16xf32>
    %275 = vector.multi_reduction <maximumf>, %274, %cst_99 [1] : vector<16x16xf32> to vector<16xf32>
    %276 = vector.shape_cast %275 : vector<16xf32> to vector<16x1xf32>
    %277 = vector.broadcast %276 : vector<16x1xf32> to vector<16x16xf32>
    %278 = arith.subf %274, %277 : vector<16x16xf32>
    %279 = math.exp %278 : vector<16x16xf32>
    %cst_100 = arith.constant dense<0.000000e+00> : vector<16xf32>
    %280 = vector.multi_reduction <add>, %279, %cst_100 [1] : vector<16x16xf32> to vector<16xf32>
    %281 = vector.shape_cast %280 : vector<16xf32> to vector<16x1xf32>
    %282 = tpu.reciprocal %281 {approx = true} : vector<16x1xf32> -> vector<16x1xf32>
    %283 = vector.broadcast %282 : vector<16x1xf32> to vector<16x16xf32>
    %284 = arith.mulf %279, %283 : vector<16x16xf32>
    %285 = arith.truncf %284 : vector<16x16xf32> to vector<16x16xbf16>
    %286 = vector.extract_strided_slice %253 {offsets = [0, 32], sizes = [16, 32], strides = [1, 1]} : vector<16x256xbf16> to vector<16x32xbf16>
    %cst_101 = arith.constant dense<0.000000e+00> : vector<16x32xf32>
    %287 = tpu.matmul %285, %286, %cst_101 {dimension_numbers = #tpu.dot_dimension_numbers<[1], [0], [0], [1], [0, 0, 1, 1], [], []>} : vector<16x16xbf16>, vector<16x32xbf16>, vector<16x32xf32> -> vector<16x32xf32>
    %288 = vector.extract_strided_slice %249 {offsets = [0, 64], sizes = [16, 32], strides = [1, 1]} : vector<16x256xbf16> to vector<16x32xbf16>
    %289 = vector.extract_strided_slice %251 {offsets = [0, 64], sizes = [16, 32], strides = [1, 1]} : vector<16x256xbf16> to vector<16x32xbf16>
    %cst_102 = arith.constant dense<0.000000e+00> : vector<16x16xf32>
    %290 = tpu.matmul %288, %289, %cst_102 {dimension_numbers = #tpu.dot_dimension_numbers<[1], [1], [0], [0], [0, 0, 1, 0], [], []>} : vector<16x32xbf16>, vector<16x32xbf16>, vector<16x16xf32> -> vector<16x16xf32>
    %291 = arith.addf %290, %3 : vector<16x16xf32>
    %cst_103 = arith.constant dense<0xFF800000> : vector<16xf32>
    %292 = vector.multi_reduction <maximumf>, %291, %cst_103 [1] : vector<16x16xf32> to vector<16xf32>
    %293 = vector.shape_cast %292 : vector<16xf32> to vector<16x1xf32>
    %294 = vector.broadcast %293 : vector<16x1xf32> to vector<16x16xf32>
    %295 = arith.subf %291, %294 : vector<16x16xf32>
    %296 = math.exp %295 : vector<16x16xf32>
    %cst_104 = arith.constant dense<0.000000e+00> : vector<16xf32>
    %297 = vector.multi_reduction <add>, %296, %cst_104 [1] : vector<16x16xf32> to vector<16xf32>
    %298 = vector.shape_cast %297 : vector<16xf32> to vector<16x1xf32>
    %299 = tpu.reciprocal %298 {approx = true} : vector<16x1xf32> -> vector<16x1xf32>
    %300 = vector.broadcast %299 : vector<16x1xf32> to vector<16x16xf32>
    %301 = arith.mulf %296, %300 : vector<16x16xf32>
    %302 = arith.truncf %301 : vector<16x16xf32> to vector<16x16xbf16>
    %303 = vector.extract_strided_slice %253 {offsets = [0, 64], sizes = [16, 32], strides = [1, 1]} : vector<16x256xbf16> to vector<16x32xbf16>
    %cst_105 = arith.constant dense<0.000000e+00> : vector<16x32xf32>
    %304 = tpu.matmul %302, %303, %cst_105 {dimension_numbers = #tpu.dot_dimension_numbers<[1], [0], [0], [1], [0, 0, 1, 1], [], []>} : vector<16x16xbf16>, vector<16x32xbf16>, vector<16x32xf32> -> vector<16x32xf32>
    %305 = vector.extract_strided_slice %249 {offsets = [0, 96], sizes = [16, 32], strides = [1, 1]} : vector<16x256xbf16> to vector<16x32xbf16>
    %306 = vector.extract_strided_slice %251 {offsets = [0, 96], sizes = [16, 32], strides = [1, 1]} : vector<16x256xbf16> to vector<16x32xbf16>
    %cst_106 = arith.constant dense<0.000000e+00> : vector<16x16xf32>
    %307 = tpu.matmul %305, %306, %cst_106 {dimension_numbers = #tpu.dot_dimension_numbers<[1], [1], [0], [0], [0, 0, 1, 0], [], []>} : vector<16x32xbf16>, vector<16x32xbf16>, vector<16x16xf32> -> vector<16x16xf32>
    %308 = arith.addf %307, %3 : vector<16x16xf32>
    %cst_107 = arith.constant dense<0xFF800000> : vector<16xf32>
    %309 = vector.multi_reduction <maximumf>, %308, %cst_107 [1] : vector<16x16xf32> to vector<16xf32>
    %310 = vector.shape_cast %309 : vector<16xf32> to vector<16x1xf32>
    %311 = vector.broadcast %310 : vector<16x1xf32> to vector<16x16xf32>
    %312 = arith.subf %308, %311 : vector<16x16xf32>
    %313 = math.exp %312 : vector<16x16xf32>
    %cst_108 = arith.constant dense<0.000000e+00> : vector<16xf32>
    %314 = vector.multi_reduction <add>, %313, %cst_108 [1] : vector<16x16xf32> to vector<16xf32>
    %315 = vector.shape_cast %314 : vector<16xf32> to vector<16x1xf32>
    %316 = tpu.reciprocal %315 {approx = true} : vector<16x1xf32> -> vector<16x1xf32>
    %317 = vector.broadcast %316 : vector<16x1xf32> to vector<16x16xf32>
    %318 = arith.mulf %313, %317 : vector<16x16xf32>
    %319 = arith.truncf %318 : vector<16x16xf32> to vector<16x16xbf16>
    %320 = vector.extract_strided_slice %253 {offsets = [0, 96], sizes = [16, 32], strides = [1, 1]} : vector<16x256xbf16> to vector<16x32xbf16>
    %cst_109 = arith.constant dense<0.000000e+00> : vector<16x32xf32>
    %321 = tpu.matmul %319, %320, %cst_109 {dimension_numbers = #tpu.dot_dimension_numbers<[1], [0], [0], [1], [0, 0, 1, 1], [], []>} : vector<16x16xbf16>, vector<16x32xbf16>, vector<16x32xf32> -> vector<16x32xf32>
    %322 = vector.extract_strided_slice %249 {offsets = [0, 128], sizes = [16, 32], strides = [1, 1]} : vector<16x256xbf16> to vector<16x32xbf16>
    %323 = vector.extract_strided_slice %251 {offsets = [0, 128], sizes = [16, 32], strides = [1, 1]} : vector<16x256xbf16> to vector<16x32xbf16>
    %cst_110 = arith.constant dense<0.000000e+00> : vector<16x16xf32>
    %324 = tpu.matmul %322, %323, %cst_110 {dimension_numbers = #tpu.dot_dimension_numbers<[1], [1], [0], [0], [0, 0, 1, 0], [], []>} : vector<16x32xbf16>, vector<16x32xbf16>, vector<16x16xf32> -> vector<16x16xf32>
    %325 = arith.addf %324, %3 : vector<16x16xf32>
    %cst_111 = arith.constant dense<0xFF800000> : vector<16xf32>
    %326 = vector.multi_reduction <maximumf>, %325, %cst_111 [1] : vector<16x16xf32> to vector<16xf32>
    %327 = vector.shape_cast %326 : vector<16xf32> to vector<16x1xf32>
    %328 = vector.broadcast %327 : vector<16x1xf32> to vector<16x16xf32>
    %329 = arith.subf %325, %328 : vector<16x16xf32>
    %330 = math.exp %329 : vector<16x16xf32>
    %cst_112 = arith.constant dense<0.000000e+00> : vector<16xf32>
    %331 = vector.multi_reduction <add>, %330, %cst_112 [1] : vector<16x16xf32> to vector<16xf32>
    %332 = vector.shape_cast %331 : vector<16xf32> to vector<16x1xf32>
    %333 = tpu.reciprocal %332 {approx = true} : vector<16x1xf32> -> vector<16x1xf32>
    %334 = vector.broadcast %333 : vector<16x1xf32> to vector<16x16xf32>
    %335 = arith.mulf %330, %334 : vector<16x16xf32>
    %336 = arith.truncf %335 : vector<16x16xf32> to vector<16x16xbf16>
    %337 = vector.extract_strided_slice %253 {offsets = [0, 128], sizes = [16, 32], strides = [1, 1]} : vector<16x256xbf16> to vector<16x32xbf16>
    %cst_113 = arith.constant dense<0.000000e+00> : vector<16x32xf32>
    %338 = tpu.matmul %336, %337, %cst_113 {dimension_numbers = #tpu.dot_dimension_numbers<[1], [0], [0], [1], [0, 0, 1, 1], [], []>} : vector<16x16xbf16>, vector<16x32xbf16>, vector<16x32xf32> -> vector<16x32xf32>
    %339 = vector.extract_strided_slice %249 {offsets = [0, 160], sizes = [16, 32], strides = [1, 1]} : vector<16x256xbf16> to vector<16x32xbf16>
    %340 = vector.extract_strided_slice %251 {offsets = [0, 160], sizes = [16, 32], strides = [1, 1]} : vector<16x256xbf16> to vector<16x32xbf16>
    %cst_114 = arith.constant dense<0.000000e+00> : vector<16x16xf32>
    %341 = tpu.matmul %339, %340, %cst_114 {dimension_numbers = #tpu.dot_dimension_numbers<[1], [1], [0], [0], [0, 0, 1, 0], [], []>} : vector<16x32xbf16>, vector<16x32xbf16>, vector<16x16xf32> -> vector<16x16xf32>
    %342 = arith.addf %341, %3 : vector<16x16xf32>
    %cst_115 = arith.constant dense<0xFF800000> : vector<16xf32>
    %343 = vector.multi_reduction <maximumf>, %342, %cst_115 [1] : vector<16x16xf32> to vector<16xf32>
    %344 = vector.shape_cast %343 : vector<16xf32> to vector<16x1xf32>
    %345 = vector.broadcast %344 : vector<16x1xf32> to vector<16x16xf32>
    %346 = arith.subf %342, %345 : vector<16x16xf32>
    %347 = math.exp %346 : vector<16x16xf32>
    %cst_116 = arith.constant dense<0.000000e+00> : vector<16xf32>
    %348 = vector.multi_reduction <add>, %347, %cst_116 [1] : vector<16x16xf32> to vector<16xf32>
    %349 = vector.shape_cast %348 : vector<16xf32> to vector<16x1xf32>
    %350 = tpu.reciprocal %349 {approx = true} : vector<16x1xf32> -> vector<16x1xf32>
    %351 = vector.broadcast %350 : vector<16x1xf32> to vector<16x16xf32>
    %352 = arith.mulf %347, %351 : vector<16x16xf32>
    %353 = arith.truncf %352 : vector<16x16xf32> to vector<16x16xbf16>
    %354 = vector.extract_strided_slice %253 {offsets = [0, 160], sizes = [16, 32], strides = [1, 1]} : vector<16x256xbf16> to vector<16x32xbf16>
    %cst_117 = arith.constant dense<0.000000e+00> : vector<16x32xf32>
    %355 = tpu.matmul %353, %354, %cst_117 {dimension_numbers = #tpu.dot_dimension_numbers<[1], [0], [0], [1], [0, 0, 1, 1], [], []>} : vector<16x16xbf16>, vector<16x32xbf16>, vector<16x32xf32> -> vector<16x32xf32>
    %356 = vector.extract_strided_slice %249 {offsets = [0, 192], sizes = [16, 32], strides = [1, 1]} : vector<16x256xbf16> to vector<16x32xbf16>
    %357 = vector.extract_strided_slice %251 {offsets = [0, 192], sizes = [16, 32], strides = [1, 1]} : vector<16x256xbf16> to vector<16x32xbf16>
    %cst_118 = arith.constant dense<0.000000e+00> : vector<16x16xf32>
    %358 = tpu.matmul %356, %357, %cst_118 {dimension_numbers = #tpu.dot_dimension_numbers<[1], [1], [0], [0], [0, 0, 1, 0], [], []>} : vector<16x32xbf16>, vector<16x32xbf16>, vector<16x16xf32> -> vector<16x16xf32>
    %359 = arith.addf %358, %3 : vector<16x16xf32>
    %cst_119 = arith.constant dense<0xFF800000> : vector<16xf32>
    %360 = vector.multi_reduction <maximumf>, %359, %cst_119 [1] : vector<16x16xf32> to vector<16xf32>
    %361 = vector.shape_cast %360 : vector<16xf32> to vector<16x1xf32>
    %362 = vector.broadcast %361 : vector<16x1xf32> to vector<16x16xf32>
    %363 = arith.subf %359, %362 : vector<16x16xf32>
    %364 = math.exp %363 : vector<16x16xf32>
    %cst_120 = arith.constant dense<0.000000e+00> : vector<16xf32>
    %365 = vector.multi_reduction <add>, %364, %cst_120 [1] : vector<16x16xf32> to vector<16xf32>
    %366 = vector.shape_cast %365 : vector<16xf32> to vector<16x1xf32>
    %367 = tpu.reciprocal %366 {approx = true} : vector<16x1xf32> -> vector<16x1xf32>
    %368 = vector.broadcast %367 : vector<16x1xf32> to vector<16x16xf32>
    %369 = arith.mulf %364, %368 : vector<16x16xf32>
    %370 = arith.truncf %369 : vector<16x16xf32> to vector<16x16xbf16>
    %371 = vector.extract_strided_slice %253 {offsets = [0, 192], sizes = [16, 32], strides = [1, 1]} : vector<16x256xbf16> to vector<16x32xbf16>
    %cst_121 = arith.constant dense<0.000000e+00> : vector<16x32xf32>
    %372 = tpu.matmul %370, %371, %cst_121 {dimension_numbers = #tpu.dot_dimension_numbers<[1], [0], [0], [1], [0, 0, 1, 1], [], []>} : vector<16x16xbf16>, vector<16x32xbf16>, vector<16x32xf32> -> vector<16x32xf32>
    %373 = vector.extract_strided_slice %249 {offsets = [0, 224], sizes = [16, 32], strides = [1, 1]} : vector<16x256xbf16> to vector<16x32xbf16>
    %374 = vector.extract_strided_slice %251 {offsets = [0, 224], sizes = [16, 32], strides = [1, 1]} : vector<16x256xbf16> to vector<16x32xbf16>
    %cst_122 = arith.constant dense<0.000000e+00> : vector<16x16xf32>
    %375 = tpu.matmul %373, %374, %cst_122 {dimension_numbers = #tpu.dot_dimension_numbers<[1], [1], [0], [0], [0, 0, 1, 0], [], []>} : vector<16x32xbf16>, vector<16x32xbf16>, vector<16x16xf32> -> vector<16x16xf32>
    %376 = arith.addf %375, %3 : vector<16x16xf32>
    %cst_123 = arith.constant dense<0xFF800000> : vector<16xf32>
    %377 = vector.multi_reduction <maximumf>, %376, %cst_123 [1] : vector<16x16xf32> to vector<16xf32>
    %378 = vector.shape_cast %377 : vector<16xf32> to vector<16x1xf32>
    %379 = vector.broadcast %378 : vector<16x1xf32> to vector<16x16xf32>
    %380 = arith.subf %376, %379 : vector<16x16xf32>
    %381 = math.exp %380 : vector<16x16xf32>
    %cst_124 = arith.constant dense<0.000000e+00> : vector<16xf32>
    %382 = vector.multi_reduction <add>, %381, %cst_124 [1] : vector<16x16xf32> to vector<16xf32>
    %383 = vector.shape_cast %382 : vector<16xf32> to vector<16x1xf32>
    %384 = tpu.reciprocal %383 {approx = true} : vector<16x1xf32> -> vector<16x1xf32>
    %385 = vector.broadcast %384 : vector<16x1xf32> to vector<16x16xf32>
    %386 = arith.mulf %381, %385 : vector<16x16xf32>
    %387 = arith.truncf %386 : vector<16x16xf32> to vector<16x16xbf16>
    %388 = vector.extract_strided_slice %253 {offsets = [0, 224], sizes = [16, 32], strides = [1, 1]} : vector<16x256xbf16> to vector<16x32xbf16>
    %cst_125 = arith.constant dense<0.000000e+00> : vector<16x32xf32>
    %389 = tpu.matmul %387, %388, %cst_125 {dimension_numbers = #tpu.dot_dimension_numbers<[1], [0], [0], [1], [0, 0, 1, 1], [], []>} : vector<16x16xbf16>, vector<16x32xbf16>, vector<16x32xf32> -> vector<16x32xf32>
    %390 = tpu.concatenate %270, %287, %304, %321, %338, %355, %372, %389 in 1 : vector<16x32xf32>, vector<16x32xf32>, vector<16x32xf32>, vector<16x32xf32>, vector<16x32xf32>, vector<16x32xf32>, vector<16x32xf32>, vector<16x32xf32> -> vector<16x256xf32>
    %391 = arith.truncf %390 : vector<16x256xf32> to vector<16x256xbf16>
    %c1_126 = arith.constant 1 : index
    %c0_127 = arith.constant 0 : index
    %c0_128 = arith.constant 0 : index
    %392 = vector.load %arg5[%c1_126, %c0_127, %c0_128] : memref<2x256x256xbf16, #tpu.memory_space<vmem>>, vector<1x256x256xbf16>
    %393 = vector.shape_cast %392 : vector<1x256x256xbf16> to vector<256x256xbf16>
    %cst_129 = arith.constant dense<0.000000e+00> : vector<16x256xf32>
    %394 = tpu.matmul %391, %393, %cst_129 {dimension_numbers = #tpu.dot_dimension_numbers<[1], [0], [0], [1], [0, 0, 1, 1], [], []>} : vector<16x256xbf16>, vector<256x256xbf16>, vector<16x256xf32> -> vector<16x256xf32>
    %c1_130 = arith.constant 1 : index
    %c0_131 = arith.constant 0 : index
    %c0_132 = arith.constant 0 : index
    %395 = vector.load %arg6[%c1_130, %c0_131, %c0_132] : memref<2x1x256xf32, #tpu.memory_space<vmem>>, vector<1x1x256xf32>
    %396 = vector.shape_cast %395 : vector<1x1x256xf32> to vector<1x256xf32>
    %397 = vector.broadcast %396 : vector<1x256xf32> to vector<16x256xf32>
    %398 = arith.addf %394, %397 : vector<16x256xf32>
    %399 = arith.addf %237, %398 : vector<16x256xf32>
    %c1_133 = arith.constant 1 : index
    %c0_134 = arith.constant 0 : index
    %c0_135 = arith.constant 0 : index
    %400 = vector.load %arg7[%c1_133, %c0_134, %c0_135] : memref<2x1x256xf32, #tpu.memory_space<vmem>>, vector<1x1x256xf32>
    %401 = vector.shape_cast %400 : vector<1x1x256xf32> to vector<1x256xf32>
    %c1_136 = arith.constant 1 : index
    %c0_137 = arith.constant 0 : index
    %c0_138 = arith.constant 0 : index
    %402 = vector.load %arg8[%c1_136, %c0_137, %c0_138] : memref<2x1x256xf32, #tpu.memory_space<vmem>>, vector<1x1x256xf32>
    %403 = vector.shape_cast %402 : vector<1x1x256xf32> to vector<1x256xf32>
    %cst_139 = arith.constant dense<0.000000e+00> : vector<16xf32>
    %404 = vector.multi_reduction <add>, %399, %cst_139 [1] : vector<16x256xf32> to vector<16xf32>
    %405 = vector.shape_cast %404 : vector<16xf32> to vector<16x1xf32>
    %cst_140 = arith.constant 2.560000e+02 : f32
    %406 = vector.broadcast %cst_140 : f32 to vector<16x1xf32>
    %407 = arith.divf %405, %406 : vector<16x1xf32>
    %408 = vector.broadcast %407 : vector<16x1xf32> to vector<16x256xf32>
    %409 = arith.subf %399, %408 : vector<16x256xf32>
    %410 = arith.mulf %409, %409 : vector<16x256xf32>
    %cst_141 = arith.constant dense<0.000000e+00> : vector<16xf32>
    %411 = vector.multi_reduction <add>, %410, %cst_141 [1] : vector<16x256xf32> to vector<16xf32>
    %412 = vector.shape_cast %411 : vector<16xf32> to vector<16x1xf32>
    %cst_142 = arith.constant 2.560000e+02 : f32
    %413 = vector.broadcast %cst_142 : f32 to vector<16x1xf32>
    %414 = arith.divf %412, %413 : vector<16x1xf32>
    %415 = vector.broadcast %407 : vector<16x1xf32> to vector<16x256xf32>
    %416 = arith.subf %399, %415 : vector<16x256xf32>
    %cst_143 = arith.constant 9.99999974E-6 : f32
    %417 = vector.broadcast %cst_143 : f32 to vector<16x1xf32>
    %418 = arith.addf %414, %417 : vector<16x1xf32>
    %419 = math.rsqrt %418 : vector<16x1xf32>
    %420 = vector.broadcast %419 : vector<16x1xf32> to vector<16x256xf32>
    %421 = arith.mulf %416, %420 : vector<16x256xf32>
    %422 = vector.broadcast %401 : vector<1x256xf32> to vector<16x256xf32>
    %423 = arith.mulf %421, %422 : vector<16x256xf32>
    %424 = vector.broadcast %403 : vector<1x256xf32> to vector<16x256xf32>
    %425 = arith.addf %423, %424 : vector<16x256xf32>
    %426 = arith.truncf %425 : vector<16x256xf32> to vector<16x256xbf16>
    %c1_144 = arith.constant 1 : index
    %c0_145 = arith.constant 0 : index
    %c0_146 = arith.constant 0 : index
    %427 = vector.load %arg9[%c1_144, %c0_145, %c0_146] : memref<2x256x128xbf16, #tpu.memory_space<vmem>>, vector<1x256x128xbf16>
    %428 = vector.shape_cast %427 : vector<1x256x128xbf16> to vector<256x128xbf16>
    %cst_147 = arith.constant dense<0.000000e+00> : vector<16x128xf32>
    %429 = tpu.matmul %426, %428, %cst_147 {dimension_numbers = #tpu.dot_dimension_numbers<[1], [0], [0], [1], [0, 0, 1, 1], [], []>} : vector<16x256xbf16>, vector<256x128xbf16>, vector<16x128xf32> -> vector<16x128xf32>
    %c1_148 = arith.constant 1 : index
    %c0_149 = arith.constant 0 : index
    %c0_150 = arith.constant 0 : index
    %430 = vector.load %arg10[%c1_148, %c0_149, %c0_150] : memref<2x1x128xf32, #tpu.memory_space<vmem>>, vector<1x1x128xf32>
    %431 = vector.shape_cast %430 : vector<1x1x128xf32> to vector<1x128xf32>
    %432 = vector.broadcast %431 : vector<1x128xf32> to vector<16x128xf32>
    %433 = arith.addf %429, %432 : vector<16x128xf32>
    %cst_151 = arith.constant 0.000000e+00 : f32
    %434 = vector.broadcast %cst_151 : f32 to vector<16x128xf32>
    %435 = arith.maximumf %433, %434 : vector<16x128xf32>
    %436 = arith.truncf %435 : vector<16x128xf32> to vector<16x128xbf16>
    %c1_152 = arith.constant 1 : index
    %c0_153 = arith.constant 0 : index
    %c0_154 = arith.constant 0 : index
    %437 = vector.load %arg11[%c1_152, %c0_153, %c0_154] : memref<2x128x256xbf16, #tpu.memory_space<vmem>>, vector<1x128x256xbf16>
    %438 = vector.shape_cast %437 : vector<1x128x256xbf16> to vector<128x256xbf16>
    %cst_155 = arith.constant dense<0.000000e+00> : vector<16x256xf32>
    %439 = tpu.matmul %436, %438, %cst_155 {dimension_numbers = #tpu.dot_dimension_numbers<[1], [0], [0], [1], [0, 0, 1, 1], [], []>} : vector<16x128xbf16>, vector<128x256xbf16>, vector<16x256xf32> -> vector<16x256xf32>
    %c1_156 = arith.constant 1 : index
    %c0_157 = arith.constant 0 : index
    %c0_158 = arith.constant 0 : index
    %440 = vector.load %arg12[%c1_156, %c0_157, %c0_158] : memref<2x1x256xf32, #tpu.memory_space<vmem>>, vector<1x1x256xf32>
    %441 = vector.shape_cast %440 : vector<1x1x256xf32> to vector<1x256xf32>
    %442 = vector.broadcast %441 : vector<1x256xf32> to vector<16x256xf32>
    %443 = arith.addf %439, %442 : vector<16x256xf32>
    %444 = arith.addf %425, %443 : vector<16x256xf32>
    %c1_159 = arith.constant 1 : index
    %c0_160 = arith.constant 0 : index
    %c0_161 = arith.constant 0 : index
    %445 = vector.load %arg13[%c1_159, %c0_160, %c0_161] : memref<2x1x256xf32, #tpu.memory_space<vmem>>, vector<1x1x256xf32>
    %446 = vector.shape_cast %445 : vector<1x1x256xf32> to vector<1x256xf32>
    %c1_162 = arith.constant 1 : index
    %c0_163 = arith.constant 0 : index
    %c0_164 = arith.constant 0 : index
    %447 = vector.load %arg14[%c1_162, %c0_163, %c0_164] : memref<2x1x256xf32, #tpu.memory_space<vmem>>, vector<1x1x256xf32>
    %448 = vector.shape_cast %447 : vector<1x1x256xf32> to vector<1x256xf32>
    %cst_165 = arith.constant dense<0.000000e+00> : vector<16xf32>
    %449 = vector.multi_reduction <add>, %444, %cst_165 [1] : vector<16x256xf32> to vector<16xf32>
    %450 = vector.shape_cast %449 : vector<16xf32> to vector<16x1xf32>
    %cst_166 = arith.constant 2.560000e+02 : f32
    %451 = vector.broadcast %cst_166 : f32 to vector<16x1xf32>
    %452 = arith.divf %450, %451 : vector<16x1xf32>
    %453 = vector.broadcast %452 : vector<16x1xf32> to vector<16x256xf32>
    %454 = arith.subf %444, %453 : vector<16x256xf32>
    %455 = arith.mulf %454, %454 : vector<16x256xf32>
    %cst_167 = arith.constant dense<0.000000e+00> : vector<16xf32>
    %456 = vector.multi_reduction <add>, %455, %cst_167 [1] : vector<16x256xf32> to vector<16xf32>
    %457 = vector.shape_cast %456 : vector<16xf32> to vector<16x1xf32>
    %cst_168 = arith.constant 2.560000e+02 : f32
    %458 = vector.broadcast %cst_168 : f32 to vector<16x1xf32>
    %459 = arith.divf %457, %458 : vector<16x1xf32>
    %460 = vector.broadcast %452 : vector<16x1xf32> to vector<16x256xf32>
    %461 = arith.subf %444, %460 : vector<16x256xf32>
    %cst_169 = arith.constant 9.99999974E-6 : f32
    %462 = vector.broadcast %cst_169 : f32 to vector<16x1xf32>
    %463 = arith.addf %459, %462 : vector<16x1xf32>
    %464 = math.rsqrt %463 : vector<16x1xf32>
    %465 = vector.broadcast %464 : vector<16x1xf32> to vector<16x256xf32>
    %466 = arith.mulf %461, %465 : vector<16x256xf32>
    %467 = vector.broadcast %446 : vector<1x256xf32> to vector<16x256xf32>
    %468 = arith.mulf %466, %467 : vector<16x256xf32>
    %469 = vector.broadcast %448 : vector<1x256xf32> to vector<16x256xf32>
    %470 = arith.addf %468, %469 : vector<16x256xf32>
    %c0_170 = arith.constant 0 : index
    %c0_171 = arith.constant 0 : index
    %471 = vector.load %arg29[%c0_170, %c0_171] : memref<16x256xf32, #tpu.memory_space<vmem>>, vector<16x256xf32>
    tpu.vector_store %arg29[%c0_170, %c0_171], %470 {strides = array<i32>} : memref<16x256xf32, #tpu.memory_space<vmem>>, vector<16x256xf32>,
    %c3_i32 = arith.constant 3 : i32
    %472 = arith.cmpi eq, %arg0, %c3_i32 : i32
    %473 = arith.extui %472 : i1 to i32
    %c0_i32_172 = arith.constant 0 : i32
    %474 = arith.cmpi ne, %473, %c0_i32_172 : i32
    scf.if %474 {
      %475 = arith.truncf %470 : vector<16x256xf32> to vector<16x256xbf16>
      %c0_173 = arith.constant 0 : index
      %c0_174 = arith.constant 0 : index
      %476 = vector.load %arg15[%c0_173, %c0_174] : memref<256x256xbf16, #tpu.memory_space<vmem>>, vector<256x256xbf16>
      %cst_175 = arith.constant dense<0.000000e+00> : vector<16x256xf32>
      %477 = tpu.matmul %475, %476, %cst_175 {dimension_numbers = #tpu.dot_dimension_numbers<[1], [0], [0], [1], [0, 0, 1, 1], [], []>} : vector<16x256xbf16>, vector<256x256xbf16>, vector<16x256xf32> -> vector<16x256xf32>
      %c0_176 = arith.constant 0 : index
      %c0_177 = arith.constant 0 : index
      %478 = vector.load %arg16[%c0_176, %c0_177] : memref<1x256xf32, #tpu.memory_space<vmem>>, vector<1x256xf32>
      %479 = vector.broadcast %478 : vector<1x256xf32> to vector<16x256xf32>
      %480 = arith.addf %477, %479 : vector<16x256xf32>
      %cst_178 = arith.constant 0.000000e+00 : f32
      %481 = vector.broadcast %cst_178 : f32 to vector<16x256xf32>
      %482 = arith.maximumf %480, %481 : vector<16x256xf32>
      %483 = arith.truncf %482 : vector<16x256xf32> to vector<16x256xbf16>
      %c0_179 = arith.constant 0 : index
      %c0_180 = arith.constant 0 : index
      %484 = vector.load %arg17[%c0_179, %c0_180] : memref<256x256xbf16, #tpu.memory_space<vmem>>, vector<256x256xbf16>
      %cst_181 = arith.constant dense<0.000000e+00> : vector<16x256xf32>
      %485 = tpu.matmul %483, %484, %cst_181 {dimension_numbers = #tpu.dot_dimension_numbers<[1], [0], [0], [1], [0, 0, 1, 1], [], []>} : vector<16x256xbf16>, vector<256x256xbf16>, vector<16x256xf32> -> vector<16x256xf32>
      %c0_182 = arith.constant 0 : index
      %c0_183 = arith.constant 0 : index
      %486 = vector.load %arg18[%c0_182, %c0_183] : memref<1x256xf32, #tpu.memory_space<vmem>>, vector<1x256xf32>
      %487 = vector.broadcast %486 : vector<1x256xf32> to vector<16x256xf32>
      %488 = arith.addf %485, %487 : vector<16x256xf32>
      %cst_184 = arith.constant 0.000000e+00 : f32
      %489 = vector.broadcast %cst_184 : f32 to vector<16x256xf32>
      %490 = arith.maximumf %488, %489 : vector<16x256xf32>
      %491 = arith.truncf %490 : vector<16x256xf32> to vector<16x256xbf16>
      %c0_185 = arith.constant 0 : index
      %c0_186 = arith.constant 0 : index
      %492 = vector.load %arg19[%c0_185, %c0_186] : memref<256x9xbf16, #tpu.memory_space<vmem>>, vector<256x9xbf16>
      %cst_187 = arith.constant dense<0.000000e+00> : vector<16x9xf32>
      %493 = tpu.matmul %491, %492, %cst_187 {dimension_numbers = #tpu.dot_dimension_numbers<[1], [0], [0], [1], [0, 0, 1, 1], [], []>} : vector<16x256xbf16>, vector<256x9xbf16>, vector<16x9xf32> -> vector<16x9xf32>
      %c0_188 = arith.constant 0 : index
      %c0_189 = arith.constant 0 : index
      %494 = vector.load %arg20[%c0_188, %c0_189] : memref<1x9xf32, #tpu.memory_space<vmem>>, vector<1x9xf32>
      %495 = vector.broadcast %494 : vector<1x9xf32> to vector<16x9xf32>
      %496 = arith.addf %493, %495 : vector<16x9xf32>
      %c0_190 = arith.constant 0 : index
      %c0_191 = arith.constant 0 : index
      %497 = vector.load %arg27[%c0_190, %c0_191] : memref<16x9xf32, #tpu.memory_space<vmem>>, vector<16x9xf32>
      tpu.vector_store %arg27[%c0_190, %c0_191], %496 {strides = array<i32>} : memref<16x9xf32, #tpu.memory_space<vmem>>, vector<16x9xf32>,
      %c0_192 = arith.constant 0 : index
      %c0_193 = arith.constant 0 : index
      %498 = vector.load %arg21[%c0_192, %c0_193] : memref<256x256xbf16, #tpu.memory_space<vmem>>, vector<256x256xbf16>
      %cst_194 = arith.constant dense<0.000000e+00> : vector<16x256xf32>
      %499 = tpu.matmul %475, %498, %cst_194 {dimension_numbers = #tpu.dot_dimension_numbers<[1], [0], [0], [1], [0, 0, 1, 1], [], []>} : vector<16x256xbf16>, vector<256x256xbf16>, vector<16x256xf32> -> vector<16x256xf32>
      %c0_195 = arith.constant 0 : index
      %c0_196 = arith.constant 0 : index
      %500 = vector.load %arg22[%c0_195, %c0_196] : memref<1x256xf32, #tpu.memory_space<vmem>>, vector<1x256xf32>
      %501 = vector.broadcast %500 : vector<1x256xf32> to vector<16x256xf32>
      %502 = arith.addf %499, %501 : vector<16x256xf32>
      %cst_197 = arith.constant 0.000000e+00 : f32
      %503 = vector.broadcast %cst_197 : f32 to vector<16x256xf32>
      %504 = arith.maximumf %502, %503 : vector<16x256xf32>
      %505 = arith.truncf %504 : vector<16x256xf32> to vector<16x256xbf16>
      %c0_198 = arith.constant 0 : index
      %c0_199 = arith.constant 0 : index
      %506 = vector.load %arg23[%c0_198, %c0_199] : memref<256x256xbf16, #tpu.memory_space<vmem>>, vector<256x256xbf16>
      %cst_200 = arith.constant dense<0.000000e+00> : vector<16x256xf32>
      %507 = tpu.matmul %505, %506, %cst_200 {dimension_numbers = #tpu.dot_dimension_numbers<[1], [0], [0], [1], [0, 0, 1, 1], [], []>} : vector<16x256xbf16>, vector<256x256xbf16>, vector<16x256xf32> -> vector<16x256xf32>
      %c0_201 = arith.constant 0 : index
      %c0_202 = arith.constant 0 : index
      %508 = vector.load %arg24[%c0_201, %c0_202] : memref<1x256xf32, #tpu.memory_space<vmem>>, vector<1x256xf32>
      %509 = vector.broadcast %508 : vector<1x256xf32> to vector<16x256xf32>
      %510 = arith.addf %507, %509 : vector<16x256xf32>
      %cst_203 = arith.constant 0.000000e+00 : f32
      %511 = vector.broadcast %cst_203 : f32 to vector<16x256xf32>
      %512 = arith.maximumf %510, %511 : vector<16x256xf32>
      %513 = arith.truncf %512 : vector<16x256xf32> to vector<16x256xbf16>
      %c0_204 = arith.constant 0 : index
      %c0_205 = arith.constant 0 : index
      %514 = vector.load %arg25[%c0_204, %c0_205] : memref<256x9xbf16, #tpu.memory_space<vmem>>, vector<256x9xbf16>
      %cst_206 = arith.constant dense<0.000000e+00> : vector<16x9xf32>
      %515 = tpu.matmul %513, %514, %cst_206 {dimension_numbers = #tpu.dot_dimension_numbers<[1], [0], [0], [1], [0, 0, 1, 1], [], []>} : vector<16x256xbf16>, vector<256x9xbf16>, vector<16x9xf32> -> vector<16x9xf32>
      %c0_207 = arith.constant 0 : index
      %c0_208 = arith.constant 0 : index
      %516 = vector.load %arg26[%c0_207, %c0_208] : memref<1x9xf32, #tpu.memory_space<vmem>>, vector<1x9xf32>
      %517 = vector.broadcast %516 : vector<1x9xf32> to vector<16x9xf32>
      %518 = arith.addf %515, %517 : vector<16x9xf32>
      %c0_209 = arith.constant 0 : index
      %c0_210 = arith.constant 0 : index
      %519 = vector.load %arg28[%c0_209, %c0_210] : memref<16x9xf32, #tpu.memory_space<vmem>>, vector<16x9xf32>
      tpu.vector_store %arg28[%c0_209, %c0_210], %518 {strides = array<i32>} : memref<16x9xf32, #tpu.memory_space<vmem>>, vector<16x9xf32>,
    } else {
    }
    return
  }
  func.func @transform_0(%arg0: i32) -> (i32, i32) {
    %c0_i32 = arith.constant 0 : i32
    %c0_i32_0 = arith.constant 0 : i32
    %c0_i32_1 = arith.constant 0 : i32
    return %c0_i32, %c0_i32_0 : i32, i32
  }
  func.func @transform_1(%arg0: i32) -> (i32, i32) {
    %c0_i32 = arith.constant 0 : i32
    %c0_i32_0 = arith.constant 0 : i32
    %c0_i32_1 = arith.constant 0 : i32
    return %c0_i32, %c0_i32_0 : i32, i32
  }
  func.func @transform_2(%arg0: i32) -> (i32, i32, i32) {
    %c0_i32 = arith.constant 0 : i32
    %c0_i32_0 = arith.constant 0 : i32
    %c0_i32_1 = arith.constant 0 : i32
    return %arg0, %c0_i32, %c0_i32_0 : i32, i32, i32
  }
  func.func @transform_3(%arg0: i32) -> (i32, i32, i32) {
    %c0_i32 = arith.constant 0 : i32
    %c0_i32_0 = arith.constant 0 : i32
    %c0_i32_1 = arith.constant 0 : i32
    return %arg0, %c0_i32, %c0_i32_0 : i32, i32, i32
  }
  func.func @transform_4(%arg0: i32) -> (i32, i32, i32) {
    %c0_i32 = arith.constant 0 : i32
    %c0_i32_0 = arith.constant 0 : i32
    %c0_i32_1 = arith.constant 0 : i32
    return %arg0, %c0_i32, %c0_i32_0 : i32, i32, i32
  }
  func.func @transform_5(%arg0: i32) -> (i32, i32, i32) {
    %c0_i32 = arith.constant 0 : i32
    %c0_i32_0 = arith.constant 0 : i32
    %c0_i32_1 = arith.constant 0 : i32
    return %arg0, %c0_i32, %c0_i32_0 : i32, i32, i32
  }
  func.func @transform_6(%arg0: i32) -> (i32, i32, i32) {
    %c0_i32 = arith.constant 0 : i32
    %c0_i32_0 = arith.constant 0 : i32
    %c0_i32_1 = arith.constant 0 : i32
    return %arg0, %c0_i32, %c0_i32_0 : i32, i32, i32
  }
  func.func @transform_7(%arg0: i32) -> (i32, i32, i32) {
    %c0_i32 = arith.constant 0 : i32
    %c0_i32_0 = arith.constant 0 : i32
    %c0_i32_1 = arith.constant 0 : i32
    return %arg0, %c0_i32, %c0_i32_0 : i32, i32, i32
  }
  func.func @transform_8(%arg0: i32) -> (i32, i32, i32) {
    %c0_i32 = arith.constant 0 : i32
    %c0_i32_0 = arith.constant 0 : i32
    %c0_i32_1 = arith.constant 0 : i32
    return %arg0, %c0_i32, %c0_i32_0 : i32, i32, i32
  }
  func.func @transform_9(%arg0: i32) -> (i32, i32, i32) {
    %c0_i32 = arith.constant 0 : i32
    %c0_i32_0 = arith.constant 0 : i32
    %c0_i32_1 = arith.constant 0 : i32
    return %arg0, %c0_i32, %c0_i32_0 : i32, i32, i32
  }
  func.func @transform_10(%arg0: i32) -> (i32, i32, i32) {
    %c0_i32 = arith.constant 0 : i32
    %c0_i32_0 = arith.constant 0 : i32
    %c0_i32_1 = arith.constant 0 : i32
    return %arg0, %c0_i32, %c0_i32_0 : i32, i32, i32
  }
  func.func @transform_11(%arg0: i32) -> (i32, i32, i32) {
    %c0_i32 = arith.constant 0 : i32
    %c0_i32_0 = arith.constant 0 : i32
    %c0_i32_1 = arith.constant 0 : i32
    return %arg0, %c0_i32, %c0_i32_0 : i32, i32, i32
  }
  func.func @transform_12(%arg0: i32) -> (i32, i32, i32) {
    %c0_i32 = arith.constant 0 : i32
    %c0_i32_0 = arith.constant 0 : i32
    %c0_i32_1 = arith.constant 0 : i32
    return %arg0, %c0_i32, %c0_i32_0 : i32, i32, i32
  }
  func.func @transform_13(%arg0: i32) -> (i32, i32, i32) {
    %c0_i32 = arith.constant 0 : i32
    %c0_i32_0 = arith.constant 0 : i32
    %c0_i32_1 = arith.constant 0 : i32
    return %arg0, %c0_i32, %c0_i32_0 : i32, i32, i32
  }
  func.func @transform_14(%arg0: i32) -> (i32, i32) {
    %c0_i32 = arith.constant 0 : i32
    %c0_i32_0 = arith.constant 0 : i32
    %c0_i32_1 = arith.constant 0 : i32
    return %c0_i32, %c0_i32_0 : i32, i32
  }
  func.func @transform_15(%arg0: i32) -> (i32, i32) {
    %c0_i32 = arith.constant 0 : i32
    %c0_i32_0 = arith.constant 0 : i32
    %c0_i32_1 = arith.constant 0 : i32
    return %c0_i32, %c0_i32_0 : i32, i32
  }
  func.func @transform_16(%arg0: i32) -> (i32, i32) {
    %c0_i32 = arith.constant 0 : i32
    %c0_i32_0 = arith.constant 0 : i32
    %c0_i32_1 = arith.constant 0 : i32
    return %c0_i32, %c0_i32_0 : i32, i32
  }
  func.func @transform_17(%arg0: i32) -> (i32, i32) {
    %c0_i32 = arith.constant 0 : i32
    %c0_i32_0 = arith.constant 0 : i32
    %c0_i32_1 = arith.constant 0 : i32
    return %c0_i32, %c0_i32_0 : i32, i32
  }
  func.func @transform_18(%arg0: i32) -> (i32, i32) {
    %c0_i32 = arith.constant 0 : i32
    %c0_i32_0 = arith.constant 0 : i32
    %c0_i32_1 = arith.constant 0 : i32
    return %c0_i32, %c0_i32_0 : i32, i32
  }
  func.func @transform_19(%arg0: i32) -> (i32, i32) {
    %c0_i32 = arith.constant 0 : i32
    %c0_i32_0 = arith.constant 0 : i32
    %c0_i32_1 = arith.constant 0 : i32
    return %c0_i32, %c0_i32_0 : i32, i32
  }
  func.func @transform_20(%arg0: i32) -> (i32, i32) {
    %c0_i32 = arith.constant 0 : i32
    %c0_i32_0 = arith.constant 0 : i32
    %c0_i32_1 = arith.constant 0 : i32
    return %c0_i32, %c0_i32_0 : i32, i32
  }
  func.func @transform_21(%arg0: i32) -> (i32, i32) {
    %c0_i32 = arith.constant 0 : i32
    %c0_i32_0 = arith.constant 0 : i32
    %c0_i32_1 = arith.constant 0 : i32
    return %c0_i32, %c0_i32_0 : i32, i32
  }
  func.func @transform_22(%arg0: i32) -> (i32, i32) {
    %c0_i32 = arith.constant 0 : i32
    %c0_i32_0 = arith.constant 0 : i32
    %c0_i32_1 = arith.constant 0 : i32
    return %c0_i32, %c0_i32_0 : i32, i32
  }
  func.func @transform_23(%arg0: i32) -> (i32, i32) {
    %c0_i32 = arith.constant 0 : i32
    %c0_i32_0 = arith.constant 0 : i32
    %c0_i32_1 = arith.constant 0 : i32
    return %c0_i32, %c0_i32_0 : i32, i32
  }
  func.func @transform_24(%arg0: i32) -> (i32, i32) {
    %c0_i32 = arith.constant 0 : i32
    %c0_i32_0 = arith.constant 0 : i32
    %c0_i32_1 = arith.constant 0 : i32
    return %c0_i32, %c0_i32_0 : i32, i32
  }
  func.func @transform_25(%arg0: i32) -> (i32, i32) {
    %c0_i32 = arith.constant 0 : i32
    %c0_i32_0 = arith.constant 0 : i32
    %c0_i32_1 = arith.constant 0 : i32
    return %c0_i32, %c0_i32_0 : i32, i32
  }
  func.func @transform_26(%arg0: i32) -> (i32, i32) {
    %c0_i32 = arith.constant 0 : i32
    %c0_i32_0 = arith.constant 0 : i32
    %c0_i32_1 = arith.constant 0 : i32
    return %c0_i32, %c0_i32_0 : i32, i32
  }
  func.func @transform_27(%arg0: i32) -> (i32, i32) {
    %c0_i32 = arith.constant 0 : i32
    %c0_i32_0 = arith.constant 0 : i32
    %c0_i32_1 = arith.constant 0 : i32
    return %c0_i32, %c0_i32_0 : i32, i32
  }
}

</mosaic_0001>

<bundles_post_ra>
// kernel: forward.2
= control target key start
LH: loop header
LB: loop body
LE: loop exit
PB: predicated region body
PF: predicated region fallthrough
CT: control target
= control target key end

     0   :  { %s6482_s0 = inlined_call_operand.vmem [shape: f32[768,6], index: 0, kind: input, shape index: {}]   ;;  %s6483_s1 = inlined_call_operand.vmem [shape: f32[6,3], index: 1, kind: input, shape index: {}]   ;;  %s6484_s2 = inlined_call_operand.hbm [shape: bf16[6,128], index: 2, kind: input, shape index: {}]   ;;  %s6485_s3 = inlined_call_operand.hbm [shape: f32[1,128], index: 3, kind: input, shape index: {}]   ;;  %s6486_s4 = inlined_call_operand.hbm [shape: bf16[128,256], index: 4, kind: input, shape index: {}]   ;;  %s6487_s5 = inlined_call_operand.hbm [shape: f32[1,256], index: 5, kind: input, shape index: {}]   ;;  %s6488_s6 = inlined_call_operand.hbm [shape: bf16[3,256], index: 6, kind: input, shape index: {}]   ;;  %s6489_s7 = inlined_call_operand.hbm [shape: f32[1,256], index: 7, kind: input, shape index: {}]   ;;  %s6490_s8 = inlined_call_operand.hbm [shape: f32[1,256], index: 8, kind: input, shape index: {}]   ;;  %s6491_s9 = inlined_call_operand.hbm [shape: f32[1,256], index: 9, kind: input, shape index: {}]   ;;  %s6492_s10 = inlined_call_operand.hbm [shape: bf16[256,256], index: 10, kind: input, shape index: {}]   ;;  %s6493_s11 = inlined_call_operand.hbm [shape: f32[1,256], index: 11, kind: input, shape index: {}]   ;;  %s6494_s12 = inlined_call_operand.hbm [shape: f32[1,256], index: 12, kind: input, shape index: {}]   ;;  %s6495_s13 = inlined_call_operand.hbm [shape: f32[1,256], index: 13, kind: input, shape index: {}]   ;;  %s6496_s14 = inlined_call_operand.vmem [shape: bf16[512,160], index: 14, kind: input, shape index: {}]   ;;  %s6497_s15 = inlined_call_operand.hbm [shape: f32[1,160], index: 15, kind: input, shape index: {}]   ;;  %s6498_s16 = inlined_call_operand.hbm [shape: f32[1,160], index: 16, kind: input, shape index: {}]   ;;  %s6499_s17 = inlined_call_operand.hbm [shape: f32[1,160], index: 17, kind: input, shape index: {}]   ;;  %s6500_s18 = inlined_call_operand.hbm [shape: bf16[160,160], index: 18, kind: input, shape index: {}]   ;;  %s6501_s19 = inlined_call_operand.hbm [shape: f32[1,160], index: 19, kind: input, shape index: {}]   ;;  %s6502_s20 = inlined_call_operand.hbm [shape: f32[1,160], index: 20, kind: input, shape index: {}]   ;;  %s6503_s21 = inlined_call_operand.hbm [shape: f32[1,160], index: 21, kind: input, shape index: {}]   ;;  %s6504_s22 = inlined_call_operand.hbm [shape: bf16[160,80], index: 22, kind: input, shape index: {}]   ;;  %s6505_s23 = inlined_call_operand.hbm [shape: f32[1,80], index: 23, kind: input, shape index: {}]   ;;  %s6506_s24 = inlined_call_operand.vmem [shape: f32[6,80], index: 24, kind: output, shape index: {}]  }
   0x1   :  { %6518 = sst [smem:[#allocation51_spill]] %s6482_s0 }
   0x2   :  { %6519 = sst [smem:[#allocation52_spill]] %s6483_s1 }
   0x3   :  { %6520 = sst [smem:[#allocation53_spill]] %s6484_s2 }
   0x4   :  { %6521 = sst [smem:[#allocation54_spill]] %s6485_s3 }
   0x5   :  { %6522 = sst [smem:[#allocation55_spill]] %s6486_s4 }
   0x6   :  { %6523 = sst [smem:[#allocation56_spill]] %s6487_s5 }
   0x7   :  { %6524 = sst [smem:[#allocation57_spill]] %s6488_s6 }
   0x8   :  { %6525 = sst [smem:[#allocation58_spill]] %s6489_s7 }
   0x9   :  { %6526 = sst [smem:[#allocation59_spill]] %s6490_s8 }
   0xa   :  { %29 = vsyncpa [#allocation3], 0 }
   0xb   :  { %30 = vsyncpa [#allocation5], 0 }
   0xc   :  { %31 = vsyncpa [#allocation8], 0 }
   0xd   :  { %32 = vsyncpa [#allocation11], 0 }
   0xe   :  { %33 = vsyncpa [#allocation14], 0 }
   0xf   :  { %34 = vsyncpa [#allocation17], 0 }
  0x10   :  { %35 = vsyncpa [#allocation20], 0 }
  0x11   :  { %36 = vsyncpa [#allocation23], 0 }
  0x12   :  { %37 = vsyncpa [#allocation26], 0 }
  0x13   :  { %38 = vsyncpa [#allocation29], 0 }
  0x14   :  { %39 = vsyncpa [#allocation32], 0  ;;  %s4715_s5 = smov [#allocation4]   ;;  %s4716_s27 = smov [#allocation7]  }
  0x15   :  { %s60_s26 = sshll.u32 %s4715_s5, 4  ;;  %s82_s28 = sshll.u32 %s4716_s27, 4  ;;  %s61_s26 = int_to_ptr.vmem [resolvable:$true] %s60_s26  ;;  %s83_s28 = int_to_ptr.vmem [resolvable:$true] %s82_s28 }
  0x16   :  { %s4281_s6 = scalar_lea.vmem %s61_s26, 16  ;;  %s4285_s2 = scalar_lea.vmem %s61_s26, 32 }
  0x17   :  { %p4282_p0 = scmp.ne.s32.totalorder %s61_s26, %s4281_s6  ;;  %p4286_p1 = scmp.lt.s32.totalorder %s61_s26, %s61_s26 }
  0x18   :  { %p4287_p2 = scmp.lt.s32.totalorder %s4285_s2, %s4281_s6 }
  0x1a   :  { %p4288_p3 = por %p4287_p2, %p4286_p1 }
  0x1c   :  { %p4289_p4 = pnand %p4288_p3, %p4282_p0 }
  0x1e   :  { %4292 = shalt.err (!%p4289_p4)
}
  0x1f   :  { %s6527_s7 = sld [smem:[#allocation54_spill]]  ;;  %s4301_s30 = scalar_lea.vmem %s83_s28, 32 }
  0x20   :  { %p4302_p5 = scmp.ne.s32.totalorder %s83_s28, %s4301_s30  ;;  %p4306_p6 = scmp.lt.s32.totalorder %s83_s28, %s83_s28 }
  0x21   :  { %p4307_p7 = scmp.lt.s32.totalorder %s4301_s30, %s4301_s30 }
  0x23   :  { %p4308_p8 = por %p4307_p7, %p4306_p6 }
  0x25   :  { %63 = dma.hbm_to_vmem [thread:$0]  %s6527_s7, 16, %s61_s26, [#allocation5]  }
  0x26   :  { %p4309_p9 = pnand %p4308_p8, %p4302_p5 }
  0x28   :  { %4312 = shalt.err (!%p4309_p9)
}
  0x29   :  { %s6528_s8 = sld [smem:[#allocation56_spill]]  ;;  %s4717_s4 = smov [#allocation10]  }
  0x2a   :  { %s102_s1 = sshll.u32 %s4717_s4, 4  ;;  %s4718_s5 = smov [#allocation13]   ;;  %s103_s1 = int_to_ptr.vmem [resolvable:$true] %s102_s1 }
  0x2b   :  { %s122_s27 = sshll.u32 %s4718_s5, 4  ;;  %s4321_s6 = scalar_lea.vmem %s103_s1, 32  ;;  %s123_s27 = int_to_ptr.vmem [resolvable:$true] %s122_s27 }
  0x2c   :  { %p4322_p10 = scmp.ne.s32.totalorder %s103_s1, %s4321_s6  ;;  %p4326_p11 = scmp.lt.s32.totalorder %s103_s1, %s103_s1 }
  0x2d   :  { %p4327_p12 = scmp.lt.s32.totalorder %s4321_s6, %s4321_s6 }
  0x2f   :  { %85 = dma.hbm_to_vmem [thread:$0]  %s6528_s8, 32, %s83_s28, [#allocation8]  }
  0x30   :  { %p4328_p13 = por %p4327_p12, %p4326_p11 }
  0x32   :  { %p4329_p0 = pnand %p4328_p13, %p4322_p10 }
  0x34   :  { %4332 = shalt.err (!%p4329_p0)
}
  0x35   :  { %s6529_s29 = sld [smem:[#allocation58_spill]]  ;;  %s4341_s0 = scalar_lea.vmem %s123_s27, 32 }
  0x36   :  { %p4342_p1 = scmp.ne.s32.totalorder %s123_s27, %s4341_s0  ;;  %p4346_p2 = scmp.lt.s32.totalorder %s123_s27, %s123_s27 }
  0x37   :  { %p4347_p3 = scmp.lt.s32.totalorder %s4341_s0, %s4341_s0 }
  0x39   :  { %p4348_p4 = por %p4347_p3, %p4346_p2 }
  0x3b   :  { %105 = dma.hbm_to_vmem [thread:$0]  %s6529_s29, 32, %s103_s1, [#allocation11]  }
  0x3c   :  { %p4349_p5 = pnand %p4348_p4, %p4342_p1 }
  0x3e   :  { %4352 = shalt.err (!%p4349_p5)
}
  0x3f   :  { %125 = dma.hbm_to_vmem [thread:$0]  %s6491_s9, 32, %s123_s27, [#allocation14]  }
  0x40   :  { %s4719_s30 = smov [#allocation16]   ;;  %s4720_s25 = smov [#allocation19]  }
  0x41   :  { %s144_s3 = sshll.u32 %s4719_s30, 4  ;;  %s164_s8 = sshll.u32 %s4720_s25, 4  ;;  %s145_s3 = int_to_ptr.vmem [resolvable:$true] %s144_s3  ;;  %s165_s8 = int_to_ptr.vmem [resolvable:$true] %s164_s8 }
  0x42   :  { %s4361_s4 = scalar_lea.vmem %s145_s3, 32  ;;  %p4366_p7 = scmp.lt.s32.totalorder %s145_s3, %s145_s3 }
  0x43   :  { %p4362_p6 = scmp.ne.s32.totalorder %s145_s3, %s4361_s4  ;;  %p4367_p8 = scmp.lt.s32.totalorder %s4361_s4, %s4361_s4 }
  0x45   :  { %p4368_p9 = por %p4367_p8, %p4366_p7 }
  0x47   :  { %p4369_p10 = pnand %p4368_p9, %p4362_p6 }
  0x49   :  { %4372 = shalt.err (!%p4369_p10)
}
  0x4a   :  { %147 = dma.hbm_to_vmem [thread:$0]  %s6493_s11, 32, %s145_s3, [#allocation17]  }
  0x4b   :  { %s4381_s6 = scalar_lea.vmem %s165_s8, 32  ;;  %p4386_p12 = scmp.lt.s32.totalorder %s165_s8, %s165_s8 }
  0x4c   :  { %p4382_p11 = scmp.ne.s32.totalorder %s165_s8, %s4381_s6  ;;  %p4387_p13 = scmp.lt.s32.totalorder %s4381_s6, %s4381_s6 }
  0x4e   :  { %p4388_p0 = por %p4387_p13, %p4386_p12 }
  0x50   :  { %p4389_p1 = pnand %p4388_p0, %p4382_p11 }
  0x52   :  { %4392 = shalt.err (!%p4389_p1)
}
  0x53   :  { %167 = dma.hbm_to_vmem [thread:$0]  %s6495_s13, 32, %s165_s8, [#allocation20]  }
  0x54   :  { %s4721_s26 = smov [#allocation22]  }
  0x55   :  { %s186_s2 = sshll.u32 %s4721_s26, 4  ;;  %s187_s2 = int_to_ptr.vmem [resolvable:$true] %s186_s2 }
  0x56   :  { %s4401_s29 = scalar_lea.vmem %s187_s2, 32  ;;  %p4406_p3 = scmp.lt.s32.totalorder %s187_s2, %s187_s2 }
  0x57   :  { %p4402_p2 = scmp.ne.s32.totalorder %s187_s2, %s4401_s29  ;;  %p4407_p4 = scmp.lt.s32.totalorder %s4401_s29, %s4401_s29 }
  0x59   :  { %p4408_p5 = por %p4407_p4, %p4406_p3 }
  0x5b   :  { %p4409_p6 = pnand %p4408_p5, %p4402_p2 }
  0x5d   :  { %4412 = shalt.err (!%p4409_p6)
}
  0x5e   :  { %189 = dma.hbm_to_vmem [thread:$0]  %s6498_s16, 32, %s187_s2, [#allocation23]  }
  0x5f   :  { %s4722_s28 = smov [#allocation25]   ;;  %s4723_s30 = smov [#allocation28]  }
  0x60   :  { %s205_s7 = sshll.u32 %s4722_s28, 4  ;;  %s228_s3 = sshll.u32 %s4723_s30, 4  ;;  %s206_s7 = int_to_ptr.vmem [resolvable:$true] %s205_s7  ;;  %s229_s3 = int_to_ptr.vmem [resolvable:$true] %s228_s3 }
  0x61   :  { %s4421_s13 = scalar_lea.vmem %s206_s7, 2560  ;;  %p4426_p8 = scmp.lt.s32.totalorder %s206_s7, %s206_s7 }
  0x62   :  { %p4422_p7 = scmp.ne.s32.totalorder %s206_s7, %s4421_s13  ;;  %p4427_p9 = scmp.lt.s32.totalorder %s4421_s13, %s4421_s13 }
  0x64   :  { %p4428_p10 = por %p4427_p9, %p4426_p8 }
  0x66   :  { %p4429_p11 = pnand %p4428_p10, %p4422_p7 }
  0x68   :  { %4432 = shalt.err (!%p4429_p11)
}
  0x69   :  { %s4724_s25 = smov 128   ;;  %s4725_s8 = smov 8  }
  0x6a   :  { %211 = dma.hbm_to_vmem [thread:$0]  %s6500_s18, 2560, %s206_s7, [#allocation26], %s4724_s25, %s4724_s25, %s4725_s8  }
  0x6b   :  { %s4441_s16 = scalar_lea.vmem %s229_s3, 32  ;;  %p4446_p13 = scmp.lt.s32.totalorder %s229_s3, %s229_s3 }
  0x6c   :  { %p4442_p12 = scmp.ne.s32.totalorder %s229_s3, %s4441_s16  ;;  %p4447_p0 = scmp.lt.s32.totalorder %s4441_s16, %s4441_s16 }
  0x6e   :  { %p4448_p1 = por %p4447_p0, %p4446_p13 }
  0x70   :  { %p4449_p2 = pnand %p4448_p1, %p4442_p12 }
  0x72   :  { %4452 = shalt.err (!%p4449_p2)
}
  0x73   :  { %231 = dma.hbm_to_vmem [thread:$0]  %s6502_s20, 32, %s229_s3, [#allocation29]  }
  0x74   :  { %s4726_s9 = smov [#allocation31]  }
  0x75   :  { %s247_s27 = sshll.u32 %s4726_s9, 4  ;;  %s248_s27 = int_to_ptr.vmem [resolvable:$true] %s247_s27 }
  0x76   :  { %s4461_s26 = scalar_lea.vmem %s248_s27, 1280  ;;  %p4466_p4 = scmp.lt.s32.totalorder %s248_s27, %s248_s27 }
  0x77   :  { %p4462_p3 = scmp.ne.s32.totalorder %s248_s27, %s4461_s26  ;;  %p4467_p5 = scmp.lt.s32.totalorder %s4461_s26, %s4461_s26 }
  0x79   :  { %p4468_p6 = por %p4467_p5, %p4466_p4 }
  0x7b   :  { %p4469_p7 = pnand %p4468_p6, %p4462_p3 }
  0x7d   :  { %4472 = shalt.err (!%p4469_p7)
}
  0x7e   :  { %s4727_s18 = smov 64   ;;  %s4728_s2 = smov 4  }
  0x7f   :  { %253 = dma.hbm_to_vmem [thread:$0]  %s6504_s22, 1280, %s248_s27, [#allocation32], %s4727_s18, %s4727_s18, %s4728_s2  }
  0x80   :  { %s4729_s0 = smov [#allocation2]   ;;  %s4730_s7 = smov [#allocation6]  }
  0x81   :  { %s50_s28 = sshll.u32 %s4729_s0, 4  ;;  %s69_s20 = sshll.u32 %s4730_s7, 4  ;;  %s51_s28 = int_to_ptr.vmem [resolvable:$true] %s50_s28  ;;  %s70_s20 = int_to_ptr.vmem [resolvable:$true] %s69_s20 }
  0x82   :  { %s4481_s30 = scalar_lea.vmem %s51_s28, 64  ;;  %p4486_p9 = scmp.lt.s32.totalorder %s51_s28, %s51_s28 }
  0x83   :  { %p4482_p8 = scmp.ne.s32.totalorder %s51_s28, %s4481_s30  ;;  %p4487_p10 = scmp.lt.s32.totalorder %s4481_s30, %s4481_s30 }
  0x85   :  { %p4488_p11 = por %p4487_p10, %p4486_p9 }
  0x87   :  { %p4489_p12 = pnand %p4488_p11, %p4482_p8 }
  0x89   :  { %4492 = shalt.err (!%p4489_p12)
}
  0x8a   :  { %s6530_s4 = sld [smem:[#allocation53_spill]]  ;;  %s4501_s1 = scalar_lea.vmem %s70_s20, 2048 }
  0x8b   :  { %p4502_p13 = scmp.ne.s32.totalorder %s70_s20, %s4501_s1  ;;  %p4506_p0 = scmp.lt.s32.totalorder %s70_s20, %s70_s20 }
  0x8c   :  { %p4507_p1 = scmp.lt.s32.totalorder %s4501_s1, %s4501_s1 }
  0x8e   :  { %p4508_p2 = por %p4507_p1, %p4506_p0 }
  0x90   :  { %53 = dma.hbm_to_vmem [thread:$0]  %s6530_s4, 64, %s51_s28, [#allocation3]  }
  0x91   :  { %p4509_p3 = pnand %p4508_p2, %p4502_p13 }
  0x93   :  { %4512 = shalt.err (!%p4509_p3)
}
  0x94   :  { %s6531_s5 = sld [smem:[#allocation55_spill]]  ;;  %s4731_s6 = smov [#allocation9]  }
  0x95   :  { %s92_s9 = sshll.u32 %s4731_s6, 4  ;;  %s4732_s27 = smov [#allocation12]   ;;  %s93_s9 = int_to_ptr.vmem [resolvable:$true] %s92_s9 }
  0x96   :  { %s112_s26 = sshll.u32 %s4732_s27, 4  ;;  %s4521_s18 = scalar_lea.vmem %s93_s9, 64  ;;  %s113_s26 = int_to_ptr.vmem [resolvable:$true] %s112_s26 }
  0x97   :  { %p4522_p4 = scmp.ne.s32.totalorder %s93_s9, %s4521_s18  ;;  %p4526_p5 = scmp.lt.s32.totalorder %s93_s9, %s93_s9 }
  0x98   :  { %p4527_p6 = scmp.lt.s32.totalorder %s4521_s18, %s4521_s18 }
  0x9a   :  { %75 = dma.hbm_to_vmem [thread:$0]  %s6531_s5, 2048, %s70_s20, [#allocation5], %s4724_s25, %s4724_s25, %s4725_s8  }
  0x9b   :  { %p4528_p7 = por %p4527_p6, %p4526_p5 }
  0x9d   :  { %p4529_p8 = pnand %p4528_p7, %p4522_p4 }
  0x9f   :  { %4532 = shalt.err (!%p4529_p8)
}
  0xa0   :  { %s6532_s11 = sld [smem:[#allocation57_spill]]  ;;  %s4541_s0 = scalar_lea.vmem %s113_s26, 32 }
  0xa1   :  { %p4542_p9 = scmp.ne.s32.totalorder %s113_s26, %s4541_s0  ;;  %p4546_p10 = scmp.lt.s32.totalorder %s113_s26, %s113_s26 }
  0xa2   :  { %p4547_p11 = scmp.lt.s32.totalorder %s4541_s0, %s4541_s0 }
  0xa4   :  { %p4548_p12 = por %p4547_p11, %p4546_p10 }
  0xa6   :  { %95 = dma.hbm_to_vmem [thread:$0]  %s6532_s11, 64, %s93_s9, [#allocation8]  }
  0xa7   :  { %p4549_p13 = pnand %p4548_p12, %p4542_p9 }
  0xa9   :  { %4552 = shalt.err (!%p4549_p13)
}
  0xaa   :  { %s6533_s20 = sld [smem:[#allocation59_spill]]  ;;  %s4733_s30 = smov [#allocation15]  }
  0xab   :  { %s131_s3 = sshll.u32 %s4733_s30, 4  ;;  %s4734_s13 = smov [#allocation18]   ;;  %s132_s3 = int_to_ptr.vmem [resolvable:$true] %s131_s3 }
  0xac   :  { %s154_s4 = sshll.u32 %s4734_s13, 4  ;;  %s4561_s1 = scalar_lea.vmem %s132_s3, 4096  ;;  %s155_s4 = int_to_ptr.vmem [resolvable:$true] %s154_s4 }
  0xad   :  { %p4562_p0 = scmp.ne.s32.totalorder %s132_s3, %s4561_s1  ;;  %p4566_p1 = scmp.lt.s32.totalorder %s132_s3, %s132_s3 }
  0xae   :  { %p4567_p2 = scmp.lt.s32.totalorder %s4561_s1, %s4561_s1 }
  0xb0   :  { %115 = dma.hbm_to_vmem [thread:$0]  %s6533_s20, 32, %s113_s26, [#allocation11]  }
  0xb1   :  { %p4568_p3 = por %p4567_p2, %p4566_p1 }
  0xb3   :  { %p4569_p4 = pnand %p4568_p3, %p4562_p0 }
  0xb5   :  { %4572 = shalt.err (!%p4569_p4)
}
  0xb6   :  { %137 = dma.hbm_to_vmem [thread:$0]  %s6492_s10, 4096, %s132_s3, [#allocation14], %s4724_s25, %s4724_s25, %s4725_s8  }
  0xb7   :  { %s4581_s5 = scalar_lea.vmem %s155_s4, 32  ;;  %p4586_p6 = scmp.lt.s32.totalorder %s155_s4, %s155_s4 }
  0xb8   :  { %p4582_p5 = scmp.ne.s32.totalorder %s155_s4, %s4581_s5  ;;  %p4587_p7 = scmp.lt.s32.totalorder %s4581_s5, %s4581_s5 }
  0xba   :  { %p4588_p8 = por %p4587_p7, %p4586_p6 }
  0xbc   :  { %p4589_p9 = pnand %p4588_p8, %p4582_p5 }
  0xbe   :  { %4592 = shalt.err (!%p4589_p9)
}
  0xbf   :  { %157 = dma.hbm_to_vmem [thread:$0]  %s6494_s12, 32, %s155_s4, [#allocation17]  }
  0xc0   :  { %s4735_s27 = smov [#allocation21]   ;;  %s4736_s18 = smov [#allocation24]  }
  0xc1   :  { %s176_s26 = sshll.u32 %s4735_s27, 4  ;;  %s196_s2 = sshll.u32 %s4736_s18, 4  ;;  %s177_s26 = int_to_ptr.vmem [resolvable:$true] %s176_s26  ;;  %s197_s2 = int_to_ptr.vmem [resolvable:$true] %s196_s2 }
  0xc2   :  { %s4601_s29 = scalar_lea.vmem %s177_s26, 32  ;;  %p4606_p11 = scmp.lt.s32.totalorder %s177_s26, %s177_s26 }
  0xc3   :  { %p4602_p10 = scmp.ne.s32.totalorder %s177_s26, %s4601_s29  ;;  %p4607_p12 = scmp.lt.s32.totalorder %s4601_s29, %s4601_s29 }
  0xc5   :  { %p4608_p13 = por %p4607_p12, %p4606_p11 }
  0xc7   :  { %p4609_p0 = pnand %p4608_p13, %p4602_p10 }
  0xc9   :  { %4612 = shalt.err (!%p4609_p0)
}
  0xca   :  { %179 = dma.hbm_to_vmem [thread:$0]  %s6497_s15, 32, %s177_s26, [#allocation20]  }
  0xcb   :  { %s4621_s8 = scalar_lea.vmem %s197_s2, 32  ;;  %p4626_p2 = scmp.lt.s32.totalorder %s197_s2, %s197_s2 }
  0xcc   :  { %p4622_p1 = scmp.ne.s32.totalorder %s197_s2, %s4621_s8  ;;  %p4627_p3 = scmp.lt.s32.totalorder %s4621_s8, %s4621_s8 }
  0xce   :  { %p4628_p4 = por %p4627_p3, %p4626_p2 }
  0xd0   :  { %p4629_p5 = pnand %p4628_p4, %p4622_p1 }
  0xd2   :  { %4632 = shalt.err (!%p4629_p5)
}
  0xd3   :  { %199 = dma.hbm_to_vmem [thread:$0]  %s6499_s17, 32, %s197_s2, [#allocation23]  }
  0xd4   :  { %s4737_s0 = smov [#allocation27]   ;;  %s4738_s7 = smov [#allocation30]  }
  0xd5   :  { %s218_s28 = sshll.u32 %s4737_s0, 4  ;;  %s238_s20 = sshll.u32 %s4738_s7, 4  ;;  %s219_s28 = int_to_ptr.vmem [resolvable:$true] %s218_s28  ;;  %s239_s20 = int_to_ptr.vmem [resolvable:$true] %s238_s20 }
  0xd6   :  { %s4641_s30 = scalar_lea.vmem %s219_s28, 32  ;;  %p4646_p7 = scmp.lt.s32.totalorder %s219_s28, %s219_s28 }
  0xd7   :  { %p4642_p6 = scmp.ne.s32.totalorder %s219_s28, %s4641_s30  ;;  %p4647_p8 = scmp.lt.s32.totalorder %s4641_s30, %s4641_s30 }
  0xd9   :  { %p4648_p9 = por %p4647_p8, %p4646_p7 }
  0xdb   :  { %p4649_p10 = pnand %p4648_p9, %p4642_p6 }
  0xdd   :  { %4652 = shalt.err (!%p4649_p10)
}
  0xde   :  { %221 = dma.hbm_to_vmem [thread:$0]  %s6501_s19, 32, %s219_s28, [#allocation26]  }
  0xdf   :  { %s4661_s13 = scalar_lea.vmem %s239_s20, 32  ;;  %p4666_p12 = scmp.lt.s32.totalorder %s239_s20, %s239_s20 }
  0xe0   :  { %p4662_p11 = scmp.ne.s32.totalorder %s239_s20, %s4661_s13  ;;  %p4667_p13 = scmp.lt.s32.totalorder %s4661_s13, %s4661_s13 }
  0xe2   :  { %p4668_p0 = por %p4667_p13, %p4666_p12 }
  0xe4   :  { %p4669_p1 = pnand %p4668_p0, %p4662_p11 }
  0xe6   :  { %4672 = shalt.err (!%p4669_p1)
}
  0xe7   :  { %241 = dma.hbm_to_vmem [thread:$0]  %s6503_s21, 32, %s239_s20, [#allocation29]  }
  0xe8   :  { %s4739_s1 = smov [#allocation33]  }
  0xe9   :  { %s260_s22 = sshll.u32 %s4739_s1, 4  ;;  %s261_s22 = int_to_ptr.vmem [resolvable:$true] %s260_s22 }
  0xea   :  { %s4681_s16 = scalar_lea.vmem %s261_s22, 16  ;;  %s4685_s5 = scalar_lea.vmem %s261_s22, 32 }
  0xeb   :  { %p4682_p2 = scmp.ne.s32.totalorder %s261_s22, %s4681_s16  ;;  %p4686_p3 = scmp.lt.s32.totalorder %s261_s22, %s261_s22 }
  0xec   :  { %p4687_p4 = scmp.lt.s32.totalorder %s4685_s5, %s4681_s16 }
  0xee   :  { %p4688_p5 = por %p4687_p4, %p4686_p3 }
  0xf0   :  { %p4689_p6 = pnand %p4688_p5, %p4682_p2 }
  0xf2   :  { %4692 = shalt.err (!%p4689_p6)
}
  0xf3   :  { %263 = dma.hbm_to_vmem [thread:$0]  %s6505_s23, 16, %s261_s22, [#allocation32]  }
  0xf4   :  { %4693 = dma.done.wait [#allocation3], 64  }
  0xf5   :  { %4694 = vsyncadd [#allocation3], 4294967232 }
  0xf6   :  { %4695 = dma.done.wait [#allocation5], 2064  }
  0xf7   :  { %4696 = vsyncadd [#allocation5], 4294965232 }
  0xf8   :  { %4697 = dma.done.wait [#allocation8], 96  }
  0xf9   :  { %4698 = vsyncadd [#allocation8], 4294967200 }
  0xfa   :  { %4699 = dma.done.wait [#allocation11], 64  }
  0xfb   :  { %4700 = vsyncadd [#allocation11], 4294967232 }
  0xfc   :  { %4701 = dma.done.wait [#allocation14], 4128  }
  0xfd   :  { %4702 = vsyncadd [#allocation14], 4294963168 }
  0xfe   :  { %4703 = dma.done.wait [#allocation17], 64  }
  0xff   :  { %4704 = vsyncadd [#allocation17], 4294967232 }
 0x100   :  { %4705 = dma.done.wait [#allocation20], 64  }
 0x101   :  { %4706 = vsyncadd [#allocation20], 4294967232 }
 0x102   :  { %4707 = dma.done.wait [#allocation23], 64  }
 0x103   :  { %4708 = vsyncadd [#allocation23], 4294967232 }
 0x104   :  { %4709 = dma.done.wait [#allocation26], 2592  }
 0x105   :  { %4710 = vsyncadd [#allocation26], 4294964704 }
 0x106   :  { %4711 = dma.done.wait [#allocation29], 64  }
 0x107   :  { %4712 = vsyncadd [#allocation29], 4294967232 }
 0x108   :  { %4713 = dma.done.wait [#allocation32], 1296  }
 0x109   :  { %4714 = vsyncadd [#allocation32], 4294966000  ;;  %vm1052_vm0 = vcmask 1040384   ;;  %v4740_v0 = vmov 0.0   ;;  %vm1053_vm1 = vcmask 1041408   ;;  %v4741_v1 = vmov 65535  }
 0x10a   :  { %4020 = vmatprep.subr.bf16.mxu1 %v4740_v0  ;;  %v1054_v2 = vsel %vm1052_vm0, 4294967295, %v4741_v1  ;;  %vm4742_vm2 = vmmov 0   ;;  %vm626_vm3 = vcmask 1042432   ;;  %v473_v4 = vld [vmem:[#allocation2] sm:$0x7]  ;;  %s6534_s9 = sld [smem:[#allocation51_spill]] }
 0x10b   :  { %4022 = vmatprep.mubr.msk.bf16.mxu1 %vm4742_vm2, %v4740_v0  ;;  %v1055_v3 = vsel %vm1053_vm1, %v1054_v2, 0  ;;  %v3740_v5 = vld.sshfl [vmem:[#allocation9] sm:$0x33 pattern:$0x76325410]  ;;  %4026 = vmatprep.subr.msk.bf16.mxu0 %vm626_vm3, %v473_v4  ;;  %v628_v6 = vsel %vm626_vm3, %v473_v4, 0 }
 0x10c   :  { %v1056_v7 = vand.u32 %v1055_v3, %v473_v4  ;;  %vm481_vm4 = vcmask 48128   ;;  %v2310_v11 = vcombine.high %v3740_v5, %v3740_v5  ;;  %3923 = vmatpush3.bf16.msra.mxu0 %v628_v6  ;;  %v2312_v12 = vand.u32 %v3740_v5, %v1055_v3  ;;  %s6535_s12 = sld [smem:[#allocation52_spill]]  ;;  %v4057_v55 = vld [vmem:[#allocation6 + $0x70] ss:$8 sps:$4 sm:$0xff]   ;;  %v4059_v56 = vld [vmem:[#allocation6 + $0x74] ss:$8 sps:$4 sm:$0xff]  }
 0x10d   :  { %vm1048_vm5 = vcmask 23552   ;;  %v4060_v61 = vld [vmem:[#allocation6 + $0x60] ss:$8 sps:$4 sm:$0xff]   ;;  %v4062_v62 = vld [vmem:[#allocation6 + $0x64] ss:$8 sps:$4 sm:$0xff]   ;;  %vm2360_vm6 = vcmask 1045504  }
 0x10e   :  { %4021 = vmatpush3.bf16.msra.mxu1 %v1056_v7  ;;  %v2315_v18 = vand.u32 %v2310_v11, %v1055_v3  ;;  %v4065_v1 = vld [vmem:[#allocation6 + $0x54] ss:$8 sps:$4 sm:$0xff]   ;;  %v4063_v3 = vld [vmem:[#allocation6 + $0x50] ss:$8 sps:$4 sm:$0xff]   ;;  %v4068_v11 = vld [vmem:[#allocation6 + $0x44] ss:$8 sps:$4 sm:$0xff]  }
 0x10f   :  { %1524 = vmatprep.subr.bf16.mxu1 %v4059_v56  ;;  %vm3010_vm7 = vcmask 1041409   ;;  %vm3012_vm8 = vcmask 1042434   ;;  %vm3014_vm9 = vcmask 1043459   ;;  %vm3016_vm10 = vcmask 1044484  }
 0x110   :  { %v328_v8 = vld [vmem:[%s6534_s9] sm:$0xff]  ;;  %v329_v9 = vld [vmem:[%s6534_s9 + $0x8] sm:$0xff]  ;;  %v330_v10 = vld [vmem:[%s6534_s9 + $0x10] sm:$0xff]  ;;  %2331 = vmatprep.subr.bf16.mxu0 %v2315_v18  ;;  %vm3018_vm11 = vcmask 1045509   ;;  %vm3247_vm12 = vcmask 259072   ;;  %vm3430_vm13 = vcmask 261120  }
 0x111   :  { %v424_v13 = vpack.c.bf16 %v329_v9, %v328_v8  ;;  %v331_v14 = vld [vmem:[%s6534_s9 + $0x18] sm:$0xff]  ;;  %v332_v16 = vld [vmem:[%s6534_s9 + $0x20] sm:$0xff]  ;;  %v333_v20 = vld [vmem:[%s6534_s9 + $0x28] sm:$0xff]  ;;  %vm3657_vm14 = vcmask 652288  }
 0x112   :  { %v472_v15 = vld [vmem:[%s6535_s12] sm:$0x3f]  ;;  %v425_v17 = vpack.c.bf16 %v331_v14, %v330_v10  ;;  %v426_v21 = vpack.c.bf16 %v333_v20, %v332_v16  ;;  %v334_v22 = vld [vmem:[%s6534_s9 + $0x30] sm:$0xff]  ;;  %v335_v23 = vld [vmem:[%s6534_s9 + $0x38] sm:$0xff]  ;;  %v6508_v14 = vmov 0  }
 0x113   :  { %v4960_v19 = vpack.c.bf16 %v472_v15, %v472_v15  ;;  %3924 = vmatprep.mubr.msk.bf16.mxu0 %vm481_vm4, %v424_v13  ;;  %v336_v24 = vld [vmem:[%s6534_s9 + $0x40] sm:$0xff]  ;;  %v337_v25 = vld [vmem:[%s6534_s9 + $0x48] sm:$0xff]  ;;  %v427_v26 = vpack.c.bf16 %v335_v23, %v334_v22  ;;  %v338_v28 = vld [vmem:[%s6534_s9 + $0x50] sm:$0xff] }
 0x114   :  { %3925 = vmatmul.mubr.msk.bf16.vlgmr.msra.gmra.mxu0 %vm481_vm4, %v425_v17  ;;  %v428_v27 = vpack.c.bf16 %v337_v25, %v336_v24  ;;  %v339_v29 = vld [vmem:[%s6534_s9 + $0x58] sm:$0xff]  ;;  %v340_v30 = vld [vmem:[%s6534_s9 + $0x60] sm:$0xff]  ;;  %v341_v31 = vld [vmem:[%s6534_s9 + $0x68] sm:$0xff] }
 0x115   :  { %4023 = vmatmul.mubr.msk.bf16.vlgmr.msra.gmra.mxu1 %vm1048_vm5, %v4960_v19  ;;  %2332 = vmatpush1.bf16.msra.mxu0 %v2312_v12  ;;  %v429_v32 = vpack.c.bf16 %v339_v29, %v338_v28  ;;  %v430_v33 = vpack.c.bf16 %v341_v31, %v340_v30  ;;  %v342_v34 = vld [vmem:[%s6534_s9 + $0x70] sm:$0xff]  ;;  %v343_v35 = vld [vmem:[%s6534_s9 + $0x78] sm:$0xff]  ;;  %v344_v36 = vld [vmem:[%s6534_s9 + $0x80] sm:$0xff] }
 0x116   :  { %3928 = vmatprep.mubr.msk.bf16.mxu0 %vm481_vm4, %v426_v21  ;;  %v345_v37 = vld [vmem:[%s6534_s9 + $0x88] sm:$0xff]  ;;  %v431_v38 = vpack.c.bf16 %v343_v35, %v342_v34  ;;  %v346_v40 = vld [vmem:[%s6534_s9 + $0x90] sm:$0xff]  ;;  %v347_v41 = vld [vmem:[%s6534_s9 + $0x98] sm:$0xff]  ;;  %1525 = vmatpush1.bf16.msra.mxu1 %v4057_v55 }
 0x117   :  { %v432_v39 = vpack.c.bf16 %v345_v37, %v344_v36  ;;  %v348_v42 = vld [vmem:[%s6534_s9 + $0xa0] sm:$0xff]  ;;  %v349_v43 = vld [vmem:[%s6534_s9 + $0xa8] sm:$0xff]  ;;  %v433_v44 = vpack.c.bf16 %v347_v41, %v346_v40  ;;  %v350_v46 = vld [vmem:[%s6534_s9 + $0xb0] sm:$0xff]  ;;  %1526 = vmatprep.subr.bf16.mxu1 %v4062_v62  ;;  %1556 = vmatprep.mubr.bf16.mxu1 %v6508_v14 }
 0x118   :  { %v434_v45 = vpack.c.bf16 %v349_v43, %v348_v42  ;;  %v351_v47 = vld [vmem:[%s6534_s9 + $0xb8] sm:$0xff]  ;;  %v352_v48 = vld [vmem:[%s6534_s9 + $0xc0] sm:$0xff]  ;;  %v353_v49 = vld [vmem:[%s6534_s9 + $0xc8] sm:$0xff] }
 0x119   :  { %v435_v50 = vpack.c.bf16 %v351_v47, %v350_v46  ;;  %v436_v51 = vpack.c.bf16 %v353_v49, %v352_v48  ;;  %v354_v52 = vld [vmem:[%s6534_s9 + $0xd0] sm:$0xff]  ;;  %v355_v53 = vld [vmem:[%s6534_s9 + $0xd8] sm:$0xff]  ;;  %v356_v54 = vld [vmem:[%s6534_s9 + $0xe0] sm:$0xff] }
 0x11a   :  { %v357_v57 = vld [vmem:[%s6534_s9 + $0xe8] sm:$0xff]  ;;  %v437_v58 = vpack.c.bf16 %v355_v53, %v354_v52  ;;  %v358_v60 = vld [vmem:[%s6534_s9 + $0xf0] sm:$0xff]  ;;  %v359_v63 = vld [vmem:[%s6534_s9 + $0xf8] sm:$0xff]  ;;  %1527 = vmatpush1.bf16.msra.mxu1 %v4060_v61 }
 0x11b   :  { %v438_v59 = vpack.c.bf16 %v357_v57, %v356_v54  ;;  %v360_v0 = vld [vmem:[%s6534_s9 + $0x100] sm:$0xff]  ;;  %v361_v2 = vld [vmem:[%s6534_s9 + $0x108] sm:$0xff]  ;;  %v439_v4 = vpack.c.bf16 %v359_v63, %v358_v60  ;;  %1528 = vmatprep.subr.bf16.mxu1 %v4065_v1  ;;  %v362_v6 = vld [vmem:[%s6534_s9 + $0x110] sm:$0xff] }
 0x11c   :  { %3929 = vmatmul.mubr.msk.bf16.gmra.mxu0 %vm481_vm4, %v427_v26  ;;  %v440_v5 = vpack.c.bf16 %v361_v2, %v360_v0  ;;  %v363_v7 = vld [vmem:[%s6534_s9 + $0x118] sm:$0xff]  ;;  %v364_v8 = vld [vmem:[%s6534_s9 + $0x120] sm:$0xff]  ;;  %v365_v9 = vld [vmem:[%s6534_s9 + $0x128] sm:$0xff] }
 0x11d   :  { %3932 = vmatprep.mubr.msk.bf16.mxu0 %vm481_vm4, %v428_v27  ;;  %v4066_v10 = vld [vmem:[#allocation6 + $0x40] ss:$8 sps:$4 sm:$0xff]   ;;  %v4069_v12 = vld [vmem:[#allocation6 + $0x30] ss:$8 sps:$4 sm:$0xff]   ;;  %v4071_v13 = vld [vmem:[#allocation6 + $0x34] ss:$8 sps:$4 sm:$0xff]   ;;  %v441_v15 = vpack.c.bf16 %v363_v7, %v362_v6  ;;  %v442_v16 = vpack.c.bf16 %v365_v9, %v364_v8 }
 0x11e   :  { %1529 = vmatpush1.bf16.msra.mxu1 %v4063_v3  ;;  %v366_v17 = vld [vmem:[%s6534_s9 + $0x130] sm:$0xff]  ;;  %v367_v18 = vld [vmem:[%s6534_s9 + $0x138] sm:$0xff]  ;;  %v368_v20 = vld [vmem:[%s6534_s9 + $0x140] sm:$0xff] }
 0x11f   :  { %1530 = vmatprep.subr.bf16.mxu1 %v4068_v11  ;;  %v369_v21 = vld [vmem:[%s6534_s9 + $0x148] sm:$0xff]  ;;  %v443_v24 = vpack.c.bf16 %v367_v18, %v366_v17  ;;  %v4077_v26 = vld [vmem:[#allocation6 + $0x14] ss:$8 sps:$4 sm:$0xff]   ;;  %v370_v27 = vld [vmem:[%s6534_s9 + $0x150] sm:$0xff] }
 0x120   :  { %v4074_v22 = vld [vmem:[#allocation6 + $0x24] ss:$8 sps:$4 sm:$0xff]   ;;  %v4072_v23 = vld [vmem:[#allocation6 + $0x20] ss:$8 sps:$4 sm:$0xff]   ;;  %v444_v25 = vpack.c.bf16 %v369_v21, %v368_v20  ;;  %v371_v28 = vld [vmem:[%s6534_s9 + $0x158] sm:$0xff] }
 0x121   :  { %v4075_v29 = vld [vmem:[#allocation6 + $0x10] ss:$8 sps:$4 sm:$0xff]   ;;  %v373_v31 = vld [vmem:[%s6534_s9 + $0x168] sm:$0xff]  ;;  %v445_v34 = vpack.c.bf16 %v371_v28, %v370_v27 }
 0x122   :  { %1531 = vmatpush1.bf16.msra.mxu1 %v4066_v10  ;;  %v372_v30 = vld [vmem:[%s6534_s9 + $0x160] sm:$0xff]  ;;  %v374_v36 = vld [vmem:[%s6534_s9 + $0x170] sm:$0xff]  ;;  %v375_v37 = vld [vmem:[%s6534_s9 + $0x178] sm:$0xff] }
 0x123   :  { %1532 = vmatprep.subr.bf16.mxu1 %v4071_v13  ;;  %v446_v35 = vpack.c.bf16 %v373_v31, %v372_v30  ;;  %v447_v40 = vpack.c.bf16 %v375_v37, %v374_v36  ;;  %v378_v42 = vld [vmem:[%s6534_s9 + $0x190] sm:$0xff]  ;;  %v379_v43 = vld [vmem:[%s6534_s9 + $0x198] sm:$0xff]  ;;  %v388_v56 = vld [vmem:[%s6534_s9 + $0x1e0] sm:$0xff] }
 0x124   :  { %3933 = vmatmul.mubr.msk.bf16.gmra.mxu0 %vm481_vm4, %v429_v32  ;;  %v4080_v32 = vld [vmem:[#allocation6 + $0x4] ss:$8 sps:$4 sm:$0xff]   ;;  %v449_v46 = vpack.c.bf16 %v379_v43, %v378_v42  ;;  %v383_v49 = vld [vmem:[%s6534_s9 + $0x1b8] sm:$0xff]  ;;  %v392_v62 = vld [vmem:[%s6534_s9 + $0x200] sm:$0xff] }
 0x125   :  { %3936 = vmatprep.mubr.msk.bf16.mxu0 %vm481_vm4, %v430_v33  ;;  %v4078_v33 = vld [vmem:[#allocation6] ss:$8 sps:$4 sm:$0xff]   ;;  %v387_v55 = vld [vmem:[%s6534_s9 + $0x1d8] sm:$0xff] }
 0x126   :  { %1533 = vmatpush1.bf16.msra.mxu1 %v4069_v12  ;;  %v382_v48 = vld [vmem:[%s6534_s9 + $0x1b0] sm:$0xff]  ;;  %v389_v57 = vld [vmem:[%s6534_s9 + $0x1e8] sm:$0xff]  ;;  %v391_v61 = vld [vmem:[%s6534_s9 + $0x1f8] sm:$0xff] }
 0x127   :  { %1534 = vmatprep.subr.bf16.mxu1 %v4074_v22  ;;  %v451_v52 = vpack.c.bf16 %v383_v49, %v382_v48  ;;  %v386_v54 = vld [vmem:[%s6534_s9 + $0x1d0] sm:$0xff]  ;;  %v393_v63 = vld [vmem:[%s6534_s9 + $0x208] sm:$0xff]  ;;  %v395_v3 = vld [vmem:[%s6534_s9 + $0x218] sm:$0xff]  ;;  %v4744_v49 = vmov 1966171168  }
 0x128   :  { %v390_v60 = vld [vmem:[%s6534_s9 + $0x1f0] sm:$0xff]  ;;  %v456_v1 = vpack.c.bf16 %v393_v63, %v392_v62  ;;  %v399_v9 = vld [vmem:[%s6534_s9 + $0x238] sm:$0xff]  ;;  %v400_v10 = vld [vmem:[%s6534_s9 + $0x240] sm:$0xff] }
 0x129   :  { %v455_v0 = vpack.c.bf16 %v391_v61, %v390_v60  ;;  %v394_v2 = vld [vmem:[%s6534_s9 + $0x210] sm:$0xff]  ;;  %v401_v11 = vld [vmem:[%s6534_s9 + $0x248] sm:$0xff]  ;;  %v404_v17 = vld [vmem:[%s6534_s9 + $0x260] sm:$0xff] }
 0x12a   :  { %1535 = vmatpush1.bf16.msra.mxu1 %v4072_v23  ;;  %v457_v6 = vpack.c.bf16 %v395_v3, %v394_v2  ;;  %v398_v8 = vld [vmem:[%s6534_s9 + $0x230] sm:$0xff]  ;;  %v460_v13 = vpack.c.bf16 %v401_v11, %v400_v10  ;;  %v405_v18 = vld [vmem:[%s6534_s9 + $0x268] sm:$0xff]  ;;  %v407_v23 = vld [vmem:[%s6534_s9 + $0x278] sm:$0xff] }
 0x12b   :  { %1536 = vmatprep.subr.bf16.mxu1 %v4077_v26  ;;  %v459_v12 = vpack.c.bf16 %v399_v9, %v398_v8  ;;  %v462_v21 = vpack.c.bf16 %v405_v18, %v404_v17  ;;  %v406_v22 = vld [vmem:[%s6534_s9 + $0x270] sm:$0xff]  ;;  %v412_v30 = vld [vmem:[%s6534_s9 + $0x2a0] sm:$0xff]  ;;  %v413_v31 = vld [vmem:[%s6534_s9 + $0x2a8] sm:$0xff] }
 0x12c   :  { %3937 = vmatmul.mubr.msk.bf16.gmra.mxu0 %vm481_vm4, %v431_v38  ;;  %v376_v38 = vld [vmem:[%s6534_s9 + $0x180] sm:$0xff]  ;;  %v463_v26 = vpack.c.bf16 %v407_v23, %v406_v22  ;;  %v410_v28 = vld [vmem:[%s6534_s9 + $0x290] sm:$0xff]  ;;  %v417_v37 = vld [vmem:[%s6534_s9 + $0x2c8] sm:$0xff] }
 0x12d   :  { %3940 = vmatprep.mubr.msk.bf16.mxu0 %vm481_vm4, %v432_v39  ;;  %v377_v39 = vld [vmem:[%s6534_s9 + $0x188] sm:$0xff]  ;;  %v416_v36 = vld [vmem:[%s6534_s9 + $0x2c0] sm:$0xff] }
 0x12e   :  { %1537 = vmatpush1.bf16.msra.mxu1 %v4075_v29  ;;  %v448_v41 = vpack.c.bf16 %v377_v39, %v376_v38  ;;  %v411_v29 = vld [vmem:[%s6534_s9 + $0x298] sm:$0xff]  ;;  %v468_v39 = vpack.c.bf16 %v417_v37, %v416_v36  ;;  %v420_v42 = vld [vmem:[%s6534_s9 + $0x2e0] sm:$0xff]  ;;  %v421_v43 = vld [vmem:[%s6534_s9 + $0x2e8] sm:$0xff] }
 0x12f   :  { %1538 = vmatprep.subr.bf16.mxu1 %v4080_v32  ;;  %v465_v32 = vpack.c.bf16 %v411_v29, %v410_v28 }
 0x132   :  { %1539 = vmatpush1.bf16.msra.mxu1 %v4078_v33  ;;  %v466_v33 = vpack.c.bf16 %v413_v31, %v412_v30 }
 0x134   :  { %3941 = vmatmul.mubr.msk.bf16.gmra.mxu0 %vm481_vm4, %v433_v44  ;;  %v380_v44 = vld [vmem:[%s6534_s9 + $0x1a0] sm:$0xff] }
 0x135   :  { %3944 = vmatprep.mubr.msk.bf16.mxu0 %vm481_vm4, %v434_v45  ;;  %v381_v45 = vld [vmem:[%s6534_s9 + $0x1a8] sm:$0xff] }
 0x136   :  { %v450_v47 = vpack.c.bf16 %v381_v45, %v380_v44  ;;  %v470_v45 = vpack.c.bf16 %v421_v43, %v420_v42 }
 0x13c   :  { %3945 = vmatmul.mubr.msk.bf16.gmra.mxu0 %vm481_vm4, %v435_v50  ;;  %v384_v50 = vld [vmem:[%s6534_s9 + $0x1c0] sm:$0xff] }
 0x13d   :  { %3948 = vmatprep.mubr.msk.bf16.mxu0 %vm481_vm4, %v436_v51  ;;  %v385_v51 = vld [vmem:[%s6534_s9 + $0x1c8] sm:$0xff] }
 0x13e   :  { %v452_v53 = vpack.c.bf16 %v385_v51, %v384_v50  ;;  %v1101_v50 = vunpack.c.l.s4 %v4744_v49  ;;  %v1103_v51 = vlaneseq }
 0x144   :  { %3949 = vmatmul.mubr.msk.bf16.gmra.mxu0 %vm481_vm4, %v437_v58  ;;  %v453_v58 = vpack.c.bf16 %v387_v55, %v386_v54 }
 0x145   :  { %3952 = vmatprep.mubr.msk.bf16.mxu0 %vm481_vm4, %v438_v59  ;;  %v454_v59 = vpack.c.bf16 %v389_v57, %v388_v56 }
 0x14c   :  { %3953 = vmatmul.mubr.msk.bf16.gmra.mxu0 %vm481_vm4, %v439_v4  ;;  %v396_v4 = vld [vmem:[%s6534_s9 + $0x220] sm:$0xff] }
 0x14d   :  { %3956 = vmatprep.mubr.msk.bf16.mxu0 %vm481_vm4, %v440_v5  ;;  %v397_v5 = vld [vmem:[%s6534_s9 + $0x228] sm:$0xff] }
 0x14e   :  { %v458_v7 = vpack.c.bf16 %v397_v5, %v396_v4 }
 0x154   :  { %3957 = vmatmul.mubr.msk.bf16.gmra.mxu0 %vm481_vm4, %v441_v15  ;;  %v402_v15 = vld [vmem:[%s6534_s9 + $0x250] sm:$0xff] }
 0x155   :  { %3960 = vmatprep.mubr.msk.bf16.mxu0 %vm481_vm4, %v442_v16  ;;  %v403_v16 = vld [vmem:[%s6534_s9 + $0x258] sm:$0xff] }
 0x156   :  { %v461_v20 = vpack.c.bf16 %v403_v16, %v402_v15 }
 0x15c   :  { %3961 = vmatmul.mubr.msk.bf16.gmra.mxu0 %vm481_vm4, %v443_v24  ;;  %v408_v24 = vld [vmem:[%s6534_s9 + $0x280] sm:$0xff] }
 0x15d   :  { %3964 = vmatprep.mubr.msk.bf16.mxu0 %vm481_vm4, %v444_v25  ;;  %v409_v25 = vld [vmem:[%s6534_s9 + $0x288] sm:$0xff] }
 0x15e   :  { %v464_v27 = vpack.c.bf16 %v409_v25, %v408_v24 }
 0x164   :  { %3965 = vmatmul.mubr.msk.bf16.gmra.mxu0 %vm481_vm4, %v445_v34  ;;  %v414_v34 = vld [vmem:[%s6534_s9 + $0x2b0] sm:$0xff] }
 0x165   :  { %3968 = vmatprep.mubr.msk.bf16.mxu0 %vm481_vm4, %v446_v35  ;;  %v415_v35 = vld [vmem:[%s6534_s9 + $0x2b8] sm:$0xff] }
 0x166   :  { %v467_v38 = vpack.c.bf16 %v415_v35, %v414_v34 }
 0x16c   :  { %3969 = vmatmul.mubr.msk.bf16.gmra.mxu0 %vm481_vm4, %v447_v40  ;;  %v418_v40 = vld [vmem:[%s6534_s9 + $0x2d0] sm:$0xff] }
 0x16d   :  { %3972 = vmatprep.mubr.msk.bf16.mxu0 %vm481_vm4, %v448_v41  ;;  %v419_v41 = vld [vmem:[%s6534_s9 + $0x2d8] sm:$0xff] }
 0x16e   :  { %v469_v44 = vpack.c.bf16 %v419_v41, %v418_v40 }
 0x174   :  { %3973 = vmatmul.mubr.msk.bf16.gmra.mxu0 %vm481_vm4, %v449_v46  ;;  %v422_v46 = vld [vmem:[%s6534_s9 + $0x2f0] sm:$0xff] }
 0x175   :  { %3976 = vmatprep.mubr.msk.bf16.mxu0 %vm481_vm4, %v450_v47  ;;  %v423_v47 = vld [vmem:[%s6534_s9 + $0x2f8] sm:$0xff] }
 0x176   :  { %v471_v48 = vpack.c.bf16 %v423_v47, %v422_v46 }
 0x17c   :  { %3977 = vmatmul.mubr.msk.bf16.gmra.mxu0 %vm481_vm4, %v451_v52  ;;  %v1102_v52 = vunpack.c.0.s8 %v1101_v50 }
 0x17d   :  { %3980 = vmatprep.mubr.msk.bf16.mxu0 %vm481_vm4, %v452_v53  ;;  %v5287_v53 = vshrl.u32 %v1103_v51, 7 }
 0x17f   :  { %v5290_v54 = vsub.s32 %v1102_v52, %v5287_v53  ;;  %v5298_v60 = vsub.s32 0, %v5287_v53 }
 0x181   :  { %6536 = vst [vmem:[#allocation45_spill] sm:$0xff] %v5298_v60 }
 0x184   :  { %3981 = vmatmul.mubr.msk.bf16.gmra.mxu0 %vm481_vm4, %v453_v58 }
 0x185   :  { %3984 = vmatprep.mubr.msk.bf16.mxu0 %vm481_vm4, %v454_v59 }
 0x18c   :  { %3985 = vmatmul.mubr.msk.bf16.gmra.mxu0 %vm481_vm4, %v455_v0 }
 0x18d   :  { %3988 = vmatprep.mubr.msk.bf16.mxu0 %vm481_vm4, %v456_v1 }
 0x194   :  { %3989 = vmatmul.mubr.msk.bf16.gmra.mxu0 %vm481_vm4, %v457_v6 }
 0x195   :  { %3992 = vmatprep.mubr.msk.bf16.mxu0 %vm481_vm4, %v458_v7 }
 0x19c   :  { %3993 = vmatmul.mubr.msk.bf16.gmra.mxu0 %vm481_vm4, %v459_v12 }
 0x19d   :  { %3996 = vmatprep.mubr.msk.bf16.mxu0 %vm481_vm4, %v460_v13 }
 0x1a4   :  { %3997 = vmatmul.mubr.msk.bf16.gmra.mxu0 %vm481_vm4, %v461_v20 }
 0x1a5   :  { %4000 = vmatprep.mubr.msk.bf16.mxu0 %vm481_vm4, %v462_v21 }
 0x1ac   :  { %4001 = vmatmul.mubr.msk.bf16.gmra.mxu0 %vm481_vm4, %v463_v26 }
 0x1ad   :  { %4004 = vmatprep.mubr.msk.bf16.mxu0 %vm481_vm4, %v464_v27 }
 0x1b4   :  { %4005 = vmatmul.mubr.msk.bf16.gmra.mxu0 %vm481_vm4, %v465_v32 }
 0x1b5   :  { %4008 = vmatprep.mubr.msk.bf16.mxu0 %vm481_vm4, %v466_v33 }
 0x1bc   :  { %4009 = vmatmul.mubr.msk.bf16.gmra.mxu0 %vm481_vm4, %v467_v38 }
 0x1bd   :  { %4012 = vmatprep.mubr.msk.bf16.mxu0 %vm481_vm4, %v468_v39 }
 0x1c4   :  { %4013 = vmatmul.mubr.msk.bf16.gmra.mxu0 %vm481_vm4, %v469_v44 }
 0x1c5   :  { %4016 = vmatprep.mubr.msk.bf16.mxu0 %vm481_vm4, %v470_v45 }
 0x1cc   :  { %4017 = vmatmul.mubr.msk.bf16.gmra.mxu0 %vm481_vm4, %v471_v48 }
 0x1cd   :  { %2349 = vmatprep.mubr.bf16.mxu0 %v6508_v14 }
 0x1d4   :  { %v3926_v55 = vpop.f32.mrf.mxu0  ;;  %3741 = vmatmul.mubr.msk.bf16.vlgmr.msra.gmra.mxu0 %vm1048_vm5, %v4960_v19  ;;  %v5307_v19 = vld [vmem:[#allocation4] ss:$0 sm:$0xff] }
 0x1d5   :  { %v1092_v56 = vpop.f32.mrf.mxu1  ;;  %v673_v16 = vadd.f32 %v3926_v55, %v5307_v19 }
 0x1d6   :  { %v1099_v57 = vcombine.high %v1092_v56, %v1092_v56  ;;  %v5295_v58 = vrot.slane %v1092_v56, %v5290_v54  ;;  %v664_v59 = vpop.f32.mrf.mxu0 }
 0x1d7   :  { %v4024_v61 = vpop.f32.mrf.mxu1  ;;  %v665_v6 = vadd.f32 %v5307_v19, %v664_v59 }
 0x1d8   :  { %v5301_v62 = vrot.slane %v1099_v57, %v5290_v54  ;;  %v5305_v63 = vrot.slane %v5295_v58, %v5290_v54  ;;  %v3927_v0 = vpop.f32.mrf.mxu0 }
 0x1d9   :  { %v1095_v1 = vpop.f32.mrf.mxu1  ;;  %v676_v12 = vadd.f32 %v3927_v0, %v5307_v19 }
 0x1da   :  { %v1115_v2 = vcombine.high %v5301_v62, %v5301_v62  ;;  %v1129_v3 = vrot.slane %v5301_v62, %v5290_v54  ;;  %v667_v4 = vpop.f32.mrf.mxu0  ;;  %v5315_v5 = vrot.slane %v5305_v63, %v5298_v60 }
 0x1db   :  { %v668_v7 = vadd.f32 %v5307_v19, %v667_v4  ;;  %v4025_v8 = vpop.f32.mrf.mxu1 }
 0x1dc   :  { %v5320_v9 = vrot.slane %v1115_v2, %v5290_v54  ;;  %v3930_v10 = vpop.f32.mrf.mxu0  ;;  %v1176_v11 = vsub.f32 %v665_v6, %v5315_v5  ;;  %v1179_v21 = vsub.f32 %v676_v12, %v5315_v5  ;;  %v1178_v23 = vsub.f32 %v673_v16, %v5315_v5 }
 0x1dd   :  { %v1177_v13 = vsub.f32 %v668_v7, %v5315_v5  ;;  %v689_v40 = vadd.f32 %v3930_v10, %v5307_v19  ;;  %v1114_v16 = vcombine.high %v5295_v58, %v5295_v58 }
 0x1de   :  { %v680_v15 = vpop.f32.mrf.mxu0  ;;  %v1272_v17 = vmax.f32 %v1176_v11, 0.0  ;;  %v1275_v26 = vmax.f32 %v1179_v21, 0.0  ;;  %v1274_v28 = vmax.f32 %v1178_v23, 0.0 }
 0x1df   :  { %v1273_v18 = vmax.f32 %v1177_v13, 0.0  ;;  %v681_v30 = vadd.f32 %v5307_v19, %v680_v15  ;;  %v1182_v46 = vsub.f32 %v689_v40, %v5315_v5 }
 0x1e0   :  { %v3931_v20 = vpop.f32.mrf.mxu0  ;;  %v1369_v33 = vpack.c.bf16 %v1275_v26, %v1274_v28 }
 0x1e1   :  { %v1368_v22 = vpack.c.bf16 %v1273_v18, %v1272_v17  ;;  %v1180_v35 = vsub.f32 %v681_v30, %v5315_v5  ;;  %v692_v37 = vadd.f32 %v3931_v20, %v5307_v19  ;;  %v1278_v51 = vmax.f32 %v1182_v46, 0.0 }
 0x1e2   :  { %v683_v24 = vpop.f32.mrf.mxu0 }
 0x1e3   :  { %1557 = vmatmul.mubr.bf16.vlgmr.msra.gmra.mxu1 %v1368_v22  ;;  %v684_v27 = vadd.f32 %v5307_v19, %v683_v24  ;;  %v1276_v41 = vmax.f32 %v1180_v35, 0.0  ;;  %v1183_v43 = vsub.f32 %v692_v37, %v5315_v5  ;;  %v5374_v24 = vrot.slane %v1114_v16, %v5290_v54 }
 0x1e4   :  { %v3934_v25 = vpop.f32.mrf.mxu0  ;;  %1566 = vmatprep.mubr.bf16.mxu1 %v6508_v14 }
 0x1e5   :  { %v1181_v32 = vsub.f32 %v684_v27, %v5315_v5  ;;  %v1279_v48 = vmax.f32 %v1183_v43, 0.0  ;;  %v705_v6 = vadd.f32 %v3934_v25, %v5307_v19 }
 0x1e6   :  { %v696_v29 = vpop.f32.mrf.mxu0 }
 0x1e7   :  { %v1277_v38 = vmax.f32 %v1181_v32, 0.0  ;;  %v697_v52 = vadd.f32 %v5307_v19, %v696_v29  ;;  %v1371_v57 = vpack.c.bf16 %v1279_v48, %v1278_v51  ;;  %v1186_v13 = vsub.f32 %v705_v6, %v5315_v5 }
 0x1e8   :  { %v3935_v31 = vpop.f32.mrf.mxu0  ;;  %v5383_v29 = vrot.slane %v5374_v24, %v5298_v60 }
 0x1e9   :  { %v1370_v44 = vpack.c.bf16 %v1277_v38, %v1276_v41  ;;  %v1184_v61 = vsub.f32 %v697_v52, %v5315_v5  ;;  %v708_v1 = vadd.f32 %v3935_v31, %v5307_v19  ;;  %v1282_v21 = vmax.f32 %v1186_v13, 0.0 }
 0x1ea   :  { %v699_v34 = vpop.f32.mrf.mxu0 }
 0x1eb   :  { %1567 = vmatmul.mubr.bf16.gmra.mxu1 %v1369_v33  ;;  %v700_v49 = vadd.f32 %v5307_v19, %v699_v34  ;;  %v1280_v7 = vmax.f32 %v1184_v61, 0.0  ;;  %v1187_v10 = vsub.f32 %v708_v1, %v5315_v5  ;;  %v1144_v34 = vcombine.high %v5305_v63, %v5305_v63 }
 0x1ec   :  { %v3938_v36 = vpop.f32.mrf.mxu0  ;;  %1576 = vmatprep.mubr.bf16.mxu1 %v6508_v14 }
 0x1ed   :  { %v1185_v56 = vsub.f32 %v700_v49, %v5315_v5  ;;  %v1283_v17 = vmax.f32 %v1187_v10, 0.0  ;;  %v721_v35 = vadd.f32 %v3938_v36, %v5307_v19 }
 0x1ee   :  { %v712_v39 = vpop.f32.mrf.mxu0 }
 0x1ef   :  { %v1281_v2 = vmax.f32 %v1185_v56, 0.0  ;;  %v713_v22 = vadd.f32 %v5307_v19, %v712_v39  ;;  %v1373_v26 = vpack.c.bf16 %v1283_v17, %v1282_v21 }
 0x1f0   :  { %v3939_v42 = vpop.f32.mrf.mxu0 }
 0x1f1   :  { %v1372_v11 = vpack.c.bf16 %v1281_v2, %v1280_v7  ;;  %v1188_v58 = vsub.f32 %v713_v22, %v5315_v5  ;;  %v724_v30 = vadd.f32 %v3939_v42, %v5307_v19 }
 0x1f2   :  { %v715_v45 = vpop.f32.mrf.mxu0 }
 0x1f3   :  { %1577 = vmatmul.mubr.bf16.gmra.mxu1 %v1370_v44  ;;  %v716_v18 = vadd.f32 %v5307_v19, %v715_v45  ;;  %v1284_v37 = vmax.f32 %v1188_v58, 0.0  ;;  %v1191_v40 = vsub.f32 %v724_v30, %v5315_v5  ;;  %v5398_v44 = vrot.slane %v1144_v34, %v5298_v60 }
 0x1f4   :  { %v5338_v47 = vpop.f32.mrf.mxu0  ;;  %1586 = vmatprep.mubr.bf16.mxu1 %v6508_v14  ;;  %v1190_v45 = vsub.f32 %v721_v35, %v5315_v5 }
 0x1f5   :  { %v1189_v25 = vsub.f32 %v716_v18, %v5315_v5  ;;  %v1287_v48 = vmax.f32 %v1191_v40, 0.0  ;;  %v737_v30 = vadd.f32 %v5338_v47, %v5307_v19 }
 0x1f6   :  { %v5342_v50 = vpop.f32.mrf.mxu0  ;;  %v1286_v5 = vmax.f32 %v1190_v45, 0.0 }
 0x1f7   :  { %v1285_v31 = vmax.f32 %v1189_v25, 0.0  ;;  %v729_v56 = vadd.f32 %v5307_v19, %v5342_v50 }
 0x1f8   :  { %v5345_v55 = vpop.f32.mrf.mxu0 }
 0x1f9   :  { %v1374_v43 = vpack.c.bf16 %v1285_v31, %v1284_v37  ;;  %v1192_v13 = vsub.f32 %v729_v56, %v5383_v29  ;;  %v740_v18 = vadd.f32 %v5345_v55, %v5307_v19 }
 0x1fa   :  { %v731_v59 = vpop.f32.mrf.mxu0 }
 0x1fb   :  { %1587 = vmatmul.mubr.bf16.gmra.mxu1 %v1371_v57  ;;  %v732_v36 = vadd.f32 %v5307_v19, %v731_v59  ;;  %v1288_v31 = vmax.f32 %v1192_v13, 0.0 }
 0x1fc   :  { %v5349_v0 = vpop.f32.mrf.mxu0  ;;  %1596 = vmatprep.mubr.bf16.mxu1 %v6508_v14 }
 0x1fd   :  { %v1193_v2 = vsub.f32 %v732_v36, %v5383_v29 }
 0x1fe   :  { %v5353_v4 = vpop.f32.mrf.mxu0 }
 0x1ff   :  { %v1289_v21 = vmax.f32 %v1193_v2, 0.0 }
 0x200   :  { %v5356_v8 = vpop.f32.mrf.mxu0 }
 0x202   :  { %v5359_v12 = vpop.f32.mrf.mxu0 }
 0x203   :  { %1597 = vmatmul.mubr.bf16.gmra.mxu1 %v1372_v11  ;;  %v1375_v11 = vpack.c.bf16 %v1287_v48, %v1286_v5  ;;  %v748_v56 = vadd.f32 %v5307_v19, %v5359_v12 }
 0x204   :  { %v5362_v15 = vpop.f32.mrf.mxu0  ;;  %1606 = vmatprep.mubr.bf16.mxu1 %v6508_v14 }
 0x206   :  { %v5368_v20 = vpop.f32.mrf.mxu0 }
 0x208   :  { %v5371_v23 = vpop.f32.mrf.mxu0 }
 0x20a   :  { %v5377_v27 = vpop.f32.mrf.mxu0 }
 0x20b   :  { %1607 = vmatmul.mubr.bf16.gmra.mxu1 %v1373_v26 }
 0x20c   :  { %v3954_v28 = vpop.f32.mrf.mxu0  ;;  %1616 = vmatprep.mubr.bf16.mxu1 %v6508_v14 }
 0x20d   :  { %v785_v32 = vadd.f32 %v3954_v28, %v5307_v19 }
 0x20e   :  { %v5387_v33 = vpop.f32.mrf.mxu0 }
 0x20f   :  { %v1206_v38 = vsub.f32 %v785_v32, %v5383_v29 }
 0x210   :  { %v3955_v39 = vpop.f32.mrf.mxu0 }
 0x211   :  { %v788_v41 = vadd.f32 %v3955_v39, %v5307_v19  ;;  %v5404_v49 = vmax.f32 %v1206_v38, 0.0  ;;  %v1195_v39 = vsub.f32 %v740_v18, %v5383_v29 }
 0x212   :  { %v5395_v42 = vpop.f32.mrf.mxu0 }
 0x213   :  { %v1207_v63 = vsub.f32 %v788_v41, %v5383_v29  ;;  %1617 = vmatmul.mubr.bf16.gmra.mxu1 %v1374_v43  ;;  %v1376_v43 = vpack.c.bf16 %v1289_v21, %v1288_v31 }
 0x214   :  { %v3958_v46 = vpop.f32.mrf.mxu0  ;;  %1626 = vmatprep.mubr.bf16.mxu1 %v6508_v14 }
 0x215   :  { %v5406_v51 = vmax.f32 %v1207_v63, 0.0  ;;  %v801_v52 = vadd.f32 %v3958_v46, %v5307_v19  ;;  %v1194_v63 = vsub.f32 %v737_v30, %v5383_v29 }
 0x216   :  { %v792_v57 = vpop.f32.mrf.mxu0 }
 0x217   :  { %v1210_v61 = vsub.f32 %v801_v52, %v5398_v44  ;;  %v793_v1 = vadd.f32 %v5307_v19, %v792_v57  ;;  %v1383_v59 = vpack.c.bf16 %v5406_v51, %v5404_v49  ;;  %v1291_v52 = vmax.f32 %v1195_v39, 0.0 }
 0x218   :  { %v3959_v6 = vpop.f32.mrf.mxu0 }
 0x219   :  { %v1208_v7 = vsub.f32 %v793_v1, %v5398_v44  ;;  %v804_v10 = vadd.f32 %v3959_v6, %v5307_v19  ;;  %v5424_v25 = vmax.f32 %v1210_v61, 0.0  ;;  %v1290_v6 = vmax.f32 %v1194_v63, 0.0 }
 0x21a   :  { %v795_v50 = vpop.f32.mrf.mxu0  ;;  %v1145_v63 = vcombine.high %v5374_v24, %v5374_v24 }
 0x21b   :  { %v1211_v16 = vsub.f32 %v804_v10, %v5398_v44  ;;  %v796_v17 = vadd.f32 %v5307_v19, %v795_v50  ;;  %1627 = vmatmul.mubr.bf16.gmra.mxu1 %v1375_v11  ;;  %v5432_v32 = vmax.f32 %v1208_v7, 0.0  ;;  %v745_v7 = vadd.f32 %v5307_v19, %v5353_v4 }
 0x21c   :  { %v3962_v22 = vpop.f32.mrf.mxu0  ;;  %1636 = vmatprep.mubr.bf16.mxu1 %v6508_v14  ;;  %v1377_v4 = vpack.c.bf16 %v1291_v52, %v1290_v6 }
 0x21d   :  { %v5426_v26 = vmax.f32 %v1211_v16, 0.0  ;;  %v1209_v58 = vsub.f32 %v796_v17, %v5398_v44  ;;  %v817_v28 = vadd.f32 %v3962_v22, %v5307_v19  ;;  %v1197_v17 = vsub.f32 %v748_v56, %v5383_v29 }
 0x21e   :  { %v808_v34 = vpop.f32.mrf.mxu0 }
 0x21f   :  { %v5434_v55 = vmax.f32 %v1209_v58, 0.0  ;;  %v1214_v35 = vsub.f32 %v817_v28, %v5398_v44  ;;  %v809_v37 = vadd.f32 %v5307_v19, %v808_v34  ;;  %v1385_v38 = vpack.c.bf16 %v5426_v26, %v5424_v25 }
 0x220   :  { %v3963_v40 = vpop.f32.mrf.mxu0  ;;  %v1196_v28 = vsub.f32 %v745_v7, %v5383_v29 }
 0x221   :  { %v1212_v41 = vsub.f32 %v809_v37, %v5398_v44  ;;  %v820_v47 = vadd.f32 %v3963_v40, %v5307_v19  ;;  %v1384_v45 = vpack.c.bf16 %v5434_v55, %v5432_v32  ;;  %v5451_v5 = vmax.f32 %v1214_v35, 0.0 }
 0x222   :  { %v811_v36 = vpop.f32.mrf.mxu0  ;;  %v756_v35 = vadd.f32 %v5356_v8, %v5307_v19  ;;  %v1293_v37 = vmax.f32 %v1197_v17, 0.0  ;;  %v5503_v17 = vrot.slane %v1145_v63, %v5298_v60 }
 0x223   :  { %v1215_v46 = vsub.f32 %v820_v47, %v5398_v44  ;;  %v812_v48 = vadd.f32 %v5307_v19, %v811_v36  ;;  %1637 = vmatmul.mubr.bf16.gmra.mxu1 %v1376_v43  ;;  %v5459_v10 = vmax.f32 %v1212_v41, 0.0  ;;  %v753_v36 = vadd.f32 %v5349_v0, %v5307_v19 }
 0x224   :  { %v3966_v57 = vpop.f32.mrf.mxu0  ;;  %1646 = vmatprep.mubr.bf16.mxu1 %v6508_v14 }
 0x225   :  { %v5453_v61 = vmax.f32 %v1215_v46, 0.0  ;;  %v1213_v1 = vsub.f32 %v812_v48, %v5398_v44  ;;  %v833_v2 = vadd.f32 %v3966_v57, %v5307_v19  ;;  %v1292_v46 = vmax.f32 %v1196_v28, 0.0 }
 0x226   :  { %v824_v11 = vpop.f32.mrf.mxu0 }
 0x227   :  { %v5461_v13 = vmax.f32 %v1213_v1, 0.0  ;;  %v1218_v12 = vsub.f32 %v833_v2, %v5398_v44  ;;  %v825_v50 = vadd.f32 %v5307_v19, %v824_v11  ;;  %v1387_v16 = vpack.c.bf16 %v5453_v61, %v5451_v5 }
 0x228   :  { %v3967_v18 = vpop.f32.mrf.mxu0  ;;  %v1199_v2 = vsub.f32 %v756_v35, %v5383_v29  ;;  %v1378_v7 = vpack.c.bf16 %v1293_v37, %v1292_v46 }
 0x229   :  { %v1216_v21 = vsub.f32 %v825_v50, %v5398_v44  ;;  %v836_v22 = vadd.f32 %v3967_v18, %v5307_v19  ;;  %v1386_v58 = vpack.c.bf16 %v5461_v13, %v5459_v10  ;;  %v5478_v40 = vmax.f32 %v1218_v12, 0.0 }
 0x22a   :  { %v827_v30 = vpop.f32.mrf.mxu0  ;;  %v1198_v12 = vsub.f32 %v753_v36, %v5383_v29 }
 0x22b   :  { %v1219_v31 = vsub.f32 %v836_v22, %v5398_v44  ;;  %v828_v34 = vadd.f32 %v5307_v19, %v827_v30  ;;  %1647 = vmatmul.mubr.bf16.gmra.mxu1 %v1377_v4  ;;  %v5488_v8 = vmax.f32 %v1216_v21, 0.0  ;;  %v1295_v22 = vmax.f32 %v1199_v2, 0.0 }
 0x22c   :  { %v3970_v39 = vpop.f32.mrf.mxu0  ;;  %1656 = vmatprep.mubr.bf16.mxu1 %v6508_v14  ;;  %v764_v4 = vadd.f32 %v5307_v19, %v5377_v27  ;;  %v1294_v37 = vmax.f32 %v1198_v12, 0.0  ;;  %v772_v12 = vadd.f32 %v5371_v23, %v5307_v19 }
 0x22d   :  { %v5480_v41 = vmax.f32 %v1219_v31, 0.0  ;;  %v1217_v47 = vsub.f32 %v828_v34, %v5398_v44  ;;  %v849_v43 = vadd.f32 %v3970_v39, %v5307_v19  ;;  %v761_v39 = vadd.f32 %v5307_v19, %v5368_v20 }
 0x22e   :  { %v840_v48 = vpop.f32.mrf.mxu0  ;;  %v1379_v20 = vpack.c.bf16 %v1295_v22, %v1294_v37 }
 0x22f   :  { %v5490_v52 = vmax.f32 %v1217_v47, 0.0  ;;  %v1222_v56 = vsub.f32 %v849_v43, %v5398_v44  ;;  %v841_v57 = vadd.f32 %v5307_v19, %v840_v48  ;;  %v1389_v1 = vpack.c.bf16 %v5480_v41, %v5478_v40 }
 0x230   :  { %v3971_v6 = vpop.f32.mrf.mxu0 }
 0x231   :  { %v1220_v24 = vsub.f32 %v841_v57, %v5398_v44  ;;  %v852_v0 = vadd.f32 %v3971_v6, %v5307_v19  ;;  %v1388_v11 = vpack.c.bf16 %v5490_v52, %v5488_v8  ;;  %v5510_v30 = vmax.f32 %v1222_v56, 0.0 }
 0x232   :  { %v843_v50 = vpop.f32.mrf.mxu0  ;;  %v1200_v6 = vsub.f32 %v761_v39, %v5383_v29 }
 0x233   :  { %v1223_v18 = vsub.f32 %v852_v0, %v5398_v44  ;;  %v844_v21 = vadd.f32 %v5307_v19, %v843_v50  ;;  %1657 = vmatmul.mubr.bf16.gmra.mxu1 %v1378_v7  ;;  %v5518_v47 = vmax.f32 %v1220_v24, 0.0 }
 0x234   :  { %v3974_v28 = vpop.f32.mrf.mxu0  ;;  %1666 = vmatprep.mubr.bf16.mxu1 %v6508_v14 }
 0x235   :  { %v5512_v31 = vmax.f32 %v1223_v18, 0.0  ;;  %v1221_v34 = vsub.f32 %v844_v21, %v5398_v44  ;;  %v865_v35 = vadd.f32 %v3974_v28, %v5307_v19  ;;  %v1201_v44 = vsub.f32 %v764_v4, %v5383_v29 }
 0x236   :  { %v856_v43 = vpop.f32.mrf.mxu0 }
 0x237   :  { %v5520_v63 = vmax.f32 %v1221_v34, 0.0  ;;  %v1226_v27 = vsub.f32 %v865_v35, %v5503_v17  ;;  %v857_v36 = vadd.f32 %v5307_v19, %v856_v43  ;;  %v1297_v50 = vmax.f32 %v1201_v44, 0.0 }
 0x238   :  { %v3975_v48 = vpop.f32.mrf.mxu0  ;;  %v769_v34 = vadd.f32 %v5362_v15, %v5307_v19  ;;  %v1296_v35 = vmax.f32 %v1200_v6, 0.0  ;;  %v1203_v44 = vsub.f32 %v772_v12, %v5383_v29  ;;  %v780_v12 = vadd.f32 %v5307_v19, %v5395_v42 }
 0x239   :  { %v1224_v56 = vsub.f32 %v857_v36, %v5503_v17  ;;  %v868_v57 = vadd.f32 %v3975_v48, %v5307_v19  ;;  %v5537_v21 = vmax.f32 %v1226_v27, 0.0 }
 0x23a   :  { %v859_v24 = vpop.f32.mrf.mxu0  ;;  %v1202_v6 = vsub.f32 %v769_v34, %v5383_v29 }
 0x23b   :  { %v1227_v0 = vsub.f32 %v868_v57, %v5503_v17  ;;  %v860_v7 = vadd.f32 %v5307_v19, %v859_v24  ;;  %1667 = vmatmul.mubr.bf16.gmra.mxu1 %v1379_v20  ;;  %v5545_v37 = vmax.f32 %v1224_v56, 0.0  ;;  %v1380_v20 = vpack.c.bf16 %v1297_v50, %v1296_v35 }
 0x23c   :  { %v3978_v18 = vpop.f32.mrf.mxu0  ;;  %1676 = vmatprep.mubr.bf16.mxu1 %v6508_v14 }
 0x23d   :  { %v5539_v22 = vmax.f32 %v1227_v0, 0.0  ;;  %v1225_v4 = vsub.f32 %v860_v7, %v5503_v17  ;;  %v881_v28 = vadd.f32 %v3978_v18, %v5307_v19  ;;  %v1299_v18 = vmax.f32 %v1203_v44, 0.0 }
 0x23e   :  { %v872_v39 = vpop.f32.mrf.mxu0 }
 0x23f   :  { %v5547_v23 = vmax.f32 %v1225_v4, 0.0  ;;  %v1230_v43 = vsub.f32 %v881_v28, %v5503_v17  ;;  %v873_v27 = vadd.f32 %v5307_v19, %v872_v39  ;;  %v1298_v39 = vmax.f32 %v1202_v6, 0.0 }
 0x240   :  { %v3979_v48 = vpop.f32.mrf.mxu0 }
 0x241   :  { %v1228_v57 = vsub.f32 %v873_v27, %v5503_v17  ;;  %v884_v15 = vadd.f32 %v3979_v48, %v5307_v19  ;;  %v5564_v28 = vmax.f32 %v1230_v43, 0.0  ;;  %v777_v27 = vadd.f32 %v5307_v19, %v5387_v33 }
 0x242   :  { %v875_v24 = vpop.f32.mrf.mxu0  ;;  %v1381_v33 = vpack.c.bf16 %v1299_v18, %v1298_v39 }
 0x243   :  { %v1231_v0 = vsub.f32 %v884_v15, %v5503_v17  ;;  %v876_v7 = vadd.f32 %v5307_v19, %v875_v24  ;;  %1677 = vmatmul.mubr.bf16.gmra.mxu1 %v1380_v20  ;;  %v5572_v48 = vmax.f32 %v1228_v57, 0.0  ;;  %v1205_v24 = vsub.f32 %v780_v12, %v5383_v29 }
 0x244   :  { %v3982_v4 = vpop.f32.mrf.mxu0  ;;  %1686 = vmatprep.mubr.bf16.mxu1 %v6508_v14 }
 0x245   :  { %v5566_v50 = vmax.f32 %v1231_v0, 0.0  ;;  %v1229_v35 = vsub.f32 %v876_v7, %v5503_v17  ;;  %v897_v34 = vadd.f32 %v3982_v4, %v5307_v19  ;;  %v1204_v4 = vsub.f32 %v777_v27, %v5383_v29 }
 0x246   :  { %v888_v44 = vpop.f32.mrf.mxu0 }
 0x247   :  { %v5576_v15 = vmax.f32 %v1229_v35, 0.0  ;;  %v1234_v43 = vsub.f32 %v897_v34, %v5503_v17  ;;  %v889_v20 = vadd.f32 %v5307_v19, %v888_v44  ;;  %v1301_v44 = vmax.f32 %v1205_v24, 0.0 }
 0x248   :  { %v3983_v0 = vpop.f32.mrf.mxu0 }
 0x249   :  { %v1232_v6 = vsub.f32 %v889_v20, %v5503_v17  ;;  %v900_v7 = vadd.f32 %v3983_v0, %v5307_v19  ;;  %v5589_v12 = vmax.f32 %v1234_v43, 0.0  ;;  %v1300_v0 = vmax.f32 %v1204_v4, 0.0 }
 0x24a   :  { %v891_v42 = vpop.f32.mrf.mxu0 }
 0x24b   :  { %v1235_v35 = vsub.f32 %v900_v7, %v5503_v17  ;;  %v892_v34 = vadd.f32 %v5307_v19, %v891_v42  ;;  %1687 = vmatmul.mubr.bf16.gmra.mxu1 %v1381_v33  ;;  %v5595_v29 = vmax.f32 %v1232_v6, 0.0  ;;  %v1382_v6 = vpack.c.bf16 %v1301_v44, %v1300_v0 }
 0x24c   :  { %v3986_v36 = vpop.f32.mrf.mxu0  ;;  %1696 = vmatprep.mubr.bf16.mxu1 %v6508_v14 }
 0x24d   :  { %v5591_v20 = vmax.f32 %v1235_v35, 0.0  ;;  %v1233_v18 = vsub.f32 %v892_v34, %v5503_v17  ;;  %v913_v39 = vadd.f32 %v3986_v36, %v5307_v19 }
 0x24e   :  { %v904_v27 = vpop.f32.mrf.mxu0 }
 0x24f   :  { %v5599_v7 = vmax.f32 %v1233_v18, 0.0  ;;  %v1238_v24 = vsub.f32 %v913_v39, %v5503_v17  ;;  %v905_v43 = vadd.f32 %v5307_v19, %v904_v27  ;;  %v5611_v18 = vrot.slane %v1129_v3, %v5298_v60 }
 0x250   :  { %v3987_v33 = vpop.f32.mrf.mxu0 }
 0x251   :  { %v1236_v34 = vsub.f32 %v905_v43, %v5503_v17  ;;  %v916_v36 = vadd.f32 %v3987_v33, %v5307_v19  ;;  %v5616_v35 = vmax.f32 %v1238_v24, 0.0 }
 0x252   :  { %v907_v4 = vpop.f32.mrf.mxu0 }
 0x253   :  { %v1239_v39 = vsub.f32 %v916_v36, %v5503_v17  ;;  %v908_v27 = vadd.f32 %v5307_v19, %v907_v4  ;;  %1697 = vmatmul.mubr.bf16.gmra.mxu1 %v1382_v6  ;;  %v5622_v33 = vmax.f32 %v1236_v34, 0.0 }
 0x254   :  { %v3990_v42 = vpop.f32.mrf.mxu0  ;;  %1706 = vmatprep.mubr.bf16.mxu1 %v6508_v14 }
 0x255   :  { %v5618_v43 = vmax.f32 %v1239_v39, 0.0  ;;  %v1237_v44 = vsub.f32 %v908_v27, %v5503_v17  ;;  %v929_v0 = vadd.f32 %v3990_v42, %v5307_v19 }
 0x256   :  { %v920_v54 = vpop.f32.mrf.mxu0 }
 0x257   :  { %v5626_v3 = vmax.f32 %v1237_v44, 0.0  ;;  %v1242_v36 = vsub.f32 %v929_v0, %v5611_v18  ;;  %v921_v6 = vadd.f32 %v5307_v19, %v920_v54 }
 0x258   :  { %v3991_v24 = vpop.f32.mrf.mxu0 }
 0x259   :  { %v1240_v17 = vsub.f32 %v921_v6, %v5611_v18  ;;  %v932_v42 = vadd.f32 %v3991_v24, %v5307_v19  ;;  %v5640_v0 = vmax.f32 %v1242_v36, 0.0 }
 0x25a   :  { %v923_v34 = vpop.f32.mrf.mxu0 }
 0x25b   :  { %v1243_v39 = vsub.f32 %v932_v42, %v5611_v18  ;;  %v924_v27 = vadd.f32 %v5307_v19, %v923_v34  ;;  %1707 = vmatmul.mubr.bf16.gmra.mxu1 %v1383_v59  ;;  %v5646_v62 = vmax.f32 %v1240_v17, 0.0 }
 0x25c   :  { %v3994_v44 = vpop.f32.mrf.mxu0  ;;  %1716 = vmatprep.mubr.bf16.mxu1 %v6508_v14 }
 0x25d   :  { %v5642_v54 = vmax.f32 %v1243_v39, 0.0  ;;  %v1241_v6 = vsub.f32 %v924_v27, %v5611_v18  ;;  %v945_v24 = vadd.f32 %v3994_v44, %v5307_v19 }
 0x25e   :  { %v936_v42 = vpop.f32.mrf.mxu0 }
 0x25f   :  { %v5650_v4 = vmax.f32 %v1241_v6, 0.0  ;;  %v1246_v49 = vsub.f32 %v945_v24, %v5611_v18  ;;  %v937_v51 = vadd.f32 %v5307_v19, %v936_v42 }
 0x260   :  { %v3995_v59 = vpop.f32.mrf.mxu0 }
 0x261   :  { %v1244_v39 = vsub.f32 %v937_v51, %v5611_v18  ;;  %v948_v27 = vadd.f32 %v3995_v59, %v5307_v19  ;;  %v5664_v24 = vmax.f32 %v1246_v49, 0.0 }
 0x262   :  { %v939_v17 = vpop.f32.mrf.mxu0 }
 0x263   :  { %v1247_v44 = vsub.f32 %v948_v27, %v5611_v18  ;;  %v940_v57 = vadd.f32 %v5307_v19, %v939_v17  ;;  %1717 = vmatmul.mubr.bf16.gmra.mxu1 %v1384_v45  ;;  %v5670_v34 = vmax.f32 %v1244_v39, 0.0 }
 0x264   :  { %v3998_v6 = vpop.f32.mrf.mxu0  ;;  %1726 = vmatprep.mubr.bf16.mxu1 %v6508_v14 }
 0x265   :  { %v5666_v42 = vmax.f32 %v1247_v44, 0.0  ;;  %v1245_v51 = vsub.f32 %v940_v57, %v5611_v18  ;;  %v961_v59 = vadd.f32 %v3998_v6, %v5307_v19 }
 0x266   :  { %v952_v27 = vpop.f32.mrf.mxu0 }
 0x267   :  { %v5674_v36 = vmax.f32 %v1245_v51, 0.0  ;;  %v1250_v32 = vsub.f32 %v961_v59, %v5611_v18  ;;  %v953_v55 = vadd.f32 %v5307_v19, %v952_v27 }
 0x268   :  { %v3999_v45 = vpop.f32.mrf.mxu0 }
 0x269   :  { %v1248_v57 = vsub.f32 %v953_v55, %v5611_v18  ;;  %v964_v44 = vadd.f32 %v3999_v45, %v5307_v19  ;;  %v5688_v59 = vmax.f32 %v1250_v32, 0.0 }
 0x26a   :  { %v955_v39 = vpop.f32.mrf.mxu0 }
 0x26b   :  { %v1251_v6 = vsub.f32 %v964_v44, %v5611_v18  ;;  %v956_v56 = vadd.f32 %v5307_v19, %v955_v39  ;;  %1727 = vmatmul.mubr.bf16.gmra.mxu1 %v1385_v38  ;;  %v5694_v17 = vmax.f32 %v1248_v57, 0.0 }
 0x26c   :  { %v4002_v51 = vpop.f32.mrf.mxu0  ;;  %1736 = vmatprep.mubr.bf16.mxu1 %v6508_v14 }
 0x26d   :  { %v5690_v27 = vmax.f32 %v1251_v6, 0.0  ;;  %v1249_v55 = vsub.f32 %v956_v56, %v5611_v18  ;;  %v977_v45 = vadd.f32 %v4002_v51, %v5307_v19  ;;  %v5708_v51 = vrot.slane %v5320_v9, %v5298_v60 }
 0x26e   :  { %v968_v44 = vpop.f32.mrf.mxu0 }
 0x26f   :  { %v5698_v49 = vmax.f32 %v1249_v55, 0.0  ;;  %v1254_v25 = vsub.f32 %v977_v45, %v5611_v18  ;;  %v969_v26 = vadd.f32 %v5307_v19, %v968_v44 }
 0x270   :  { %v4003_v38 = vpop.f32.mrf.mxu0 }
 0x271   :  { %v1252_v56 = vsub.f32 %v969_v26, %v5611_v18  ;;  %v980_v6 = vadd.f32 %v4003_v38, %v5307_v19  ;;  %v5716_v44 = vmax.f32 %v1254_v25, 0.0 }
 0x272   :  { %v971_v57 = vpop.f32.mrf.mxu0 }
 0x273   :  { %v1255_v55 = vsub.f32 %v980_v6, %v5611_v18  ;;  %v972_v39 = vadd.f32 %v5307_v19, %v971_v57  ;;  %1737 = vmatmul.mubr.bf16.gmra.mxu1 %v1386_v58  ;;  %v5722_v32 = vmax.f32 %v1252_v56, 0.0 }
 0x274   :  { %v4006_v45 = vpop.f32.mrf.mxu0  ;;  %1746 = vmatprep.mubr.bf16.mxu1 %v6508_v14 }
 0x275   :  { %v5718_v26 = vmax.f32 %v1255_v55, 0.0  ;;  %v1253_v38 = vsub.f32 %v972_v39, %v5611_v18  ;;  %v993_v9 = vadd.f32 %v4006_v45, %v5307_v19 }
 0x276   :  { %v984_v6 = vpop.f32.mrf.mxu0 }
 0x277   :  { %v5726_v46 = vmax.f32 %v1253_v38, 0.0  ;;  %v1258_v10 = vsub.f32 %v993_v9, %v5708_v51  ;;  %v985_v13 = vadd.f32 %v5307_v19, %v984_v6 }
 0x278   :  { %v4007_v58 = vpop.f32.mrf.mxu0 }
 0x279   :  { %v1256_v18 = vsub.f32 %v985_v13, %v5708_v51  ;;  %v996_v39 = vadd.f32 %v4007_v58, %v5307_v19  ;;  %v5740_v9 = vmax.f32 %v1258_v10, 0.0 }
 0x27a   :  { %v987_v56 = vpop.f32.mrf.mxu0 }
 0x27b   :  { %v1259_v55 = vsub.f32 %v996_v39, %v5708_v51  ;;  %v988_v45 = vadd.f32 %v5307_v19, %v987_v56  ;;  %1747 = vmatmul.mubr.bf16.gmra.mxu1 %v1387_v16  ;;  %v5746_v57 = vmax.f32 %v1256_v18, 0.0 }
 0x27c   :  { %v4010_v38 = vpop.f32.mrf.mxu0  ;;  %1756 = vmatprep.mubr.bf16.mxu1 %v6508_v14 }
 0x27d   :  { %v5742_v6 = vmax.f32 %v1259_v55, 0.0  ;;  %v1257_v13 = vsub.f32 %v988_v45, %v5708_v51  ;;  %v1009_v58 = vadd.f32 %v4010_v38, %v5307_v19 }
 0x27e   :  { %v1000_v39 = vpop.f32.mrf.mxu0 }
 0x27f   :  { %v5750_v25 = vmax.f32 %v1257_v13, 0.0  ;;  %v1262_v5 = vsub.f32 %v1009_v58, %v5708_v51  ;;  %v1001_v61 = vadd.f32 %v5307_v19, %v1000_v39 }
 0x280   :  { %v4011_v16 = vpop.f32.mrf.mxu0 }
 0x281   :  { %v1260_v55 = vsub.f32 %v1001_v61, %v5708_v51  ;;  %v1012_v45 = vadd.f32 %v4011_v16, %v5307_v19  ;;  %v5764_v58 = vmax.f32 %v1262_v5, 0.0  ;;  %v5795_v5 = vsub.s32 1, %v5287_v53 }
 0x282   :  { %v1003_v18 = vpop.f32.mrf.mxu0 }
 0x283   :  { %v1263_v38 = vsub.f32 %v1012_v45, %v5708_v51  ;;  %v1004_v2 = vadd.f32 %v5307_v19, %v1003_v18  ;;  %1757 = vmatmul.mubr.bf16.gmra.mxu1 %v1388_v11  ;;  %6537 = vst [vmem:[#allocation46_spill] sm:$0xff] %v5764_v58  ;;  %v5770_v56 = vmax.f32 %v1260_v55, 0.0  ;;  %6542 = vst [vmem:[#allocation50_spill] sm:$0xff] %v5795_v5  ;;  %v2290_v58 = vld [vmem:[#allocation10] sm:$0x3] }
 0x284   :  { %v4014_v13 = vpop.f32.mrf.mxu0  ;;  %1766 = vmatprep.mubr.bf16.mxu1 %v6508_v14 }
 0x285   :  { %v5766_v39 = vmax.f32 %v1263_v38, 0.0  ;;  %v1261_v61 = vsub.f32 %v1004_v2, %v5708_v51  ;;  %v1025_v16 = vadd.f32 %v4014_v13, %v5307_v19  ;;  %6539 = vst [vmem:[#allocation48_spill] sm:$0xff] %v5770_v56 }
 0x286   :  { %v1016_v45 = vpop.f32.mrf.mxu0 }
 0x287   :  { %6538 = vst [vmem:[#allocation47_spill] sm:$0xff] %v5766_v39  ;;  %v5774_v10 = vmax.f32 %v1261_v61, 0.0  ;;  %v1266_v8 = vsub.f32 %v1025_v16, %v5708_v51  ;;  %v1017_v52 = vadd.f32 %v5307_v19, %v1016_v45  ;;  %v6540_v16 = vmov 0  }
 0x288   :  { %v4015_v11 = vpop.f32.mrf.mxu0 }
 0x289   :  { %v1264_v2 = vsub.f32 %v1017_v52, %v5708_v51  ;;  %v1028_v38 = vadd.f32 %v4015_v11, %v5307_v19  ;;  %v5788_v45 = vmax.f32 %v1266_v8, 0.0 }
 0x28a   :  { %v1019_v55 = vpop.f32.mrf.mxu0 }
 0x28b   :  { %v1267_v13 = vsub.f32 %v1028_v38, %v5708_v51  ;;  %v1020_v14 = vadd.f32 %v5307_v19, %v1019_v55  ;;  %1767 = vmatmul.mubr.bf16.gmra.mxu1 %v1389_v1  ;;  %6541 = vst [vmem:[#allocation49_spill] sm:$0xff] %v5788_v45  ;;  %v5797_v38 = vmax.f32 %v1264_v2, 0.0 }
 0x28c   :  { %v4018_v61 = vpop.f32.mrf.mxu0  ;;  %1776 = vmatprep.mubr.bf16.mxu1 %v6540_v16 }
 0x28d   :  { %v5790_v18 = vmax.f32 %v1267_v13, 0.0  ;;  %v1265_v52 = vsub.f32 %v1020_v14, %v5708_v51  ;;  %v1041_v11 = vadd.f32 %v4018_v61, %v5307_v19  ;;  %v2295_v61 = vrot.slane %v2290_v58, %v5298_v60 }
 0x28e   :  { %v1032_v55 = vpop.f32.mrf.mxu0 }
 0x28f   :  { %v5801_v41 = vmax.f32 %v1265_v52, 0.0  ;;  %v1270_v1 = vsub.f32 %v1041_v11, %v5708_v51  ;;  %v1033_v8 = vadd.f32 %v5307_v19, %v1032_v55  ;;  %v6543_v11 = vpack.c.bf16 %v5520_v63, %v5518_v47 }
 0x290   :  { %v4019_v13 = vpop.f32.mrf.mxu0  ;;  %v2299_v55 = vrot.slane %v2290_v58, %v5795_v5 }
 0x291   :  { %v1268_v53 = vsub.f32 %v1033_v8, %v5708_v51  ;;  %v1044_v2 = vadd.f32 %v4019_v13, %v5307_v19  ;;  %v5817_v14 = vmax.f32 %v1270_v1, 0.0 }
 0x292   :  { %v1035_v39 = vpop.f32.mrf.mxu0 }
 0x293   :  { %v1271_v56 = vsub.f32 %v1044_v2, %v5708_v51  ;;  %v1036_v52 = vadd.f32 %v5307_v19, %v1035_v39  ;;  %1777 = vmatmul.mubr.bf16.gmra.mxu1 %v6543_v11  ;;  %v5824_v19 = vmax.f32 %v1268_v53, 0.0 }
 0x294   :  { %v2351_v40 = vpop.f32.mrf.mxu0  ;;  %1786 = vmatprep.mubr.bf16.mxu1 %v6540_v16 }
 0x295   :  { %v5819_v8 = vmax.f32 %v1271_v56, 0.0  ;;  %v1269_v13 = vsub.f32 %v1036_v52, %v5708_v51  ;;  %v5822_v45 = vadd.f32 %v2351_v40, %v2295_v61  ;;  %v6544_v61 = vpack.c.bf16 %v5512_v31, %v5510_v30  ;;  %v1432_v52 = vld [vmem:[#allocation7] sm:$0x3] }
 0x296   :  { %v2353_v2 = vpop.f32.mrf.mxu0 }
 0x297   :  { %v5828_v63 = vmax.f32 %v1269_v13, 0.0  ;;  %v5830_v58 = vadd.f32 %v2353_v2, %v2299_v55  ;;  %v2361_v51 = vsel %vm2360_vm6, %v5822_v45, 0.0  ;;  %v6545_v55 = vpack.c.bf16 %v5547_v23, %v5545_v37 }
 0x298   :  { %v2355_v39 = vpop.f32.mrf.mxu0  ;;  %v5846_v13 = vrot.slane %v1432_v52, %v5298_v60 }
 0x299   :  { %v2362_v40 = vsel %vm2360_vm6, %v5830_v58, 0.0  ;;  %v5850_v39 = vrot.slane %v1432_v52, %v5795_v5 }
 0x29a   :  { %v2356_v1 = vpop.f32.mrf.mxu0  ;;  %v2363_v53 = vadd.f32 %v2362_v40, %v2361_v51 }
 0x29b   :  { %1787 = vmatmul.mubr.bf16.gmra.mxu1 %v6544_v61  ;;  %v6546_v61 = vpack.c.bf16 %v5539_v22, %v5537_v21  ;;  %v6547_v21 = vpack.c.bf16 %v5576_v15, %v5572_v48  ;;  %v6548_v48 = vpack.c.bf16 %v5566_v50, %v5564_v28  ;;  %v6549_v28 = vpack.c.bf16 %v5599_v7, %v5595_v29 }
 0x29c   :  { %2364 = vadd.xlane.f32.xlu0 %v2363_v53  ;;  %1796 = vmatprep.mubr.bf16.mxu1 %v6540_v16  ;;  %v6550_v29 = vpack.c.bf16 %v5591_v20, %v5589_v12  ;;  %v6551_v12 = vpack.c.bf16 %v5626_v3, %v5622_v33  ;;  %v6552_v33 = vpack.c.bf16 %v5618_v43, %v5616_v35 }
 0x29d   :  { %v6553_v43 = vpack.c.bf16 %v5650_v4, %v5646_v62  ;;  %v6554_v62 = vpack.c.bf16 %v5642_v54, %v5640_v0  ;;  %v6555_v0 = vpack.c.bf16 %v5674_v36, %v5670_v34  ;;  %v6556_v34 = vpack.c.bf16 %v5666_v42, %v5664_v24 }
 0x29e   :  { %v6557_v24 = vpack.c.bf16 %v5698_v49, %v5694_v17  ;;  %v6558_v17 = vpack.c.bf16 %v5690_v27, %v5688_v59  ;;  %v6559_v59 = vpack.c.bf16 %v5726_v46, %v5722_v32 }
 0x2a3   :  { %v1558_v11 = vpop.f32.mrf.mxu1  ;;  %1797 = vmatmul.mubr.bf16.gmra.mxu1 %v6545_v55 }
 0x2a4   :  { %1806 = vmatprep.mubr.bf16.mxu1 %v6540_v16  ;;  %v1559_v31 = vadd.f32 %v1558_v11, %v5846_v13 }
 0x2a5   :  { %v1560_v2 = vpop.f32.mrf.mxu1 }
 0x2a6   :  { %v1561_v1 = vadd.f32 %v1560_v2, %v5850_v39 }
 0x2a7   :  { %v1562_v30 = vpop.f32.mrf.mxu1 }
 0x2a8   :  { %v1563_v51 = vadd.f32 %v1562_v30, %v5846_v13 }
 0x2a9   :  { %v1564_v40 = vpop.f32.mrf.mxu1 }
 0x2aa   :  { %v2037_v53 = vmax.f32 %v1559_v31, %v1563_v51  ;;  %v1565_v37 = vadd.f32 %v1564_v40, %v5850_v39 }
 0x2ab   :  { %v1568_v23 = vpop.f32.mrf.mxu1  ;;  %1807 = vmatmul.mubr.bf16.gmra.mxu1 %v6546_v61 }
 0x2ac   :  { %v2058_v55 = vmax.f32 %v1561_v1, %v1565_v37  ;;  %v1569_v52 = vadd.f32 %v1568_v23, %v5846_v13  ;;  %1816 = vmatprep.mubr.bf16.mxu1 %v6540_v16 }
 0x2ad   :  { %v1570_v47 = vpop.f32.mrf.mxu1 }
 0x2ae   :  { %v2038_v11 = vmax.f32 %v2037_v53, %v1569_v52  ;;  %v1571_v30 = vadd.f32 %v1570_v47, %v5850_v39 }
 0x2af   :  { %v1572_v56 = vpop.f32.mrf.mxu1 }
 0x2b0   :  { %v2059_v5 = vmax.f32 %v2058_v55, %v1571_v30  ;;  %v1573_v2 = vadd.f32 %v1572_v56, %v5846_v13 }
 0x2b1   :  { %v1574_v31 = vpop.f32.mrf.mxu1 }
 0x2b2   :  { %v2039_v51 = vmax.f32 %v2038_v11, %v1573_v2  ;;  %v1575_v40 = vadd.f32 %v1574_v31, %v5850_v39 }
 0x2b3   :  { %v1578_v60 = vpop.f32.mrf.mxu1  ;;  %1817 = vmatmul.mubr.bf16.gmra.mxu1 %v6547_v21 }
 0x2b4   :  { %v2060_v22 = vmax.f32 %v2059_v5, %v1575_v40  ;;  %v1579_v1 = vadd.f32 %v1578_v60, %v5846_v13  ;;  %1826 = vmatprep.mubr.bf16.mxu1 %v6540_v16 }
 0x2b5   :  { %v1580_v53 = vpop.f32.mrf.mxu1 }
 0x2b6   :  { %v2040_v47 = vmax.f32 %v2039_v51, %v1579_v1  ;;  %v1581_v37 = vadd.f32 %v1580_v53, %v5850_v39 }
 0x2b7   :  { %v1582_v23 = vpop.f32.mrf.mxu1 }
 0x2b8   :  { %v2061_v56 = vmax.f32 %v2060_v22, %v1581_v37  ;;  %v1583_v61 = vadd.f32 %v1582_v23, %v5846_v13 }
 0x2b9   :  { %v1584_v55 = vpop.f32.mrf.mxu1 }
 0x2ba   :  { %v2041_v52 = vmax.f32 %v2040_v47, %v1583_v61  ;;  %v1585_v11 = vadd.f32 %v1584_v55, %v5850_v39 }
 0x2bb   :  { %v1588_v30 = vpop.f32.mrf.mxu1  ;;  %1827 = vmatmul.mubr.bf16.gmra.mxu1 %v6548_v48 }
 0x2bc   :  { %v2062_v60 = vmax.f32 %v2061_v56, %v1585_v11  ;;  %v1589_v15 = vadd.f32 %v1588_v30, %v5846_v13  ;;  %1836 = vmatprep.mubr.bf16.mxu1 %v6540_v16 }
 0x2bd   :  { %v1590_v5 = vpop.f32.mrf.mxu1 }
 0x2be   :  { %v2042_v2 = vmax.f32 %v2041_v52, %v1589_v15  ;;  %v1591_v31 = vadd.f32 %v1590_v5, %v5850_v39 }
 0x2bf   :  { %v1592_v51 = vpop.f32.mrf.mxu1 }
 0x2c0   :  { %v2063_v40 = vmax.f32 %v2062_v60, %v1591_v31  ;;  %v1593_v21 = vadd.f32 %v1592_v51, %v5846_v13 }
 0x2c1   :  { %v1594_v22 = vpop.f32.mrf.mxu1 }
 0x2c2   :  { %v2043_v1 = vmax.f32 %v2042_v2, %v1593_v21  ;;  %v1595_v53 = vadd.f32 %v1594_v22, %v5850_v39 }
 0x2c3   :  { %v1598_v47 = vpop.f32.mrf.mxu1  ;;  %1837 = vmatmul.mubr.bf16.gmra.mxu1 %v6549_v28 }
 0x2c4   :  { %v2064_v50 = vmax.f32 %v2063_v40, %v1595_v53  ;;  %v1599_v37 = vadd.f32 %v1598_v47, %v5846_v13  ;;  %1846 = vmatprep.mubr.bf16.mxu1 %v6540_v16 }
 0x2c5   :  { %v1600_v23 = vpop.f32.mrf.mxu1 }
 0x2c6   :  { %v2044_v56 = vmax.f32 %v2043_v1, %v1599_v37  ;;  %v1601_v61 = vadd.f32 %v1600_v23, %v5850_v39 }
 0x2c7   :  { %v1602_v55 = vpop.f32.mrf.mxu1 }
 0x2c8   :  { %v2065_v52 = vmax.f32 %v2064_v50, %v1601_v61  ;;  %v1603_v11 = vadd.f32 %v1602_v55, %v5846_v13 }
 0x2c9   :  { %v1604_v30 = vpop.f32.mrf.mxu1 }
 0x2ca   :  { %v2045_v48 = vmax.f32 %v2044_v56, %v1603_v11  ;;  %v1605_v60 = vadd.f32 %v1604_v30, %v5850_v39 }
 0x2cb   :  { %v1608_v15 = vpop.f32.mrf.mxu1  ;;  %1847 = vmatmul.mubr.bf16.gmra.mxu1 %v6550_v29 }
 0x2cc   :  { %v2066_v7 = vmax.f32 %v2065_v52, %v1605_v60  ;;  %v1609_v5 = vadd.f32 %v1608_v15, %v5846_v13  ;;  %1856 = vmatprep.mubr.bf16.mxu1 %v6540_v16 }
 0x2cd   :  { %v1610_v2 = vpop.f32.mrf.mxu1 }
 0x2ce   :  { %v2046_v31 = vmax.f32 %v2045_v48, %v1609_v5  ;;  %v1611_v51 = vadd.f32 %v1610_v2, %v5850_v39 }
 0x2cf   :  { %v1612_v40 = vpop.f32.mrf.mxu1 }
 0x2d0   :  { %v2067_v21 = vmax.f32 %v2066_v7, %v1611_v51  ;;  %v1613_v22 = vadd.f32 %v1612_v40, %v5846_v13 }
 0x2d1   :  { %v1614_v1 = vpop.f32.mrf.mxu1 }
 0x2d2   :  { %v2047_v53 = vmax.f32 %v2046_v31, %v1613_v22  ;;  %v1615_v47 = vadd.f32 %v1614_v1, %v5850_v39 }
 0x2d3   :  { %v1618_v28 = vpop.f32.mrf.mxu1  ;;  %1857 = vmatmul.mubr.bf16.gmra.mxu1 %v6551_v12 }
 0x2d4   :  { %v2068_v20 = vmax.f32 %v2067_v21, %v1615_v47  ;;  %v1619_v50 = vadd.f32 %v1618_v28, %v5846_v13  ;;  %1866 = vmatprep.mubr.bf16.mxu1 %v6540_v16 }
 0x2d5   :  { %v1620_v37 = vpop.f32.mrf.mxu1 }
 0x2d6   :  { %v2048_v23 = vmax.f32 %v2047_v53, %v1619_v50  ;;  %v1621_v56 = vadd.f32 %v1620_v37, %v5850_v39 }
 0x2d7   :  { %v1622_v61 = vpop.f32.mrf.mxu1 }
 0x2d8   :  { %v2069_v55 = vmax.f32 %v2068_v20, %v1621_v56  ;;  %v1623_v52 = vadd.f32 %v1622_v61, %v5846_v13 }
 0x2d9   :  { %v1624_v11 = vpop.f32.mrf.mxu1 }
 0x2da   :  { %v2049_v30 = vmax.f32 %v2048_v23, %v1623_v52  ;;  %v1625_v48 = vadd.f32 %v1624_v11, %v5850_v39 }
 0x2db   :  { %v1628_v60 = vpop.f32.mrf.mxu1  ;;  %1867 = vmatmul.mubr.bf16.gmra.mxu1 %v6552_v33 }
 0x2dc   :  { %v2070_v3 = vmax.f32 %v2069_v55, %v1625_v48  ;;  %v1629_v15 = vadd.f32 %v1628_v60, %v5846_v13  ;;  %1876 = vmatprep.mubr.bf16.mxu1 %v6540_v16 }
 0x2dd   :  { %v1630_v29 = vpop.f32.mrf.mxu1 }
 0x2de   :  { %v2050_v7 = vmax.f32 %v2049_v30, %v1629_v15  ;;  %v1631_v5 = vadd.f32 %v1630_v29, %v5850_v39 }
 0x2df   :  { %v1632_v2 = vpop.f32.mrf.mxu1 }
 0x2e0   :  { %v2071_v31 = vmax.f32 %v2070_v3, %v1631_v5  ;;  %v1633_v51 = vadd.f32 %v1632_v2, %v5846_v13 }
 0x2e1   :  { %v1634_v40 = vpop.f32.mrf.mxu1 }
 0x2e2   :  { %v5911_v21 = vmax.f32 %v2050_v7, %v1633_v51  ;;  %v1635_v22 = vadd.f32 %v1634_v40, %v5850_v39 }
 0x2e3   :  { %v1638_v35 = vpop.f32.mrf.mxu1  ;;  %1877 = vmatmul.mubr.bf16.gmra.mxu1 %v6553_v43 }
 0x2e4   :  { %v5917_v1 = vmax.f32 %v2071_v31, %v1635_v22  ;;  %1886 = vmatprep.mubr.bf16.mxu1 %v6540_v16  ;;  %v1639_v28 = vadd.f32 %v1638_v35, %v5846_v13 }
 0x2e5   :  { %v1640_v53 = vpop.f32.mrf.mxu1 }
 0x2e6   :  { %v1641_v50 = vadd.f32 %v1640_v53, %v5850_v39 }
 0x2e7   :  { %v1642_v47 = vpop.f32.mrf.mxu1 }
 0x2e8   :  { %v1643_v12 = vadd.f32 %v1642_v47, %v5846_v13 }
 0x2e9   :  { %v1644_v20 = vpop.f32.mrf.mxu1 }
 0x2ea   :  { %v2079_v37 = vmax.f32 %v1639_v28, %v1643_v12  ;;  %v1645_v23 = vadd.f32 %v1644_v20, %v5850_v39 }
 0x2eb   :  { %v1648_v56 = vpop.f32.mrf.mxu1  ;;  %1887 = vmatmul.mubr.bf16.gmra.mxu1 %v6554_v62 }
 0x2ec   :  { %v2100_v4 = vmax.f32 %v1641_v50, %v1645_v23  ;;  %v1649_v61 = vadd.f32 %v1648_v56, %v5846_v13  ;;  %1896 = vmatprep.mubr.bf16.mxu1 %v6540_v16 }
 0x2ed   :  { %v1650_v55 = vpop.f32.mrf.mxu1 }
 0x2ee   :  { %v2080_v52 = vmax.f32 %v2079_v37, %v1649_v61  ;;  %v1651_v11 = vadd.f32 %v1650_v55, %v5850_v39 }
 0x2ef   :  { %v1652_v30 = vpop.f32.mrf.mxu1 }
 0x2f0   :  { %v2101_v48 = vmax.f32 %v2100_v4, %v1651_v11  ;;  %v1653_v60 = vadd.f32 %v1652_v30, %v5846_v13 }
 0x2f1   :  { %v1654_v33 = vpop.f32.mrf.mxu1 }
 0x2f2   :  { %v2081_v3 = vmax.f32 %v2080_v52, %v1653_v60  ;;  %v1655_v15 = vadd.f32 %v1654_v33, %v5850_v39 }
 0x2f3   :  { %v1658_v29 = vpop.f32.mrf.mxu1  ;;  %1897 = vmatmul.mubr.bf16.gmra.mxu1 %v6555_v0 }
 0x2f4   :  { %v2102_v54 = vmax.f32 %v2101_v48, %v1655_v15  ;;  %v1659_v7 = vadd.f32 %v1658_v29, %v5846_v13  ;;  %1906 = vmatprep.mubr.bf16.mxu1 %v6540_v16 }
 0x2f5   :  { %v1660_v5 = vpop.f32.mrf.mxu1 }
 0x2f6   :  { %v2082_v2 = vmax.f32 %v2081_v3, %v1659_v7  ;;  %v1661_v31 = vadd.f32 %v1660_v5, %v5850_v39 }
 0x2f7   :  { %v1662_v51 = vpop.f32.mrf.mxu1 }
 0x2f8   :  { %v2103_v40 = vmax.f32 %v2102_v54, %v1661_v31  ;;  %v1663_v22 = vadd.f32 %v1662_v51, %v5846_v13 }
 0x2f9   :  { %v1664_v35 = vpop.f32.mrf.mxu1 }
 0x2fa   :  { %v2083_v43 = vmax.f32 %v2082_v2, %v1663_v22  ;;  %v1665_v53 = vadd.f32 %v1664_v35, %v5850_v39 }
 0x2fb   :  { %v1668_v47 = vpop.f32.mrf.mxu1  ;;  %1907 = vmatmul.mubr.bf16.gmra.mxu1 %v6556_v34 }
 0x2fc   :  { %v2104_v36 = vmax.f32 %v2103_v40, %v1665_v53  ;;  %v1669_v28 = vadd.f32 %v1668_v47, %v5846_v13  ;;  %1916 = vmatprep.mubr.bf16.mxu1 %v6540_v16 }
 0x2fd   :  { %v1670_v12 = vpop.f32.mrf.mxu1 }
 0x2fe   :  { %v2084_v20 = vmax.f32 %v2083_v43, %v1669_v28  ;;  %v1671_v50 = vadd.f32 %v1670_v12, %v5850_v39 }
 0x2ff   :  { %v1672_v37 = vpop.f32.mrf.mxu1 }
 0x300   :  { %v2105_v23 = vmax.f32 %v2104_v36, %v1671_v50  ;;  %v1673_v56 = vadd.f32 %v1672_v37, %v5846_v13  ;;  %v2052_v36 = vrot.slane %v5911_v21, 4  ;;  %v4083_v50 = vld [vmem:[#allocation15 + $0x74] ss:$8 sps:$4 sm:$0xff]   ;;  %v2073_v37 = vrot.slane %v5917_v1, 4 }
 0x301   :  { %v1674_v62 = vpop.f32.mrf.mxu1  ;;  %2616 = vmatprep.subr.bf16.mxu0 %v4083_v50  ;;  %v4093_v50 = vld [vmem:[#allocation15 + $0x30] ss:$8 sps:$4 sm:$0xff]  }
 0x302   :  { %v2085_v4 = vmax.f32 %v2084_v20, %v1673_v56  ;;  %v1675_v61 = vadd.f32 %v1674_v62, %v5850_v39  ;;  %v4081_v56 = vld [vmem:[#allocation15 + $0x70] ss:$8 sps:$4 sm:$0xff]   ;;  %v2053_v32 = vmax.f32 %v5911_v21, %v2052_v36 }
 0x303   :  { %v1678_v55 = vpop.f32.mrf.mxu1  ;;  %1917 = vmatmul.mubr.bf16.gmra.mxu1 %v6557_v24  ;;  %2617 = vmatpush1.bf16.msra.mxu0 %v4081_v56  ;;  %v4086_v24 = vld [vmem:[#allocation15 + $0x64] ss:$8 sps:$4 sm:$0xff]  }
 0x304   :  { %v2106_v42 = vmax.f32 %v2105_v23, %v1675_v61  ;;  %v1679_v52 = vadd.f32 %v1678_v55, %v5846_v13  ;;  %1926 = vmatprep.mubr.bf16.mxu1 %v6540_v16  ;;  %2618 = vmatprep.subr.bf16.mxu0 %v4086_v24  ;;  %v2054_v21 = vrot.slane %v2053_v32, 2 }
 0x305   :  { %v1680_v11 = vpop.f32.mrf.mxu1 }
 0x306   :  { %v2086_v30 = vmax.f32 %v2085_v4, %v1679_v52  ;;  %v1681_v48 = vadd.f32 %v1680_v11, %v5850_v39  ;;  %v6560_v11 = vpack.c.bf16 %v5718_v26, %v5716_v44  ;;  %v2055_v26 = vmax.f32 %v2053_v32, %v2054_v21 }
 0x307   :  { %v1682_v60 = vpop.f32.mrf.mxu1 }
 0x308   :  { %v2107_v33 = vmax.f32 %v2106_v42, %v1681_v48  ;;  %v1683_v3 = vadd.f32 %v1682_v60, %v5846_v13  ;;  %v2074_v42 = vmax.f32 %v5917_v1, %v2073_v37 }
 0x309   :  { %v1684_v15 = vpop.f32.mrf.mxu1 }
 0x30a   :  { %v2087_v29 = vmax.f32 %v2086_v30, %v1683_v3  ;;  %v1685_v0 = vadd.f32 %v1684_v15, %v5850_v39  ;;  %v4084_v30 = vld [vmem:[#allocation15 + $0x60] ss:$8 sps:$4 sm:$0xff]   ;;  %v2075_v1 = vrot.slane %v2074_v42, 2 }
 0x30b   :  { %v1688_v54 = vpop.f32.mrf.mxu1  ;;  %1927 = vmatmul.mubr.bf16.gmra.mxu1 %v6558_v17  ;;  %2619 = vmatpush1.bf16.msra.mxu0 %v4084_v30  ;;  %v6562_v30 = vpack.c.bf16 %v5742_v6, %v5740_v9 }
 0x30c   :  { %v2108_v49 = vmax.f32 %v2107_v33, %v1685_v0  ;;  %v1689_v7 = vadd.f32 %v1688_v54, %v5846_v13  ;;  %1936 = vmatprep.mubr.bf16.mxu1 %v6540_v16  ;;  %v4087_v54 = vld [vmem:[#allocation15 + $0x50] ss:$8 sps:$4 sm:$0xff]  }
 0x30d   :  { %v1690_v5 = vpop.f32.mrf.mxu1 }
 0x30e   :  { %v2088_v2 = vmax.f32 %v2087_v29, %v1689_v7  ;;  %v1691_v31 = vadd.f32 %v1690_v5, %v5850_v39  ;;  %v4089_v29 = vld [vmem:[#allocation15 + $0x54] ss:$8 sps:$4 sm:$0xff]  }
 0x30f   :  { %v1692_v51 = vpop.f32.mrf.mxu1  ;;  %2620 = vmatprep.subr.bf16.mxu0 %v4089_v29 }
 0x310   :  { %v2109_v40 = vmax.f32 %v2108_v49, %v1691_v31  ;;  %v1693_v22 = vadd.f32 %v1692_v51, %v5846_v13  ;;  %2621 = vmatpush1.bf16.msra.mxu0 %v4087_v54  ;;  %v2076_v31 = vmax.f32 %v2074_v42, %v2075_v1  ;;  %v4098_v42 = vld [vmem:[#allocation15 + $0x24] ss:$8 sps:$4 sm:$0xff]  }
 0x311   :  { %v1694_v35 = vpop.f32.mrf.mxu1 }
 0x312   :  { %v2089_v43 = vmax.f32 %v2088_v2, %v1693_v22  ;;  %v1695_v53 = vadd.f32 %v1694_v35, %v5850_v39  ;;  %v4092_v2 = vld [vmem:[#allocation15 + $0x44] ss:$8 sps:$4 sm:$0xff]   ;;  %v4090_v22 = vld [vmem:[#allocation15 + $0x40] ss:$8 sps:$4 sm:$0xff]  }
 0x313   :  { %v1698_v47 = vpop.f32.mrf.mxu1  ;;  %1937 = vmatmul.mubr.bf16.gmra.mxu1 %v6559_v59  ;;  %2622 = vmatprep.subr.bf16.mxu0 %v4092_v2  ;;  %v4099_v2 = vld [vmem:[#allocation15 + $0x10] ss:$8 sps:$4 sm:$0xff]  }
 0x314   :  { %v2110_v27 = vmax.f32 %v2109_v40, %v1695_v53  ;;  %v1699_v34 = vadd.f32 %v1698_v47, %v5846_v13  ;;  %1946 = vmatprep.mubr.bf16.mxu1 %v6540_v16  ;;  %v6561_v40 = vpack.c.bf16 %v5750_v25, %v5746_v57  ;;  %v2056_v53 = vrot.slane %v2055_v26, 1  ;;  %2623 = vmatpush1.bf16.msra.mxu0 %v4090_v22 }
 0x315   :  { %v1700_v28 = vpop.f32.mrf.mxu1 }
 0x316   :  { %v2090_v12 = vmax.f32 %v2089_v43, %v1699_v34  ;;  %v1701_v20 = vadd.f32 %v1700_v28, %v5850_v39  ;;  %v4095_v28 = vld [vmem:[#allocation15 + $0x34] ss:$8 sps:$4 sm:$0xff]   ;;  %v2057_v56 = vmax.f32 %v2055_v26, %v2056_v53 }
 0x317   :  { %v1702_v23 = vpop.f32.mrf.mxu1  ;;  %2624 = vmatprep.subr.bf16.mxu0 %v4095_v28  ;;  %v4101_v26 = vld [vmem:[#allocation15 + $0x14] ss:$8 sps:$4 sm:$0xff]  }
 0x318   :  { %v2111_v62 = vmax.f32 %v2110_v27, %v1701_v20  ;;  %v1703_v46 = vadd.f32 %v1702_v23, %v5846_v13  ;;  %2625 = vmatpush1.bf16.msra.mxu0 %v4093_v50  ;;  %v2771_v29 = vpack.c.bf16 %v2057_v56, %v2057_v56  ;;  %v4102_v50 = vld [vmem:[#allocation15] ss:$8 sps:$4 sm:$0xff]  }
 0x319   :  { %v1704_v4 = vpop.f32.mrf.mxu1  ;;  %2626 = vmatprep.subr.bf16.mxu0 %v4098_v42 }
 0x31a   :  { %v2091_v61 = vmax.f32 %v2090_v12, %v1703_v46  ;;  %v1705_v55 = vadd.f32 %v1704_v4, %v5850_v39  ;;  %v2077_v12 = vrot.slane %v2076_v31, 1 }
 0x31b   :  { %v1708_v52 = vpop.f32.mrf.mxu1  ;;  %1947 = vmatmul.mubr.bf16.gmra.mxu1 %v6560_v11 }
 0x31c   :  { %v2112_v48 = vmax.f32 %v2111_v62, %v1705_v55  ;;  %v1709_v60 = vadd.f32 %v1708_v52, %v5846_v13  ;;  %1956 = vmatprep.mubr.bf16.mxu1 %v6540_v16 }
 0x31d   :  { %v1710_v33 = vpop.f32.mrf.mxu1 }
 0x31e   :  { %v2092_v3 = vmax.f32 %v2091_v61, %v1709_v60  ;;  %v1711_v15 = vadd.f32 %v1710_v33, %v5850_v39  ;;  %v4096_v60 = vld [vmem:[#allocation15 + $0x20] ss:$8 sps:$4 sm:$0xff]  }
 0x31f   :  { %v1712_v0 = vpop.f32.mrf.mxu1  ;;  %2627 = vmatpush1.bf16.msra.mxu0 %v4096_v60  ;;  %v6565_v60 = vld [vmem:[#allocation47_spill] sm:$0xff] }
 0x320   :  { %v2113_v17 = vmax.f32 %v2112_v48, %v1711_v15  ;;  %v1713_v44 = vadd.f32 %v1712_v0, %v5846_v13  ;;  %2628 = vmatprep.subr.bf16.mxu0 %v4101_v26 }
 0x321   :  { %v1714_v49 = vpop.f32.mrf.mxu1 }
 0x322   :  { %v2093_v7 = vmax.f32 %v2092_v3, %v1713_v44  ;;  %v1715_v5 = vadd.f32 %v1714_v49, %v5850_v39 }
 0x323   :  { %v1718_v51 = vpop.f32.mrf.mxu1  ;;  %1957 = vmatmul.mubr.bf16.gmra.mxu1 %v6561_v40  ;;  %2629 = vmatpush1.bf16.msra.mxu0 %v4099_v2  ;;  %v4116_v2 = vld [vmem:[#allocation15 + $0xc4] ss:$8 sps:$4 sm:$0xff]  }
 0x324   :  { %v2094_v35 = vrot.slane %v2093_v7, 4  ;;  %v2114_v43 = vmax.f32 %v2113_v17, %v1715_v5  ;;  %1966 = vmatprep.mubr.bf16.mxu1 %v6540_v16  ;;  %v1719_v62 = vadd.f32 %v1718_v51, %v5846_v13 }
 0x325   :  { %v2365_v47 = vpop.xlane.xlu0 %2364  ;;  %v1720_v59 = vpop.f32.mrf.mxu1 }
 0x326   :  { %v2095_v27 = vmax.f32 %v2093_v7, %v2094_v35  ;;  %v2115_v34 = vrot.slane %v2114_v43, 4  ;;  %v2367_v36 = vmul.f32 0.00390625, %v2365_v47  ;;  %v1721_v46 = vadd.f32 %v1720_v59, %v5850_v39 }
 0x327   :  { %v1722_v20 = vpop.f32.mrf.mxu1  ;;  %v2998_v35 = vunpack.c.l.b16 %v2771_v29 }
 0x328   :  { %v2096_v37 = vrot.slane %v2095_v27, 2  ;;  %v2116_v57 = vmax.f32 %v2114_v43, %v2115_v34  ;;  %v5989_v25 = vsub.f32 %v5822_v45, %v2367_v36  ;;  %v5992_v23 = vsub.f32 %v5830_v58, %v2367_v36  ;;  %v4104_v34 = vld [vmem:[#allocation15 + $0x4] ss:$8 sps:$4 sm:$0xff]  }
 0x329   :  { %v1723_v32 = vadd.f32 %v1722_v20, %v5846_v13  ;;  %v1724_v4 = vpop.f32.mrf.mxu1  ;;  %v2078_v58 = vmax.f32 %v2076_v31, %v2077_v12  ;;  %v6563_v12 = vld [vmem:[#allocation48_spill] sm:$0xff]  ;;  %2630 = vmatprep.subr.bf16.mxu0 %v4104_v34  ;;  %v4117_v34 = vld [vmem:[#allocation15 + $0xb0] ss:$8 sps:$4 sm:$0xff]  }
 0x32a   :  { %v2097_v61 = vmax.f32 %v2095_v27, %v2096_v37  ;;  %v2117_v55 = vrot.slane %v2116_v57, 2  ;;  %v1725_v24 = vadd.f32 %v1724_v4, %v5850_v39  ;;  %v2370_v45 = vmul.f32 %v5989_v25, %v5989_v25  ;;  %2631 = vmatpush1.bf16.msra.mxu0 %v4102_v50 }
 0x32b   :  { %v2121_v52 = vmax.f32 %v1719_v62, %v1723_v32  ;;  %v1728_v11 = vpop.f32.mrf.mxu1  ;;  %1967 = vmatmul.mubr.bf16.gmra.mxu1 %v6562_v30  ;;  %v2371_v48 = vmul.f32 %v5992_v23, %v5992_v23  ;;  %v2772_v49 = vpack.c.bf16 %v2078_v58, %v2078_v58  ;;  %v6564_v20 = vpack.c.bf16 %v5774_v10, %v6563_v12  ;;  %v4110_v30 = vld [vmem:[#allocation15 + $0xe4] ss:$8 sps:$4 sm:$0xff]  }
 0x32c   :  { %v2098_v21 = vrot.slane %v2097_v61, 1  ;;  %v2118_v33 = vmax.f32 %v2116_v57, %v2117_v55  ;;  %v2142_v3 = vmax.f32 %v1721_v46, %v1725_v24  ;;  %v1729_v15 = vadd.f32 %v1728_v11, %v5846_v13  ;;  %1976 = vmatprep.mubr.bf16.mxu1 %v6540_v16  ;;  %v4105_v24 = vld [vmem:[#allocation15 + $0xf0] ss:$8 sps:$4 sm:$0xff]  }
 0x32d   :  { %v1730_v1 = vpop.f32.mrf.mxu1  ;;  %v2372_v0 = vsel %vm2360_vm6, %v2370_v45, 0.0  ;;  %v2373_v54 = vsel %vm2360_vm6, %v2371_v48, 0.0  ;;  %v2999_v36 = vunpack.c.l.b16 %v2772_v49 }
 0x32e   :  { %v2099_v9 = vmax.f32 %v2097_v61, %v2098_v21  ;;  %v2119_v6 = vrot.slane %v2118_v33, 1  ;;  %v2122_v17 = vmax.f32 %v2121_v52, %v1729_v15  ;;  %v1731_v44 = vadd.f32 %v1730_v1, %v5850_v39  ;;  %v4107_v61 = vld [vmem:[#allocation15 + $0xf4] ss:$8 sps:$4 sm:$0xff]   ;;  %v6566_v21 = vld [vmem:[#allocation46_spill] sm:$0xff] }
 0x32f   :  { %v2374_v7 = vadd.f32 %v2373_v54, %v2372_v0  ;;  %v1732_v5 = vpop.f32.mrf.mxu1  ;;  %2632 = vmatprep.subr.bf16.mxu0 %v4107_v61 }
 0x330   :  { %v2773_v31 = vpack.c.bf16 %v2099_v9, %v2099_v9  ;;  %v2120_v51 = vmax.f32 %v2118_v33, %v2119_v6  ;;  %v2143_v40 = vmax.f32 %v2142_v3, %v1731_v44  ;;  %v1733_v22 = vadd.f32 %v1732_v5, %v5846_v13  ;;  %2633 = vmatpush2.bf16.msra.mxu0 %v4105_v24  ;;  %v4108_v3 = vld [vmem:[#allocation15 + $0xe0] ss:$8 sps:$4 sm:$0xff]   ;;  %v4113_v9 = vld [vmem:[#allocation15 + $0xd4] ss:$8 sps:$4 sm:$0xff]  }
 0x331   :  { %2375 = vadd.xlane.f32.xlu0 %v2374_v7  ;;  %v1734_v43 = vpop.f32.mrf.mxu1  ;;  %v6567_v33 = vpack.c.bf16 %v6565_v60, %v6566_v21  ;;  %2634 = vmatprep.subr.bf16.mxu0 %v4110_v30  ;;  %v4125_v24 = vld [vmem:[#allocation15 + $0x94] ss:$8 sps:$4 sm:$0xff]   ;;  %v6571_v21 = vpack.c.bf16 %v5828_v63, %v5824_v19 }
 0x332   :  { %v3000_v53 = vunpack.c.l.b16 %v2773_v31  ;;  %v2774_v47 = vpack.c.bf16 %v2120_v51, %v2120_v51  ;;  %v2123_v59 = vmax.f32 %v2122_v17, %v1733_v22  ;;  %v1735_v27 = vadd.f32 %v1734_v43, %v5850_v39  ;;  %v4111_v17 = vld [vmem:[#allocation15 + $0xd0] ss:$8 sps:$4 sm:$0xff]  }
 0x333   :  { %v1738_v28 = vpop.f32.mrf.mxu1  ;;  %1977 = vmatmul.mubr.bf16.gmra.mxu1 %v6564_v20  ;;  %v6568_v51 = vpack.c.bf16 %v5801_v41, %v5797_v38  ;;  %v4122_v20 = vld [vmem:[#allocation15 + $0xa4] ss:$8 sps:$4 sm:$0xff]  }
 0x334   :  { %v6016_v37 = vsel %vm3010_vm7, %v3000_v53, %v2998_v35  ;;  %v3001_v57 = vunpack.c.l.b16 %v2774_v47  ;;  %v2144_v56 = vmax.f32 %v2143_v40, %v1735_v27  ;;  %v1739_v62 = vadd.f32 %v1738_v28, %v5846_v13  ;;  %1986 = vmatprep.mubr.bf16.mxu1 %v6540_v16  ;;  %2635 = vmatpush2.bf16.msra.mxu0 %v4108_v3  ;;  %v4114_v40 = vld [vmem:[#allocation15 + $0xc0] ss:$8 sps:$4 sm:$0xff]  }
 0x335   :  { %v1740_v46 = vpop.f32.mrf.mxu1  ;;  %2636 = vmatprep.subr.bf16.mxu0 %v4113_v9 }
 0x336   :  { %v2124_v32 = vmax.f32 %v2123_v59, %v1739_v62  ;;  %v1741_v4 = vadd.f32 %v1740_v46, %v5850_v39  ;;  %v6022_v10 = vsel %vm3010_vm7, %v3001_v57, %v2999_v36  ;;  %v4119_v59 = vld [vmem:[#allocation15 + $0xb4] ss:$8 sps:$4 sm:$0xff]   ;;  %v6569_v57 = vld [vmem:[#allocation49_spill] sm:$0xff] }
 0x337   :  { %v1742_v55 = vpop.f32.mrf.mxu1  ;;  %v4120_v62 = vld [vmem:[#allocation15 + $0xa0] ss:$8 sps:$4 sm:$0xff]  }
 0x338   :  { %v2145_v45 = vmax.f32 %v2144_v56, %v1741_v4  ;;  %v1743_v42 = vadd.f32 %v1742_v55, %v5846_v13  ;;  %2637 = vmatpush2.bf16.msra.mxu0 %v4111_v17  ;;  %v6570_v56 = vpack.c.bf16 %v5790_v18, %v6569_v57 }
 0x339   :  { %v1744_v58 = vpop.f32.mrf.mxu1  ;;  %2638 = vmatprep.subr.bf16.mxu0 %v4116_v2 }
 0x33a   :  { %v2125_v52 = vmax.f32 %v2124_v32, %v1743_v42  ;;  %v1745_v11 = vadd.f32 %v1744_v58, %v5850_v39  ;;  %v4123_v42 = vld [vmem:[#allocation15 + $0x90] ss:$8 sps:$4 sm:$0xff]  }
 0x33b   :  { %v1748_v48 = vpop.f32.mrf.mxu1  ;;  %1987 = vmatmul.mubr.bf16.gmra.mxu1 %v6567_v33  ;;  %v4126_v33 = vld [vmem:[#allocation15 + $0x80] ss:$8 sps:$4 sm:$0xff]  }
 0x33c   :  { %v2146_v15 = vmax.f32 %v2145_v45, %v1745_v11  ;;  %v1749_v29 = vadd.f32 %v1748_v48, %v5846_v13  ;;  %1996 = vmatprep.mubr.bf16.mxu1 %v6540_v16  ;;  %2639 = vmatpush2.bf16.msra.mxu0 %v4114_v40  ;;  %v4128_v48 = vld [vmem:[#allocation15 + $0x84] ss:$8 sps:$4 sm:$0xff]  }
 0x33d   :  { %v1750_v1 = vpop.f32.mrf.mxu1  ;;  %2640 = vmatprep.subr.bf16.mxu0 %v4119_v59 }
 0x33e   :  { %v2126_v0 = vmax.f32 %v2125_v52, %v1749_v29  ;;  %v1751_v54 = vadd.f32 %v1750_v1, %v5850_v39 }
 0x33f   :  { %v1752_v6 = vpop.f32.mrf.mxu1 }
 0x340   :  { %v2147_v44 = vmax.f32 %v2146_v15, %v1751_v54  ;;  %v1753_v26 = vadd.f32 %v1752_v6, %v5846_v13  ;;  %2641 = vmatpush2.bf16.msra.mxu0 %v4117_v34 }
 0x341   :  { %v1754_v49 = vpop.f32.mrf.mxu1  ;;  %2642 = vmatprep.subr.bf16.mxu0 %v4122_v20 }
 0x342   :  { %v2127_v7 = vmax.f32 %v2126_v0, %v1753_v26  ;;  %v1755_v5 = vadd.f32 %v1754_v49, %v5850_v39  ;;  %v6572_v26 = vpack.c.bf16 %v5819_v8, %v5817_v14 }
 0x343   :  { %v1758_v31 = vpop.f32.mrf.mxu1  ;;  %1997 = vmatmul.mubr.bf16.gmra.mxu1 %v6568_v51 }
 0x344   :  { %v2148_v22 = vmax.f32 %v2147_v44, %v1755_v5  ;;  %v1759_v35 = vadd.f32 %v1758_v31, %v5846_v13  ;;  %2006 = vmatprep.mubr.bf16.mxu1 %v6540_v16  ;;  %2643 = vmatpush2.bf16.msra.mxu0 %v4120_v62 }
 0x345   :  { %v1760_v43 = vpop.f32.mrf.mxu1  ;;  %2644 = vmatprep.subr.bf16.mxu0 %v4125_v24 }
 0x346   :  { %v2128_v53 = vmax.f32 %v2127_v7, %v1759_v35  ;;  %v1761_v47 = vadd.f32 %v1760_v43, %v5850_v39 }
 0x347   :  { %v1762_v27 = vpop.f32.mrf.mxu1 }
 0x348   :  { %v2149_v36 = vmax.f32 %v2148_v22, %v1761_v47  ;;  %v1763_v28 = vadd.f32 %v1762_v27, %v5846_v13  ;;  %2645 = vmatpush2.bf16.msra.mxu0 %v4123_v42 }
 0x349   :  { %v1764_v38 = vpop.f32.mrf.mxu1  ;;  %2646 = vmatprep.subr.bf16.mxu0 %v4128_v48 }
 0x34a   :  { %v2129_v41 = vmax.f32 %v2128_v53, %v1763_v28  ;;  %v1765_v12 = vadd.f32 %v1764_v38, %v5850_v39 }
 0x34b   :  { %v1768_v50 = vpop.f32.mrf.mxu1  ;;  %2007 = vmatmul.mubr.bf16.gmra.mxu1 %v6570_v56 }
 0x34c   :  { %v1769_v46 = vadd.f32 %v1768_v50, %v5846_v13  ;;  %2016 = vmatprep.mubr.bf16.mxu1 %v6540_v16  ;;  %v2150_v4 = vmax.f32 %v2149_v36, %v1765_v12  ;;  %2647 = vmatpush2.bf16.msra.mxu0 %v4126_v33 }
 0x34d   :  { %v1770_v32 = vpop.f32.mrf.mxu1 }
 0x34e   :  { %v2130_v61 = vmax.f32 %v2129_v41, %v1769_v46  ;;  %v1771_v55 = vadd.f32 %v1770_v32, %v5850_v39 }
 0x34f   :  { %v1772_v45 = vpop.f32.mrf.mxu1 }
 0x350   :  { %v2151_v58 = vmax.f32 %v2150_v4, %v1771_v55  ;;  %v1773_v52 = vadd.f32 %v1772_v45, %v5846_v13 }
 0x351   :  { %v1774_v18 = vpop.f32.mrf.mxu1 }
 0x352   :  { %v2131_v11 = vmax.f32 %v2130_v61, %v1773_v52  ;;  %v1775_v30 = vadd.f32 %v1774_v18, %v5850_v39 }
 0x353   :  { %v1778_v60 = vpop.f32.mrf.mxu1  ;;  %2017 = vmatmul.mubr.bf16.gmra.mxu1 %v6571_v21 }
 0x354   :  { %v2152_v3 = vmax.f32 %v2151_v58, %v1775_v30  ;;  %v1779_v15 = vadd.f32 %v1778_v60, %v5846_v13  ;;  %2026 = vmatprep.mubr.bf16.mxu1 %v6540_v16 }
 0x355   :  { %v1780_v29 = vpop.f32.mrf.mxu1 }
 0x356   :  { %v2132_v1 = vmax.f32 %v2131_v11, %v1779_v15  ;;  %v1781_v0 = vadd.f32 %v1780_v29, %v5850_v39 }
 0x357   :  { %v1782_v54 = vpop.f32.mrf.mxu1 }
 0x358   :  { %v2153_v9 = vmax.f32 %v2152_v3, %v1781_v0  ;;  %v1783_v6 = vadd.f32 %v1782_v54, %v5846_v13 }
 0x359   :  { %v1784_v17 = vpop.f32.mrf.mxu1 }
 0x35a   :  { %v2133_v44 = vmax.f32 %v2132_v1, %v1783_v6  ;;  %v1785_v19 = vadd.f32 %v1784_v17, %v5850_v39 }
 0x35b   :  { %v1788_v63 = vpop.f32.mrf.mxu1  ;;  %2027 = vmatmul.mubr.bf16.gmra.mxu1 %v6572_v26 }
 0x35c   :  { %v2154_v49 = vmax.f32 %v2153_v9, %v1785_v19  ;;  %v1789_v7 = vadd.f32 %v1788_v63, %v5846_v13 }
 0x35d   :  { %v1790_v5 = vpop.f32.mrf.mxu1 }
 0x35e   :  { %v2134_v2 = vmax.f32 %v2133_v44, %v1789_v7  ;;  %v1791_v31 = vadd.f32 %v1790_v5, %v5850_v39 }
 0x35f   :  { %v1792_v51 = vpop.f32.mrf.mxu1 }
 0x360   :  { %v2155_v40 = vmax.f32 %v2154_v49, %v1791_v31  ;;  %v1793_v22 = vadd.f32 %v1792_v51, %v5846_v13 }
 0x361   :  { %v1794_v35 = vpop.f32.mrf.mxu1 }
 0x362   :  { %v2135_v43 = vmax.f32 %v2134_v2, %v1793_v22  ;;  %v1795_v53 = vadd.f32 %v1794_v35, %v5850_v39 }
 0x363   :  { %v1798_v47 = vpop.f32.mrf.mxu1 }
 0x364   :  { %v2136_v59 = vrot.slane %v2135_v43, 4  ;;  %v2156_v27 = vmax.f32 %v2155_v40, %v1795_v53  ;;  %v1799_v41 = vadd.f32 %v1798_v47, %v5846_v13 }
 0x365   :  { %v1800_v14 = vpop.f32.mrf.mxu1 }
 0x366   :  { %v2137_v8 = vmax.f32 %v2135_v43, %v2136_v59  ;;  %v2157_v34 = vrot.slane %v2156_v27, 4  ;;  %v1801_v20 = vadd.f32 %v1800_v14, %v5850_v39 }
 0x367   :  { %v1802_v36 = vpop.f32.mrf.mxu1 }
 0x368   :  { %v2138_v28 = vrot.slane %v2137_v8, 2  ;;  %v2158_v38 = vmax.f32 %v2156_v27, %v2157_v34  ;;  %v1803_v12 = vadd.f32 %v1802_v36, %v5846_v13 }
 0x369   :  { %v1804_v50 = vpop.f32.mrf.mxu1 }
 0x36a   :  { %v2139_v57 = vmax.f32 %v2137_v8, %v2138_v28  ;;  %v2159_v56 = vrot.slane %v2158_v38, 2  ;;  %v2163_v62 = vmax.f32 %v1799_v41, %v1803_v12  ;;  %v1805_v46 = vadd.f32 %v1804_v50, %v5850_v39 }
 0x36b   :  { %v1808_v32 = vpop.f32.mrf.mxu1 }
 0x36c   :  { %v2140_v4 = vrot.slane %v2139_v57, 1  ;;  %v2160_v61 = vmax.f32 %v2158_v38, %v2159_v56  ;;  %v2184_v55 = vmax.f32 %v1801_v20, %v1805_v46  ;;  %v1809_v24 = vadd.f32 %v1808_v32, %v5846_v13 }
 0x36d   :  { %v1810_v45 = vpop.f32.mrf.mxu1 }
 0x36e   :  { %v2141_v42 = vmax.f32 %v2139_v57, %v2140_v4  ;;  %v2161_v58 = vrot.slane %v2160_v61, 1  ;;  %v2164_v52 = vmax.f32 %v2163_v62, %v1809_v24  ;;  %v1811_v18 = vadd.f32 %v1810_v45, %v5850_v39 }
 0x36f   :  { %v1812_v11 = vpop.f32.mrf.mxu1 }
 0x370   :  { %v2775_v30 = vpack.c.bf16 %v2141_v42, %v2141_v42  ;;  %v2162_v48 = vmax.f32 %v2160_v61, %v2161_v58  ;;  %v2185_v60 = vmax.f32 %v2184_v55, %v1811_v18  ;;  %v1813_v21 = vadd.f32 %v1812_v11, %v5846_v13 }
 0x371   :  { %v1814_v33 = vpop.f32.mrf.mxu1 }
 0x372   :  { %v3002_v3 = vunpack.c.l.b16 %v2775_v30  ;;  %v2776_v15 = vpack.c.bf16 %v2162_v48, %v2162_v48  ;;  %v2165_v29 = vmax.f32 %v2164_v52, %v1813_v21  ;;  %v1815_v1 = vadd.f32 %v1814_v33, %v5850_v39 }
 0x373   :  { %v1818_v0 = vpop.f32.mrf.mxu1 }
 0x374   :  { %v3003_v54 = vunpack.c.l.b16 %v2776_v15  ;;  %v2186_v9 = vmax.f32 %v2185_v60, %v1815_v1  ;;  %v1819_v6 = vadd.f32 %v1818_v0, %v5846_v13  ;;  %v6075_v17 = vsel %vm3012_vm8, %v3002_v3, %v6016_v37 }
 0x375   :  { %v1820_v44 = vpop.f32.mrf.mxu1 }
 0x376   :  { %v2166_v19 = vmax.f32 %v2165_v29, %v1819_v6  ;;  %v1821_v63 = vadd.f32 %v1820_v44, %v5850_v39  ;;  %v6079_v26 = vsel %vm3012_vm8, %v3003_v54, %v6022_v10 }
 0x377   :  { %v1822_v49 = vpop.f32.mrf.mxu1 }
 0x378   :  { %v2187_v7 = vmax.f32 %v2186_v9, %v1821_v63  ;;  %v1823_v5 = vadd.f32 %v1822_v49, %v5846_v13 }
 0x379   :  { %v1824_v2 = vpop.f32.mrf.mxu1 }
 0x37a   :  { %v2167_v31 = vmax.f32 %v2166_v19, %v1823_v5  ;;  %v1825_v51 = vadd.f32 %v1824_v2, %v5850_v39 }
 0x37b   :  { %v1828_v40 = vpop.f32.mrf.mxu1 }
 0x37c   :  { %v2188_v22 = vmax.f32 %v2187_v7, %v1825_v51  ;;  %v1829_v37 = vadd.f32 %v1828_v40, %v5846_v13 }
 0x37d   :  { %v1830_v35 = vpop.f32.mrf.mxu1 }
 0x37e   :  { %v2168_v43 = vmax.f32 %v2167_v31, %v1829_v37  ;;  %v1831_v53 = vadd.f32 %v1830_v35, %v5850_v39 }
 0x37f   :  { %v1832_v47 = vpop.f32.mrf.mxu1 }
 0x380   :  { %v2189_v59 = vmax.f32 %v2188_v22, %v1831_v53  ;;  %v1833_v10 = vadd.f32 %v1832_v47, %v5846_v13 }
 0x381   :  { %v1834_v27 = vpop.f32.mrf.mxu1 }
 0x382   :  { %v2169_v14 = vmax.f32 %v2168_v43, %v1833_v10  ;;  %v1835_v8 = vadd.f32 %v1834_v27, %v5850_v39 }
 0x383   :  { %v1838_v34 = vpop.f32.mrf.mxu1 }
 0x384   :  { %v2190_v36 = vmax.f32 %v2189_v59, %v1835_v8  ;;  %v1839_v28 = vadd.f32 %v1838_v34, %v5846_v13 }
 0x385   :  { %v1840_v38 = vpop.f32.mrf.mxu1 }
 0x386   :  { %v2170_v41 = vmax.f32 %v2169_v14, %v1839_v28  ;;  %v1841_v12 = vadd.f32 %v1840_v38, %v5850_v39 }
 0x387   :  { %v1842_v20 = vpop.f32.mrf.mxu1 }
 0x388   :  { %v2191_v50 = vmax.f32 %v2190_v36, %v1841_v12  ;;  %v1843_v57 = vadd.f32 %v1842_v20, %v5846_v13 }
 0x389   :  { %v1844_v56 = vpop.f32.mrf.mxu1 }
 0x38a   :  { %v2171_v62 = vmax.f32 %v2170_v41, %v1843_v57  ;;  %v1845_v46 = vadd.f32 %v1844_v56, %v5850_v39 }
 0x38b   :  { %v1848_v32 = vpop.f32.mrf.mxu1 }
 0x38c   :  { %v2192_v4 = vmax.f32 %v2191_v50, %v1845_v46  ;;  %v1849_v61 = vadd.f32 %v1848_v32, %v5846_v13 }
 0x38d   :  { %v1850_v55 = vpop.f32.mrf.mxu1 }
 0x38e   :  { %v2172_v24 = vmax.f32 %v2171_v62, %v1849_v61  ;;  %v1851_v45 = vadd.f32 %v1850_v55, %v5850_v39 }
 0x38f   :  { %v1852_v42 = vpop.f32.mrf.mxu1 }
 0x390   :  { %v2193_v58 = vmax.f32 %v2192_v4, %v1851_v45  ;;  %v1853_v52 = vadd.f32 %v1852_v42, %v5846_v13 }
 0x391   :  { %v1854_v18 = vpop.f32.mrf.mxu1 }
 0x392   :  { %v2173_v11 = vmax.f32 %v2172_v24, %v1853_v52  ;;  %v1855_v30 = vadd.f32 %v1854_v18, %v5850_v39 }
 0x393   :  { %v1858_v48 = vpop.f32.mrf.mxu1 }
 0x394   :  { %v2194_v60 = vmax.f32 %v2193_v58, %v1855_v30  ;;  %v1859_v21 = vadd.f32 %v1858_v48, %v5846_v13 }
 0x395   :  { %v1860_v33 = vpop.f32.mrf.mxu1 }
 0x396   :  { %v2174_v3 = vmax.f32 %v2173_v11, %v1859_v21  ;;  %v1861_v15 = vadd.f32 %v1860_v33, %v5850_v39 }
 0x397   :  { %v1862_v29 = vpop.f32.mrf.mxu1 }
 0x398   :  { %v2195_v1 = vmax.f32 %v2194_v60, %v1861_v15  ;;  %v1863_v0 = vadd.f32 %v1862_v29, %v5846_v13 }
 0x399   :  { %v1864_v54 = vpop.f32.mrf.mxu1 }
 0x39a   :  { %v2175_v9 = vmax.f32 %v2174_v3, %v1863_v0  ;;  %v1865_v6 = vadd.f32 %v1864_v54, %v5850_v39 }
 0x39b   :  { %v1868_v44 = vpop.f32.mrf.mxu1 }
 0x39c   :  { %v2196_v19 = vmax.f32 %v2195_v1, %v1865_v6  ;;  %v1869_v63 = vadd.f32 %v1868_v44, %v5846_v13 }
 0x39d   :  { %v1870_v49 = vpop.f32.mrf.mxu1 }
 0x39e   :  { %v2176_v7 = vmax.f32 %v2175_v9, %v1869_v63  ;;  %v1871_v5 = vadd.f32 %v1870_v49, %v5850_v39 }
 0x39f   :  { %v1872_v2 = vpop.f32.mrf.mxu1 }
 0x3a0   :  { %v2197_v31 = vmax.f32 %v2196_v19, %v1871_v5  ;;  %v1873_v51 = vadd.f32 %v1872_v2, %v5846_v13 }
 0x3a1   :  { %v1874_v40 = vpop.f32.mrf.mxu1 }
 0x3a2   :  { %v2177_v22 = vmax.f32 %v2176_v7, %v1873_v51  ;;  %v1875_v37 = vadd.f32 %v1874_v40, %v5850_v39 }
 0x3a3   :  { %v1878_v35 = vpop.f32.mrf.mxu1 }
 0x3a4   :  { %v2178_v43 = vrot.slane %v2177_v22, 4  ;;  %v2198_v53 = vmax.f32 %v2197_v31, %v1875_v37  ;;  %v1879_v34 = vadd.f32 %v1878_v35, %v5846_v13 }
 0x3a5   :  { %v1880_v47 = vpop.f32.mrf.mxu1 }
 0x3a6   :  { %v2179_v59 = vmax.f32 %v2177_v22, %v2178_v43  ;;  %v2199_v10 = vrot.slane %v2198_v53, 4  ;;  %v1881_v28 = vadd.f32 %v1880_v47, %v5850_v39 }
 0x3a7   :  { %v1882_v27 = vpop.f32.mrf.mxu1 }
 0x3a8   :  { %v2180_v14 = vrot.slane %v2179_v59, 2  ;;  %v2200_v8 = vmax.f32 %v2198_v53, %v2199_v10  ;;  %v1883_v36 = vadd.f32 %v1882_v27, %v5846_v13 }
 0x3a9   :  { %v1884_v38 = vpop.f32.mrf.mxu1 }
 0x3aa   :  { %v2181_v41 = vmax.f32 %v2179_v59, %v2180_v14  ;;  %v2201_v12 = vrot.slane %v2200_v8, 2  ;;  %v2205_v20 = vmax.f32 %v1879_v34, %v1883_v36  ;;  %v1885_v50 = vadd.f32 %v1884_v38, %v5850_v39 }
 0x3ab   :  { %v1888_v57 = vpop.f32.mrf.mxu1 }
 0x3ac   :  { %v2182_v56 = vrot.slane %v2181_v41, 1  ;;  %v2202_v62 = vmax.f32 %v2200_v8, %v2201_v12  ;;  %v2226_v46 = vmax.f32 %v1881_v28, %v1885_v50  ;;  %v1889_v32 = vadd.f32 %v1888_v57, %v5846_v13  ;;  %v2358_v57 = vld [vmem:[#allocation12] sm:$0x3] }
 0x3ad   :  { %v1890_v4 = vpop.f32.mrf.mxu1 }
 0x3ae   :  { %v2183_v61 = vmax.f32 %v2181_v41, %v2182_v56  ;;  %v2203_v55 = vrot.slane %v2202_v62, 1  ;;  %v2206_v24 = vmax.f32 %v2205_v20, %v1889_v32  ;;  %v1891_v45 = vadd.f32 %v1890_v4, %v5850_v39  ;;  %v2359_v32 = vld [vmem:[#allocation13] sm:$0x3] }
 0x3af   :  { %v1892_v42 = vpop.f32.mrf.mxu1 }
 0x3b0   :  { %v2777_v58 = vpack.c.bf16 %v2183_v61, %v2183_v61  ;;  %v2204_v52 = vmax.f32 %v2202_v62, %v2203_v55  ;;  %v2227_v18 = vmax.f32 %v2226_v46, %v1891_v45  ;;  %v1893_v11 = vadd.f32 %v1892_v42, %v5846_v13  ;;  %v6573_v61 = vld [vmem:[#allocation45_spill] sm:$0xff] }
 0x3b1   :  { %v1894_v30 = vpop.f32.mrf.mxu1  ;;  %v2386_v55 = vrot.slane %v2358_v57, %v6573_v61 }
 0x3b2   :  { %v3004_v48 = vunpack.c.l.b16 %v2777_v58  ;;  %v2778_v60 = vpack.c.bf16 %v2204_v52, %v2204_v52  ;;  %v2207_v21 = vmax.f32 %v2206_v24, %v1893_v11  ;;  %v1895_v33 = vadd.f32 %v1894_v30, %v5850_v39  ;;  %v6574_v24 = vld [vmem:[#allocation50_spill] sm:$0xff] }
 0x3b3   :  { %v1898_v3 = vpop.f32.mrf.mxu1  ;;  %v2390_v45 = vrot.slane %v2358_v57, %v6574_v24  ;;  %v2399_v30 = vrot.slane %v2359_v32, %v6573_v61 }
 0x3b4   :  { %v3005_v15 = vunpack.c.l.b16 %v2778_v60  ;;  %v2228_v29 = vmax.f32 %v2227_v18, %v1895_v33  ;;  %v1899_v1 = vadd.f32 %v1898_v3, %v5846_v13  ;;  %v6113_v0 = vsel %vm3014_vm9, %v3004_v48, %v6075_v17 }
 0x3b5   :  { %v1900_v54 = vpop.f32.mrf.mxu1  ;;  %v2403_v48 = vrot.slane %v2359_v32, %v6574_v24 }
 0x3b6   :  { %v2208_v9 = vmax.f32 %v2207_v21, %v1899_v1  ;;  %v1901_v6 = vadd.f32 %v1900_v54, %v5850_v39  ;;  %v6117_v44 = vsel %vm3014_vm9, %v3005_v15, %v6079_v26 }
 0x3b7   :  { %v1902_v19 = vpop.f32.mrf.mxu1 }
 0x3b8   :  { %v2229_v63 = vmax.f32 %v2228_v29, %v1901_v6  ;;  %v1903_v49 = vadd.f32 %v1902_v19, %v5846_v13 }
 0x3b9   :  { %v1904_v7 = vpop.f32.mrf.mxu1 }
 0x3ba   :  { %v2209_v5 = vmax.f32 %v2208_v9, %v1903_v49  ;;  %v2376_v2 = vpop.xlane.xlu0 %2375  ;;  %v1905_v31 = vadd.f32 %v1904_v7, %v5850_v39 }
 0x3bb   :  { %v2377_v51 = vmul.f32 0.00390625, %v2376_v2  ;;  %v1908_v40 = vpop.f32.mrf.mxu1 }
 0x3bc   :  { %v2230_v17 = vmax.f32 %v2229_v63, %v1905_v31  ;;  %v1909_v22 = vadd.f32 %v1908_v40, %v5846_v13 }
 0x3bd   :  { %v2378_v37 = vadd.f32 1e-05, %v2377_v51  ;;  %v1910_v35 = vpop.f32.mrf.mxu1 }
 0x3be   :  { %v2210_v43 = vmax.f32 %v2209_v5, %v1909_v22  ;;  %v1911_v26 = vadd.f32 %v1910_v35, %v5850_v39 }
 0x3bf   :  { %4265 = vrsqrt.f32 %v2378_v37  ;;  %v1912_v53 = vpop.f32.mrf.mxu1 }
 0x3c0   :  { %v2231_v47 = vmax.f32 %v2230_v17, %v1911_v26  ;;  %v1913_v59 = vadd.f32 %v1912_v53, %v5846_v13 }
 0x3c1   :  { %v1914_v10 = vpop.f32.mrf.mxu1 }
 0x3c2   :  { %v2211_v27 = vmax.f32 %v2210_v43, %v1913_v59  ;;  %v1915_v14 = vadd.f32 %v1914_v10, %v5850_v39 }
 0x3c3   :  { %v1918_v8 = vpop.f32.mrf.mxu1 }
 0x3c4   :  { %v2232_v34 = vmax.f32 %v2231_v47, %v1915_v14  ;;  %v1919_v36 = vadd.f32 %v1918_v8, %v5846_v13 }
 0x3c5   :  { %v1920_v28 = vpop.f32.mrf.mxu1 }
 0x3c6   :  { %v2212_v38 = vmax.f32 %v2211_v27, %v1919_v36  ;;  %v1921_v41 = vadd.f32 %v1920_v28, %v5850_v39 }
 0x3c7   :  { %v1922_v12 = vpop.f32.mrf.mxu1 }
 0x3c8   :  { %v2233_v20 = vmax.f32 %v2232_v34, %v1921_v41  ;;  %v1923_v50 = vadd.f32 %v1922_v12, %v5846_v13 }
 0x3c9   :  { %v1924_v56 = vpop.f32.mrf.mxu1 }
 0x3ca   :  { %v2213_v62 = vmax.f32 %v2212_v38, %v1923_v50  ;;  %v1925_v46 = vadd.f32 %v1924_v56, %v5850_v39 }
 0x3cb   :  { %v1928_v4 = vpop.f32.mrf.mxu1 }
 0x3cc   :  { %v4266_v42 = vpop.eup %4265  ;;  %v2234_v58 = vmax.f32 %v2233_v20, %v1925_v46  ;;  %v1929_v52 = vadd.f32 %v1928_v4, %v5846_v13 }
 0x3cd   :  { %v1930_v18 = vpop.f32.mrf.mxu1  ;;  %v2381_v11 = vmul.f32 %v4266_v42, %v5992_v23  ;;  %v2380_v60 = vmul.f32 %v4266_v42, %v5989_v25 }
 0x3ce   :  { %v2214_v21 = vmax.f32 %v2213_v62, %v1929_v52  ;;  %v1931_v33 = vadd.f32 %v1930_v18, %v5850_v39 }
 0x3cf   :  { %v1932_v3 = vpop.f32.mrf.mxu1  ;;  %v2394_v15 = vmul.f32 %v2390_v45, %v2381_v11  ;;  %v2393_v29 = vmul.f32 %v2386_v55, %v2380_v60 }
 0x3d0   :  { %v2235_v1 = vmax.f32 %v2234_v58, %v1931_v33  ;;  %v1933_v54 = vadd.f32 %v1932_v3, %v5846_v13 }
 0x3d1   :  { %v1934_v9 = vpop.f32.mrf.mxu1  ;;  %v2407_v6 = vadd.f32 %v2403_v48, %v2394_v15  ;;  %v2406_v19 = vadd.f32 %v2399_v30, %v2393_v29 }
 0x3d2   :  { %v2215_v63 = vmax.f32 %v2214_v21, %v1933_v54  ;;  %v1935_v23 = vadd.f32 %v1934_v9, %v5850_v39 }
 0x3d3   :  { %v1938_v49 = vpop.f32.mrf.mxu1  ;;  %v2409_v7 = vmax.f32 %v2407_v6, 0.0  ;;  %v2408_v5 = vmax.f32 %v2406_v19, 0.0 }
 0x3d4   :  { %v2236_v2 = vmax.f32 %v2235_v1, %v1935_v23  ;;  %v1939_v25 = vadd.f32 %v1938_v49, %v5846_v13 }
 0x3d5   :  { %v1940_v31 = vpop.f32.mrf.mxu1  ;;  %v2411_v51 = vpack.c.bf16 %v2409_v7, %v2409_v7  ;;  %v2410_v40 = vpack.c.bf16 %v2408_v5, %v2408_v5 }
 0x3d6   :  { %v2216_v17 = vmax.f32 %v2215_v63, %v1939_v25  ;;  %v1941_v22 = vadd.f32 %v1940_v31, %v5850_v39 }
 0x3d7   :  { %2648 = vmatprep.mubr.bf16.mxu0 %v2411_v51  ;;  %v1942_v37 = vpop.f32.mrf.mxu1 }
 0x3d8   :  { %v2237_v35 = vmax.f32 %v2236_v2, %v1941_v22  ;;  %2649 = vmatmul.mubr.bf16.vlgmr.msra.gmra.mxu0 %v2410_v40  ;;  %v1943_v43 = vadd.f32 %v1942_v37, %v5846_v13 }
 0x3d9   :  { %v1944_v26 = vpop.f32.mrf.mxu1 }
 0x3da   :  { %v2217_v53 = vmax.f32 %v2216_v17, %v1943_v43  ;;  %v1945_v47 = vadd.f32 %v1944_v26, %v5850_v39 }
 0x3db   :  { %v1948_v59 = vpop.f32.mrf.mxu1 }
 0x3dc   :  { %v2238_v10 = vmax.f32 %v2237_v35, %v1945_v47  ;;  %v1949_v27 = vadd.f32 %v1948_v59, %v5846_v13 }
 0x3dd   :  { %v1950_v14 = vpop.f32.mrf.mxu1 }
 0x3de   :  { %v2218_v8 = vmax.f32 %v2217_v53, %v1949_v27  ;;  %v1951_v34 = vadd.f32 %v1950_v14, %v5850_v39 }
 0x3df   :  { %v1952_v36 = vpop.f32.mrf.mxu1 }
 0x3e0   :  { %v2239_v28 = vmax.f32 %v2238_v10, %v1951_v34  ;;  %v1953_v38 = vadd.f32 %v1952_v36, %v5846_v13 }
 0x3e1   :  { %v1954_v41 = vpop.f32.mrf.mxu1 }
 0x3e2   :  { %v2219_v12 = vmax.f32 %v2218_v8, %v1953_v38  ;;  %v1955_v20 = vadd.f32 %v1954_v41, %v5850_v39 }
 0x3e3   :  { %v1958_v50 = vpop.f32.mrf.mxu1 }
 0x3e4   :  { %v2220_v57 = vrot.slane %v2219_v12, 4  ;;  %v2240_v56 = vmax.f32 %v2239_v28, %v1955_v20  ;;  %v1959_v42 = vadd.f32 %v1958_v50, %v5846_v13 }
 0x3e5   :  { %v6147_v62 = vpop.f32.mrf.mxu1 }
 0x3e6   :  { %v2221_v46 = vmax.f32 %v2219_v12, %v2220_v57  ;;  %v2241_v32 = vrot.slane %v2240_v56, 4 }
 0x3e7   :  { %v1962_v4 = vpop.f32.mrf.mxu1 }
 0x3e8   :  { %v2222_v55 = vrot.slane %v2221_v46, 2  ;;  %v2242_v45 = vmax.f32 %v2240_v56, %v2241_v32  ;;  %v1963_v58 = vadd.f32 %v1962_v4, %v5846_v13 }
 0x3e9   :  { %v6151_v52 = vpop.f32.mrf.mxu1 }
 0x3ea   :  { %v2223_v18 = vmax.f32 %v2221_v46, %v2222_v55  ;;  %v2243_v11 = vrot.slane %v2242_v45, 2  ;;  %v2247_v30 = vmax.f32 %v1959_v42, %v1963_v58 }
 0x3eb   :  { %v1968_v48 = vpop.f32.mrf.mxu1 }
 0x3ec   :  { %v2224_v60 = vrot.slane %v2223_v18, 1  ;;  %v2244_v21 = vmax.f32 %v2242_v45, %v2243_v11  ;;  %v1969_v33 = vadd.f32 %v1968_v48, %v5846_v13 }
 0x3ed   :  { %v6154_v3 = vpop.f32.mrf.mxu1 }
 0x3ee   :  { %v2225_v15 = vmax.f32 %v2223_v18, %v2224_v60  ;;  %v2245_v29 = vrot.slane %v2244_v21, 1  ;;  %v2248_v1 = vmax.f32 %v2247_v30, %v1969_v33 }
 0x3ef   :  { %v1972_v54 = vpop.f32.mrf.mxu1 }
 0x3f0   :  { %v2779_v9 = vpack.c.bf16 %v2225_v15, %v2225_v15  ;;  %v2246_v6 = vmax.f32 %v2244_v21, %v2245_v29  ;;  %v1973_v19 = vadd.f32 %v1972_v54, %v5846_v13 }
 0x3f1   :  { %v6157_v63 = vpop.f32.mrf.mxu1 }
 0x3f2   :  { %v3006_v23 = vunpack.c.l.b16 %v2779_v9  ;;  %v2780_v49 = vpack.c.bf16 %v2246_v6, %v2246_v6  ;;  %v2249_v7 = vmax.f32 %v2248_v1, %v1973_v19 }
 0x3f3   :  { %v1978_v5 = vpop.f32.mrf.mxu1 }
 0x3f4   :  { %v3007_v2 = vunpack.c.l.b16 %v2780_v49  ;;  %v1979_v25 = vadd.f32 %v1978_v5, %v5846_v13  ;;  %v3017_v31 = vsel %vm3016_vm10, %v3006_v23, %v6113_v0 }
 0x3f5   :  { %v6161_v51 = vpop.f32.mrf.mxu1 }
 0x3f6   :  { %v2250_v40 = vmax.f32 %v2249_v7, %v1979_v25  ;;  %v6164_v17 = vsel %vm3016_vm10, %v3007_v2, %v6117_v44 }
 0x3f7   :  { %v1982_v22 = vpop.f32.mrf.mxu1 }
 0x3f8   :  { %v1983_v37 = vadd.f32 %v1982_v22, %v5846_v13  ;;  %v2444_v22 = vld [vmem:[#allocation16] sm:$0x3] }
 0x3f9   :  { %v6167_v35 = vpop.f32.mrf.mxu1 }
 0x3fa   :  { %v2251_v43 = vmax.f32 %v2250_v40, %v1983_v37  ;;  %v2449_v37 = vrot.slane %v2444_v22, %v6573_v61 }
 0x3fb   :  { %v1988_v26 = vpop.f32.mrf.mxu1 }
 0x3fc   :  { %v1989_v53 = vadd.f32 %v1988_v26, %v5846_v13 }
 0x3fd   :  { %v6170_v47 = vpop.f32.mrf.mxu1 }
 0x3fe   :  { %v2252_v59 = vmax.f32 %v2251_v43, %v1989_v53  ;;  %v2453_v43 = vrot.slane %v2444_v22, %v6574_v24  ;;  %v4164_v22 = vld [vmem:[%s6496_s14 + $0x1c4] ss:$8 sps:$4 sm:$0xff]  }
 0x3ff   :  { %v1992_v10 = vpop.f32.mrf.mxu1 }
 0x400   :  { %v1993_v0 = vadd.f32 %v1992_v10, %v5846_v13 }
 0x401   :  { %v6173_v27 = vpop.f32.mrf.mxu1 }
 0x402   :  { %v2253_v14 = vmax.f32 %v2252_v59, %v1993_v0 }
 0x403   :  { %v1998_v44 = vpop.f32.mrf.mxu1 }
 0x404   :  { %v1999_v8 = vadd.f32 %v1998_v44, %v5846_v13 }
 0x405   :  { %v6176_v34 = vpop.f32.mrf.mxu1 }
 0x406   :  { %v2254_v36 = vmax.f32 %v2253_v14, %v1999_v8 }
 0x407   :  { %v2002_v28 = vpop.f32.mrf.mxu1 }
 0x408   :  { %v2003_v38 = vadd.f32 %v2002_v28, %v5846_v13  ;;  %v4134_v28 = vld [vmem:[%s6496_s14 + $0x164] ss:$8 sps:$4 sm:$0xff]  }
 0x409   :  { %v6179_v41 = vpop.f32.mrf.mxu1 }
 0x40a   :  { %v2255_v12 = vmax.f32 %v2254_v36, %v2003_v38  ;;  %v4131_v36 = vld [vmem:[%s6496_s14 + $0x174] ss:$8 sps:$4 sm:$0xff]   ;;  %v4132_v38 = vld [vmem:[%s6496_s14 + $0x160] ss:$8 sps:$4 sm:$0xff]  }
 0x40b   :  { %v2008_v20 = vpop.f32.mrf.mxu1  ;;  %2945 = vmatprep.subr.bf16.mxu0 %v4131_v36  ;;  %v1971_v36 = vadd.f32 %v6154_v3, %v5850_v39  ;;  %v1995_v3 = vadd.f32 %v6173_v27, %v5850_v39 }
 0x40c   :  { %v2009_v50 = vadd.f32 %v2008_v20, %v5846_v13  ;;  %v4135_v20 = vld [vmem:[%s6496_s14 + $0x150] ss:$8 sps:$4 sm:$0xff]  }
 0x40d   :  { %v6182_v57 = vpop.f32.mrf.mxu1 }
 0x40e   :  { %v2256_v56 = vmax.f32 %v2255_v12, %v2009_v50  ;;  %v4137_v12 = vld [vmem:[%s6496_s14 + $0x154] ss:$8 sps:$4 sm:$0xff]   ;;  %v4140_v50 = vld [vmem:[%s6496_s14 + $0x144] ss:$8 sps:$4 sm:$0xff]  }
 0x40f   :  { %v2012_v46 = vpop.f32.mrf.mxu1 }
 0x410   :  { %v2013_v32 = vadd.f32 %v2012_v46, %v5846_v13  ;;  %v4143_v46 = vld [vmem:[%s6496_s14 + $0x134] ss:$8 sps:$4 sm:$0xff]  }
 0x411   :  { %v6185_v4 = vpop.f32.mrf.mxu1 }
 0x412   :  { %v2257_v55 = vmax.f32 %v2256_v56, %v2013_v32  ;;  %v4138_v56 = vld [vmem:[%s6496_s14 + $0x140] ss:$8 sps:$4 sm:$0xff]   ;;  %v4141_v32 = vld [vmem:[%s6496_s14 + $0x130] ss:$8 sps:$4 sm:$0xff]  }
 0x413   :  { %v2018_v45 = vpop.f32.mrf.mxu1 }
 0x414   :  { %v2019_v42 = vadd.f32 %v2018_v45, %v5846_v13  ;;  %v4144_v45 = vld [vmem:[%s6496_s14 + $0x120] ss:$8 sps:$4 sm:$0xff]  }
 0x415   :  { %v6188_v58 = vpop.f32.mrf.mxu1 }
 0x416   :  { %v2258_v18 = vmax.f32 %v2257_v55, %v2019_v42  ;;  %v4146_v55 = vld [vmem:[%s6496_s14 + $0x124] ss:$8 sps:$4 sm:$0xff]   ;;  %v4149_v42 = vld [vmem:[%s6496_s14 + $0x114] ss:$8 sps:$4 sm:$0xff]   ;;  %v2021_v27 = vadd.f32 %v6188_v58, %v5850_v39 }
 0x417   :  { %v2022_v11 = vpop.f32.mrf.mxu1 }
 0x418   :  { %v2023_v30 = vadd.f32 %v2022_v11, %v5846_v13  ;;  %v4152_v11 = vld [vmem:[%s6496_s14 + $0x104] ss:$8 sps:$4 sm:$0xff]  }
 0x419   :  { %v6191_v48 = vpop.f32.mrf.mxu1 }
 0x41a   :  { %v2259_v60 = vmax.f32 %v2258_v18, %v2023_v30  ;;  %v4147_v18 = vld [vmem:[%s6496_s14 + $0x110] ss:$8 sps:$4 sm:$0xff]   ;;  %v4150_v30 = vld [vmem:[%s6496_s14 + $0x100] ss:$8 sps:$4 sm:$0xff]  }
 0x41b   :  { %v2028_v21 = vpop.f32.mrf.mxu1 }
 0x41c   :  { %v2029_v33 = vadd.f32 %v2028_v21, %v5846_v13  ;;  %v4153_v21 = vld [vmem:[%s6496_s14 + $0x1f0] ss:$8 sps:$4 sm:$0xff]  }
 0x41d   :  { %v6194_v15 = vpop.f32.mrf.mxu1 }
 0x41e   :  { %v2260_v29 = vmax.f32 %v2259_v60, %v2029_v33  ;;  %v4155_v60 = vld [vmem:[%s6496_s14 + $0x1f4] ss:$8 sps:$4 sm:$0xff]  }
 0x41f   :  { %v2032_v1 = vpop.f32.mrf.mxu1 }
 0x420   :  { %v2033_v54 = vadd.f32 %v2032_v1, %v5846_v13 }
 0x422   :  { %v2261_v9 = vmax.f32 %v2260_v29, %v2033_v54 }
 0x424   :  { %v2262_v6 = vrot.slane %v2261_v9, 4 }
 0x426   :  { %v2263_v19 = vmax.f32 %v2261_v9, %v2262_v6 }
 0x428   :  { %v2264_v23 = vrot.slane %v2263_v19, 2 }
 0x42a   :  { %v2265_v49 = vmax.f32 %v2263_v19, %v2264_v23 }
 0x42c   :  { %v2266_v7 = vrot.slane %v2265_v49, 1 }
 0x42e   :  { %v2267_v5 = vmax.f32 %v2265_v49, %v2266_v7  ;;  %v4158_v7 = vld [vmem:[%s6496_s14 + $0x1e4] ss:$8 sps:$4 sm:$0xff]  }
 0x430   :  { %v2781_v2 = vpack.c.bf16 %v2267_v5, %v2267_v5  ;;  %v4156_v5 = vld [vmem:[%s6496_s14 + $0x1e0] ss:$8 sps:$4 sm:$0xff]  }
 0x432   :  { %v3008_v25 = vunpack.c.l.b16 %v2781_v2  ;;  %v4161_v2 = vld [vmem:[%s6496_s14 + $0x1d4] ss:$8 sps:$4 sm:$0xff]  }
 0x434   :  { %v6198_v40 = vsel %vm3018_vm11, %v3008_v25, %v3017_v31  ;;  %v4129_v31 = vld [vmem:[%s6496_s14 + $0x170] ss:$8 sps:$4 sm:$0xff]  }
 0x435   :  { %2946 = vmatpush1.bf16.msra.mxu0 %v4129_v31  ;;  %v4159_v25 = vld [vmem:[%s6496_s14 + $0x1d0] ss:$8 sps:$4 sm:$0xff]   ;;  %v1961_v31 = vadd.f32 %v6147_v62, %v5850_v39 }
 0x436   :  { %2947 = vmatprep.subr.bf16.mxu0 %v4134_v28 }
 0x439   :  { %2948 = vmatpush1.bf16.msra.mxu0 %v4132_v38  ;;  %v1975_v38 = vadd.f32 %v6157_v63, %v5850_v39  ;;  %v2001_v63 = vadd.f32 %v6176_v34, %v5850_v39  ;;  %v2025_v34 = vadd.f32 %v6191_v48, %v5850_v39 }
 0x43a   :  { %2949 = vmatprep.subr.bf16.mxu0 %v4137_v12 }
 0x43d   :  { %2950 = vmatpush1.bf16.msra.mxu0 %v4135_v20  ;;  %v1981_v20 = vadd.f32 %v6161_v51, %v5850_v39  ;;  %v2005_v51 = vadd.f32 %v6179_v41, %v5850_v39  ;;  %v2031_v41 = vadd.f32 %v6194_v15, %v5850_v39 }
 0x43e   :  { %2951 = vmatprep.subr.bf16.mxu0 %v4140_v50 }
 0x441   :  { %2952 = vmatpush1.bf16.msra.mxu0 %v4138_v56  ;;  %v1985_v56 = vadd.f32 %v6167_v35, %v5850_v39  ;;  %v2011_v35 = vadd.f32 %v6182_v57, %v5850_v39 }
 0x442   :  { %2953 = vmatprep.subr.bf16.mxu0 %v4143_v46 }
 0x445   :  { %2954 = vmatpush1.bf16.msra.mxu0 %v4141_v32 }
 0x446   :  { %2955 = vmatprep.subr.bf16.mxu0 %v4146_v55 }
 0x449   :  { %2956 = vmatpush1.bf16.msra.mxu0 %v4144_v45 }
 0x44a   :  { %2957 = vmatprep.subr.bf16.mxu0 %v4149_v42 }
 0x44d   :  { %2958 = vmatpush1.bf16.msra.mxu0 %v4147_v18 }
 0x44e   :  { %2959 = vmatprep.subr.bf16.mxu0 %v4152_v11 }
 0x451   :  { %2960 = vmatpush1.bf16.msra.mxu0 %v4150_v30  ;;  %v2034_v30 = vpop.f32.mrf.mxu1 }
 0x452   :  { %2961 = vmatprep.subr.bf16.mxu0 %v4155_v60  ;;  %v2035_v57 = vadd.f32 %v2034_v30, %v5850_v39  ;;  %v4215_v30 = vld [vmem:[%s6496_s14 + $0xb4] ss:$8 sps:$4 sm:$0xff]  }
 0x455   :  { %2962 = vmatpush2.bf16.msra.mxu0 %v4153_v21 }
 0x456   :  { %2963 = vmatprep.subr.bf16.mxu0 %v4158_v7 }
 0x459   :  { %2964 = vmatpush2.bf16.msra.mxu0 %v4156_v5  ;;  %v2657_v5 = vld [vmem:[#allocation18] sm:$0x3] }
 0x45a   :  { %2965 = vmatprep.subr.bf16.mxu0 %v4161_v2  ;;  %v2658_v2 = vld [vmem:[#allocation19] sm:$0x3]  ;;  %v2687_v15 = vrot.slane %v2657_v5, %v6574_v24 }
 0x45d   :  { %2966 = vmatpush2.bf16.msra.mxu0 %v4159_v25  ;;  %v2683_v25 = vrot.slane %v2657_v5, %v6573_v61  ;;  %v4234_v5 = vld [vmem:[#allocation25 + $0x40] ss:$8 sps:$4 sm:$0xff]  }
 0x45e   :  { %2967 = vmatprep.subr.bf16.mxu0 %v4164_v22 }
 0x498   :  { %v2650_v26 = vpop.f32.mrf.mxu0 }
 0x499   :  { %v2651_v13 = vadd.f32 %v2650_v26, %v2449_v37  ;;  %v4162_v37 = vld [vmem:[%s6496_s14 + $0x1c0] ss:$8 sps:$4 sm:$0xff]   ;;  %v4165_v26 = vld [vmem:[%s6496_s14 + $0x1b0] ss:$8 sps:$4 sm:$0xff]  }
 0x49a   :  { %v2652_v53 = vpop.f32.mrf.mxu0  ;;  %2968 = vmatpush2.bf16.msra.mxu0 %v4162_v37 }
 0x49b   :  { %v2653_v59 = vadd.f32 %v2652_v53, %v2453_v43  ;;  %v2659_v0 = vsel %vm2360_vm6, %v2651_v13, 0.0  ;;  %v4167_v43 = vld [vmem:[%s6496_s14 + $0x1b4] ss:$8 sps:$4 sm:$0xff]   ;;  %v4168_v53 = vld [vmem:[%s6496_s14 + $0x1a0] ss:$8 sps:$4 sm:$0xff]  }
 0x49c   :  { %v2654_v10 = vpop.f32.mrf.mxu0  ;;  %2969 = vmatprep.subr.bf16.mxu0 %v4167_v43  ;;  %v2696_v43 = vrot.slane %v2658_v2, %v6573_v61 }
 0x49d   :  { %v2660_v14 = vsel %vm2360_vm6, %v2653_v59, 0.0  ;;  %v4171_v10 = vld [vmem:[%s6496_s14 + $0x190] ss:$8 sps:$4 sm:$0xff]  }
 0x49e   :  { %v2655_v44 = vpop.f32.mrf.mxu0  ;;  %v2661_v8 = vadd.f32 %v2660_v14, %v2659_v0  ;;  %2970 = vmatpush2.bf16.msra.mxu0 %v4165_v26  ;;  %v4176_v0 = vld [vmem:[%s6496_s14 + $0x184] ss:$8 sps:$4 sm:$0xff]   ;;  %v4174_v14 = vld [vmem:[%s6496_s14 + $0x180] ss:$8 sps:$4 sm:$0xff]   ;;  %v2700_v26 = vrot.slane %v2658_v2, %v6574_v24  ;;  %v4239_v2 = vld [vmem:[#allocation25 + $0x34] ss:$8 sps:$4 sm:$0xff]  }
 0x49f   :  { %v4179_v44 = vld [vmem:[%s6496_s14 + $0x74] ss:$8 sps:$4 sm:$0xff]  }
 0x4a0   :  { %2662 = vadd.xlane.f32.xlu1 %v2661_v8  ;;  %v1965_v8 = vadd.f32 %v6151_v52, %v5850_v39  ;;  %v1991_v52 = vadd.f32 %v6170_v47, %v5850_v39  ;;  %v2015_v47 = vadd.f32 %v6185_v4, %v5850_v39 }
 0x4a2   :  { %v2268_v28 = vmax.f32 %v1961_v31, %v1965_v8 }
 0x4a4   :  { %v2269_v12 = vmax.f32 %v2268_v28, %v1971_v36 }
 0x4a6   :  { %v2270_v50 = vmax.f32 %v2269_v12, %v1975_v38  ;;  %v4180_v12 = vld [vmem:[%s6496_s14 + $0x60] ss:$8 sps:$4 sm:$0xff]  }
 0x4a8   :  { %v2271_v46 = vmax.f32 %v2270_v50, %v1981_v20  ;;  %v4183_v20 = vld [vmem:[%s6496_s14 + $0x50] ss:$8 sps:$4 sm:$0xff]   ;;  %v4188_v50 = vld [vmem:[%s6496_s14 + $0x44] ss:$8 sps:$4 sm:$0xff]  }
 0x4aa   :  { %v2272_v62 = vmax.f32 %v2271_v46, %v1985_v56  ;;  %v4186_v56 = vld [vmem:[%s6496_s14 + $0x40] ss:$8 sps:$4 sm:$0xff]   ;;  %v4191_v46 = vld [vmem:[%s6496_s14 + $0x34] ss:$8 sps:$4 sm:$0xff]  }
 0x4ac   :  { %v2273_v32 = vmax.f32 %v2272_v62, %v1991_v52  ;;  %v4189_v52 = vld [vmem:[%s6496_s14 + $0x30] ss:$8 sps:$4 sm:$0xff]   ;;  %v4194_v62 = vld [vmem:[%s6496_s14 + $0x24] ss:$8 sps:$4 sm:$0xff]  }
 0x4ae   :  { %v2274_v55 = vmax.f32 %v2273_v32, %v1995_v3  ;;  %v4192_v3 = vld [vmem:[%s6496_s14 + $0x20] ss:$8 sps:$4 sm:$0xff]   ;;  %v4197_v32 = vld [vmem:[%s6496_s14 + $0x14] ss:$8 sps:$4 sm:$0xff]  }
 0x4b0   :  { %v2275_v45 = vmax.f32 %v2274_v55, %v2001_v63  ;;  %v4195_v63 = vld [vmem:[%s6496_s14 + $0x10] ss:$8 sps:$4 sm:$0xff]   ;;  %v4200_v55 = vld [vmem:[%s6496_s14 + $0x4] ss:$8 sps:$4 sm:$0xff]  }
 0x4b2   :  { %v2276_v42 = vmax.f32 %v2275_v45, %v2005_v51  ;;  %v4198_v51 = vld [vmem:[%s6496_s14] ss:$8 sps:$4 sm:$0xff]   ;;  %v4203_v45 = vld [vmem:[%s6496_s14 + $0xf4] ss:$8 sps:$4 sm:$0xff]  }
 0x4b4   :  { %v2277_v18 = vmax.f32 %v2276_v42, %v2011_v35  ;;  %v4201_v35 = vld [vmem:[%s6496_s14 + $0xf0] ss:$8 sps:$4 sm:$0xff]   ;;  %v4206_v42 = vld [vmem:[%s6496_s14 + $0xe4] ss:$8 sps:$4 sm:$0xff]  }
 0x4b6   :  { %v2278_v11 = vmax.f32 %v2277_v18, %v2015_v47  ;;  %v4204_v47 = vld [vmem:[%s6496_s14 + $0xe0] ss:$8 sps:$4 sm:$0xff]   ;;  %v4209_v18 = vld [vmem:[%s6496_s14 + $0xd4] ss:$8 sps:$4 sm:$0xff]  }
 0x4b8   :  { %v2279_v60 = vmax.f32 %v2278_v11, %v2021_v27  ;;  %v4207_v27 = vld [vmem:[%s6496_s14 + $0xd0] ss:$8 sps:$4 sm:$0xff]   ;;  %v4212_v11 = vld [vmem:[%s6496_s14 + $0xc4] ss:$8 sps:$4 sm:$0xff]  }
 0x4ba   :  { %v2280_v21 = vmax.f32 %v2279_v60, %v2025_v34  ;;  %v4210_v34 = vld [vmem:[%s6496_s14 + $0xc0] ss:$8 sps:$4 sm:$0xff]   ;;  %v4213_v60 = vld [vmem:[%s6496_s14 + $0xb0] ss:$8 sps:$4 sm:$0xff]  }
 0x529   :  { %v2663_v33 = vpop.xlane.xlu1 %2662 }
 0x52a   :  { %v2664_v29 = vmul.f32 0.00390625, %v2663_v33  ;;  %v2281_v33 = vmax.f32 %v2280_v21, %v2031_v41  ;;  %v4218_v41 = vld [vmem:[%s6496_s14 + $0xa4] ss:$8 sps:$4 sm:$0xff]   ;;  %v4216_v21 = vld [vmem:[%s6496_s14 + $0xa0] ss:$8 sps:$4 sm:$0xff]  }
 0x52c   :  { %v6258_v1 = vsub.f32 %v2651_v13, %v2664_v29  ;;  %v6260_v54 = vsub.f32 %v2653_v59, %v2664_v29  ;;  %v4170_v13 = vld [vmem:[%s6496_s14 + $0x1a4] ss:$8 sps:$4 sm:$0xff]   ;;  %v4173_v59 = vld [vmem:[%s6496_s14 + $0x194] ss:$8 sps:$4 sm:$0xff]   ;;  %v2282_v29 = vmax.f32 %v2281_v33, %v2035_v57  ;;  %v4219_v33 = vld [vmem:[%s6496_s14 + $0x90] ss:$8 sps:$4 sm:$0xff]  }
 0x52d   :  { %2971 = vmatprep.subr.bf16.mxu0 %v4170_v13  ;;  %v4221_v57 = vld [vmem:[%s6496_s14 + $0x94] ss:$8 sps:$4 sm:$0xff]  }
 0x52e   :  { %v2667_v9 = vmul.f32 %v6258_v1, %v6258_v1  ;;  %v2668_v6 = vmul.f32 %v6260_v54, %v6260_v54  ;;  %2972 = vmatpush2.bf16.msra.mxu0 %v4168_v53 }
 0x52f   :  { %2973 = vmatprep.subr.bf16.mxu0 %v4173_v59 }
 0x530   :  { %v2669_v19 = vsel %vm2360_vm6, %v2667_v9, 0.0  ;;  %v2670_v23 = vsel %vm2360_vm6, %v2668_v6, 0.0  ;;  %v2283_v9 = vrot.slane %v2282_v29, 4 }
 0x531   :  { %v2671_v49 = vadd.f32 %v2670_v23, %v2669_v19 }
 0x532   :  { %2974 = vmatpush2.bf16.msra.mxu0 %v4171_v10  ;;  %v2284_v4 = vmax.f32 %v2282_v29, %v2283_v9  ;;  %v4224_v29 = vld [vmem:[%s6496_s14 + $0x84] ss:$8 sps:$4 sm:$0xff]   ;;  %v4222_v9 = vld [vmem:[%s6496_s14 + $0x80] ss:$8 sps:$4 sm:$0xff]  }
 0x533   :  { %2672 = vadd.xlane.f32.xlu1 %v2671_v49  ;;  %2975 = vmatprep.subr.bf16.mxu0 %v4176_v0 }
 0x534   :  { %v2285_v23 = vrot.slane %v2284_v4, 2 }
 0x536   :  { %2976 = vmatpush2.bf16.msra.mxu0 %v4174_v14  ;;  %v2286_v49 = vmax.f32 %v2284_v4, %v2285_v23  ;;  %v3025_v4 = vpack.c.b16 %v6198_v40, %v6198_v40  ;;  %v4228_v23 = vld [vmem:[#allocation25 + $0x60] ss:$8 sps:$4 sm:$0xff]   ;;  %v4237_v40 = vld [vmem:[#allocation25 + $0x30] ss:$8 sps:$4 sm:$0xff]  }
 0x537   :  { %3189 = vmatprep.subr.bf16.mxu0 %v4179_v44 }
 0x538   :  { %v2287_v7 = vrot.slane %v2286_v49, 1 }
 0x53a   :  { %v2288_v48 = vmax.f32 %v2286_v49, %v2287_v7  ;;  %v4231_v49 = vld [vmem:[#allocation25 + $0x50] ss:$8 sps:$4 sm:$0xff]   ;;  %v4233_v7 = vld [vmem:[#allocation25 + $0x54] ss:$8 sps:$4 sm:$0xff]  }
 0x53c   :  { %v2782_v39 = vpack.c.bf16 %v2288_v48, %v2288_v48  ;;  %v4236_v48 = vld [vmem:[#allocation25 + $0x44] ss:$8 sps:$4 sm:$0xff]  }
 0x53e   :  { %v3009_v10 = vunpack.c.l.b16 %v2782_v39 }
 0x540   :  { %v3024_v31 = vsel %vm3018_vm11, %v3009_v10, %v6164_v17  ;;  %v4185_v17 = vld [vmem:[%s6496_s14 + $0x54] ss:$8 sps:$4 sm:$0xff]  }
 0x541   :  { %v3026_v38 = vpack.c.b16 %v3024_v31, %v3024_v31 }
 0x5bc   :  { %v2673_v6 = vpop.xlane.xlu1 %2672 }
 0x5bd   :  { %v2674_v19 = vmul.f32 0.00390625, %v2673_v6  ;;  %v4225_v6 = vld [vmem:[#allocation25 + $0x70] ss:$8 sps:$4 sm:$0xff]  }
 0x5bf   :  { %v2675_v58 = vadd.f32 1e-05, %v2674_v19  ;;  %v4227_v19 = vld [vmem:[#allocation25 + $0x74] ss:$8 sps:$4 sm:$0xff]  }
 0x5c0   :  { %3434 = vmatprep.subr.bf16.mxu1 %v4227_v19 }
 0x5c1   :  { %4267 = vrsqrt.f32 %v2675_v58  ;;  %3435 = vmatpush1.bf16.msra.mxu1 %v4225_v6  ;;  %v4230_v58 = vld [vmem:[#allocation25 + $0x64] ss:$8 sps:$4 sm:$0xff]  }
 0x5c2   :  { %3436 = vmatprep.subr.bf16.mxu1 %v4230_v58 }
 0x5c5   :  { %3437 = vmatpush1.bf16.msra.mxu1 %v4228_v23 }
 0x5c6   :  { %3438 = vmatprep.subr.bf16.mxu1 %v4233_v7 }
 0x5c9   :  { %3439 = vmatpush1.bf16.msra.mxu1 %v4231_v49 }
 0x5ca   :  { %3440 = vmatprep.subr.bf16.mxu1 %v4236_v48  ;;  %v3318_v48 = vld [vmem:[#allocation27] sm:$0x3] }
 0x5cd   :  { %3441 = vmatpush1.bf16.msra.mxu1 %v4234_v5  ;;  %v3323_v5 = vrot.slane %v3318_v48, %v6573_v61 }
 0x5ce   :  { %v4268_v22 = vpop.eup %4267  ;;  %3442 = vmatprep.subr.bf16.mxu1 %v4239_v2  ;;  %v3327_v2 = vrot.slane %v3318_v48, %v6574_v24 }
 0x5cf   :  { %v2678_v37 = vmul.f32 %v4268_v22, %v6260_v54  ;;  %v2677_v13 = vmul.f32 %v4268_v22, %v6258_v1  ;;  %v4177_v54 = vld [vmem:[%s6496_s14 + $0x70] ss:$8 sps:$4 sm:$0xff]   ;;  %v4182_v1 = vld [vmem:[%s6496_s14 + $0x64] ss:$8 sps:$4 sm:$0xff]  }
 0x5d1   :  { %v2691_v53 = vmul.f32 %v2687_v15, %v2678_v37  ;;  %v2690_v59 = vmul.f32 %v2683_v25, %v2677_v13  ;;  %v4242_v25 = vld [vmem:[#allocation25 + $0x24] ss:$8 sps:$4 sm:$0xff]   ;;  %3443 = vmatpush1.bf16.msra.mxu1 %v4237_v40  ;;  %v4240_v15 = vld [vmem:[#allocation25 + $0x20] ss:$8 sps:$4 sm:$0xff]  }
 0x5d2   :  { %3444 = vmatprep.subr.bf16.mxu1 %v4242_v25 }
 0x5d3   :  { %v2704_v0 = vadd.f32 %v2700_v26, %v2691_v53  ;;  %v2703_v14 = vadd.f32 %v2696_v43, %v2690_v59  ;;  %v3230_v26 = vld [vmem:[#allocation21] sm:$0x3] }
 0x5d4   :  { %v3235_v13 = vrot.slane %v3230_v26, %v6573_v61  ;;  %v3239_v10 = vrot.slane %v3230_v26, %v6574_v24 }
 0x5d5   :  { %v2706_v44 = vmax.f32 %v2704_v0, 0.0  ;;  %v2705_v8 = vmax.f32 %v2703_v14, 0.0  ;;  %3445 = vmatpush1.bf16.msra.mxu1 %v4240_v15 }
 0x5d7   :  { %v2784_v36 = vpack.c.bf16 %v2706_v44, %v2706_v44  ;;  %v2783_v28 = vpack.c.bf16 %v2705_v8, %v2705_v8 }
 0x5d9   :  { %2977 = vmatprep.mubr.bf16.mxu0 %v2784_v36 }
 0x5da   :  { %2978 = vmatmul.mubr.bf16.vlgmr.msra.gmra.mxu0 %v2783_v28 }
 0x5db   :  { %3190 = vmatpush1.bf16.msra.mxu0 %v4177_v54  ;;  %3221 = vmatprep.mubr.bf16.mxu0 %v3026_v38  ;;  %v4243_v38 = vld [vmem:[#allocation25 + $0x10] ss:$8 sps:$4 sm:$0xff]  }
 0x5dc   :  { %3191 = vmatprep.subr.bf16.mxu0 %v4182_v1 }
 0x5df   :  { %3192 = vmatpush1.bf16.msra.mxu0 %v4180_v12  ;;  %v4245_v12 = vld [vmem:[#allocation25 + $0x14] ss:$8 sps:$4 sm:$0xff]  }
 0x5e0   :  { %3193 = vmatprep.subr.bf16.mxu0 %v4185_v17  ;;  %v4248_v17 = vld [vmem:[#allocation25 + $0x4] ss:$8 sps:$4 sm:$0xff]   ;;  %3446 = vmatprep.subr.bf16.mxu1 %v4245_v12 }
 0x5e1   :  { %3447 = vmatpush1.bf16.msra.mxu1 %v4243_v38  ;;  %v4258_v38 = vld [vmem:[#allocation31 + $0x20] sm:$0xff]   ;;  %v4259_v12 = vld [vmem:[#allocation31 + $0x18] sm:$0xff]  }
 0x5e2   :  { %3448 = vmatprep.subr.bf16.mxu1 %v4248_v17  ;;  %v4260_v17 = vld [vmem:[#allocation31 + $0x10] sm:$0xff]  }
 0x5e3   :  { %3194 = vmatpush1.bf16.msra.mxu0 %v4183_v20  ;;  %v4246_v20 = vld [vmem:[#allocation25] ss:$8 sps:$4 sm:$0xff]  }
 0x5e4   :  { %3195 = vmatprep.subr.bf16.mxu0 %v4188_v50  ;;  %v4251_v50 = vld [vmem:[#allocation25 + $0x94] ss:$8 sps:$4 sm:$0xff]  }
 0x5e5   :  { %3449 = vmatpush1.bf16.msra.mxu1 %v4246_v20  ;;  %v4261_v20 = vld [vmem:[#allocation31 + $0x8] sm:$0xff]  }
 0x5e6   :  { %3462 = vmatprep.subr.bf16.mxu1 %v4251_v50  ;;  %v4262_v50 = vld [vmem:[#allocation31] sm:$0xff]  }
 0x5e7   :  { %3196 = vmatpush1.bf16.msra.mxu0 %v4186_v56  ;;  %v4249_v56 = vld [vmem:[#allocation25 + $0x90] ss:$8 sps:$4 sm:$0xff]  }
 0x5e8   :  { %3197 = vmatprep.subr.bf16.mxu0 %v4191_v46  ;;  %v4254_v46 = vld [vmem:[#allocation25 + $0x84] ss:$8 sps:$4 sm:$0xff]  }
 0x5e9   :  { %3463 = vmatpush2.bf16.msra.mxu1 %v4249_v56  ;;  %v4263_v56 = vld [vmem:[#allocation31 + $0x48] sm:$0xff]  }
 0x5ea   :  { %3464 = vmatprep.subr.bf16.mxu1 %v4254_v46  ;;  %v4264_v46 = vld [vmem:[#allocation31 + $0x40] sm:$0xff]  }
 0x5eb   :  { %3198 = vmatpush1.bf16.msra.mxu0 %v4189_v52  ;;  %v4252_v52 = vld [vmem:[#allocation25 + $0x80] ss:$8 sps:$4 sm:$0xff]  }
 0x5ec   :  { %3199 = vmatprep.subr.bf16.mxu0 %v4194_v62 }
 0x5ed   :  { %3465 = vmatpush2.bf16.msra.mxu1 %v4252_v52 }
 0x5ef   :  { %3200 = vmatpush1.bf16.msra.mxu0 %v4192_v3 }
 0x5f0   :  { %3201 = vmatprep.subr.bf16.mxu0 %v4197_v32 }
 0x5f3   :  { %3202 = vmatpush1.bf16.msra.mxu0 %v4195_v63 }
 0x5f4   :  { %3203 = vmatprep.subr.bf16.mxu0 %v4200_v55 }
 0x5f7   :  { %3204 = vmatpush1.bf16.msra.mxu0 %v4198_v51 }
 0x5f8   :  { %3205 = vmatprep.subr.bf16.mxu0 %v4203_v45 }
 0x5fb   :  { %3206 = vmatpush2.bf16.msra.mxu0 %v4201_v35 }
 0x5fc   :  { %3207 = vmatprep.subr.bf16.mxu0 %v4206_v42 }
 0x5ff   :  { %3208 = vmatpush2.bf16.msra.mxu0 %v4204_v47 }
 0x600   :  { %3209 = vmatprep.subr.bf16.mxu0 %v4209_v18 }
 0x603   :  { %3210 = vmatpush2.bf16.msra.mxu0 %v4207_v27 }
 0x604   :  { %3211 = vmatprep.subr.bf16.mxu0 %v4212_v11  ;;  %v3244_v11 = vld [vmem:[#allocation22] sm:$0x3] }
 0x607   :  { %3212 = vmatpush2.bf16.msra.mxu0 %v4210_v34  ;;  %v3245_v34 = vld [vmem:[#allocation24] sm:$0x3] }
 0x608   :  { %3213 = vmatprep.subr.bf16.mxu0 %v4215_v30  ;;  %v3272_v30 = vrot.slane %v3244_v11, %v6573_v61 }
 0x60b   :  { %3214 = vmatpush2.bf16.msra.mxu0 %v4213_v60  ;;  %v3276_v60 = vrot.slane %v3244_v11, %v6574_v24 }
 0x60c   :  { %3215 = vmatprep.subr.bf16.mxu0 %v4218_v41 }
 0x60f   :  { %3216 = vmatpush2.bf16.msra.mxu0 %v4216_v21 }
 0x610   :  { %3217 = vmatprep.subr.bf16.mxu0 %v4221_v57 }
 0x613   :  { %3218 = vmatpush2.bf16.msra.mxu0 %v4219_v33  ;;  %v3285_v33 = vrot.slane %v3245_v34, %v6573_v61 }
 0x614   :  { %3219 = vmatprep.subr.bf16.mxu0 %v4224_v29  ;;  %v3289_v29 = vrot.slane %v3245_v34, %v6574_v24 }
 0x617   :  { %3220 = vmatpush2.bf16.msra.mxu0 %v4222_v9 }
 0x618   :  { %3617 = vmatprep.subr.bf16.mxu0 %v6540_v16 }
 0x61a   :  { %3222 = vmatmul.mubr.bf16.vlgmr.msra.gmra.mxu0 %v3025_v4 }
 0x69a   :  { %v2979_v22 = vpop.f32.mrf.mxu0 }
 0x69c   :  { %v2981_v39 = vpop.f32.mrf.mxu0 }
 0x69e   :  { %v2983_v37 = vpop.f32.mrf.mxu0 }
 0x6a0   :  { %v2984_v43 = vpop.f32.mrf.mxu0 }
 0x6da   :  { %v3223_v53 = vpop.f32.mrf.mxu0 }
 0x6db   :  { %v3224_v59 = vadd.f32 %v3223_v53, %v2979_v22  ;;  %v4255_v53 = vld [vmem:[#allocation31 + $0x38] sm:$0xff]  }
 0x6dc   :  { %v3225_v0 = vpop.f32.mrf.mxu0  ;;  %3618 = vmatpush1.bf16.msra.mxu0 %v4255_v53 }
 0x6dd   :  { %v3242_v14 = vadd.f32 %v3235_v13, %v3224_v59  ;;  %v3226_v44 = vadd.f32 %v3225_v0, %v2981_v39  ;;  %v4256_v59 = vld [vmem:[#allocation31 + $0x30] sm:$0xff]   ;;  %3619 = vmatprep.subr.bf16.mxu0 %v6540_v16 }
 0x6de   :  { %v3227_v8 = vpop.f32.mrf.mxu0 }
 0x6df   :  { %v3243_v31 = vadd.f32 %v3239_v10, %v3226_v44  ;;  %v3246_v54 = vsel %vm2360_vm6, %v3242_v14, 0.0  ;;  %v4257_v10 = vld [vmem:[#allocation31 + $0x28] sm:$0xff]  }
 0x6e0   :  { %v3228_v36 = vpop.f32.mrf.mxu0  ;;  %3620 = vmatpush1.bf16.msra.mxu0 %v4256_v59 }
 0x6e1   :  { %v3248_v28 = vsel %vm3247_vm12, %v3243_v31, 0.0  ;;  %3621 = vmatprep.subr.bf16.mxu0 %v6540_v16 }
 0x6e2   :  { %v3249_v1 = vadd.f32 %v3248_v28, %v3246_v54 }
 0x6e4   :  { %3250 = vadd.xlane.f32.xlu0 %v3249_v1  ;;  %3622 = vmatpush1.bf16.msra.mxu0 %v4257_v10 }
 0x6e5   :  { %3623 = vmatprep.subr.bf16.mxu0 %v6540_v16 }
 0x6e8   :  { %3624 = vmatpush1.bf16.msra.mxu0 %v4258_v38 }
 0x6e9   :  { %3625 = vmatprep.subr.bf16.mxu0 %v6540_v16 }
 0x6ec   :  { %3626 = vmatpush1.bf16.msra.mxu0 %v4259_v12 }
 0x6ed   :  { %3627 = vmatprep.subr.bf16.mxu0 %v6540_v16 }
 0x6f0   :  { %3628 = vmatpush1.bf16.msra.mxu0 %v4260_v17 }
 0x6f1   :  { %3629 = vmatprep.subr.bf16.mxu0 %v6540_v16 }
 0x6f4   :  { %3630 = vmatpush1.bf16.msra.mxu0 %v4261_v20 }
 0x6f5   :  { %3631 = vmatprep.subr.bf16.mxu0 %v6540_v16 }
 0x6f8   :  { %3632 = vmatpush1.bf16.msra.mxu0 %v4262_v50 }
 0x6f9   :  { %3645 = vmatprep.subr.bf16.mxu0 %v6540_v16 }
 0x6fc   :  { %3646 = vmatpush2.bf16.msra.mxu0 %v4263_v56 }
 0x6fd   :  { %3647 = vmatprep.subr.bf16.mxu0 %v6540_v16 }
 0x700   :  { %3648 = vmatpush2.bf16.msra.mxu0 %v4264_v46 }
 0x76d   :  { %v3251_v62 = vpop.xlane.xlu0 %3250 }
 0x76e   :  { %v3253_v3 = vmul.f32 0.00625, %v3251_v62 }
 0x770   :  { %v3254_v32 = vsub.f32 %v3242_v14, %v3253_v3  ;;  %v3255_v63 = vsub.f32 %v3243_v31, %v3253_v3 }
 0x772   :  { %v3256_v55 = vmul.f32 %v3254_v32, %v3254_v32  ;;  %v3257_v51 = vmul.f32 %v3255_v63, %v3255_v63 }
 0x774   :  { %v3258_v45 = vsel %vm2360_vm6, %v3256_v55, 0.0  ;;  %v3259_v35 = vsel %vm3247_vm12, %v3257_v51, 0.0 }
 0x775   :  { %v3260_v42 = vadd.f32 %v3259_v35, %v3258_v45 }
 0x777   :  { %3261 = vadd.xlane.f32.xlu1 %v3260_v42 }
 0x800   :  { %v3262_v47 = vpop.xlane.xlu1 %3261 }
 0x801   :  { %v3263_v18 = vmul.f32 0.00625, %v3262_v47 }
 0x803   :  { %v3264_v27 = vadd.f32 1e-05, %v3263_v18 }
 0x805   :  { %4269 = vrsqrt.f32 %v3264_v27 }
 0x812   :  { %v4270_v41 = vpop.eup %4269 }
 0x813   :  { %v3266_v21 = vmul.f32 %v4270_v41, %v3254_v32  ;;  %v3267_v57 = vmul.f32 %v4270_v41, %v3255_v63  ;;  %v3475_v32 = vld [vmem:[#allocation28] sm:$0x3]  ;;  %v3476_v63 = vld [vmem:[#allocation30] sm:$0x3] }
 0x814   :  { %v3501_v55 = vrot.slane %v3475_v32, %v6573_v61  ;;  %v3505_v51 = vrot.slane %v3475_v32, %v6574_v24  ;;  %v3514_v47 = vrot.slane %v3476_v63, %v6573_v61  ;;  %v3518_v18 = vrot.slane %v3476_v63, %v6574_v24 }
 0x815   :  { %v3279_v9 = vmul.f32 %v3272_v30, %v3266_v21  ;;  %v3280_v4 = vmul.f32 %v3276_v60, %v3267_v57  ;;  %v3859_v57 = vld [vmem:[#allocation33] ss:$0 sm:$0xff] }
 0x817   :  { %v3292_v6 = vadd.f32 %v3285_v33, %v3279_v9  ;;  %v3293_v19 = vadd.f32 %v3289_v29, %v3280_v4 }
 0x819   :  { %v3294_v23 = vmax.f32 %v3292_v6, 0.0  ;;  %v3295_v58 = vmax.f32 %v3293_v19, 0.0 }
 0x81b   :  { %v3296_v49 = vpack.c.bf16 %v3294_v23, %v3294_v23  ;;  %v3297_v7 = vpack.c.bf16 %v3295_v58, %v3295_v58 }
 0x81d   :  { %3858 = vmatprep.mubr.msk.bf16.mxu1 %vm3430_vm13, %v3297_v7 }
 0x81e   :  { %3467 = vmatmul.mubr.bf16.vlgmr.msra.gmra.mxu1 %v3296_v49 }
 0x8de   :  { %v3468_v40 = vpop.f32.mrf.mxu1 }
 0x8df   :  { %v3469_v25 = vadd.f32 %v3468_v40, %v3323_v5 }
 0x8e0   :  { %v3470_v15 = vpop.f32.mrf.mxu1 }
 0x8e1   :  { %v3471_v22 = vadd.f32 %v3470_v15, %v3327_v2  ;;  %v3477_v37 = vsel %vm2360_vm6, %v3469_v25, 0.0 }
 0x8e2   :  { %v3472_v39 = vpop.f32.mrf.mxu1 }
 0x8e3   :  { %v3478_v43 = vsel %vm3247_vm12, %v3471_v22, 0.0 }
 0x8e4   :  { %v3473_v26 = vpop.f32.mrf.mxu1  ;;  %v3479_v13 = vadd.f32 %v3478_v43, %v3477_v37 }
 0x8e6   :  { %3480 = vadd.xlane.f32.xlu0 %v3479_v13 }
 0x96f   :  { %v3481_v0 = vpop.xlane.xlu0 %3480 }
 0x970   :  { %v3482_v14 = vmul.f32 0.00625, %v3481_v0 }
 0x972   :  { %v3483_v44 = vsub.f32 %v3469_v25, %v3482_v14  ;;  %v3484_v8 = vsub.f32 %v3471_v22, %v3482_v14 }
 0x974   :  { %v3485_v31 = vmul.f32 %v3483_v44, %v3483_v44  ;;  %v3486_v36 = vmul.f32 %v3484_v8, %v3484_v8 }
 0x976   :  { %v3487_v54 = vsel %vm2360_vm6, %v3485_v31, 0.0  ;;  %v3488_v28 = vsel %vm3247_vm12, %v3486_v36, 0.0 }
 0x977   :  { %v3489_v1 = vadd.f32 %v3488_v28, %v3487_v54 }
 0x979   :  { %3490 = vadd.xlane.f32.xlu1 %v3489_v1 }
 0xa02   :  { %v3491_v52 = vpop.xlane.xlu1 %3490 }
 0xa03   :  { %v3492_v62 = vmul.f32 0.00625, %v3491_v52 }
 0xa05   :  { %v3493_v3 = vadd.f32 1e-05, %v3492_v62 }
 0xa07   :  { %4271 = vrsqrt.f32 %v3493_v3 }
 0xa14   :  { %v4272_v45 = vpop.eup %4271 }
 0xa15   :  { %v3495_v35 = vmul.f32 %v4272_v45, %v3483_v44  ;;  %v3496_v42 = vmul.f32 %v4272_v45, %v3484_v8 }
 0xa17   :  { %v3509_v27 = vmul.f32 %v3505_v51, %v3496_v42  ;;  %v3508_v16 = vmul.f32 %v3501_v55, %v3495_v35 }
 0xa19   :  { %v3522_v11 = vadd.f32 %v3518_v18, %v3509_v27  ;;  %v3521_v34 = vadd.f32 %v3514_v47, %v3508_v16 }
 0xa1b   :  { %v3524_v30 = vmax.f32 %v3522_v11, 0.0  ;;  %v3523_v60 = vmax.f32 %v3521_v34, 0.0 }
 0xa1d   :  { %v3526_v41 = vpack.c.bf16 %v3524_v30, %v3524_v30  ;;  %v3525_v21 = vpack.c.bf16 %v3523_v60, %v3523_v60 }
 0xa1f   :  { %3870 = vmatprep.mubr.msk.bf16.mxu0 %vm3430_vm13, %v3526_v41 }
 0xa20   :  { %3650 = vmatmul.mubr.bf16.vlgmr.msra.gmra.mxu0 %v3525_v21 }
 0xae0   :  { %v3651_v33 = vpop.f32.mrf.mxu0 }
 0xae1   :  { %v3652_v29 = vadd.f32 %v3859_v57, %v3651_v33 }
 0xae2   :  { %v3653_v9 = vpop.f32.mrf.mxu0 }
 0xae3   :  { %3658 = vst.msk [vmem:[%s6506_s24] sm:$0x3f] %vm3657_vm14, %v3652_v29 }
 0xae4   :  { %v3654_v61 = vpop.f32.mrf.mxu0 }
 0xae6   :  { %v3655_v24 = vpop.f32.mrf.mxu0 }
 0xae7   :  { %3663 = vsyncpa [#allocation3], 1 }
 0xae8   :  { %3664 = vsyncpa [#allocation5], 1 }
 0xae9   :  { %3665 = vsyncpa [#allocation8], 1 }
 0xaea   :  { %3666 = vsyncpa [#allocation11], 1 }
 0xaeb   :  { %3667 = vsyncpa [#allocation14], 1 }
 0xaec   :  { %3668 = vsyncpa [#allocation17], 1 }
 0xaed   :  { %3669 = vsyncpa [#allocation20], 1 }
 0xaee   :  { %3670 = vsyncpa [#allocation23], 1 }
 0xaef   :  { %3671 = vsyncpa [#allocation26], 1 }
 0xaf0   :  { %3672 = vsyncpa [#allocation29], 1 }
 0xaf1   :  { %3673 = vsyncpa [#allocation32], 1 }

// kernel: forward.3
= control target key start
LH: loop header
LB: loop body
LE: loop exit
PB: predicated region body
PF: predicated region fallthrough
CT: control target
= control target key end

     0   :  { %s12821_s0 = inlined_call_operand.vmem [shape: f32[16,256], index: 0, kind: input, shape index: {}]   ;;  %s12822_s1 = inlined_call_operand.vmem [shape: f32[16,16], index: 1, kind: input, shape index: {}]   ;;  %s12823_s2 = inlined_call_operand.hbm [shape: bf16[8,256,768], index: 2, kind: input, shape index: {}]   ;;  %s12824_s3 = inlined_call_operand.hbm [shape: f32[8,1,768], index: 3, kind: input, shape index: {}]   ;;  %s12825_s4 = inlined_call_operand.vmem [shape: bf16[8,256,256], index: 4, kind: input, shape index: {}]   ;;  %s12826_s5 = inlined_call_operand.hbm [shape: f32[8,1,256], index: 5, kind: input, shape index: {}]   ;;  %s12827_s6 = inlined_call_operand.hbm [shape: f32[8,1,256], index: 6, kind: input, shape index: {}]   ;;  %s12828_s7 = inlined_call_operand.hbm [shape: f32[8,1,256], index: 7, kind: input, shape index: {}]   ;;  %s12829_s8 = inlined_call_operand.vmem [shape: bf16[8,256,128], index: 8, kind: input, shape index: {}]   ;;  %s12830_s9 = inlined_call_operand.hbm [shape: f32[8,1,128], index: 9, kind: input, shape index: {}]   ;;  %s12831_s10 = inlined_call_operand.vmem [shape: bf16[8,128,256], index: 10, kind: input, shape index: {}]   ;;  %s12832_s11 = inlined_call_operand.hbm [shape: f32[8,1,256], index: 11, kind: input, shape index: {}]   ;;  %s12833_s12 = inlined_call_operand.hbm [shape: f32[8,1,256], index: 12, kind: input, shape index: {}]   ;;  %s12834_s13 = inlined_call_operand.hbm [shape: f32[8,1,256], index: 13, kind: input, shape index: {}]   ;;  %s12835_s14 = inlined_call_operand.hbm [shape: bf16[256,256], index: 14, kind: input, shape index: {}]   ;;  %s12836_s15 = inlined_call_operand.hbm [shape: f32[1,256], index: 15, kind: input, shape index: {}]   ;;  %s12837_s16 = inlined_call_operand.hbm [shape: bf16[256,256], index: 16, kind: input, shape index: {}]   ;;  %s12838_s17 = inlined_call_operand.hbm [shape: f32[1,256], index: 17, kind: input, shape index: {}]   ;;  %s12839_s18 = inlined_call_operand.vmem [shape: bf16[256,9], index: 18, kind: input, shape index: {}]   ;;  %s12840_s19 = inlined_call_operand.hbm [shape: f32[1,9], index: 19, kind: input, shape index: {}]   ;;  %s12841_s20 = inlined_call_operand.hbm [shape: bf16[256,256], index: 20, kind: input, shape index: {}]   ;;  %s12842_s21 = inlined_call_operand.hbm [shape: f32[1,256], index: 21, kind: input, shape index: {}]   ;;  %s12843_s22 = inlined_call_operand.hbm [shape: bf16[256,256], index: 22, kind: input, shape index: {}]   ;;  %s12844_s23 = inlined_call_operand.hbm [shape: f32[1,256], index: 23, kind: input, shape index: {}]   ;;  %s12845_s24 = inlined_call_operand.vmem [shape: bf16[256,9], index: 24, kind: input, shape index: {}]   ;;  %s12846_s25 = inlined_call_operand.hbm [shape: f32[1,9], index: 25, kind: input, shape index: {}]   ;;  %s12847_s26 = inlined_call_operand.vmem [shape: f32[16,9], index: 26, kind: output, shape index: {0}]   ;;  %s12848_s27 = inlined_call_operand.vmem [shape: f32[16,9], index: 27, kind: output, shape index: {1}]  }
   0x1   :  { %12895 = sst [smem:[#allocation49_spill]] %s12821_s0 }
   0x2   :  { %12896 = sst [smem:[#allocation50_spill]] %s12822_s1 }
   0x3   :  { %12897 = sst [smem:[#allocation51_spill]] %s12823_s2 }
   0x4   :  { %12898 = sst [smem:[#allocation52_spill]] %s12824_s3 }
   0x5   :  { %12899 = sst [smem:[#allocation53_spill]] %s12825_s4 }
   0x6   :  { %12900 = sst [smem:[#allocation54_spill]] %s12826_s5 }
   0x7   :  { %12901 = sst [smem:[#allocation55_spill]] %s12827_s6 }
   0x8   :  { %12902 = sst [smem:[#allocation56_spill]] %s12828_s7 }
   0x9   :  { %12903 = sst [smem:[#allocation57_spill]] %s12829_s8 }
   0xa   :  { %12904 = sst [smem:[#allocation58_spill]] %s12830_s9 }
   0xb   :  { %12905 = sst [smem:[#allocation59_spill]] %s12831_s10 }
   0xc   :  { %12906 = sst [smem:[#allocation60_spill]] %s12832_s11 }
   0xd   :  { %12907 = sst [smem:[#allocation61_spill]] %s12833_s12 }
   0xe   :  { %12908 = sst [smem:[#allocation62_spill]] %s12835_s14 }
   0xf   :  { %12909 = sst [smem:[#allocation63_spill]] %s12837_s16 }
  0x10   :  { %12910 = sst [smem:[#allocation64_spill]] %s12839_s18 }
  0x11   :  { %12911 = sst [smem:[#allocation65_spill]] %s12840_s19 }
  0x12   :  { %12912 = sst [smem:[#allocation66_spill]] %s12842_s21 }
  0x13   :  { %12913 = sst [smem:[#allocation67_spill]] %s12844_s23 }
  0x14   :  { %12914 = sst [smem:[#allocation68_spill]] %s12845_s24 }
  0x15   :  { %12915 = sst [smem:[#allocation69_spill]] %s12847_s26 }
  0x16   :  { %12916 = sst [smem:[#allocation70_spill]] %s12848_s27 }
  0x17   :  { %33 = vsyncpa [#allocation4], 0 }
  0x18   :  { %35 = vsyncpa [#allocation4 + $0x1], 0 }
  0x19   :  { %36 = vsyncpa [#allocation6], 0 }
  0x1a   :  { %38 = vsyncpa [#allocation6 + $0x1], 0 }
  0x1b   :  { %39 = vsyncpa [#allocation9], 0 }
  0x1c   :  { %41 = vsyncpa [#allocation9 + $0x1], 0 }
  0x1d   :  { %42 = vsyncpa [#allocation12], 0 }
  0x1e   :  { %44 = vsyncpa [#allocation12 + $0x1], 0 }
  0x1f   :  { %45 = vsyncpa [#allocation15], 0 }
  0x20   :  { %47 = vsyncpa [#allocation15 + $0x1], 0 }
  0x21   :  { %48 = vsyncpa [#allocation18], 0 }
  0x22   :  { %49 = vsyncpa [#allocation21], 0 }
  0x23   :  { %50 = vsyncpa [#allocation24], 0 }
  0x24   :  { %51 = vsyncpa [#allocation27], 0 }
  0x25   :  { %52 = vsyncpa [#allocation30], 0  ;;  %s11086_s7 = smov 0   ;;  %s11088_s4 = smov 0  }
  0x26   :  { %s11090_s8 = smov 0   ;;  %s11092_s30 = smov 0  }
  0x27 LB: > { %12917 = sst [smem:[#allocation42_spill]] %s10901_s4  ;;  %s10911_s9 = smov [#allocation17]   ;;  %s10909_s30 = sphi %s11092_s30, %s12997_s30   ;;  %s10905_s8 = sphi %s11090_s8, %s13000_s8   ;;  %s10901_s4 = sphi %s11088_s4, %s12999_s4   ;;  %s10897_s7 = sphi %s11086_s7, %s12998_s7  }
  0x28   : > { %12918 = sst [smem:[#allocation43_spill]] %s10905_s8  ;;  %s729_s5 = sshll.u32 %s10911_s9, 4  ;;  %s730_s5 = int_to_ptr.vmem [resolvable:$true] %s729_s5 }
  0x29   : > { %s11107_s28 = sadd.s32 4294967295, %s10909_s30   ;;  %p8091_p0 = scmp.ge.s32.totalorder %s10909_s30, 1 }
  0x2a   : > { %12919 = sst [smem:[#allocation44_spill]] %s11107_s28  ;;  %p12864_p1 = scmp.eq.s32.totalorder %s11107_s28, 0 }
  0x2b   : > { %p711_p2 = scmp.lt.s32.totalorder %s10909_s30, 5  ;;  %s10912_s10 = smov [#allocation20]  }
  0x2c   : > { %s753_s29 = sshll.u32 %s10912_s10, 4  ;;  %s10913_s6 = smov [#allocation23]   ;;  %s11125_s29 = int_to_ptr.vmem [resolvable:$true] %s753_s29 }
  0x2d   : > { %p11113_p4 = pnand %p8091_p0, %p711_p2  ;;  %s781_s11 = sshll.u32 %s10913_s6, 4  ;;  %s11127_s11 = int_to_ptr.vmem [resolvable:$true] %s781_s11 }
  0x2e   : > { %s10338_s3 = scalar_lea.vmem %s730_s5, 4096  ;;  %p10346_p11 = scmp.lt.s32.totalorder %s730_s5, %s730_s5 }
  0x2f   : > { %s12920_s0 = scalar_select %p11113_p4, 1, 0 }
  0x30   : > { %p9291_p5 = pneg %p11113_p4  ;;  %p10339_p8 = scmp.ne.s32.totalorder %s730_s5, %s10338_s3 }
  0x31   : > { %12921 = sst [smem:[#allocation45_spill]] %s12920_s0  ;;  %p10347_p12 = scmp.lt.s32.totalorder %s10338_s3, %s10338_s3 }
  0x32   : > { %p11121_p6 = pnand %p9291_p5, %p12864_p1 }
  0x33   : > { %p10348_p13 = por %p10347_p12, %p10346_p11 }
  0x34   : > { %s12922_s1 = scalar_select %p11121_p6, 1, 0 }
  0x35   : > { %p11131_p7 = pneg %p11121_p6 }
  0x37   : > { %s12923_s2 = scalar_select %p11131_p7, 1, 0 }
  0x38   : > { %p10341_p9 = pnand %p10339_p8, %p11131_p7 }
  0x3a   : > { %p10342_p10 = pneg %p10341_p9 }
  0x3c   : > { %p10349_p0 = pnand %p10348_p13, %p10342_p10 }
  0x3e   : > { %10352 = shalt.err (!%p10349_p0)
}
  0x3f   : > { %s12860_s9 = smov 128   ;;  %s12862_s10 = smov 8  }
  0x40   : > { %s12924_s14 = sld [smem:[#allocation62_spill]]  ;;  %s10364_s26 = scalar_lea.vmem %s11125_s29, 4096 }
  0x41   : > { %p10365_p2 = scmp.ne.s32.totalorder %s11125_s29, %s10364_s26  ;;  %p10372_p9 = scmp.lt.s32.totalorder %s11125_s29, %s11125_s29 }
  0x42   : > { %p10373_p10 = scmp.lt.s32.totalorder %s10364_s26, %s10364_s26 }
  0x43   : > { %p10367_p5 = pnand %p10365_p2, %p11131_p7 }
  0x44   : > { %p10374_p11 = por %p10373_p10, %p10372_p9 }
  0x45   : > { %p10368_p8 = pneg %p10367_p5 }
  0x46   : > { %9294 = dma.hbm_to_vmem [thread:$0]  (!%p11121_p6), %s12924_s14, 4096, %s730_s5, [#allocation18], %s12860_s9, %s12860_s9, %s12862_s10  }
  0x47   : > { %p10375_p12 = pnand %p10374_p11, %p10368_p8 }
  0x49   : > { %10378 = shalt.err (!%p10375_p12)
}
  0x4a   : > { %s12925_s16 = sld [smem:[#allocation63_spill]]  ;;  %s10390_s5 = scalar_lea.vmem %s11127_s11, 16 }
  0x4b   : > { %p10391_p13 = scmp.ne.s32.totalorder %s11127_s11, %s10390_s5  ;;  %s10397_s26 = scalar_lea.vmem %s11127_s11, 32 }
  0x4c   : > { %p10398_p5 = scmp.lt.s32.totalorder %s11127_s11, %s11127_s11  ;;  %p10399_p8 = scmp.lt.s32.totalorder %s10397_s26, %s10390_s5 }
  0x4d   : > { %p10393_p0 = pnand %p10391_p13, %p11131_p7 }
  0x4e   : > { %p10400_p9 = por %p10399_p8, %p10398_p5 }
  0x4f   : > { %p10394_p2 = pneg %p10393_p0 }
  0x50   : > { %9300 = dma.hbm_to_vmem [thread:$0]  (!%p11121_p6), %s12925_s16, 4096, %s11125_s29, [#allocation21], %s12860_s9, %s12860_s9, %s12862_s10  }
  0x51   : > { %p10401_p10 = pnand %p10400_p9, %p10394_p2 }
  0x53   : > { %10404 = shalt.err (!%p10401_p10)
}
  0x54   : > { %s12926_s19 = sld [smem:[#allocation65_spill]]  ;;  %s10916_s29 = smov [#allocation26]  }
  0x55   : > { %s805_s27 = sshll.u32 %s10916_s29, 4  ;;  %s10917_s9 = smov [#allocation29]   ;;  %s806_s27 = int_to_ptr.vmem [resolvable:$true] %s805_s27 }
  0x56   : > { %s829_s10 = sshll.u32 %s10917_s9, 4  ;;  %s10416_s14 = scalar_lea.vmem %s806_s27, 32  ;;  %s830_s10 = int_to_ptr.vmem [resolvable:$true] %s829_s10 }
  0x57   : > { %p10417_p11 = scmp.ne.s32.totalorder %s806_s27, %s10416_s14  ;;  %p10424_p0 = scmp.lt.s32.totalorder %s806_s27, %s806_s27 }
  0x58   : > { %p10425_p2 = scmp.lt.s32.totalorder %s10416_s14, %s10416_s14 }
  0x59   : > { %p10419_p12 = pnand %p10417_p11, %p11131_p7 }
  0x5a   : > { %9306 = dma.hbm_to_vmem [thread:$0]  (!%p11121_p6), %s12926_s19, 16, %s11127_s11, [#allocation24]  }
  0x5b   : > { %p10420_p13 = pneg %p10419_p12  ;;  %p10426_p5 = por %p10425_p2, %p10424_p0 }
  0x5d   : > { %p10427_p8 = pnand %p10426_p5, %p10420_p13 }
  0x5f   : > { %10430 = shalt.err (!%p10427_p8)
}
  0x60   : > { %s12927_s21 = sld [smem:[#allocation66_spill]]  ;;  %s10442_s11 = scalar_lea.vmem %s830_s10, 32 }
  0x61   : > { %p10443_p9 = scmp.ne.s32.totalorder %s830_s10, %s10442_s11  ;;  %p10450_p11 = scmp.lt.s32.totalorder %s830_s10, %s830_s10 }
  0x62   : > { %p10451_p12 = scmp.lt.s32.totalorder %s10442_s11, %s10442_s11 }
  0x63   : > { %p10445_p10 = pnand %p10443_p9, %p11131_p7 }
  0x64   : > { %p10452_p1 = por %p10451_p12, %p10450_p11 }
  0x65   : > { %p10446_p3 = pneg %p10445_p10 }
  0x66   : > { %9312 = dma.hbm_to_vmem [thread:$0]  (!%p11121_p6), %s12927_s21, 32, %s806_s27, [#allocation27]  }
  0x67   : > { %p10453_p4 = pnand %p10452_p1, %p10446_p3 }
  0x69   : > { %10456 = shalt.err (!%p10453_p4)
}
  0x6a   : > { %s12928_s23 = sld [smem:[#allocation67_spill]]  ;;  %s11188_s6 = sadd.s32 1, %s10909_s30  }
  0x6b   : > { %12929 = sst [smem:[#allocation46_spill]] %s11188_s6  ;;  %s104_s3 = ssub.s32 %s10909_s30, %s11188_s6 }
  0x6c   : > { %s107_s29 = sadd.s32 1, %s10905_s8  ;;  %p105_p1 = scmp.eq.s32.totalorder %s104_s3, 0 }
  0x6d   : > { %p114_p3 = scmp.ne.s32.totalorder %s10905_s8, %s10901_s4  ;;  %p115_p4 = scmp.eq.s32.totalorder %s10909_s30, 0 }
  0x6e   : > { %p120_p13 = scmp.ne.s32.totalorder %s10901_s4, %s10897_s7  ;;  %p12931_p2 = scmp.eq.s32.totalorder %s11107_s28, 0 }
  0x6f   : > { %s11199_s27 = scalar_select %p105_p1, %s10905_s8, %s107_s29  }
  0x70   : > { %9318 = dma.hbm_to_vmem [thread:$0]  (!%p11121_p6), %s12928_s23, 32, %s830_s10, [#allocation30]  }
  0x71   : > { %12930 = sst [smem:[#allocation47_spill]] %s11199_s27  ;;  %p116_p0 = por %p115_p4, %p114_p3 }
  0x72   : > { %p11203_p5 = por %p12931_p2, %p120_p13  ;;  %p9360_p8 = scmp.lt.s32.totalorder %s10909_s30, 4 }
  0x73   : > { %s11209_s10 = sand.u32 1, %s10905_s8   ;;  %s11212_s26 = sand.u32 1, %s10909_s30  }
  0x74   : > { %s12932_s5 = scalar_select %p11203_p5, 1, 0 }
  0x75   : > { %s9229_s11 = smul.u32 12, %s11209_s10  ;;  %p11215_p9 = pnand %p9360_p8, %p116_p0 }
  0x76   : > { %12933 = sst [smem:[#allocation48_spill]] %s12932_s5  ;;  %s9230_s7 = smul.u32 192, %s10909_s30 }
  0x77   : > { %s12934_s14 = scalar_select %p11215_p9, 1, 0 }
  0x78   : > { %s880_s9 = scalar_lea.vmem [#allocation5], %s9229_s11  ;;  %s12935_s19 = sld [smem:[#allocation52_spill]] }
  0x79   : > { %s888_s3 = sshll.u32 %s880_s9, 4  ;;  %p11232_p11 = pneg %p11215_p9  ;;  %s11225_s3 = int_to_ptr.vmem [resolvable:$true] %s888_s3 }
  0x7b   : > { %s12936_s8 = scalar_select %p11232_p11, 1, 0 }
  0x7e   : > { %s11223_s21 = scalar_lea.hbm %s12935_s19, %s9230_s7  ;;  %s10462_s7 = scalar_lea.hbm %s12935_s19, 768 }
  0x7f   : > { %s10457_s27 = scalar_lea.hbm %s11223_s21, 192  ;;  %p10463_p3 = scmp.lt.s32.totalorder %s11223_s21, %s12935_s19 }
  0x80   : > { %p10458_p10 = scmp.ne.s32.totalorder %s11223_s21, %s10457_s27  ;;  %p10464_p4 = scmp.lt.s32.totalorder %s10462_s7, %s10457_s27 }
  0x82   : > { %p10460_p12 = pnand %p11232_p11, %p10458_p10  ;;  %p10465_p13 = por %p10464_p4, %p10463_p3 }
  0x84   : > { %p10461_p1 = pneg %p10460_p12 }
  0x86   : > { %p10466_p0 = pnand %p10465_p13, %p10461_p1 }
  0x88   : > { %10469 = shalt.err (!%p10466_p0)
}
  0x89   : > { %s10470_s23 = scalar_lea.vmem %s11225_s3, 192  ;;  %s10918_s6 = smov [#allocation5]  }
  0x8a   : > { %p10471_p2 = scmp.ne.s32.totalorder %s11225_s3, %s10470_s23  ;;  %s10475_s16 = sshll.u32 %s10918_s6, 4  ;;  %s10476_s16 = int_to_ptr.vmem [resolvable:$false] %s10475_s16 }
  0x8b   : > { %s10477_s11 = scalar_lea.vmem %s10476_s16, 384  ;;  %p10478_p12 = scmp.lt.s32.totalorder %s11225_s3, %s10476_s16 }
  0x8c   : > { %p10473_p8 = pnand %p10471_p2, %p11232_p11  ;;  %p10479_p5 = scmp.lt.s32.totalorder %s10477_s11, %s10470_s23 }
  0x8e   : > { %p10474_p10 = pneg %p10473_p8  ;;  %p10480_p6 = por %p10479_p5, %p10478_p12 }
  0x90   : > { %p10481_p7 = pnand %p10480_p6, %p10474_p10 }
  0x92   : > { %10484 = shalt.err (!%p10481_p7)
}
  0x93   : > { %s10919_s27 = smov 96   ;;  %s10920_s7 = smov 6  }
  0x94   : > { %s12937_s9 = scalar_lea.sflag [#allocation6], %s11212_s26  ;;  %s11257_s6 = sshll.u32 %s11209_s10, 2 }
  0x95   : > { %9328 = dma.hbm_to_vmem [thread:$0]  (!%p11215_p9), %s11223_s21, 192, %s11225_s3, %s12937_s9, %s10919_s27, %s10919_s27, %s10920_s7  }
  0x96   : > { %s11260_s23 = sshll.u32 %s10909_s30, 6  ;;  %s12938_s11 = sld [smem:[#allocation55_spill]] }
  0x97   : > { %s934_s24 = scalar_lea.vmem [#allocation8], %s11257_s6  ;;  %s12884_s28 = scalar_lea.sflag [#allocation9], %s11212_s26 }
  0x98   : > { %s942_s18 = sshll.u32 %s934_s24, 4  ;;  %s11269_s18 = int_to_ptr.vmem [resolvable:$true] %s942_s18 }
  0x9c   : > { %s11266_s19 = scalar_lea.hbm %s12938_s11, %s11260_s23  ;;  %s10490_s7 = scalar_lea.hbm %s12938_s11, 256 }
  0x9d   : > { %s10485_s21 = scalar_lea.hbm %s11266_s19, 64  ;;  %p10491_p1 = scmp.lt.s32.totalorder %s11266_s19, %s12938_s11 }
  0x9e   : > { %p10486_p6 = scmp.ne.s32.totalorder %s11266_s19, %s10485_s21  ;;  %p10492_p3 = scmp.lt.s32.totalorder %s10490_s7, %s10485_s21 }
  0xa0   : > { %p10488_p7 = pnand %p10486_p6, %p11232_p11  ;;  %p10493_p4 = por %p10492_p3, %p10491_p1 }
  0xa2   : > { %p10489_p5 = pneg %p10488_p7 }
  0xa4   : > { %p10494_p13 = pnand %p10493_p4, %p10489_p5 }
  0xa6   : > { %10497 = shalt.err (!%p10494_p13)
}
  0xa7   : > { %s10498_s24 = scalar_lea.vmem %s11269_s18, 64  ;;  %s10921_s16 = smov [#allocation8]  }
  0xa8   : > { %p10499_p0 = scmp.ne.s32.totalorder %s11269_s18, %s10498_s24  ;;  %s10503_s3 = sshll.u32 %s10921_s16, 4  ;;  %s10504_s3 = int_to_ptr.vmem [resolvable:$false] %s10503_s3 }
  0xa9   : > { %s10505_s27 = scalar_lea.vmem %s10504_s3, 128  ;;  %p10506_p10 = scmp.lt.s32.totalorder %s11269_s18, %s10504_s3 }
  0xaa   : > { %p10501_p2 = pnand %p10499_p0, %p11232_p11  ;;  %p10507_p12 = scmp.lt.s32.totalorder %s10505_s27, %s10498_s24 }
  0xac   : > { %p10502_p8 = pneg %p10501_p2  ;;  %p10508_p6 = por %p10507_p12, %p10506_p10 }
  0xae   : > { %p10509_p7 = pnand %p10508_p6, %p10502_p8 }
  0xb0   : > { %10512 = shalt.err (!%p10509_p7)
}
  0xb1   : > { %s12885_s21 = smov 32   ;;  %s10923_s7 = smov 2  }
  0xb2   : > { %9334 = dma.hbm_to_vmem [thread:$0]  (!%p11215_p9), %s11266_s19, 64, %s11269_s18, %s12884_s28, %s12885_s21, %s12885_s21, %s10923_s7  }
  0xb3   : > { %s8121_s9 = sshll.u32 %s11209_s10, 1  ;;  %s8873_s29 = sshll.u32 %s10909_s30, 5 }
  0xb4   : > { %s12939_s3 = sld [smem:[#allocation58_spill]]  ;;  %s988_s11 = scalar_lea.vmem [#allocation11], %s8121_s9 }
  0xb5   : > { %s995_s5 = sshll.u32 %s988_s11, 4  ;;  %s12892_s4 = scalar_lea.sflag [#allocation12], %s11212_s26  ;;  %s11304_s5 = int_to_ptr.vmem [resolvable:$true] %s995_s5 }
  0xba   : > { %s11302_s27 = scalar_lea.hbm %s12939_s3, %s8873_s29  ;;  %s10518_s28 = scalar_lea.hbm %s12939_s3, 128 }
  0xbb   : > { %s10513_s0 = scalar_lea.hbm %s11302_s27, 32  ;;  %p10519_p4 = scmp.lt.s32.totalorder %s11302_s27, %s12939_s3 }
  0xbc   : > { %p10514_p5 = scmp.ne.s32.totalorder %s11302_s27, %s10513_s0  ;;  %p10520_p13 = scmp.lt.s32.totalorder %s10518_s28, %s10513_s0 }
  0xbe   : > { %p10516_p1 = pnand %p10514_p5, %p11232_p11  ;;  %p10521_p0 = por %p10520_p13, %p10519_p4 }
  0xc0   : > { %p10517_p3 = pneg %p10516_p1 }
  0xc2   : > { %p10522_p2 = pnand %p10521_p0, %p10517_p3 }
  0xc4   : > { %10525 = shalt.err (!%p10522_p2)
}
  0xc5   : > { %s10526_s11 = scalar_lea.vmem %s11304_s5, 32  ;;  %s10924_s9 = smov [#allocation11]  }
  0xc6   : > { %p10527_p8 = scmp.ne.s32.totalorder %s11304_s5, %s10526_s11  ;;  %s10531_s16 = sshll.u32 %s10924_s9, 4  ;;  %s10532_s16 = int_to_ptr.vmem [resolvable:$false] %s10531_s16 }
  0xc7   : > { %s10533_s18 = scalar_lea.vmem %s10532_s16, 64  ;;  %p10534_p6 = scmp.lt.s32.totalorder %s11304_s5, %s10532_s16 }
  0xc8   : > { %p10529_p10 = pnand %p10527_p8, %p11232_p11  ;;  %p10535_p7 = scmp.lt.s32.totalorder %s10533_s18, %s10526_s11 }
  0xca   : > { %p10530_p12 = pneg %p10529_p10  ;;  %p10536_p5 = por %p10535_p7, %p10534_p6 }
  0xcc   : > { %p10537_p1 = pnand %p10536_p5, %p10530_p12 }
  0xce   : > { %10540 = shalt.err (!%p10537_p1)
}
  0xcf   : > { %s10925_s28 = smov 16   ;;  %s10926_s0 = smov 1  }
  0xd0   : > { %9340 = dma.hbm_to_vmem [thread:$0]  (!%p11215_p9), %s11302_s27, 32, %s11304_s5, %s12892_s4, %s10925_s28, %s10925_s28, %s10926_s0  }
  0xd1   : > { %s12940_s12 = sld [smem:[#allocation61_spill]]  ;;  %s1041_s11 = scalar_lea.vmem [#allocation14], %s11257_s6 }
  0xd2   : > { %s1049_s9 = sshll.u32 %s1041_s11, 4  ;;  %s12891_s16 = scalar_lea.sflag [#allocation15], %s11212_s26  ;;  %s11336_s9 = int_to_ptr.vmem [resolvable:$true] %s1049_s9 }
  0xd7   : > { %s11333_s29 = scalar_lea.hbm %s12940_s12, %s11260_s23  ;;  %s10546_s27 = scalar_lea.hbm %s12940_s12, 256 }
  0xd8   : > { %s10541_s18 = scalar_lea.hbm %s11333_s29, 64  ;;  %p10547_p0 = scmp.lt.s32.totalorder %s11333_s29, %s12940_s12 }
  0xd9   : > { %p10542_p3 = scmp.ne.s32.totalorder %s11333_s29, %s10541_s18  ;;  %p10548_p2 = scmp.lt.s32.totalorder %s10546_s27, %s10541_s18 }
  0xdb   : > { %p10544_p4 = pnand %p10542_p3, %p11232_p11  ;;  %p10549_p8 = por %p10548_p2, %p10547_p0 }
  0xdd   : > { %p10545_p13 = pneg %p10544_p4 }
  0xdf   : > { %p10550_p10 = pnand %p10549_p8, %p10545_p13 }
  0xe1   : > { %10553 = shalt.err (!%p10550_p10)
}
  0xe2   : > { %s10554_s19 = scalar_lea.vmem %s11336_s9, 64  ;;  %s10927_s24 = smov [#allocation14]  }
  0xe3   : > { %p10555_p12 = scmp.ne.s32.totalorder %s11336_s9, %s10554_s19  ;;  %s10559_s21 = sshll.u32 %s10927_s24, 4  ;;  %s10560_s21 = int_to_ptr.vmem [resolvable:$false] %s10559_s21 }
  0xe4   : > { %s10561_s11 = scalar_lea.vmem %s10560_s21, 128  ;;  %p10562_p5 = scmp.lt.s32.totalorder %s11336_s9, %s10560_s21 }
  0xe5   : > { %p10557_p6 = pnand %p10555_p12, %p11232_p11  ;;  %p10563_p1 = scmp.lt.s32.totalorder %s10561_s11, %s10554_s19 }
  0xe7   : > { %p10558_p7 = pneg %p10557_p6  ;;  %p10564_p3 = por %p10563_p1, %p10562_p5 }
  0xe9   : > { %p10565_p4 = pnand %p10564_p3, %p10558_p7 }
  0xeb   : > { %10568 = shalt.err (!%p10565_p4)
}
  0xec   : > { %s12941_s18 = smov 32   ;;  %s10928_s5 = smov [#allocation19]  }
  0xed   : > { %9346 = dma.hbm_to_vmem [thread:$0]  (!%p11215_p9), %s11333_s29, 64, %s11336_s9, %s12891_s16, %s12941_s18, %s12941_s18, %s10923_s7  }
  0xee   : > { %s743_s27 = sshll.u32 %s10928_s5, 4  ;;  %s10929_s28 = smov [#allocation22]   ;;  %s744_s27 = int_to_ptr.vmem [resolvable:$true] %s743_s27 }
  0xef   : > { %s767_s0 = sshll.u32 %s10929_s28, 4  ;;  %s10580_s19 = scalar_lea.vmem %s744_s27, 32  ;;  %s768_s0 = int_to_ptr.vmem [resolvable:$true] %s767_s0 }
  0xf0   : > { %p10581_p13 = scmp.ne.s32.totalorder %s744_s27, %s10580_s19  ;;  %p12942_p0 = scmp.ne.s32.totalorder %s12923_s2, 0 }
  0xf1   : > { %p10588_p10 = scmp.lt.s32.totalorder %s744_s27, %s744_s27  ;;  %p10589_p12 = scmp.lt.s32.totalorder %s10580_s19, %s10580_s19 }
  0xf2   : > { %p10583_p2 = pnand %p10581_p13, %p12942_p0 }
  0xf3   : > { %p10590_p6 = por %p10589_p12, %p10588_p10 }
  0xf4   : > { %p10584_p8 = pneg %p10583_p2 }
  0xf6   : > { %p10591_p7 = pnand %p10590_p6, %p10584_p8 }
  0xf8   : > { %10594 = shalt.err (!%p10591_p7)
}
  0xf9   : > { %p12943_p5 = scmp.ne.s32.totalorder %s12922_s1, 0  ;;  %s10606_s29 = scalar_lea.vmem %s768_s0, 32 }
  0xfa   : > { %p10607_p1 = scmp.ne.s32.totalorder %s768_s0, %s10606_s29  ;;  %p10614_p13 = scmp.lt.s32.totalorder %s768_s0, %s768_s0 }
  0xfb   : > { %9297 = dma.hbm_to_vmem [thread:$0]  (!%p12943_p5), %s12836_s15, 32, %s744_s27, [#allocation18]  }
  0xfc   : > { %p10609_p3 = pnand %p10607_p1, %p12942_p0  ;;  %p10615_p2 = scmp.lt.s32.totalorder %s10606_s29, %s10606_s29 }
  0xfe   : > { %p10610_p4 = pneg %p10609_p3  ;;  %p10616_p9 = por %p10615_p2, %p10614_p13 }
 0x100   : > { %p10617_p11 = pnand %p10616_p9, %p10610_p4 }
 0x102   : > { %10620 = shalt.err (!%p10617_p11)
}
 0x103   : > { %9303 = dma.hbm_to_vmem [thread:$0]  (!%p12943_p5), %s12838_s17, 32, %s768_s0, [#allocation21]  }
 0x104   : > { %s10930_s5 = smov [#allocation25]   ;;  %s10931_s28 = smov [#allocation28]  }
 0x105   : > { %s791_s27 = sshll.u32 %s10930_s5, 4  ;;  %s815_s19 = sshll.u32 %s10931_s28, 4  ;;  %s792_s27 = int_to_ptr.vmem [resolvable:$true] %s791_s27  ;;  %s816_s19 = int_to_ptr.vmem [resolvable:$true] %s815_s19 }
 0x106   : > { %s10632_s24 = scalar_lea.vmem %s792_s27, 4096  ;;  %p10640_p6 = scmp.lt.s32.totalorder %s792_s27, %s792_s27 }
 0x107   : > { %p10633_p8 = scmp.ne.s32.totalorder %s792_s27, %s10632_s24  ;;  %p10641_p9 = scmp.lt.s32.totalorder %s10632_s24, %s10632_s24 }
 0x109   : > { %p10635_p10 = pnand %p10633_p8, %p12942_p0  ;;  %p10642_p11 = por %p10641_p9, %p10640_p6 }
 0x10b   : > { %p10636_p12 = pneg %p10635_p10 }
 0x10d   : > { %p10643_p7 = pnand %p10642_p11, %p10636_p12 }
 0x10f   : > { %10646 = shalt.err (!%p10643_p7)
}
 0x110   : > { %s12944_s21 = smov 8   ;;  %s12945_s29 = smov 128  }
 0x111   : > { %9309 = dma.hbm_to_vmem [thread:$0]  (!%p12943_p5), %s12841_s20, 4096, %s792_s27, [#allocation24], %s12945_s29, %s12945_s29, %s12944_s21  }
 0x112   : > { %s10658_s11 = scalar_lea.vmem %s816_s19, 4096  ;;  %p10666_p13 = scmp.lt.s32.totalorder %s816_s19, %s816_s19 }
 0x113   : > { %p10659_p1 = scmp.ne.s32.totalorder %s816_s19, %s10658_s11  ;;  %p10667_p2 = scmp.lt.s32.totalorder %s10658_s11, %s10658_s11 }
 0x115   : > { %p10661_p3 = pnand %p10659_p1, %p12942_p0  ;;  %p10668_p8 = por %p10667_p2, %p10666_p13 }
 0x117   : > { %p10662_p4 = pneg %p10661_p3 }
 0x119   : > { %p10669_p10 = pnand %p10668_p8, %p10662_p4 }
 0x11b   : > { %10672 = shalt.err (!%p10669_p10)
}
 0x11c   : > { %9315 = dma.hbm_to_vmem [thread:$0]  (!%p12943_p5), %s12843_s22, 4096, %s816_s19, [#allocation27], %s12945_s29, %s12945_s29, %s12944_s21  }
 0x11d   : > { %s10932_s27 = smov [#allocation31]   ;;  %s9227_s0 = smul.u32 1536, %s11209_s10 }
 0x11e   : > { %s843_s24 = sshll.u32 %s10932_s27, 4  ;;  %s844_s24 = int_to_ptr.vmem [resolvable:$true] %s843_s24 }
 0x11f   : > { %s10684_s9 = scalar_lea.vmem %s844_s24, 16  ;;  %s10691_s11 = scalar_lea.vmem %s844_s24, 32 }
 0x120   : > { %p10685_p12 = scmp.ne.s32.totalorder %s844_s24, %s10684_s9  ;;  %p10692_p11 = scmp.lt.s32.totalorder %s844_s24, %s844_s24 }
 0x121   : > { %p10693_p7 = scmp.lt.s32.totalorder %s10691_s11, %s10684_s9 }
 0x122   : > { %p10687_p6 = pnand %p10685_p12, %p12942_p0 }
 0x123   : > { %p10694_p1 = por %p10693_p7, %p10692_p11 }
 0x124   : > { %p10688_p9 = pneg %p10687_p6 }
 0x126   : > { %p10695_p3 = pnand %p10694_p1, %p10688_p9 }
 0x128   : > { %10698 = shalt.err (!%p10695_p3)
}
 0x129   : > { %9321 = dma.hbm_to_vmem [thread:$0]  (!%p12943_p5), %s12846_s25, 16, %s844_s24, [#allocation30]  }
 0x12a   : > { %s9228_s19 = smul.u32 24576, %s10909_s30  ;;  %s858_s21 = scalar_lea.vmem [#allocation3], %s9227_s0 }
 0x12b   : > { %s866_s2 = sshll.u32 %s858_s21, 4  ;;  %s12946_s16 = sld [smem:[#allocation51_spill]]  ;;  %s11412_s2 = int_to_ptr.vmem [resolvable:$true] %s866_s2 }
 0x12c   : > { %s855_s1 = scalar_lea.sflag [#allocation4], %s11209_s10  ;;  %p12947_p4 = scmp.ne.s32.totalorder %s12936_s8, 0 }
 0x131   : > { %s11410_s4 = scalar_lea.hbm %s12946_s16, %s9228_s19  ;;  %s10704_s0 = scalar_lea.hbm %s12946_s16, 98304 }
 0x132   : > { %s10699_s9 = scalar_lea.hbm %s11410_s4, 24576  ;;  %p10705_p5 = scmp.lt.s32.totalorder %s11410_s4, %s12946_s16 }
 0x133   : > { %p10700_p0 = scmp.ne.s32.totalorder %s11410_s4, %s10699_s9  ;;  %p10706_p8 = scmp.lt.s32.totalorder %s10704_s0, %s10699_s9 }
 0x135   : > { %p10702_p13 = pnand %p10700_p0, %p12947_p4  ;;  %p10707_p10 = por %p10706_p8, %p10705_p5 }
 0x137   : > { %p10703_p2 = pneg %p10702_p13 }
 0x139   : > { %p10708_p12 = pnand %p10707_p10, %p10703_p2 }
 0x13b   : > { %10711 = shalt.err (!%p10708_p12)
}
 0x13c   : > { %s10712_s28 = scalar_lea.vmem %s11412_s2, 24576  ;;  %s10933_s19 = smov [#allocation3]  }
 0x13d   : > { %p10713_p6 = scmp.ne.s32.totalorder %s11412_s2, %s10712_s28  ;;  %s10717_s21 = sshll.u32 %s10933_s19, 4  ;;  %s10718_s21 = int_to_ptr.vmem [resolvable:$false] %s10717_s21 }
 0x13e   : > { %s10719_s29 = scalar_lea.vmem %s10718_s21, 49152  ;;  %p10720_p7 = scmp.lt.s32.totalorder %s11412_s2, %s10718_s21 }
 0x13f   : > { %p10715_p9 = pnand %p10713_p6, %p12947_p4  ;;  %p10721_p1 = scmp.lt.s32.totalorder %s10719_s29, %s10712_s28 }
 0x141   : > { %p10716_p11 = pneg %p10715_p9  ;;  %p10722_p3 = por %p10721_p1, %p10720_p7 }
 0x143   : > { %p10723_p0 = pnand %p10722_p3, %p10716_p11 }
 0x145   : > { %10726 = shalt.err (!%p10723_p0)
}
 0x146   : > { %s10934_s27 = smov 384   ;;  %s10935_s9 = smov 24  }
 0x147   : > { %p12948_p13 = scmp.ne.s32.totalorder %s12934_s14, 0  ;;  %s12949_s0 = sld [smem:[#allocation54_spill]] }
 0x148   : > { %s912_s5 = scalar_lea.vmem [#allocation7], %s11257_s6 }
 0x149   : > { %9325 = dma.hbm_to_vmem [thread:$0]  (!%p12948_p13), %s11410_s4, 24576, %s11412_s2, %s855_s1, %s10934_s27, %s10934_s27, %s10935_s9  }
 0x14a   : > { %s920_s28 = sshll.u32 %s912_s5, 4  ;;  %s921_s28 = int_to_ptr.vmem [resolvable:$true] %s920_s28 }
 0x14d   : > { %s11441_s11 = scalar_lea.hbm %s12949_s0, %s11260_s23  ;;  %s10732_s4 = scalar_lea.hbm %s12949_s0, 256 }
 0x14e   : > { %s10727_s19 = scalar_lea.hbm %s11441_s11, 64  ;;  %p10733_p10 = scmp.lt.s32.totalorder %s11441_s11, %s12949_s0 }
 0x14f   : > { %p10728_p2 = scmp.ne.s32.totalorder %s11441_s11, %s10727_s19  ;;  %p10734_p12 = scmp.lt.s32.totalorder %s10732_s4, %s10727_s19 }
 0x151   : > { %p10730_p5 = pnand %p10728_p2, %p12947_p4  ;;  %p10735_p6 = por %p10734_p12, %p10733_p10 }
 0x153   : > { %p10731_p8 = pneg %p10730_p5 }
 0x155   : > { %p10736_p9 = pnand %p10735_p6, %p10731_p8 }
 0x157   : > { %10739 = shalt.err (!%p10736_p9)
}
 0x158   : > { %s10740_s1 = scalar_lea.vmem %s921_s28, 64  ;;  %s10936_s27 = smov [#allocation7]  }
 0x159   : > { %p10741_p11 = scmp.ne.s32.totalorder %s921_s28, %s10740_s1  ;;  %s10745_s9 = sshll.u32 %s10936_s27, 4  ;;  %s10746_s9 = int_to_ptr.vmem [resolvable:$false] %s10745_s9 }
 0x15a   : > { %s10747_s24 = scalar_lea.vmem %s10746_s9, 128  ;;  %p10748_p3 = scmp.lt.s32.totalorder %s921_s28, %s10746_s9 }
 0x15b   : > { %p10743_p7 = pnand %p10741_p11, %p12947_p4  ;;  %p10749_p0 = scmp.lt.s32.totalorder %s10747_s24, %s10740_s1 }
 0x15d   : > { %p10744_p1 = pneg %p10743_p7  ;;  %p10750_p2 = por %p10749_p0, %p10748_p3 }
 0x15f   : > { %p10751_p5 = pnand %p10750_p2, %p10744_p1 }
 0x161   : > { %10754 = shalt.err (!%p10751_p5)
}
 0x162   : > { %s12950_s30 = scalar_lea.sflag [#allocation6], %s11212_s26  ;;  %s12951_s21 = sld [smem:[#allocation56_spill]] }
 0x163   : > { %9331 = dma.hbm_to_vmem [thread:$0]  (!%p12948_p13), %s11441_s11, 64, %s921_s28, %s12950_s30, %s12941_s18, %s12941_s18, %s10923_s7  }
 0x164   : > { %s956_s4 = scalar_lea.vmem [#allocation10], %s11257_s6 }
 0x165   : > { %s964_s10 = sshll.u32 %s956_s4, 4  ;;  %s965_s10 = int_to_ptr.vmem [resolvable:$true] %s964_s10 }
 0x168   : > { %s11469_s29 = scalar_lea.hbm %s12951_s21, %s11260_s23  ;;  %s10760_s11 = scalar_lea.hbm %s12951_s21, 256 }
 0x169   : > { %s10755_s2 = scalar_lea.hbm %s11469_s29, 64  ;;  %p10761_p6 = scmp.lt.s32.totalorder %s11469_s29, %s12951_s21 }
 0x16a   : > { %p10756_p8 = scmp.ne.s32.totalorder %s11469_s29, %s10755_s2  ;;  %p10762_p9 = scmp.lt.s32.totalorder %s10760_s11, %s10755_s2 }
 0x16c   : > { %p10758_p10 = pnand %p10756_p8, %p12947_p4  ;;  %p10763_p11 = por %p10762_p9, %p10761_p6 }
 0x16e   : > { %p10759_p12 = pneg %p10758_p10 }
 0x170   : > { %p10764_p7 = pnand %p10763_p11, %p10759_p12 }
 0x172   : > { %10767 = shalt.err (!%p10764_p7)
}
 0x173   : > { %s10768_s24 = scalar_lea.vmem %s965_s10, 64  ;;  %s10937_s30 = smov [#allocation10]  }
 0x174   : > { %p10769_p1 = scmp.ne.s32.totalorder %s965_s10, %s10768_s24  ;;  %s10773_s5 = sshll.u32 %s10937_s30, 4  ;;  %s10774_s5 = int_to_ptr.vmem [resolvable:$false] %s10773_s5 }
 0x175   : > { %s10775_s19 = scalar_lea.vmem %s10774_s5, 128  ;;  %p10776_p2 = scmp.lt.s32.totalorder %s965_s10, %s10774_s5 }
 0x176   : > { %p10771_p3 = pnand %p10769_p1, %p12947_p4  ;;  %p10777_p5 = scmp.lt.s32.totalorder %s10775_s19, %s10768_s24 }
 0x178   : > { %p10772_p0 = pneg %p10771_p3  ;;  %p10778_p8 = por %p10777_p5, %p10776_p2 }
 0x17a   : > { %p10779_p10 = pnand %p10778_p8, %p10772_p0 }
 0x17c   : > { %10782 = shalt.err (!%p10779_p10)
}
 0x17d   : > { %s12952_s4 = scalar_lea.sflag [#allocation9], %s11212_s26  ;;  %s12953_s27 = sld [smem:[#allocation60_spill]] }
 0x17e   : > { %9337 = dma.hbm_to_vmem [thread:$0]  (!%p12948_p13), %s11469_s29, 64, %s965_s10, %s12952_s4, %s12941_s18, %s12941_s18, %s10923_s7  }
 0x17f   : > { %s1019_s28 = scalar_lea.vmem [#allocation13], %s11257_s6 }
 0x180   : > { %s1027_s9 = sshll.u32 %s1019_s28, 4  ;;  %s1028_s9 = int_to_ptr.vmem [resolvable:$true] %s1027_s9 }
 0x183   : > { %s11497_s11 = scalar_lea.hbm %s12953_s27, %s11260_s23  ;;  %s10788_s29 = scalar_lea.hbm %s12953_s27, 256 }
 0x184   : > { %s10783_s24 = scalar_lea.hbm %s11497_s11, 64  ;;  %p10789_p11 = scmp.lt.s32.totalorder %s11497_s11, %s12953_s27 }
 0x185   : > { %p10784_p12 = scmp.ne.s32.totalorder %s11497_s11, %s10783_s24  ;;  %p10790_p7 = scmp.lt.s32.totalorder %s10788_s29, %s10783_s24 }
 0x187   : > { %p10786_p6 = pnand %p10784_p12, %p12947_p4  ;;  %p10791_p1 = por %p10790_p7, %p10789_p11 }
 0x189   : > { %p10787_p9 = pneg %p10786_p6 }
 0x18b   : > { %p10792_p3 = pnand %p10791_p1, %p10787_p9 }
 0x18d   : > { %10795 = shalt.err (!%p10792_p3)
}
 0x18e   : > { %s10796_s4 = scalar_lea.vmem %s1028_s9, 64  ;;  %s10938_s2 = smov [#allocation13]  }
 0x18f   : > { %p10797_p0 = scmp.ne.s32.totalorder %s1028_s9, %s10796_s4  ;;  %s10801_s1 = sshll.u32 %s10938_s2, 4  ;;  %s10802_s1 = int_to_ptr.vmem [resolvable:$false] %s10801_s1 }
 0x190   : > { %s10803_s28 = scalar_lea.vmem %s10802_s1, 128  ;;  %p10804_p8 = scmp.lt.s32.totalorder %s1028_s9, %s10802_s1 }
 0x191   : > { %p10799_p2 = pnand %p10797_p0, %p12947_p4  ;;  %p10805_p10 = scmp.lt.s32.totalorder %s10803_s28, %s10796_s4 }
 0x193   : > { %p10800_p5 = pneg %p10799_p2  ;;  %p10806_p12 = por %p10805_p10, %p10804_p8 }
 0x195   : > { %p10807_p6 = pnand %p10806_p12, %p10800_p5 }
 0x197   : > { %10810 = shalt.err (!%p10807_p6)
}
 0x198   : > { %s12954_s24 = scalar_lea.sflag [#allocation12], %s11212_s26  ;;  %s11525_s29 = scalar_lea.hbm %s12834_s13, %s11260_s23 }
 0x199   : > { %9343 = dma.hbm_to_vmem [thread:$0]  (!%p12948_p13), %s11497_s11, 64, %s1028_s9, %s12954_s24, %s12941_s18, %s12941_s18, %s10923_s7  }
 0x19a   : > { %s1063_s10 = scalar_lea.vmem [#allocation16], %s11257_s6  ;;  %s10811_s4 = scalar_lea.hbm %s11525_s29, 64 }
 0x19b   : > { %s1071_s19 = sshll.u32 %s1063_s10, 4  ;;  %p10812_p9 = scmp.ne.s32.totalorder %s11525_s29, %s10811_s4  ;;  %s1072_s19 = int_to_ptr.vmem [resolvable:$true] %s1071_s19 }
 0x19c   : > { %s10816_s11 = scalar_lea.hbm %s12834_s13, 256  ;;  %p10817_p1 = scmp.lt.s32.totalorder %s11525_s29, %s12834_s13 }
 0x19d   : > { %p10814_p11 = pnand %p10812_p9, %p12947_p4  ;;  %p10818_p3 = scmp.lt.s32.totalorder %s10816_s11, %s10811_s4 }
 0x19f   : > { %p10815_p7 = pneg %p10814_p11  ;;  %p10819_p0 = por %p10818_p3, %p10817_p1 }
 0x1a1   : > { %p10820_p2 = pnand %p10819_p0, %p10815_p7 }
 0x1a3   : > { %10823 = shalt.err (!%p10820_p2)
}
 0x1a4   : > { %s10824_s6 = scalar_lea.vmem %s1072_s19, 64  ;;  %s10939_s23 = smov [#allocation16]  }
 0x1a5   : > { %p10825_p5 = scmp.ne.s32.totalorder %s1072_s19, %s10824_s6  ;;  %s10829_s24 = sshll.u32 %s10939_s23, 4  ;;  %s10830_s24 = int_to_ptr.vmem [resolvable:$false] %s10829_s24 }
 0x1a6   : > { %s10831_s30 = scalar_lea.vmem %s10830_s24, 128  ;;  %p10832_p12 = scmp.lt.s32.totalorder %s1072_s19, %s10830_s24 }
 0x1a7   : > { %p10827_p8 = pnand %p10825_p5, %p12947_p4  ;;  %p10833_p6 = scmp.lt.s32.totalorder %s10831_s30, %s10824_s6 }
 0x1a9   : > { %p10828_p10 = pneg %p10827_p8  ;;  %p10834_p9 = por %p10833_p6, %p10832_p12 }
 0x1ab   : > { %p10835_p11 = pnand %p10834_p9, %p10828_p10 }
 0x1ad   : > { %10838 = shalt.err (!%p10835_p11)
}
 0x1ae   : > { %s12955_s5 = scalar_lea.sflag [#allocation15], %s11212_s26  ;;  %s12956_s8 = sld [smem:[#allocation45_spill]] }
 0x1af   : > { %9349 = dma.hbm_to_vmem [thread:$0]  (!%p12948_p13), %s11525_s29, 64, %s1072_s19, %s12955_s5, %s12941_s18, %s12941_s18, %s10923_s7  }
 0x1b4   : > { %p12957_p4 = scmp.ne.s32.totalorder %s12956_s8, 0 }
 0x1b5   : > { %s12958_s10 = sld [smem:[#allocation42_spill]] (!%p12957_p4) }
 0x1b6   : > { %1083 = sbr.rel (%p12957_p4) target bundleno = 9294 (0x244e), region = 124  ;;  %s12959_s4 = sld [smem:[#allocation48_spill]] (!%p12957_p4) }
 0x1bb   : > { %s1085_s2 = sand.u32 1, %s12958_s10  }
 0x1bc   : > { %s9231_s1 = smul.u32 1536, %s1085_s2  ;;  %s1086_s11 = scalar_lea.sflag [#allocation4], %s1085_s2 }
 0x1bd   : > { %p12960_p7 = scmp.ne.s32.totalorder %s12959_s4, 0 }
 0x1be   : > { %s11552_s9 = scalar_lea.vmem [#allocation3], %s9231_s1 }
 0x1bf   : > { %10856 = dma.done.wait (%p12960_p7), %s1086_s11, 24576  }
 0x1c0   : > { %10858 = vsyncadd (%p12960_p7), %s1086_s11, 4294942720  ;;  %s12961_s14 = sld [smem:[#allocation44_spill]]  ;;  %s9232_s28 = smul.u32 12, %s1085_s2 }
 0x1c2   : > { %s11559_s18 = scalar_lea.vmem [#allocation5], %s9232_s28 }
 0x1c6   : > { %s1094_s26 = sand.u32 1, %s12961_s14  }
 0x1c7   : > { %s1095_s7 = scalar_lea.sflag [#allocation6], %s1094_s26 }
 0x1c8   : > { %10860 = dma.done.wait (%p12960_p7), %s1095_s7, 256  }
 0x1c9   : > { %10862 = vsyncadd (%p12960_p7), %s1095_s7, 4294967040  ;;  %s11565_s29 = sshll.u32 %s1085_s2, 2  ;;  %s1113_s6 = scalar_lea.sflag [#allocation9], %s1094_s26 }
 0x1ca   : > { %10864 = dma.done.wait (%p12960_p7), %s1113_s6, 128  }
 0x1cb   : > { %10866 = vsyncadd (%p12960_p7), %s1113_s6, 4294967168  ;;  %s8140_s24 = sshll.u32 %s1085_s2, 1  ;;  %s1131_s5 = scalar_lea.sflag [#allocation12], %s1094_s26 }
 0x1cc   : > { %s11574_s8 = scalar_lea.vmem [#allocation11], %s8140_s24 }
 0x1cd   : > { %10868 = dma.done.wait (%p12960_p7), %s1131_s5, 96  }
 0x1ce   : > { %10870 = vsyncadd (%p12960_p7), %s1131_s5, 4294967200  ;;  %s1149_s1 = scalar_lea.sflag [#allocation15], %s1094_s26 }
 0x1cf   : > { %10872 = dma.done.wait (%p12960_p7), %s1149_s1, 128  }
 0x1d0   : > { %10874 = vsyncadd (%p12960_p7), %s1149_s1, 4294967168  ;;  %p12962_p13 = scmp.eq.s32.totalorder %s12961_s14, 0 }
 0x1d2   : > { %10876 = dma.done.wait (%p12962_p13), [#allocation18], 4128   ;;  %p12963_p1 = pmov %p12962_p13 }
 0x1d4   : > { %10878 = vsyncadd (%p12963_p1), [#allocation18], 4294963168  ;;  %p12964_p3 = pmov %p12963_p1 }
 0x1d5   : > { %p12965_p0 = pmov %p12963_p1 }
 0x1d6   : > { %10880 = dma.done.wait (%p12964_p3), [#allocation21], 4128  }
 0x1d7   : > { %10882 = vsyncadd (%p12965_p0), [#allocation21], 4294963168  ;;  %p12966_p2 = pmov %p12965_p0 }
 0x1d8   : > { %p12967_p5 = pmov %p12965_p0 }
 0x1d9   : > { %10884 = dma.done.wait (%p12966_p2), [#allocation24], 4112  }
 0x1da   : > { %10886 = vsyncadd (%p12967_p5), [#allocation24], 4294963184  ;;  %p12968_p8 = pmov %p12965_p0 }
 0x1db   : > { %p12969_p10 = pmov %p12965_p0 }
 0x1dc   : > { %10888 = dma.done.wait (%p12968_p8), [#allocation27], 4128  }
 0x1dd   : > { %10890 = vsyncadd (%p12969_p10), [#allocation27], 4294963168  ;;  %p12970_p12 = pmov %p12965_p0 }
 0x1de   : > { %p12971_p6 = pmov %p12965_p0 }
 0x1df   : > { %10892 = dma.done.wait (%p12970_p12), [#allocation30], 48  }
 0x1e0   : > { %10894 = vsyncadd (%p12971_p6), [#allocation30], 4294967248  ;;  %s8154_s4 = sshll.u32 %s12961_s14, 1  ;;  %s12972_s24 = sld [smem:[#allocation53_spill]] }
 0x1e1   : > { %p1328_p9 = scmp.lt.s32.totalorder %s8154_s4, 7  ;;  %s12973_s11 = sld [smem:[#allocation57_spill]] }
 0x1e2   : > { %s12974_s19 = sld [smem:[#allocation59_spill]]  ;;  %p12975_p11 = scmp.ne.s32.totalorder %s12961_s14, 0 }
 0x1e3   : > { %s13002_s4 = smov (!%p1328_p9, %s8154_s4), 7  ;;  %s12976_s12 = sld [smem:[#allocation49_spill]] (!%p12975_p11) }
 0x1e4   : > { %s8880_s26 = sshll.u32 %s13002_s4, 8  ;;  %s8881_s28 = sshll.u32 %s13002_s4, 7 }
 0x1e5   : > { %1359 = sbr.rel (%p12975_p11) target bundleno = 493 (0x1ed), region = 204 }
 0x1e6   : > { %s11611_s5 = scalar_lea.vmem %s12972_s24, %s8880_s26 }
 0x1e7   : > { %s11616_s10 = scalar_lea.vmem %s12973_s11, %s8881_s28 }
 0x1e8   : > { %s11621_s0 = scalar_lea.vmem %s12974_s19, %s8881_s28 }
 0x1ea   : > { %v1360_v0 = vld [vmem:[%s12976_s12] sm:$0xff]  ;;  %v1361_v1 = vld [vmem:[%s12976_s12 + $0x8] sm:$0xff]  ;;  %v1362_v2 = vld [vmem:[%s12976_s12 + $0x10] sm:$0xff] }
 0x1eb   : > { %1364 = vst [vmem:[#allocation2 + $0x10] sm:$0xff] %v1360_v0  ;;  %1365 = vst [vmem:[#allocation2] sm:$0xff] %v1361_v1  ;;  %v1363_v3 = vld [vmem:[%s12976_s12 + $0x18] sm:$0xff] }
 0x1ec   : > { %1366 = vst [vmem:[#allocation2 + $0x18] sm:$0xff] %v1362_v2  ;;  %1367 = vst [vmem:[#allocation2 + $0x8] sm:$0xff] %v1363_v3 }
 0x1ed PF: > { %v9489_v4 = vld [vmem:[%s11552_s9 + $0x154] ss:$24 sps:$4 sm:$0xff]   ;;  %v9493_v6 = vld [vmem:[%s11552_s9 + $0x150] ss:$24 sps:$4 sm:$0xff]   ;;  %v9495_v8 = vld [vmem:[%s11552_s9 + $0x124] ss:$24 sps:$4 sm:$0xff]  }
 0x1ee   : > { %v9491_v5 = vld [vmem:[%s11552_s9 + $0x15c] ss:$24 sps:$4 sm:$0xff]   ;;  %1984 = vmatprep.subr.bf16.mxu0 %v9489_v4  ;;  %v9494_v7 = vld [vmem:[%s11552_s9 + $0x158] ss:$24 sps:$4 sm:$0xff]   ;;  %v9497_v9 = vld [vmem:[%s11552_s9 + $0x12c] ss:$24 sps:$4 sm:$0xff]  }
 0x1ef   : > { %2027 = vmatprep.subr.bf16.mxu1 %v9491_v5  ;;  %1985 = vmatpush1.bf16.msra.mxu0 %v9493_v6  ;;  %v9499_v10 = vld [vmem:[%s11552_s9 + $0x120] ss:$24 sps:$4 sm:$0xff]   ;;  %v9501_v12 = vld [vmem:[%s11552_s9 + $0xf4] ss:$24 sps:$4 sm:$0xff]   ;;  %v9505_v14 = vld [vmem:[%s11552_s9 + $0xf0] ss:$24 sps:$4 sm:$0xff]  }
 0x1f0   : > { %2028 = vmatpush1.bf16.msra.mxu1 %v9494_v7  ;;  %1986 = vmatprep.subr.bf16.mxu0 %v9495_v8  ;;  %v9500_v11 = vld [vmem:[%s11552_s9 + $0x128] ss:$24 sps:$4 sm:$0xff]   ;;  %v9503_v13 = vld [vmem:[%s11552_s9 + $0xfc] ss:$24 sps:$4 sm:$0xff]   ;;  %v9506_v15 = vld [vmem:[%s11552_s9 + $0xf8] ss:$24 sps:$4 sm:$0xff]  }
 0x1f1   : > { %2029 = vmatprep.subr.bf16.mxu1 %v9497_v9  ;;  %v9507_v16 = vld [vmem:[%s11552_s9 + $0xc4] ss:$24 sps:$4 sm:$0xff]   ;;  %v9511_v18 = vld [vmem:[%s11552_s9 + $0xc0] ss:$24 sps:$4 sm:$0xff]   ;;  %v9513_v20 = vld [vmem:[%s11552_s9 + $0x94] ss:$24 sps:$4 sm:$0xff]  }
 0x1f2   : > { %v9509_v17 = vld [vmem:[%s11552_s9 + $0xcc] ss:$24 sps:$4 sm:$0xff]   ;;  %v9512_v19 = vld [vmem:[%s11552_s9 + $0xc8] ss:$24 sps:$4 sm:$0xff]   ;;  %v9515_v21 = vld [vmem:[%s11552_s9 + $0x9c] ss:$24 sps:$4 sm:$0xff]  }
 0x1f3   : > { %1987 = vmatpush1.bf16.msra.mxu0 %v9499_v10  ;;  %v9517_v22 = vld [vmem:[%s11552_s9 + $0x90] ss:$24 sps:$4 sm:$0xff]   ;;  %v9519_v24 = vld [vmem:[%s11552_s9 + $0x64] ss:$24 sps:$4 sm:$0xff]   ;;  %v9523_v26 = vld [vmem:[%s11552_s9 + $0x60] ss:$24 sps:$4 sm:$0xff]  }
 0x1f4   : > { %2030 = vmatpush1.bf16.msra.mxu1 %v9500_v11  ;;  %1988 = vmatprep.subr.bf16.mxu0 %v9501_v12  ;;  %v9518_v23 = vld [vmem:[%s11552_s9 + $0x98] ss:$24 sps:$4 sm:$0xff]   ;;  %v9521_v25 = vld [vmem:[%s11552_s9 + $0x6c] ss:$24 sps:$4 sm:$0xff]   ;;  %v9524_v27 = vld [vmem:[%s11552_s9 + $0x68] ss:$24 sps:$4 sm:$0xff]  }
 0x1f5   : > { %2031 = vmatprep.subr.bf16.mxu1 %v9503_v13  ;;  %v9525_v28 = vld [vmem:[%s11552_s9 + $0x34] ss:$24 sps:$4 sm:$0xff]   ;;  %v9529_v30 = vld [vmem:[%s11552_s9 + $0x30] ss:$24 sps:$4 sm:$0xff]   ;;  %v9531_v32 = vld [vmem:[%s11552_s9 + $0x4] ss:$24 sps:$4 sm:$0xff]  }
 0x1f6   : > { %v9527_v29 = vld [vmem:[%s11552_s9 + $0x3c] ss:$24 sps:$4 sm:$0xff]   ;;  %v9530_v31 = vld [vmem:[%s11552_s9 + $0x38] ss:$24 sps:$4 sm:$0xff]   ;;  %v9533_v33 = vld [vmem:[%s11552_s9 + $0xc] ss:$24 sps:$4 sm:$0xff]  }
 0x1f7   : > { %1989 = vmatpush1.bf16.msra.mxu0 %v9505_v14  ;;  %v9535_v34 = vld [vmem:[%s11552_s9] ss:$24 sps:$4 sm:$0xff]   ;;  %v9537_v36 = vld [vmem:[%s11552_s9 + $0x2d4] ss:$24 sps:$4 sm:$0xff]   ;;  %v9541_v38 = vld [vmem:[%s11552_s9 + $0x2d0] ss:$24 sps:$4 sm:$0xff]  }
 0x1f8   : > { %2032 = vmatpush1.bf16.msra.mxu1 %v9506_v15  ;;  %1990 = vmatprep.subr.bf16.mxu0 %v9507_v16  ;;  %v9536_v35 = vld [vmem:[%s11552_s9 + $0x8] ss:$24 sps:$4 sm:$0xff]   ;;  %v9539_v37 = vld [vmem:[%s11552_s9 + $0x2dc] ss:$24 sps:$4 sm:$0xff]   ;;  %v9542_v39 = vld [vmem:[%s11552_s9 + $0x2d8] ss:$24 sps:$4 sm:$0xff]  }
 0x1f9   : > { %2033 = vmatprep.subr.bf16.mxu1 %v9509_v17  ;;  %v9543_v40 = vld [vmem:[%s11552_s9 + $0x2a4] ss:$24 sps:$4 sm:$0xff]   ;;  %v9547_v42 = vld [vmem:[%s11552_s9 + $0x2a0] ss:$24 sps:$4 sm:$0xff]   ;;  %v9549_v44 = vld [vmem:[%s11552_s9 + $0x274] ss:$24 sps:$4 sm:$0xff]  }
 0x1fa   : > { %v9545_v41 = vld [vmem:[%s11552_s9 + $0x2ac] ss:$24 sps:$4 sm:$0xff]   ;;  %v9548_v43 = vld [vmem:[%s11552_s9 + $0x2a8] ss:$24 sps:$4 sm:$0xff]   ;;  %v9551_v45 = vld [vmem:[%s11552_s9 + $0x27c] ss:$24 sps:$4 sm:$0xff]  }
 0x1fb   : > { %1991 = vmatpush1.bf16.msra.mxu0 %v9511_v18  ;;  %v9553_v46 = vld [vmem:[%s11552_s9 + $0x270] ss:$24 sps:$4 sm:$0xff]   ;;  %v9555_v48 = vld [vmem:[%s11552_s9 + $0x244] ss:$24 sps:$4 sm:$0xff]   ;;  %v9559_v51 = vld [vmem:[%s11552_s9 + $0x240] ss:$24 sps:$4 sm:$0xff]  }
 0x1fc   : > { %2034 = vmatpush1.bf16.msra.mxu1 %v9512_v19  ;;  %1992 = vmatprep.subr.bf16.mxu0 %v9513_v20  ;;  %v9554_v47 = vld [vmem:[%s11552_s9 + $0x278] ss:$24 sps:$4 sm:$0xff]   ;;  %v9557_v49 = vld [vmem:[%s11552_s9 + $0x24c] ss:$24 sps:$4 sm:$0xff]   ;;  %v9560_v52 = vld [vmem:[%s11552_s9 + $0x248] ss:$24 sps:$4 sm:$0xff]  }
 0x1fd   : > { %2035 = vmatprep.subr.bf16.mxu1 %v9515_v21  ;;  %v1371_v50 = vld [vmem:[#allocation2] sm:$0xff]  ;;  %v1373_v53 = vld [vmem:[#allocation2 + $0x8] sm:$0xff]  ;;  %v9563_v56 = vld [vmem:[%s11552_s9 + $0x21c] ss:$24 sps:$4 sm:$0xff]   ;;  %vm10941_vm0 = vmmov 0   ;;  %vm2123_vm1 = vcmask 261120  }
 0x1fe   : > { %v9561_v54 = vld [vmem:[%s11552_s9 + $0x214] ss:$24 sps:$4 sm:$0xff]   ;;  %v1375_v55 = vpack.c.bf16 %v1373_v53, %v1371_v50  ;;  %v9565_v57 = vld [vmem:[%s11552_s9 + $0x210] ss:$24 sps:$4 sm:$0xff]   ;;  %v9567_v59 = vld [vmem:[%s11552_s9 + $0x1e4] ss:$24 sps:$4 sm:$0xff]  }
 0x1ff   : > { %1993 = vmatpush1.bf16.msra.mxu0 %v9517_v22  ;;  %v9566_v58 = vld [vmem:[%s11552_s9 + $0x218] ss:$24 sps:$4 sm:$0xff]   ;;  %v9569_v60 = vld [vmem:[%s11552_s9 + $0x1ec] ss:$24 sps:$4 sm:$0xff]   ;;  %v9572_v62 = vld [vmem:[%s11552_s9 + $0x1e8] ss:$24 sps:$4 sm:$0xff]  }
 0x200   : > { %2036 = vmatpush1.bf16.msra.mxu1 %v9518_v23  ;;  %1994 = vmatprep.subr.bf16.mxu0 %v9519_v24  ;;  %v9571_v61 = vld [vmem:[%s11552_s9 + $0x1e0] ss:$24 sps:$4 sm:$0xff]   ;;  %v9573_v63 = vld [vmem:[%s11552_s9 + $0x1b4] ss:$24 sps:$4 sm:$0xff]   ;;  %v9577_v1 = vld [vmem:[%s11552_s9 + $0x1b0] ss:$24 sps:$4 sm:$0xff]  }
 0x201   : > { %2037 = vmatprep.subr.bf16.mxu1 %v9521_v25  ;;  %2016 = vmatprep.mubr.bf16.mxu0 %v1375_v55  ;;  %v9575_v0 = vld [vmem:[%s11552_s9 + $0x1bc] ss:$24 sps:$4 sm:$0xff]   ;;  %v9578_v2 = vld [vmem:[%s11552_s9 + $0x1b8] ss:$24 sps:$4 sm:$0xff]   ;;  %v9581_v4 = vld [vmem:[%s11552_s9 + $0x18c] ss:$24 sps:$4 sm:$0xff]  }
 0x202   : > { %2059 = vmatprep.mubr.bf16.mxu1 %v1375_v55  ;;  %v9579_v3 = vld [vmem:[%s11552_s9 + $0x184] ss:$24 sps:$4 sm:$0xff]   ;;  %v9583_v5 = vld [vmem:[%s11552_s9 + $0x180] ss:$24 sps:$4 sm:$0xff]   ;;  %v1370_v7 = vld [vmem:[#allocation2 + $0x10] sm:$0xff]  ;;  %s12977_s30 = sld [smem:[#allocation50_spill]] }
 0x203   : > { %1995 = vmatpush1.bf16.msra.mxu0 %v9523_v26  ;;  %v9584_v6 = vld [vmem:[%s11552_s9 + $0x188] ss:$24 sps:$4 sm:$0xff]   ;;  %v1372_v8 = vld [vmem:[#allocation2 + $0x18] sm:$0xff]  ;;  %v9590_v12 = vld [vmem:[%s11552_s9 + $0x134] ss:$24 sps:$4 sm:$0xff]   ;;  %vm2171_vm2 = vcmask 130048  }
 0x204   : > { %2038 = vmatpush1.bf16.msra.mxu1 %v9524_v27  ;;  %1996 = vmatprep.subr.bf16.mxu0 %v9525_v28  ;;  %v9587_v9 = vld [vmem:[%s11552_s9 + $0x164] ss:$24 sps:$4 sm:$0xff]   ;;  %v9585_v10 = vld [vmem:[%s11552_s9 + $0x160] ss:$24 sps:$4 sm:$0xff]   ;;  %v11703_v11 = vpack.c.bf16 %v1372_v8, %v1370_v7  ;;  %v9588_v13 = vld [vmem:[%s11552_s9 + $0x130] ss:$24 sps:$4 sm:$0xff]  }
 0x205   : > { %2039 = vmatprep.subr.bf16.mxu1 %v9527_v29  ;;  %v9593_v14 = vld [vmem:[%s11552_s9 + $0x104] ss:$24 sps:$4 sm:$0xff]   ;;  %v9591_v15 = vld [vmem:[%s11552_s9 + $0x100] ss:$24 sps:$4 sm:$0xff]   ;;  %v9596_v16 = vld [vmem:[%s11552_s9 + $0xd4] ss:$24 sps:$4 sm:$0xff]  }
 0x206   : > { %v9594_v17 = vld [vmem:[%s11552_s9 + $0xd0] ss:$24 sps:$4 sm:$0xff]   ;;  %v9599_v18 = vld [vmem:[%s11552_s9 + $0xa4] ss:$24 sps:$4 sm:$0xff]   ;;  %v9597_v19 = vld [vmem:[%s11552_s9 + $0xa0] ss:$24 sps:$4 sm:$0xff]  }
 0x207   : > { %1997 = vmatpush1.bf16.msra.mxu0 %v9529_v30  ;;  %v9602_v20 = vld [vmem:[%s11552_s9 + $0x74] ss:$24 sps:$4 sm:$0xff]   ;;  %v9600_v21 = vld [vmem:[%s11552_s9 + $0x70] ss:$24 sps:$4 sm:$0xff]   ;;  %v9605_v22 = vld [vmem:[%s11552_s9 + $0x44] ss:$24 sps:$4 sm:$0xff]  }
 0x208   : > { %2040 = vmatpush1.bf16.msra.mxu1 %v9530_v31  ;;  %1998 = vmatprep.subr.bf16.mxu0 %v9531_v32  ;;  %v9603_v23 = vld [vmem:[%s11552_s9 + $0x40] ss:$24 sps:$4 sm:$0xff]   ;;  %v9608_v24 = vld [vmem:[%s11552_s9 + $0x14] ss:$24 sps:$4 sm:$0xff]   ;;  %v9606_v25 = vld [vmem:[%s11552_s9 + $0x10] ss:$24 sps:$4 sm:$0xff]   ;;  %s12978_s11 = smov %s12977_s30 }
 0x209   : > { %2041 = vmatprep.subr.bf16.mxu1 %v9533_v33  ;;  %v9611_v26 = vld [vmem:[%s11552_s9 + $0x2e4] ss:$24 sps:$4 sm:$0xff]   ;;  %v9609_v27 = vld [vmem:[%s11552_s9 + $0x2e0] ss:$24 sps:$4 sm:$0xff]   ;;  %v9614_v28 = vld [vmem:[%s11552_s9 + $0x2b4] ss:$24 sps:$4 sm:$0xff]  }
 0x20a   : > { %v9612_v29 = vld [vmem:[%s11552_s9 + $0x2b0] ss:$24 sps:$4 sm:$0xff]   ;;  %v9617_v30 = vld [vmem:[%s11552_s9 + $0x284] ss:$24 sps:$4 sm:$0xff]   ;;  %v9615_v31 = vld [vmem:[%s11552_s9 + $0x280] ss:$24 sps:$4 sm:$0xff]  }
 0x20b   : > { %1999 = vmatpush1.bf16.msra.mxu0 %v9535_v34  ;;  %v9620_v32 = vld [vmem:[%s11552_s9 + $0x254] ss:$24 sps:$4 sm:$0xff]   ;;  %v9618_v33 = vld [vmem:[%s11552_s9 + $0x250] ss:$24 sps:$4 sm:$0xff]   ;;  %v9623_v34 = vld [vmem:[%s11552_s9 + $0x224] ss:$24 sps:$4 sm:$0xff]  }
 0x20c   : > { %2042 = vmatpush1.bf16.msra.mxu1 %v9536_v35  ;;  %2000 = vmatprep.subr.bf16.mxu0 %v9537_v36  ;;  %v9621_v35 = vld [vmem:[%s11552_s9 + $0x220] ss:$24 sps:$4 sm:$0xff]   ;;  %v9626_v36 = vld [vmem:[%s11552_s9 + $0x1f4] ss:$24 sps:$4 sm:$0xff]   ;;  %s10942_s1 = smov 96   ;;  %s10943_s4 = smov 64  }
 0x20d   : > { %2043 = vmatprep.subr.bf16.mxu1 %v9539_v37  ;;  %v9624_v37 = vld [vmem:[%s11552_s9 + $0x1f0] ss:$24 sps:$4 sm:$0xff]   ;;  %s10944_s7 = smov 32   ;;  %vm3135_vm3 = vcmask 523264   ;;  %vm3138_vm4 = vcmask 785408   ;;  %s12979_s26 = scalar_lea.vmem [#allocation7], %s11565_s29 }
 0x20e   : > { %s12980_s6 = scalar_lea.vmem [#allocation8], %s11565_s29  ;;  %s12981_s2 = scalar_lea.vmem [#allocation10], %s11565_s29 }
 0x20f   : > { %2001 = vmatpush2.bf16.msra.mxu0 %v9541_v38  ;;  %v9629_v38 = vld [vmem:[%s11552_s9 + $0x1c4] ss:$24 sps:$4 sm:$0xff]   ;;  %s12982_s19 = scalar_lea.vmem [#allocation13], %s11565_s29  ;;  %s12983_s23 = scalar_lea.vmem [#allocation14], %s11565_s29 }
 0x210   : > { %2044 = vmatpush2.bf16.msra.mxu1 %v9542_v39  ;;  %2002 = vmatprep.subr.bf16.mxu0 %v9543_v40  ;;  %v9627_v39 = vld [vmem:[%s11552_s9 + $0x1c0] ss:$24 sps:$4 sm:$0xff]   ;;  %v9632_v40 = vld [vmem:[%s11552_s9 + $0x194] ss:$24 sps:$4 sm:$0xff]   ;;  %s12984_s3 = scalar_lea.vmem [#allocation16], %s11565_s29  ;;  %s12986_s28 = smov %s12980_s6 }
 0x211   : > { %2045 = vmatprep.subr.bf16.mxu1 %v9545_v41  ;;  %v9630_v41 = vld [vmem:[%s11552_s9 + $0x190] ss:$24 sps:$4 sm:$0xff]   ;;  %s12987_s24 = smov %s12981_s2  ;;  %s12991_s29 = sld [smem:[#allocation44_spill]] }
 0x213   : > { %2003 = vmatpush2.bf16.msra.mxu0 %v9547_v42  ;;  %v10940_v42 = vmov 0.0  }
 0x214   : > { %2046 = vmatpush2.bf16.msra.mxu1 %v9548_v43  ;;  %2004 = vmatprep.subr.bf16.mxu0 %v9549_v44  ;;  %v1474_v43 = vlaneseq }
 0x215   : > { %2047 = vmatprep.subr.bf16.mxu1 %v9551_v45 }
 0x216   : > { %v11744_v44 = vshrl.u32 %v1474_v43, 7 }
 0x217   : > { %2005 = vmatpush2.bf16.msra.mxu0 %v9553_v46  ;;  %v11748_v46 = vld [vmem:[%s11559_s18] sm:$0x3f]  ;;  %p8702_p4 = scmp.ne.s32.totalorder %s12991_s29, 3 }
 0x218   : > { %2048 = vmatpush2.bf16.msra.mxu1 %v9554_v47  ;;  %2006 = vmatprep.subr.bf16.mxu0 %v9555_v48  ;;  %v1484_v45 = vsub.s32 2, %v11744_v44  ;;  %v11751_v47 = vsub.s32 0, %v11744_v44  ;;  %v1488_v48 = vsub.s32 3, %v11744_v44  ;;  %s12996_s29 = sld [smem:[#allocation70_spill]] (!%p8702_p4) }
 0x219   : > { %2049 = vmatprep.subr.bf16.mxu1 %v9557_v49 }
 0x21a   : > { %v1477_v53 = vrot.slane %v11748_v46, %v11751_v47 }
 0x21b   : > { %2007 = vmatpush2.bf16.msra.mxu0 %v9559_v51  ;;  %v1485_v51 = vrot.slane %v11748_v46, %v1484_v45 }
 0x21c   : > { %2050 = vmatpush2.bf16.msra.mxu1 %v9560_v52  ;;  %2008 = vmatprep.subr.bf16.mxu0 %v9561_v54  ;;  %v11758_v52 = vsub.s32 1, %v11744_v44 }
 0x21d   : > { %2051 = vmatprep.subr.bf16.mxu1 %v9563_v56  ;;  %v1489_v56 = vrot.slane %v11748_v46, %v1488_v48 }
 0x21f   : > { %2009 = vmatpush2.bf16.msra.mxu0 %v9565_v57 }
 0x220   : > { %2052 = vmatpush2.bf16.msra.mxu1 %v9566_v58  ;;  %2010 = vmatprep.subr.bf16.mxu0 %v9567_v59 }
 0x221   : > { %2053 = vmatprep.subr.bf16.mxu1 %v9569_v60  ;;  %v1481_v60 = vrot.slane %v11748_v46, %v11758_v52 }
 0x223   : > { %2011 = vmatpush2.bf16.msra.mxu0 %v9571_v61 }
 0x224   : > { %2054 = vmatpush2.bf16.msra.mxu1 %v9572_v62  ;;  %2012 = vmatprep.subr.bf16.mxu0 %v9573_v63 }
 0x225   : > { %2055 = vmatprep.subr.bf16.mxu1 %v9575_v0 }
 0x227   : > { %2013 = vmatpush2.bf16.msra.mxu0 %v9577_v1 }
 0x228   : > { %2056 = vmatpush2.bf16.msra.mxu1 %v9578_v2  ;;  %2014 = vmatprep.subr.bf16.mxu0 %v9579_v3 }
 0x229   : > { %2057 = vmatprep.subr.bf16.mxu1 %v9581_v4 }
 0x22b   : > { %2015 = vmatpush2.bf16.msra.mxu0 %v9583_v5 }
 0x22c   : > { %2058 = vmatpush2.bf16.msra.mxu1 %v9584_v6  ;;  %2070 = vmatprep.subr.bf16.mxu0 %v9587_v9 }
 0x22d   : > { %9035 = vmatprep.subr.bf16.mxu1 %v10940_v42 }
 0x22e   : > { %2017 = vmatmul.mubr.bf16.vlgmr.msra.gmra.mxu0 %v11703_v11 }
 0x22f   : > { %2060 = vmatmul.mubr.bf16.vlgmr.msra.gmra.mxu1 %v11703_v11  ;;  %2071 = vmatpush1.bf16.msra.mxu0 %v9585_v10 }
 0x230   : > { %2102 = vmatprep.mubr.bf16.mxu0 %v1375_v55  ;;  %2072 = vmatprep.subr.bf16.mxu0 %v9590_v12 }
 0x231   : > { %9037 = vmatprep.mubr.msk.bf16.mxu1 %vm10941_vm0, %v10940_v42 }
 0x233   : > { %2073 = vmatpush1.bf16.msra.mxu0 %v9588_v13 }
 0x234   : > { %2074 = vmatprep.subr.bf16.mxu0 %v9593_v14 }
 0x237   : > { %2075 = vmatpush1.bf16.msra.mxu0 %v9591_v15 }
 0x238   : > { %2076 = vmatprep.subr.bf16.mxu0 %v9596_v16  ;;  %v1492_v16 = vsub.s32 4, %v11744_v44 }
 0x23b   : > { %2077 = vmatpush1.bf16.msra.mxu0 %v9594_v17  ;;  %v1493_v17 = vrot.slane %v11748_v46, %v1492_v16 }
 0x23c   : > { %2078 = vmatprep.subr.bf16.mxu0 %v9599_v18 }
 0x23f   : > { %2079 = vmatpush1.bf16.msra.mxu0 %v9597_v19 }
 0x240   : > { %2080 = vmatprep.subr.bf16.mxu0 %v9602_v20 }
 0x243   : > { %2081 = vmatpush1.bf16.msra.mxu0 %v9600_v21 }
 0x244   : > { %2082 = vmatprep.subr.bf16.mxu0 %v9605_v22 }
 0x247   : > { %2083 = vmatpush1.bf16.msra.mxu0 %v9603_v23 }
 0x248   : > { %2084 = vmatprep.subr.bf16.mxu0 %v9608_v24 }
 0x24b   : > { %2085 = vmatpush1.bf16.msra.mxu0 %v9606_v25  ;;  %v11804_v25 = vld [vmem:[%s12977_s30] sm:$0xff] }
 0x24c   : > { %2086 = vmatprep.subr.bf16.mxu0 %v9611_v26 }
 0x24f   : > { %2087 = vmatpush2.bf16.msra.mxu0 %v9609_v27 }
 0x250   : > { %2088 = vmatprep.subr.bf16.mxu0 %v9614_v28 }
 0x253   : > { %2089 = vmatpush2.bf16.msra.mxu0 %v9612_v29 }
 0x254   : > { %2090 = vmatprep.subr.bf16.mxu0 %v9617_v30  ;;  %v11812_v30 = vld [vmem:[%s12978_s11 + $0x8] sm:$0xff] }
 0x257   : > { %2091 = vmatpush2.bf16.msra.mxu0 %v9615_v31 }
 0x258   : > { %2092 = vmatprep.subr.bf16.mxu0 %v9620_v32 }
 0x25b   : > { %2093 = vmatpush2.bf16.msra.mxu0 %v9618_v33 }
 0x25c   : > { %2094 = vmatprep.subr.bf16.mxu0 %v9623_v34 }
 0x25f   : > { %2095 = vmatpush2.bf16.msra.mxu0 %v9621_v35 }
 0x260   : > { %2096 = vmatprep.subr.bf16.mxu0 %v9626_v36 }
 0x263   : > { %2097 = vmatpush2.bf16.msra.mxu0 %v9624_v37 }
 0x264   : > { %2098 = vmatprep.subr.bf16.mxu0 %v9629_v38 }
 0x267   : > { %2099 = vmatpush2.bf16.msra.mxu0 %v9627_v39 }
 0x268   : > { %2100 = vmatprep.subr.bf16.mxu0 %v9632_v40 }
 0x26b   : > { %2101 = vmatpush2.bf16.msra.mxu0 %v9630_v41 }
 0x26c   : > { %9083 = vmatprep.subr.bf16.mxu0 %v10940_v42 }
 0x26e   : > { %2103 = vmatmul.mubr.bf16.vlgmr.msra.gmra.mxu0 %v11703_v11 }
 0x26f   : > { %9085 = vmatprep.mubr.msk.bf16.mxu0 %vm10941_vm0, %v10940_v42 }
 0x2ee   : > { %v2018_v49 = vpop.f32.mrf.mxu0 }
 0x2ef   : > { %v2061_v50 = vpop.f32.mrf.mxu1  ;;  %v2019_v62 = vadd.f32 %v2018_v49, %v1477_v53 }
 0x2f0   : > { %v2020_v54 = vpop.f32.mrf.mxu0  ;;  %v2062_v59 = vadd.f32 %v2061_v50, %v1485_v51 }
 0x2f1   : > { %v2063_v55 = vpop.f32.mrf.mxu1  ;;  %v2021_v5 = vadd.f32 %v2020_v54, %v1481_v60  ;;  %v2113_v9 = vmul.f32 0.17677669, %v2019_v62 }
 0x2f2   : > { %v2022_v57 = vpop.f32.mrf.mxu0  ;;  %v2064_v1 = vadd.f32 %v2063_v55, %v1489_v56 }
 0x2f3   : > { %v2065_v58 = vpop.f32.mrf.mxu1  ;;  %v2023_v2 = vadd.f32 %v2022_v57, %v1477_v53  ;;  %v2114_v12 = vmul.f32 0.17677669, %v2021_v5 }
 0x2f4   : > { %v2066_v61 = vadd.f32 %v2065_v58, %v1485_v51  ;;  %v2024_v63 = vpop.f32.mrf.mxu0 }
 0x2f5   : > { %v2067_v0 = vpop.f32.mrf.mxu1  ;;  %v2025_v6 = vadd.f32 %v2024_v63, %v1481_v60  ;;  %v2115_v10 = vmul.f32 0.17677669, %v2023_v2 }
 0x2f6   : > { %v11767_v3 = vpack.c.bf16 %v2066_v61, %v2062_v59  ;;  %v2068_v4 = vadd.f32 %v2067_v0, %v1489_v56 }
 0x2f7   : > { %v2116_v13 = vmul.f32 0.17677669, %v2025_v6  ;;  %v11777_v14 = vpack.c.bf16 %v2115_v10, %v2113_v9 }
 0x2f8   : > { %v11769_v7 = vpack.c.bf16 %v2068_v4, %v2064_v1  ;;  %v2128_v8 = vsel %vm2123_vm1, %v11767_v3, 0 }
 0x2f9   : > { %9036 = vmatpush3.bf16.xpose.msra.mxu1 %v2128_v8  ;;  %v11779_v15 = vpack.c.bf16 %v2116_v13, %v2114_v12 }
 0x2fa   : > { %v2609_v11 = vsel %vm2123_vm1, %v11769_v7, 0  ;;  %9041 = vmatprep.subr.bf16.mxu1 %v10940_v42 }
 0x2fb   : > { %9084 = vmatpush3.bf16.xpose.msra.mxu0 %v2609_v11 }
 0x2fc   : > { %9095 = vmatprep.subr.bf16.mxu0 %v10940_v42 }
 0x300   : > { %9038 = vmatmul.mubr.msk.bf16.vlgmr.msra.gmra.mxu1 %vm2123_vm1, %v11777_v14 }
 0x301   : > { %9043 = vmatprep.mubr.msk.bf16.mxu1 %vm10941_vm0, %v10940_v42 }
 0x302   : > { %9086 = vmatmul.mubr.msk.bf16.vlgmr.msra.gmra.mxu0 %vm2123_vm1, %v11779_v15 }
 0x303   : > { %9097 = vmatprep.mubr.msk.bf16.mxu0 %vm10941_vm0, %v10940_v42 }
 0x32e   : > { %v2104_v18 = vpop.f32.mrf.mxu0 }
 0x32f   : > { %v2105_v20 = vadd.f32 %v2104_v18, %v1493_v17 }
 0x330   : > { %v11793_v19 = vpop.f32.mrf.mxu0 }
 0x332   : > { %v2108_v21 = vpop.f32.mrf.mxu0 }
 0x333   : > { %v2109_v22 = vadd.f32 %v2108_v21, %v1493_v17 }
 0x334   : > { %v11799_v24 = vpop.f32.mrf.mxu0 }
 0x335   : > { %v11795_v23 = vpack.c.bf16 %v2109_v22, %v2105_v20 }
 0x337   : > { %9042 = vmatpush3.bf16.msra.mxu1 %v11795_v23 }
 0x338   : > { %9047 = vmatprep.subr.bf16.mxu1 %v10940_v42 }
 0x3c0   : > { %v2164_v26 = vpop.f32.mrf.mxu1 }
 0x3c1   : > { %v2165_v27 = vadd.f32 %v2164_v26, %v11804_v25 }
 0x3c2   : > { %v9039_v28 = vpop.f32.mrf.mxu1  ;;  %v11807_v29 = vpop.f32.mrf.mxu0 }
 0x3c3   : > { %v2172_v31 = vsel %vm2171_vm2, %v2165_v27, -inf }
 0x3c4   : > { %v2167_v32 = vpop.f32.mrf.mxu1  ;;  %v9087_v33 = vpop.f32.mrf.mxu0  ;;  %2173 = vmax.xlane.f32.xlu0 %v2172_v31 }
 0x3c5   : > { %v2168_v34 = vadd.f32 %v2167_v32, %v11812_v30 }
 0x3c6   : > { %v9040_v35 = vpop.f32.mrf.mxu1  ;;  %v11816_v36 = vpop.f32.mrf.mxu0 }
 0x3c7   : > { %v2175_v37 = vsel %vm2171_vm2, %v2168_v34, -inf }
 0x3c8   : > { %v9088_v38 = vpop.f32.mrf.mxu0  ;;  %2176 = vmax.xlane.f32.xlu0 %v2175_v37 }
 0x3de   : > { %2243 = vrot.lane.b32.xlu0 %v11767_v3, %s10942_s1 }
 0x44d   : > { %v2174_v39 = vpop.xlane.xlu0 %2173 }
 0x44e   : > { %v2178_v40 = vsub.f32 %v2165_v27, %v2174_v39 }
 0x450   : > { %v2180_v41 = vmul.f32 1.442695, %v2178_v40 }
 0x451   : > { %v2177_v43 = vpop.xlane.xlu0 %2176 }
 0x452   : > { %9953 = vpow2.f32 %v2180_v41  ;;  %v2179_v49 = vsub.f32 %v2168_v34, %v2177_v43 }
 0x454   : > { %v2182_v50 = vmul.f32 1.442695, %v2179_v49 }
 0x455   : > { %v2244_v62 = vpop.permute.xlu0 %2243 }
 0x456   : > { %9955 = vpow2.f32 %v2182_v50  ;;  %v2249_v0 = vsel %vm2123_vm1, %v2244_v62, 0 }
 0x45f   : > { %v9954_v51 = vpop.eup %9953 }
 0x460   : > { %v2184_v53 = vsel %vm2171_vm2, %v9954_v51, 0.0 }
 0x461   : > { %2185 = vadd.xlane.f32.xlu1 %v2184_v53 }
 0x463   : > { %v9956_v54 = vpop.eup %9955 }
 0x464   : > { %v2187_v55 = vsel %vm2171_vm2, %v9956_v54, 0.0 }
 0x465   : > { %2188 = vadd.xlane.f32.xlu1 %v2187_v55 }
 0x476   : > { %2240 = vrot.lane.b32.xlu1 %v11777_v14, %s10942_s1 }
 0x4ea   : > { %v2186_v56 = vpop.xlane.xlu1 %2185 }
 0x4eb   : > { %9957 = vrcp.f32 %v2186_v56 }
 0x4ee   : > { %v2189_v57 = vpop.xlane.xlu1 %2188 }
 0x4ef   : > { %9959 = vrcp.f32 %v2189_v57 }
 0x4f2   : > { %v2241_v1 = vpop.permute.xlu1 %2240 }
 0x4f8   : > { %v9958_v58 = vpop.eup %9957 }
 0x4f9   : > { %v2192_v60 = vmul.f32 %v9958_v58, %v9954_v51 }
 0x4fc   : > { %v9960_v59 = vpop.eup %9959 }
 0x4fd   : > { %v2193_v61 = vmul.f32 %v9960_v59, %v9956_v54 }
 0x4ff   : > { %v2194_v63 = vpack.c.bf16 %v2193_v61, %v2192_v60 }
 0x501   : > { %9044 = vmatmul.mubr.msk.bf16.vlgmr.msra.gmra.mxu1 %vm2171_vm2, %v2194_v63 }
 0x502   : > { %9048 = vmatpush3.bf16.xpose.msra.mxu1 %v2249_v0  ;;  %9049 = vmatprep.mubr.msk.bf16.mxu1 %vm10941_vm0, %v10940_v42 }
 0x503   : > { %9053 = vmatprep.subr.bf16.mxu1 %v10940_v42 }
 0x509   : > { %9050 = vmatmul.mubr.msk.bf16.vlgmr.msra.gmra.mxu1 %vm2123_vm1, %v2241_v1 }
 0x50a   : > { %9055 = vmatprep.mubr.msk.bf16.mxu1 %vm10941_vm0, %v10940_v42 }
 0x5c1   : > { %v11833_v2 = vpop.f32.mrf.mxu1 }
 0x5c3   : > { %v9045_v4 = vpop.f32.mrf.mxu1 }
 0x5c5   : > { %v11835_v5 = vpop.f32.mrf.mxu1 }
 0x5c7   : > { %v9046_v6 = vpop.f32.mrf.mxu1 }
 0x5c9   : > { %v2285_v8 = vpop.f32.mrf.mxu1 }
 0x5ca   : > { %v2286_v9 = vadd.f32 %v2285_v8, %v11804_v25 }
 0x5cb   : > { %v9051_v10 = vpop.f32.mrf.mxu1 }
 0x5cc   : > { %v2292_v11 = vsel %vm2171_vm2, %v2286_v9, -inf }
 0x5cd   : > { %2293 = vmax.xlane.f32.xlu1 %v2292_v11  ;;  %v2288_v12 = vpop.f32.mrf.mxu1 }
 0x5ce   : > { %v2289_v13 = vadd.f32 %v2288_v12, %v11812_v30 }
 0x5cf   : > { %v9052_v17 = vpop.f32.mrf.mxu1 }
 0x5d0   : > { %v2295_v18 = vsel %vm2171_vm2, %v2289_v13, -inf }
 0x5d1   : > { %2296 = vmax.xlane.f32.xlu0 %v2295_v18 }
 0x656   : > { %v2294_v20 = vpop.xlane.xlu1 %2293 }
 0x657   : > { %v2298_v21 = vsub.f32 %v2286_v9, %v2294_v20 }
 0x659   : > { %v2300_v22 = vmul.f32 1.442695, %v2298_v21 }
 0x65a   : > { %v2297_v26 = vpop.xlane.xlu0 %2296 }
 0x65b   : > { %9961 = vpow2.f32 %v2300_v22  ;;  %v2299_v27 = vsub.f32 %v2289_v13, %v2297_v26 }
 0x65d   : > { %v2302_v28 = vmul.f32 1.442695, %v2299_v27 }
 0x65f   : > { %9963 = vpow2.f32 %v2302_v28 }
 0x668   : > { %v9962_v31 = vpop.eup %9961 }
 0x669   : > { %v2304_v32 = vsel %vm2171_vm2, %v9962_v31, 0.0 }
 0x66a   : > { %2305 = vadd.xlane.f32.xlu0 %v2304_v32 }
 0x66c   : > { %v9964_v33 = vpop.eup %9963 }
 0x66d   : > { %v2307_v34 = vsel %vm2171_vm2, %v9964_v33, 0.0 }
 0x66e   : > { %2308 = vadd.xlane.f32.xlu1 %v2307_v34 }
 0x67f   : > { %2365 = vrot.lane.b32.xlu1 %v11767_v3, %s10943_s4 }
 0x680   : > { %2316 = vrot.lane.b32.xlu0 %v11795_v23, %s10942_s1 }
 0x683   : > { %2363 = vrot.lane.b32.xlu1 %v11777_v14, %s10943_s4 }
 0x6f3   : > { %v2306_v35 = vpop.xlane.xlu0 %2305 }
 0x6f4   : > { %9965 = vrcp.f32 %v2306_v35 }
 0x6f7   : > { %v2309_v37 = vpop.xlane.xlu1 %2308  ;;  %v2317_v38 = vpop.permute.xlu0 %2316 }
 0x6f8   : > { %9967 = vrcp.f32 %v2309_v37  ;;  %9054 = vmatpush3.bf16.msra.mxu1 %v2317_v38 }
 0x6f9   : > { %9059 = vmatprep.subr.bf16.mxu1 %v10940_v42 }
 0x6fb   : > { %v2366_v49 = vpop.permute.xlu1 %2365 }
 0x6fc   : > { %v2371_v51 = vsel %vm2123_vm1, %v2366_v49, 0 }
 0x6ff   : > { %v2364_v53 = vpop.permute.xlu1 %2363 }
 0x701   : > { %v9966_v39 = vpop.eup %9965 }
 0x702   : > { %v2312_v41 = vmul.f32 %v9966_v39, %v9962_v31 }
 0x705   : > { %v9968_v40 = vpop.eup %9967 }
 0x706   : > { %v2313_v43 = vmul.f32 %v9968_v40, %v9964_v33 }
 0x708   : > { %v2314_v50 = vpack.c.bf16 %v2313_v43, %v2312_v41 }
 0x70a   : > { %9056 = vmatmul.mubr.msk.bf16.vlgmr.msra.gmra.mxu1 %vm2171_vm2, %v2314_v50 }
 0x70b   : > { %9060 = vmatpush3.bf16.xpose.msra.mxu1 %v2371_v51  ;;  %9061 = vmatprep.mubr.msk.bf16.mxu1 %vm10941_vm0, %v10940_v42 }
 0x70c   : > { %9065 = vmatprep.subr.bf16.mxu1 %v10940_v42 }
 0x712   : > { %9062 = vmatmul.mubr.msk.bf16.vlgmr.msra.gmra.mxu1 %vm2123_vm1, %v2364_v53 }
 0x713   : > { %9067 = vmatprep.mubr.msk.bf16.mxu1 %vm10941_vm0, %v10940_v42 }
 0x7ca   : > { %v11858_v54 = vpop.f32.mrf.mxu1 }
 0x7cc   : > { %v9057_v55 = vpop.f32.mrf.mxu1 }
 0x7ce   : > { %v11860_v56 = vpop.f32.mrf.mxu1 }
 0x7cf   : > { %v9429_v57 = vpack.i.bf16 %v11860_v56, %v11858_v54 }
 0x7d0   : > { %v9058_v58 = vpop.f32.mrf.mxu1 }
 0x7d2   : > { %v2407_v59 = vpop.f32.mrf.mxu1 }
 0x7d3   : > { %v2408_v60 = vadd.f32 %v2407_v59, %v11804_v25 }
 0x7d4   : > { %v9063_v61 = vpop.f32.mrf.mxu1 }
 0x7d5   : > { %v2414_v62 = vsel %vm2171_vm2, %v2408_v60, -inf }
 0x7d6   : > { %2415 = vmax.xlane.f32.xlu1 %v2414_v62  ;;  %v2410_v63 = vpop.f32.mrf.mxu1 }
 0x7d7   : > { %v2411_v0 = vadd.f32 %v2410_v63, %v11812_v30 }
 0x7d8   : > { %v9064_v1 = vpop.f32.mrf.mxu1 }
 0x7d9   : > { %v2417_v4 = vsel %vm2171_vm2, %v2411_v0, -inf }
 0x7da   : > { %2418 = vmax.xlane.f32.xlu0 %v2417_v4 }
 0x7e7   : > { %2437 = vrot.lane.b32.xlu1 %v11795_v23, %s10943_s4 }
 0x7eb   : > { %2484 = vrot.lane.b32.xlu1 %v11777_v14, %s10944_s7 }
 0x7ef   : > { %2723 = vrot.lane.b32.xlu1 %v11769_v7, %s10942_s1 }
 0x7f3   : > { %2720 = vrot.lane.b32.xlu1 %v11779_v15, %s10942_s1 }
 0x7f7   : > { %2843 = vrot.lane.b32.xlu1 %v11779_v15, %s10943_s4 }
 0x7fb   : > { %2964 = vrot.lane.b32.xlu1 %v11779_v15, %s10944_s7 }
 0x85f   : > { %v2416_v6 = vpop.xlane.xlu1 %2415 }
 0x860   : > { %v2420_v8 = vsub.f32 %v2408_v60, %v2416_v6 }
 0x862   : > { %v2422_v9 = vmul.f32 1.442695, %v2420_v8 }
 0x863   : > { %v2438_v10 = vpop.permute.xlu1 %2437  ;;  %v2419_v11 = vpop.xlane.xlu0 %2418 }
 0x864   : > { %9969 = vpow2.f32 %v2422_v9  ;;  %v2421_v12 = vsub.f32 %v2411_v0, %v2419_v11  ;;  %9066 = vmatpush3.bf16.msra.mxu1 %v2438_v10 }
 0x865   : > { %9071 = vmatprep.subr.bf16.mxu1 %v10940_v42 }
 0x866   : > { %v2424_v14 = vmul.f32 1.442695, %v2421_v12  ;;  %v2646_v12 = vadd.f32 %v11807_v29, %v11804_v25 }
 0x867   : > { %v2485_v13 = vpop.permute.xlu1 %2484 }
 0x868   : > { %9971 = vpow2.f32 %v2424_v14 }
 0x86b   : > { %v2724_v17 = vpop.permute.xlu1 %2723 }
 0x86c   : > { %v2729_v18 = vsel %vm2123_vm1, %v2724_v17, 0 }
 0x86d   : > { %9096 = vmatpush3.bf16.xpose.msra.mxu0 %v2729_v18 }
 0x86e   : > { %9107 = vmatprep.subr.bf16.mxu0 %v10940_v42 }
 0x86f   : > { %v2721_v21 = vpop.permute.xlu1 %2720 }
 0x871   : > { %v9970_v15 = vpop.eup %9969 }
 0x872   : > { %v2426_v20 = vsel %vm2171_vm2, %v9970_v15, 0.0 }
 0x873   : > { %2427 = vadd.xlane.f32.xlu0 %v2426_v20  ;;  %v2844_v39 = vpop.permute.xlu1 %2843  ;;  %v2649_v20 = vadd.f32 %v11816_v36, %v11812_v30 }
 0x874   : > { %9098 = vmatmul.mubr.msk.bf16.vlgmr.msra.gmra.mxu0 %vm2123_vm1, %v2721_v21 }
 0x875   : > { %v9972_v22 = vpop.eup %9971  ;;  %9109 = vmatprep.mubr.msk.bf16.mxu0 %vm10941_vm0, %v10940_v42 }
 0x876   : > { %v2429_v26 = vsel %vm2171_vm2, %v9972_v22, 0.0 }
 0x877   : > { %2430 = vadd.xlane.f32.xlu0 %v2429_v26  ;;  %v2965_v43 = vpop.permute.xlu1 %2964 }
 0x88d   : > { %2486 = vrot.lane.b32.xlu0 %v11767_v3, %s10944_s7 }
 0x891   : > { %2845 = vrot.lane.b32.xlu0 %v11769_v7, %s10943_s4 }
 0x895   : > { %2966 = vrot.lane.b32.xlu0 %v11769_v7, %s10944_s7 }
 0x8fc   : > { %v2428_v27 = vpop.xlane.xlu0 %2427 }
 0x8fd   : > { %9973 = vrcp.f32 %v2428_v27 }
 0x900   : > { %v2431_v28 = vpop.xlane.xlu0 %2430 }
 0x901   : > { %9975 = vrcp.f32 %v2431_v28  ;;  %v2655_v28 = vsel %vm2171_vm2, %v2649_v20, -inf }
 0x904   : > { %v2487_v31 = vpop.permute.xlu0 %2486 }
 0x905   : > { %v2492_v41 = vsel %vm2123_vm1, %v2487_v31, 0 }
 0x908   : > { %v2846_v32 = vpop.permute.xlu0 %2845 }
 0x909   : > { %v2851_v33 = vsel %vm2123_vm1, %v2846_v32, 0 }
 0x90a   : > { %9108 = vmatpush3.bf16.xpose.msra.mxu0 %v2851_v33  ;;  %v9974_v34 = vpop.eup %9973 }
 0x90b   : > { %9119 = vmatprep.subr.bf16.mxu0 %v10940_v42  ;;  %v2434_v37 = vmul.f32 %v9974_v34, %v9970_v15 }
 0x90c   : > { %v2967_v3 = vpop.permute.xlu0 %2966 }
 0x90d   : > { %v2972_v40 = vsel %vm2123_vm1, %v2967_v3, 0 }
 0x90e   : > { %v9976_v35 = vpop.eup %9975 }
 0x90f   : > { %v2435_v38 = vmul.f32 %v9976_v35, %v9972_v22  ;;  %v2652_v22 = vsel %vm2171_vm2, %v2646_v12, -inf }
 0x911   : > { %9110 = vmatmul.mubr.msk.bf16.vlgmr.msra.gmra.mxu0 %vm2123_vm1, %v2844_v39  ;;  %v2436_v7 = vpack.c.bf16 %v2435_v38, %v2434_v37 }
 0x912   : > { %9120 = vmatpush3.bf16.xpose.msra.mxu0 %v2972_v40  ;;  %9121 = vmatprep.mubr.msk.bf16.mxu0 %vm10941_vm0, %v10940_v42 }
 0x913   : > { %9068 = vmatmul.mubr.msk.bf16.vlgmr.msra.gmra.mxu1 %vm2171_vm2, %v2436_v7 }
 0x914   : > { %9072 = vmatpush3.bf16.xpose.msra.mxu1 %v2492_v41  ;;  %9073 = vmatprep.mubr.msk.bf16.mxu1 %vm10941_vm0, %v10940_v42 }
 0x915   : > { %9077 = vmatprep.subr.bf16.mxu1 %v10940_v42 }
 0x919   : > { %9122 = vmatmul.mubr.msk.bf16.vlgmr.msra.gmra.mxu0 %vm2123_vm1, %v2965_v43 }
 0x91b   : > { %9074 = vmatmul.mubr.msk.bf16.vlgmr.msra.gmra.mxu1 %vm2123_vm1, %v2485_v13 }
 0x91c   : > { %9079 = vmatprep.mubr.msk.bf16.mxu1 %vm10941_vm0, %v10940_v42 }
 0x934   : > { %v2765_v49 = vpop.f32.mrf.mxu0 }
 0x935   : > { %v2766_v29 = vadd.f32 %v2765_v49, %v11804_v25 }
 0x936   : > { %v9099_v50 = vpop.f32.mrf.mxu0 }
 0x937   : > { %v2772_v33 = vsel %vm2171_vm2, %v2766_v29, -inf }
 0x938   : > { %v2768_v51 = vpop.f32.mrf.mxu0 }
 0x939   : > { %v2769_v21 = vadd.f32 %v2768_v51, %v11812_v30 }
 0x93a   : > { %v9100_v53 = vpop.f32.mrf.mxu0 }
 0x93b   : > { %v2775_v31 = vsel %vm2171_vm2, %v2769_v21, -inf }
 0x9d1   : > { %v2887_v55 = vpop.f32.mrf.mxu0 }
 0x9d2   : > { %v2888_v36 = vadd.f32 %v2887_v55, %v11804_v25 }
 0x9d3   : > { %v11909_v58 = vpop.f32.mrf.mxu1  ;;  %v9111_v59 = vpop.f32.mrf.mxu0 }
 0x9d4   : > { %v2894_v3 = vsel %vm2171_vm2, %v2888_v36, -inf }
 0x9d5   : > { %v9069_v60 = vpop.f32.mrf.mxu1  ;;  %v2890_v61 = vpop.f32.mrf.mxu0 }
 0x9d6   : > { %v2891_v27 = vadd.f32 %v2890_v61, %v11812_v30 }
 0x9d7   : > { %v11911_v62 = vpop.f32.mrf.mxu1  ;;  %v9112_v63 = vpop.f32.mrf.mxu0 }
 0x9d8   : > { %v9434_v0 = vpack.i.bf16 %v11911_v62, %v11909_v58  ;;  %v2897_v34 = vsel %vm2171_vm2, %v2891_v27, -inf }
 0x9d9   : > { %v9070_v1 = vpop.f32.mrf.mxu1  ;;  %v3008_v4 = vpop.f32.mrf.mxu0 }
 0x9da   : > { %v3009_v35 = vadd.f32 %v3008_v4, %v11804_v25 }
 0x9db   : > { %v2528_v6 = vpop.f32.mrf.mxu1  ;;  %v9123_v8 = vpop.f32.mrf.mxu0 }
 0x9dc   : > { %v2529_v9 = vadd.f32 %v2528_v6, %v11804_v25  ;;  %v3015_v38 = vsel %vm2171_vm2, %v3009_v35, -inf }
 0x9dd   : > { %v9075_v10 = vpop.f32.mrf.mxu1  ;;  %v3011_v11 = vpop.f32.mrf.mxu0 }
 0x9de   : > { %v2535_v14 = vsel %vm2171_vm2, %v2529_v9, -inf  ;;  %v3012_v32 = vadd.f32 %v3011_v11, %v11812_v30 }
 0x9df   : > { %v9124_v13 = vpop.f32.mrf.mxu0  ;;  %2536 = vmax.xlane.f32.xlu0 %v2535_v14  ;;  %v2531_v17 = vpop.f32.mrf.mxu1 }
 0x9e0   : > { %v2532_v18 = vadd.f32 %v2531_v17, %v11812_v30  ;;  %v3018_v37 = vsel %vm2171_vm2, %v3012_v32, -inf }
 0x9e1   : > { %v9076_v15 = vpop.f32.mrf.mxu1 }
 0x9e2   : > { %v2538_v26 = vsel %vm2171_vm2, %v2532_v18, -inf }
 0x9e3   : > { %2653 = vmax.xlane.f32.xlu0 %v2652_v22  ;;  %2539 = vmax.xlane.f32.xlu1 %v2538_v26 }
 0x9e7   : > { %2656 = vmax.xlane.f32.xlu0 %v2655_v28  ;;  %2776 = vmax.xlane.f32.xlu1 %v2775_v31 }
 0x9eb   : > { %2773 = vmax.xlane.f32.xlu0 %v2772_v33  ;;  %2898 = vmax.xlane.f32.xlu1 %v2897_v34 }
 0x9ef   : > { %2895 = vmax.xlane.f32.xlu0 %v2894_v3  ;;  %3019 = vmax.xlane.f32.xlu1 %v3018_v37 }
 0x9f3   : > { %3016 = vmax.xlane.f32.xlu0 %v3015_v38 }
 0xa68   : > { %v2537_v39 = vpop.xlane.xlu0 %2536 }
 0xa69   : > { %v2541_v63 = vsub.f32 %v2529_v9, %v2537_v39 }
 0xa6b   : > { %v2543_v11 = vmul.f32 1.442695, %v2541_v63 }
 0xa6c   : > { %v2654_v40 = vpop.xlane.xlu0 %2653  ;;  %v2540_v30 = vpop.xlane.xlu1 %2539 }
 0xa6d   : > { %v2658_v7 = vsub.f32 %v2646_v12, %v2654_v40  ;;  %v2542_v1 = vsub.f32 %v2532_v18, %v2540_v30 }
 0xa6f   : > { %v2660_v41 = vmul.f32 1.442695, %v2658_v7  ;;  %v2545_v12 = vmul.f32 1.442695, %v2542_v1 }
 0xa70   : > { %v2657_v43 = vpop.xlane.xlu0 %2656  ;;  %v2777_v49 = vpop.xlane.xlu1 %2776 }
 0xa71   : > { %9977 = vpow2.f32 %v2660_v41  ;;  %v2659_v50 = vsub.f32 %v2649_v20, %v2657_v43  ;;  %v2779_v51 = vsub.f32 %v2769_v21, %v2777_v49  ;;  %v1496_v43 = vsub.s32 5, %v11744_v44 }
 0xa73   : > { %v2662_v25 = vmul.f32 1.442695, %v2659_v50  ;;  %v2782_v53 = vmul.f32 1.442695, %v2779_v51  ;;  %v1497_v49 = vrot.slane %v11748_v46, %v1496_v43 }
 0xa74   : > { %v2774_v55 = vpop.xlane.xlu0 %2773  ;;  %v2899_v59 = vpop.xlane.xlu1 %2898 }
 0xa75   : > { %9979 = vpow2.f32 %v2662_v25  ;;  %v2778_v60 = vsub.f32 %v2766_v29, %v2774_v55  ;;  %v2901_v61 = vsub.f32 %v2891_v27, %v2899_v59  ;;  %v2107_v50 = vadd.f32 %v11793_v19, %v1497_v49 }
 0xa76   : > { %9981 = vpow2.f32 %v2782_v53  ;;  %v2111_v51 = vadd.f32 %v11799_v24, %v1497_v49  ;;  %v9648_v49 = vld [vmem:[%s11611_s5 + $0x20] ss:$8 sps:$4 sm:$0xff]  }
 0xa77   : > { %v2780_v4 = vmul.f32 1.442695, %v2778_v60  ;;  %v2904_v6 = vmul.f32 1.442695, %v2901_v61 }
 0xa78   : > { %v2896_v8 = vpop.xlane.xlu0 %2895  ;;  %v3020_v13 = vpop.xlane.xlu1 %3019  ;;  %v2122_v25 = vpack.c.bf16 %v2111_v51, %v2107_v50  ;;  %v9653_v50 = vld [vmem:[%s11611_s5 + $0x14] ss:$8 sps:$4 sm:$0xff]   ;;  %v9651_v51 = vld [vmem:[%s11611_s5 + $0x10] ss:$8 sps:$4 sm:$0xff]  }
 0xa79   : > { %9983 = vpow2.f32 %v2780_v4  ;;  %v2900_v10 = vsub.f32 %v2888_v36, %v2896_v8  ;;  %v3022_v9 = vsub.f32 %v3012_v32, %v3020_v13 }
 0xa7a   : > { %9985 = vpow2.f32 %v2904_v6 }
 0xa7b   : > { %v2902_v14 = vmul.f32 1.442695, %v2900_v10  ;;  %v3025_v26 = vmul.f32 1.442695, %v3022_v9 }
 0xa7c   : > { %v3017_v17 = vpop.xlane.xlu0 %3016 }
 0xa7d   : > { %9987 = vpow2.f32 %v2902_v14  ;;  %v3021_v15 = vsub.f32 %v3009_v35, %v3017_v17 }
 0xa7e   : > { %v11937_v20 = vpop.eup %9977  ;;  %9989 = vpow2.f32 %v2543_v11 }
 0xa7f   : > { %9991 = vpow2.f32 %v2545_v12  ;;  %v3023_v18 = vmul.f32 1.442695, %v3021_v15  ;;  %v2664_v21 = vsel %vm2171_vm2, %v11937_v20, 0.0 }
 0xa80   : > { %2665 = vadd.xlane.f32.xlu0 %v2664_v21 }
 0xa81   : > { %9993 = vpow2.f32 %v3023_v18 }
 0xa82   : > { %v11941_v22 = vpop.eup %9979  ;;  %9995 = vpow2.f32 %v3025_v26 }
 0xa83   : > { %v2667_v29 = vsel %vm2171_vm2, %v11941_v22, 0.0  ;;  %v11945_v27 = vpop.eup %9981 }
 0xa84   : > { %2668 = vadd.xlane.f32.xlu1 %v2667_v29  ;;  %v2787_v36 = vsel %vm2171_vm2, %v11945_v27, 0.0 }
 0xa86   : > { %v11947_v28 = vpop.eup %9983 }
 0xa87   : > { %v2784_v31 = vsel %vm2171_vm2, %v11947_v28, 0.0  ;;  %v11953_v32 = vpop.eup %9985 }
 0xa88   : > { %2785 = vadd.xlane.f32.xlu0 %v2784_v31  ;;  %2788 = vadd.xlane.f32.xlu1 %v2787_v36  ;;  %v2909_v3 = vsel %vm2171_vm2, %v11953_v32, 0.0 }
 0xa8a   : > { %v11955_v33 = vpop.eup %9987 }
 0xa8b   : > { %v9990_v34 = vpop.eup %9989  ;;  %v2906_v35 = vsel %vm2171_vm2, %v11955_v33, 0.0 }
 0xa8c   : > { %v9992_v37 = vpop.eup %9991  ;;  %2907 = vadd.xlane.f32.xlu0 %v2906_v35  ;;  %2910 = vadd.xlane.f32.xlu1 %v2909_v3  ;;  %v2547_v38 = vsel %vm2171_vm2, %v9990_v34, 0.0  ;;  %v9638_v35 = vld [vmem:[%s11611_s5 + $0x64] ss:$8 sps:$4 sm:$0xff]   ;;  %v9636_v3 = vld [vmem:[%s11611_s5 + $0x60] ss:$8 sps:$4 sm:$0xff]  }
 0xa8d   : > { %v2550_v39 = vsel %vm2171_vm2, %v9992_v37, 0.0 }
 0xa8e   : > { %v11963_v40 = vpop.eup %9993 }
 0xa8f   : > { %v3027_v30 = vsel %vm2171_vm2, %v11963_v40, 0.0  ;;  %v11967_v7 = vpop.eup %9995 }
 0xa90   : > { %2548 = vadd.xlane.f32.xlu0 %v2547_v38  ;;  %2551 = vadd.xlane.f32.xlu1 %v2550_v39  ;;  %v3030_v41 = vsel %vm2171_vm2, %v11967_v7, 0.0  ;;  %v9639_v38 = vld [vmem:[%s11611_s5 + $0x50] ss:$8 sps:$4 sm:$0xff]   ;;  %v9644_v39 = vld [vmem:[%s11611_s5 + $0x44] ss:$8 sps:$4 sm:$0xff]  }
 0xa94   : > { %3028 = vadd.xlane.f32.xlu1 %v3027_v30  ;;  %v9647_v30 = vld [vmem:[%s11611_s5 + $0x34] ss:$8 sps:$4 sm:$0xff]  }
 0xa98   : > { %3031 = vadd.xlane.f32.xlu1 %v3030_v41  ;;  %v9650_v41 = vld [vmem:[%s11611_s5 + $0x24] ss:$8 sps:$4 sm:$0xff]  }
 0xaa6   : > { %2558 = vrot.lane.b32.xlu0 %v11795_v23, %s10944_s7 }
 0xaa9   : > { %2796 = vrot.lane.b32.xlu1 %v2122_v25, %s10942_s1 }
 0xaaa   : > { %2917 = vrot.lane.b32.xlu0 %v2122_v25, %s10943_s4 }
 0xaad   : > { %3038 = vrot.lane.b32.xlu1 %v2122_v25, %s10944_s7 }
 0xab1   : > { %9430 = vrot.lane.b32.xlu1 %v9429_v57, %s10944_s7 }
 0xab5   : > { %9435 = vrot.lane.b32.xlu1 %v9434_v0, %s10943_s4 }
 0xb09   : > { %v2666_v46 = vpop.xlane.xlu0 %2665 }
 0xb0d   : > { %v2669_v19 = vpop.xlane.xlu1 %2668 }
 0xb11   : > { %v2786_v23 = vpop.xlane.xlu0 %2785  ;;  %v2789_v24 = vpop.xlane.xlu1 %2788 }
 0xb15   : > { %v2908_v53 = vpop.xlane.xlu0 %2907  ;;  %v2911_v55 = vpop.xlane.xlu1 %2910 }
 0xb19   : > { %v2549_v59 = vpop.xlane.xlu0 %2548  ;;  %v2552_v60 = vpop.xlane.xlu1 %2551 }
 0xb1a   : > { %9997 = vrcp.f32 %v2549_v59  ;;  %v9660_v59 = vld [vmem:[%s11611_s5 + $0xe0] ss:$8 sps:$4 sm:$0xff]  }
 0xb1b   : > { %9999 = vrcp.f32 %v2552_v60  ;;  %v9665_v60 = vld [vmem:[%s11611_s5 + $0xd4] ss:$8 sps:$4 sm:$0xff]  }
 0xb1c   : > { %10001 = vrcp.f32 %v2669_v19  ;;  %v9659_v19 = vld [vmem:[%s11611_s5 + $0xf4] ss:$8 sps:$4 sm:$0xff]  }
 0xb1d   : > { %v2559_v61 = vpop.permute.xlu0 %2558  ;;  %10003 = vrcp.f32 %v2666_v46  ;;  %v3029_v58 = vpop.xlane.xlu1 %3028  ;;  %v9654_v46 = vld [vmem:[%s11611_s5] ss:$8 sps:$4 sm:$0xff]  }
 0xb1e   : > { %9078 = vmatpush3.bf16.msra.mxu1 %v2559_v61  ;;  %10005 = vrcp.f32 %v2786_v23  ;;  %v9657_v23 = vld [vmem:[%s11611_s5 + $0xf0] ss:$8 sps:$4 sm:$0xff]  }
 0xb1f   : > { %9089 = vmatprep.subr.bf16.mxu1 %v10940_v42  ;;  %10007 = vrcp.f32 %v2789_v24  ;;  %v9662_v24 = vld [vmem:[%s11611_s5 + $0xe4] ss:$8 sps:$4 sm:$0xff]  }
 0xb20   : > { %10009 = vrcp.f32 %v2908_v53 }
 0xb21   : > { %10011 = vrcp.f32 %v2911_v55  ;;  %v3032_v4 = vpop.xlane.xlu1 %3031  ;;  %v2918_v18 = vpop.permute.xlu0 %2917 }
 0xb22   : > { %10013 = vrcp.f32 %v3032_v4  ;;  %v9671_v4 = vld [vmem:[%s11611_s5 + $0xb4] ss:$8 sps:$4 sm:$0xff]  }
 0xb23   : > { %10015 = vrcp.f32 %v3029_v58 }
 0xb25   : > { %v2797_v14 = vpop.permute.xlu1 %2796 }
 0xb27   : > { %v9998_v54 = vpop.eup %9997 }
 0xb28   : > { %v10000_v56 = vpop.eup %9999  ;;  %v2555_v57 = vmul.f32 %v9998_v54, %v9990_v34  ;;  %v9635_v34 = vld [vmem:[%s11611_s5 + $0x74] ss:$8 sps:$4 sm:$0xff]  }
 0xb29   : > { %v2556_v62 = vmul.f32 %v10000_v56, %v9992_v37  ;;  %v10002_v63 = vpop.eup %10001  ;;  %3353 = vmatprep.subr.bf16.mxu0 %v9635_v34  ;;  %v9641_v37 = vld [vmem:[%s11611_s5 + $0x54] ss:$8 sps:$4 sm:$0xff]  }
 0xb2a   : > { %v10004_v1 = vpop.eup %10003  ;;  %v2673_v6 = vmul.f32 %v10002_v63, %v11941_v22 }
 0xb2b   : > { %v2557_v0 = vpack.c.bf16 %v2556_v62, %v2555_v57  ;;  %v2672_v8 = vmul.f32 %v10004_v1, %v11937_v20  ;;  %v10006_v10 = vpop.eup %10005  ;;  %v9663_v57 = vld [vmem:[%s11611_s5 + $0xd0] ss:$8 sps:$4 sm:$0xff]   ;;  %v9666_v1 = vld [vmem:[%s11611_s5 + $0xc0] ss:$8 sps:$4 sm:$0xff]  }
 0xb2c   : > { %v10008_v12 = vpop.eup %10007  ;;  %v2792_v13 = vmul.f32 %v10006_v10, %v11947_v28 }
 0xb2d   : > { %9080 = vmatmul.mubr.msk.bf16.vlgmr.msra.gmra.mxu1 %vm2171_vm2, %v2557_v0  ;;  %v2674_v11 = vpack.c.bf16 %v2673_v6, %v2672_v8  ;;  %v2793_v17 = vmul.f32 %v10008_v12, %v11945_v27  ;;  %v10010_v15 = vpop.eup %10009  ;;  %v3039_v27 = vpop.permute.xlu1 %3038  ;;  %v9668_v0 = vld [vmem:[%s11611_s5 + $0xc4] ss:$8 sps:$4 sm:$0xff]   ;;  %v9669_v8 = vld [vmem:[%s11611_s5 + $0xb0] ss:$8 sps:$4 sm:$0xff]  }
 0xb2e   : > { %9090 = vmatpush3.bf16.msra.mxu1 %v2122_v25  ;;  %9091 = vmatprep.mubr.msk.bf16.mxu1 %vm10941_vm0, %v10940_v42  ;;  %v10012_v9 = vpop.eup %10011  ;;  %v2914_v21 = vmul.f32 %v10010_v15, %v11955_v33  ;;  %v9633_v33 = vld [vmem:[%s11611_s5 + $0x70] ss:$8 sps:$4 sm:$0xff]   ;;  %v9656_v25 = vld [vmem:[%s11611_s5 + $0x4] ss:$8 sps:$4 sm:$0xff]  }
 0xb2f   : > { %9101 = vmatprep.subr.bf16.mxu1 %v10940_v42  ;;  %v2794_v20 = vpack.c.bf16 %v2793_v17, %v2792_v13  ;;  %v2915_v22 = vmul.f32 %v10012_v9, %v11953_v32  ;;  %v10014_v29 = vpop.eup %10013  ;;  %3354 = vmatpush1.bf16.msra.mxu0 %v9633_v33  ;;  %v9674_v12 = vld [vmem:[%s11611_s5 + $0xa4] ss:$8 sps:$4 sm:$0xff]   ;;  %v9672_v13 = vld [vmem:[%s11611_s5 + $0xa0] ss:$8 sps:$4 sm:$0xff]   ;;  %v9677_v17 = vld [vmem:[%s11611_s5 + $0x94] ss:$8 sps:$4 sm:$0xff]  }
 0xb30   : > { %v10016_v28 = vpop.eup %10015  ;;  %v3036_v31 = vmul.f32 %v10014_v29, %v11967_v7  ;;  %3355 = vmatprep.subr.bf16.mxu0 %v9638_v35  ;;  %v9645_v7 = vld [vmem:[%s11611_s5 + $0x30] ss:$8 sps:$4 sm:$0xff]  }
 0xb31   : > { %v2916_v26 = vpack.c.bf16 %v2915_v22, %v2914_v21  ;;  %v3035_v36 = vmul.f32 %v10016_v28, %v11963_v40  ;;  %v9642_v40 = vld [vmem:[%s11611_s5 + $0x40] ss:$8 sps:$4 sm:$0xff]   ;;  %v9675_v9 = vld [vmem:[%s11611_s5 + $0x90] ss:$8 sps:$4 sm:$0xff]   ;;  %v9431_v35 = vpop.permute.xlu1 %9430 }
 0xb32   : > { %v9678_v22 = vld [vmem:[%s11611_s5 + $0x80] ss:$8 sps:$4 sm:$0xff]  }
 0xb33   : > { %v3037_v32 = vpack.c.bf16 %v3036_v31, %v3035_v36  ;;  %3356 = vmatpush1.bf16.msra.mxu0 %v9636_v3 }
 0xb34   : > { %3357 = vmatprep.subr.bf16.mxu0 %v9641_v37 }
 0xb35   : > { %9092 = vmatmul.mubr.msk.bf16.vlgmr.msra.gmra.mxu1 %vm2171_vm2, %v2674_v11  ;;  %v9436_v3 = vpop.permute.xlu1 %9435 }
 0xb36   : > { %9102 = vmatpush3.bf16.msra.mxu1 %v2797_v14  ;;  %9103 = vmatprep.mubr.msk.bf16.mxu1 %vm10941_vm0, %v10940_v42 }
 0xb37   : > { %9113 = vmatprep.subr.bf16.mxu1 %v10940_v42  ;;  %3358 = vmatpush1.bf16.msra.mxu0 %v9639_v38  ;;  %v9433_v38 = vunpack.i.h.bf16 %v9431_v35 }
 0xb38   : > { %3359 = vmatprep.subr.bf16.mxu0 %v9644_v39  ;;  %v9432_v39 = vunpack.i.l.bf16 %v9431_v35 }
 0xb3b   : > { %3360 = vmatpush1.bf16.msra.mxu0 %v9642_v40 }
 0xb3c   : > { %3361 = vmatprep.subr.bf16.mxu0 %v9647_v30 }
 0xb3d   : > { %9104 = vmatmul.mubr.msk.bf16.vlgmr.msra.gmra.mxu1 %vm2171_vm2, %v2794_v20 }
 0xb3e   : > { %9114 = vmatpush3.bf16.msra.mxu1 %v2918_v18  ;;  %9115 = vmatprep.mubr.msk.bf16.mxu1 %vm10941_vm0, %v10940_v42 }
 0xb3f   : > { %9125 = vmatprep.subr.bf16.mxu1 %v10940_v42  ;;  %3362 = vmatpush1.bf16.msra.mxu0 %v9645_v7  ;;  %v9438_v7 = vunpack.i.h.bf16 %v9436_v3 }
 0xb40   : > { %3363 = vmatprep.subr.bf16.mxu0 %v9650_v41  ;;  %v9437_v41 = vunpack.i.l.bf16 %v9436_v3 }
 0xb43   : > { %3364 = vmatpush1.bf16.msra.mxu0 %v9648_v49 }
 0xb44   : > { %3365 = vmatprep.subr.bf16.mxu0 %v9653_v50 }
 0xb45   : > { %9116 = vmatmul.mubr.msk.bf16.vlgmr.msra.gmra.mxu1 %vm2171_vm2, %v2916_v26  ;;  %v9680_v26 = vld [vmem:[%s11611_s5 + $0x84] ss:$8 sps:$4 sm:$0xff]  }
 0xb46   : > { %9126 = vmatpush3.bf16.msra.mxu1 %v3039_v27  ;;  %9127 = vmatprep.mubr.msk.bf16.mxu1 %vm10941_vm0, %v10940_v42 }
 0xb47   : > { %3366 = vmatpush1.bf16.msra.mxu0 %v9651_v51 }
 0xb48   : > { %3367 = vmatprep.subr.bf16.mxu0 %v9656_v25 }
 0xb4b   : > { %3368 = vmatpush1.bf16.msra.mxu0 %v9654_v46 }
 0xb4c   : > { %3369 = vmatprep.subr.bf16.mxu0 %v9659_v19 }
 0xb4d   : > { %9128 = vmatmul.mubr.msk.bf16.vlgmr.msra.gmra.mxu1 %vm2171_vm2, %v3037_v32 }
 0xb4f   : > { %3370 = vmatpush2.bf16.msra.mxu0 %v9657_v23  ;;  %v3134_v23 = vsel %vm2123_vm1, %v11835_v5, %v9433_v38 }
 0xb50   : > { %3371 = vmatprep.subr.bf16.mxu0 %v9662_v24  ;;  %v3133_v24 = vsel %vm2123_vm1, %v11833_v2, %v9432_v39 }
 0xb53   : > { %3372 = vmatpush2.bf16.msra.mxu0 %v9660_v59 }
 0xb54   : > { %3373 = vmatprep.subr.bf16.mxu0 %v9665_v60 }
 0xb57   : > { %3374 = vmatpush2.bf16.msra.mxu0 %v9663_v57 }
 0xb58   : > { %3375 = vmatprep.subr.bf16.mxu0 %v9668_v0 }
 0xb5b   : > { %3376 = vmatpush2.bf16.msra.mxu0 %v9666_v1 }
 0xb5c   : > { %3377 = vmatprep.subr.bf16.mxu0 %v9671_v4 }
 0xb5f   : > { %3378 = vmatpush2.bf16.msra.mxu0 %v9669_v8 }
 0xb60   : > { %3379 = vmatprep.subr.bf16.mxu0 %v9674_v12 }
 0xb63   : > { %3380 = vmatpush2.bf16.msra.mxu0 %v9672_v13 }
 0xb64   : > { %3381 = vmatprep.subr.bf16.mxu0 %v9677_v17  ;;  %v10097_v17 = vld [vmem:[#allocation2 + $0x10] sm:$0xff] }
 0xb67   : > { %3382 = vmatpush2.bf16.msra.mxu0 %v9675_v9 }
 0xb68   : > { %3383 = vmatprep.subr.bf16.mxu0 %v9680_v26 }
 0xb6b   : > { %3384 = vmatpush2.bf16.msra.mxu0 %v9678_v22 }
 0xbed   : > { %v2598_v53 = vpop.f32.mrf.mxu1 }
 0xbef   : > { %v9081_v55 = vpop.f32.mrf.mxu1 }
 0xbf0   : > { %v3137_v55 = vsel %vm3135_vm3, %v3134_v23, %v9438_v7  ;;  %v9685_v23 = vld [vmem:[%s11616_s10 + $0x68] sm:$0xff]  }
 0xbf1   : > { %v2601_v61 = vpop.f32.mrf.mxu1 }
 0xbf2   : > { %v9454_v54 = vpack.i.bf16 %v2601_v61, %v2598_v53  ;;  %v3136_v53 = vsel %vm3135_vm3, %v3133_v24, %v9437_v41  ;;  %v9686_v24 = vld [vmem:[%s11616_s10 + $0x28] sm:$0xff]  }
 0xbf3   : > { %v9082_v56 = vpop.f32.mrf.mxu1 }
 0xbf4   : > { %9455 = vrot.lane.b32.xlu1 %v9454_v54, %s10942_s1 }
 0xbf5   : > { %v12038_v58 = vpop.f32.mrf.mxu1 }
 0xbf7   : > { %v9093_v62 = vpop.f32.mrf.mxu1 }
 0xbf9   : > { %v2715_v63 = vpop.f32.mrf.mxu1 }
 0xbfb   : > { %v9094_v6 = vpop.f32.mrf.mxu1 }
 0xbfd   : > { %v2836_v10 = vpop.f32.mrf.mxu1 }
 0xbff   : > { %v9105_v11 = vpop.f32.mrf.mxu1 }
 0xc01   : > { %v2839_v14 = vpop.f32.mrf.mxu1 }
 0xc02   : > { %v9439_v15 = vpack.i.bf16 %v2839_v14, %v2836_v10 }
 0xc03   : > { %v9106_v20 = vpop.f32.mrf.mxu1 }
 0xc04   : > { %9440 = vrot.lane.b32.xlu0 %v9439_v15, %s10944_s7  ;;  %v10098_v20 = vld [vmem:[#allocation2] sm:$0xff] }
 0xc05   : > { %v2957_v18 = vpop.f32.mrf.mxu1 }
 0xc07   : > { %v9117_v21 = vpop.f32.mrf.mxu1 }
 0xc09   : > { %v2960_v29 = vpop.f32.mrf.mxu1 }
 0xc0a   : > { %v9444_v27 = vpack.i.bf16 %v2960_v29, %v2957_v18  ;;  %v10099_v29 = vld [vmem:[#allocation2 + $0x18] sm:$0xff] }
 0xc0b   : > { %v9118_v28 = vpop.f32.mrf.mxu1 }
 0xc0c   : > { %9445 = vrot.lane.b32.xlu0 %v9444_v27, %s10943_s4  ;;  %v10100_v28 = vld [vmem:[#allocation2 + $0x8] sm:$0xff] }
 0xc0d   : > { %v3078_v31 = vpop.f32.mrf.mxu1 }
 0xc0f   : > { %v9129_v36 = vpop.f32.mrf.mxu1 }
 0xc11   : > { %v3081_v32 = vpop.f32.mrf.mxu1 }
 0xc12   : > { %v9449_v33 = vpack.i.bf16 %v3081_v32, %v3078_v31  ;;  %v9681_v32 = vld [vmem:[%s11616_s10 + $0x78] sm:$0xff]  }
 0xc13   : > { %v9130_v34 = vpop.f32.mrf.mxu1  ;;  %8915 = vmatprep.subr.bf16.mxu1 %v9681_v32 }
 0xc14   : > { %9450 = vrot.lane.b32.xlu0 %v9449_v33, %s10942_s1 }
 0xc66   : > { %v9456_v40 = vpop.permute.xlu1 %9455 }
 0xc67   : > { %v9458_v51 = vunpack.i.h.bf16 %v9456_v40  ;;  %v9457_v25 = vunpack.i.l.bf16 %v9456_v40 }
 0xc69   : > { %v3140_v57 = vsel %vm3138_vm4, %v3137_v55, %v9458_v51  ;;  %v3139_v5 = vsel %vm3138_vm4, %v3136_v53, %v9457_v25  ;;  %v9682_v25 = vld [vmem:[%s11616_s10 + $0x38] sm:$0xff]   ;;  %v9687_v53 = vld [vmem:[%s11616_s10 + $0x60] sm:$0xff]  }
 0xc6a   : > { %v3147_v6 = vpack.c.bf16 %v3140_v57, %v3139_v5  ;;  %8916 = vmatpush3.bf16.msra.mxu1 %v9682_v25  ;;  %v9688_v55 = vld [vmem:[%s11616_s10 + $0x20] sm:$0xff]   ;;  %v9694_v57 = vld [vmem:[%s11616_s10 + $0x8] sm:$0xff]   ;;  %v9715_v25 = vld [vmem:[%s11621_s0 + $0x10] ss:$8 sps:$4 sm:$0xff]  }
 0xc6b   : > { %v9695_v5 = vld [vmem:[%s11616_s10 + $0x40] sm:$0xff]  }
 0xc76   : > { %v9441_v37 = vpop.permute.xlu0 %9440 }
 0xc77   : > { %v9443_v49 = vunpack.i.h.bf16 %v9441_v37  ;;  %v9442_v50 = vunpack.i.l.bf16 %v9441_v37 }
 0xc79   : > { %v3142_v60 = vsel %vm2123_vm1, %v2715_v63, %v9443_v49  ;;  %v3141_v61 = vsel %vm2123_vm1, %v12038_v58, %v9442_v50  ;;  %v3181_v58 = vld [vmem:[%s12979_s26] sm:$0x3] }
 0xc7a   : > { %v3186_v63 = vrot.slane %v3181_v58, %v11751_v47  ;;  %v3190_v8 = vrot.slane %v3181_v58, %v11758_v52 }
 0xc7e   : > { %v9446_v30 = vpop.permute.xlu0 %9445 }
 0xc7f   : > { %v9448_v46 = vunpack.i.h.bf16 %v9446_v30  ;;  %v9447_v19 = vunpack.i.l.bf16 %v9446_v30 }
 0xc81   : > { %v3144_v2 = vsel %vm3135_vm3, %v3142_v60, %v9448_v46  ;;  %v3143_v62 = vsel %vm3135_vm3, %v3141_v61, %v9447_v19  ;;  %v9683_v46 = vld [vmem:[%s11616_s10 + $0x70] sm:$0xff]   ;;  %v9690_v60 = vld [vmem:[%s11616_s10 + $0x18] sm:$0xff]  }
 0xc82   : > { %v9684_v19 = vld [vmem:[%s11616_s10 + $0x30] sm:$0xff]   ;;  %8917 = vmatprep.subr.bf16.mxu1 %v9683_v46  ;;  %v9720_v46 = vld [vmem:[%s11621_s0 + $0x4] ss:$8 sps:$4 sm:$0xff]  }
 0xc83   : > { %8918 = vmatpush3.bf16.msra.mxu1 %v9684_v19  ;;  %v9691_v61 = vld [vmem:[%s11616_s10 + $0x50] sm:$0xff]   ;;  %v9718_v19 = vld [vmem:[%s11621_s0] ss:$8 sps:$4 sm:$0xff]  }
 0xc84   : > { %8919 = vmatprep.subr.bf16.mxu1 %v9685_v23  ;;  %v10945_v23 = vmov 0  }
 0xc86   : > { %v9451_v59 = vpop.permute.xlu0 %9450 }
 0xc87   : > { %v9453_v54 = vunpack.i.h.bf16 %v9451_v59  ;;  %v9452_v56 = vunpack.i.l.bf16 %v9451_v59  ;;  %8920 = vmatpush3.bf16.msra.mxu1 %v9686_v24  ;;  %v9689_v59 = vld [vmem:[%s11616_s10 + $0x58] sm:$0xff]  }
 0xc88   : > { %8921 = vmatprep.subr.bf16.mxu1 %v9687_v53 }
 0xc89   : > { %v3145_v0 = vsel %vm3138_vm4, %v3143_v62, %v9452_v56  ;;  %v3146_v1 = vsel %vm3138_vm4, %v3144_v2, %v9453_v54  ;;  %v9692_v54 = vld [vmem:[%s11616_s10 + $0x10] sm:$0xff]   ;;  %v9693_v56 = vld [vmem:[%s11616_s10 + $0x48] sm:$0xff]   ;;  %v9696_v2 = vld [vmem:[%s11616_s10] sm:$0xff]  }
 0xc8a   : > { %v3148_v4 = vpack.c.bf16 %v3146_v1, %v3145_v0  ;;  %v9699_v62 = vld [vmem:[%s11621_s0 + $0x74] ss:$8 sps:$4 sm:$0xff]  }
 0xc8b   : > { %8922 = vmatpush3.bf16.msra.mxu1 %v9688_v55 }
 0xc8c   : > { %3385 = vmatprep.mubr.bf16.mxu0 %v3148_v4  ;;  %8923 = vmatprep.subr.bf16.mxu1 %v9689_v59  ;;  %v8308_v59 = vld [vmem:[%s11574_s8] ss:$0 sm:$0xff] }
 0xc8d   : > { %3386 = vmatmul.mubr.bf16.vlgmr.msra.gmra.mxu0 %v3147_v6 }
 0xc8f   : > { %8924 = vmatpush3.bf16.msra.mxu1 %v9690_v60 }
 0xc90   : > { %8925 = vmatprep.subr.bf16.mxu1 %v9691_v61 }
 0xc93   : > { %8926 = vmatpush3.bf16.msra.mxu1 %v9692_v54 }
 0xc94   : > { %8927 = vmatprep.subr.bf16.mxu1 %v9693_v56 }
 0xc97   : > { %8928 = vmatpush3.bf16.msra.mxu1 %v9694_v57 }
 0xc98   : > { %8929 = vmatprep.subr.bf16.mxu1 %v9695_v5 }
 0xc9b   : > { %8930 = vmatpush3.bf16.msra.mxu1 %v9696_v2 }
 0xc9c   : > { %3754 = vmatprep.subr.bf16.mxu1 %v9699_v62 }
 0xd4d   : > { %v3387_v10 = vpop.f32.mrf.mxu0 }
 0xd4e   : > { %v3388_v11 = vadd.f32 %v3387_v10, %v3186_v63 }
 0xd4f   : > { %v3389_v12 = vpop.f32.mrf.mxu0 }
 0xd50   : > { %v3390_v14 = vadd.f32 %v3389_v12, %v3190_v8  ;;  %v3396_v15 = vadd.f32 %v10097_v17, %v3388_v11  ;;  %v3401_v11 = vld [vmem:[%s12981_s2] sm:$0x3] }
 0xd51   : > { %v3391_v13 = vpop.f32.mrf.mxu0 }
 0xd52   : > { %v3397_v9 = vadd.f32 %v10098_v20, %v3390_v14  ;;  %v3392_v18 = vadd.f32 %v3391_v13, %v3186_v63  ;;  %v3454_v20 = vrot.slane %v3401_v11, %v11751_v47 }
 0xd53   : > { %v3393_v21 = vpop.f32.mrf.mxu0 }
 0xd54   : > { %v3394_v22 = vadd.f32 %v3393_v21, %v3190_v8  ;;  %v3402_v26 = vadd.f32 %v3397_v9, %v3396_v15  ;;  %v3398_v27 = vadd.f32 %v10099_v29, %v3392_v18  ;;  %v3400_v8 = vld [vmem:[%s12980_s6] sm:$0x3] }
 0xd55   : > { %v3439_v14 = vrot.slane %v3400_v8, %v11751_v47  ;;  %v3443_v13 = vrot.slane %v3400_v8, %v11758_v52 }
 0xd56   : > { %v3399_v31 = vadd.f32 %v10100_v28, %v3394_v22  ;;  %3403 = vadd.xlane.f32.xlu0 %v3402_v26 }
 0xd58   : > { %v3405_v36 = vadd.f32 %v3399_v31, %v3398_v27 }
 0xd5a   : > { %3406 = vadd.xlane.f32.xlu1 %v3405_v36 }
 0xddf   : > { %v3404_v33 = vpop.xlane.xlu0 %3403 }
 0xde0   : > { %v3409_v34 = vmul.f32 0.00390625, %v3404_v33 }
 0xde2   : > { %v3411_v35 = vsub.f32 %v3396_v15, %v3409_v34  ;;  %v3412_v3 = vsub.f32 %v3397_v9, %v3409_v34  ;;  %v3458_v9 = vrot.slane %v3401_v11, %v11758_v52 }
 0xde3   : > { %v3407_v37 = vpop.xlane.xlu1 %3406 }
 0xde4   : > { %v3410_v38 = vmul.f32 0.00390625, %v3407_v37  ;;  %v3415_v39 = vmul.f32 %v3411_v35, %v3411_v35  ;;  %v3416_v40 = vmul.f32 %v3412_v3, %v3412_v3  ;;  %v9700_v37 = vld [vmem:[%s11621_s0 + $0x60] ss:$8 sps:$4 sm:$0xff]  }
 0xde6   : > { %v3413_v30 = vsub.f32 %v3398_v27, %v3410_v38  ;;  %v3414_v7 = vsub.f32 %v3399_v31, %v3410_v38  ;;  %v3419_v41 = vadd.f32 %v3416_v40, %v3415_v39  ;;  %v9705_v38 = vld [vmem:[%s11621_s0 + $0x54] ss:$8 sps:$4 sm:$0xff]   ;;  %v9703_v39 = vld [vmem:[%s11621_s0 + $0x50] ss:$8 sps:$4 sm:$0xff]   ;;  %v9708_v40 = vld [vmem:[%s11621_s0 + $0x44] ss:$8 sps:$4 sm:$0xff]  }
 0xde8   : > { %3420 = vadd.xlane.f32.xlu0 %v3419_v41  ;;  %v3417_v49 = vmul.f32 %v3413_v30, %v3413_v30  ;;  %v3418_v50 = vmul.f32 %v3414_v7, %v3414_v7  ;;  %v9709_v41 = vld [vmem:[%s11621_s0 + $0x30] ss:$8 sps:$4 sm:$0xff]  }
 0xdea   : > { %v3422_v51 = vadd.f32 %v3418_v50, %v3417_v49  ;;  %v9714_v49 = vld [vmem:[%s11621_s0 + $0x24] ss:$8 sps:$4 sm:$0xff]   ;;  %v9712_v50 = vld [vmem:[%s11621_s0 + $0x20] ss:$8 sps:$4 sm:$0xff]  }
 0xdec   : > { %3423 = vadd.xlane.f32.xlu0 %v3422_v51  ;;  %v9717_v51 = vld [vmem:[%s11621_s0 + $0x14] ss:$8 sps:$4 sm:$0xff]  }
 0xe71   : > { %v3421_v0 = vpop.xlane.xlu0 %3420 }
 0xe72   : > { %v3425_v1 = vmul.f32 0.00390625, %v3421_v0  ;;  %v3662_v0 = vld [vmem:[%s12982_s19] sm:$0x3] }
 0xe74   : > { %v3427_v4 = vadd.f32 1e-05, %v3425_v1  ;;  %v3667_v1 = vrot.slane %v3662_v0, %v11751_v47 }
 0xe75   : > { %v3424_v6 = vpop.xlane.xlu0 %3423 }
 0xe76   : > { %10017 = vrsqrt.f32 %v3427_v4  ;;  %v3426_v58 = vmul.f32 0.00390625, %v3424_v6  ;;  %v3671_v4 = vrot.slane %v3662_v0, %v11758_v52 }
 0xe78   : > { %v3428_v63 = vadd.f32 1e-05, %v3426_v58 }
 0xe7a   : > { %10019 = vrsqrt.f32 %v3428_v63 }
 0xe83   : > { %v10018_v10 = vpop.eup %10017 }
 0xe84   : > { %v3432_v12 = vmul.f32 %v10018_v10, %v3412_v3  ;;  %v3431_v17 = vmul.f32 %v10018_v10, %v3411_v35  ;;  %v9697_v35 = vld [vmem:[%s11621_s0 + $0x70] ss:$8 sps:$4 sm:$0xff]   ;;  %v9702_v3 = vld [vmem:[%s11621_s0 + $0x64] ss:$8 sps:$4 sm:$0xff]  }
 0xe86   : > { %v3447_v21 = vmul.f32 %v3443_v13, %v3432_v12  ;;  %v3446_v26 = vmul.f32 %v3439_v14, %v3431_v17 }
 0xe87   : > { %v10020_v15 = vpop.eup %10019 }
 0xe88   : > { %v3434_v18 = vmul.f32 %v10020_v15, %v3414_v7  ;;  %v3433_v22 = vmul.f32 %v10020_v15, %v3413_v30  ;;  %v3462_v28 = vadd.f32 %v3458_v9, %v3447_v21  ;;  %v3461_v36 = vadd.f32 %v3454_v20, %v3446_v26  ;;  %v9706_v30 = vld [vmem:[%s11621_s0 + $0x40] ss:$8 sps:$4 sm:$0xff]   ;;  %v9711_v7 = vld [vmem:[%s11621_s0 + $0x34] ss:$8 sps:$4 sm:$0xff]   ;;  %v9724_v26 = vld [vmem:[%s11552_s9 + $0x458] ss:$24 sps:$4 sm:$0xff]  }
 0xe89   : > { %v9721_v21 = vld [vmem:[%s11552_s9 + $0x450] ss:$24 sps:$4 sm:$0xff]  }
 0xe8a   : > { %v3449_v29 = vmul.f32 %v3443_v13, %v3434_v18  ;;  %v3448_v27 = vmul.f32 %v3439_v14, %v3433_v22  ;;  %v9723_v22 = vld [vmem:[%s11552_s9 + $0x454] ss:$24 sps:$4 sm:$0xff]  }
 0xe8b   : > { %4477 = vmatprep.subr.bf16.mxu0 %v9723_v22  ;;  %v9786_v22 = vld [vmem:[%s11552_s9 + $0x57c] ss:$24 sps:$4 sm:$0xff]  }
 0xe8c   : > { %v12097_v31 = vadd.f32 %v3458_v9, %v3449_v29  ;;  %v12099_v32 = vadd.f32 %v3454_v20, %v3448_v27  ;;  %v9726_v29 = vld [vmem:[%s11552_s9 + $0x45c] ss:$24 sps:$4 sm:$0xff]   ;;  %4478 = vmatpush1.bf16.msra.mxu0 %v9721_v21  ;;  %v9781_v21 = vld [vmem:[%s11552_s9 + $0x570] ss:$24 sps:$4 sm:$0xff]  }
 0xe8d   : > { %v9729_v27 = vld [vmem:[%s11552_s9 + $0x424] ss:$24 sps:$4 sm:$0xff]  }
 0xe8e   : > { %v3466_v33 = vpack.c.bf16 %v12097_v31, %v3462_v28  ;;  %v3465_v34 = vpack.c.bf16 %v12099_v32, %v3461_v36  ;;  %4479 = vmatprep.subr.bf16.mxu0 %v9729_v27  ;;  %v9789_v27 = vld [vmem:[%s11552_s9 + $0x544] ss:$24 sps:$4 sm:$0xff]  }
 0xe90   : > { %3634 = vmatprep.mubr.bf16.mxu1 %v3466_v33  ;;  %v9738_v33 = vld [vmem:[%s11552_s9 + $0x3fc] ss:$24 sps:$4 sm:$0xff]  }
 0xe91   : > { %3635 = vmatmul.mubr.bf16.vlgmr.msra.gmra.mxu1 %v3465_v34  ;;  %v9733_v34 = vld [vmem:[%s11552_s9 + $0x3f0] ss:$24 sps:$4 sm:$0xff]  }
 0xe92   : > { %3755 = vmatpush1.bf16.msra.mxu1 %v9697_v35  ;;  %3786 = vmatprep.mubr.bf16.mxu1 %v10945_v23  ;;  %v9736_v35 = vld [vmem:[%s11552_s9 + $0x3f8] ss:$24 sps:$4 sm:$0xff]  }
 0xe93   : > { %3756 = vmatprep.subr.bf16.mxu1 %v9702_v3  ;;  %v9741_v3 = vld [vmem:[%s11552_s9 + $0x3c4] ss:$24 sps:$4 sm:$0xff]  }
 0xe96   : > { %3757 = vmatpush1.bf16.msra.mxu1 %v9700_v37  ;;  %v9744_v37 = vld [vmem:[%s11552_s9 + $0x3cc] ss:$24 sps:$4 sm:$0xff]  }
 0xe97   : > { %3758 = vmatprep.subr.bf16.mxu1 %v9705_v38  ;;  %v9739_v38 = vld [vmem:[%s11552_s9 + $0x3c0] ss:$24 sps:$4 sm:$0xff]  }
 0xe9a   : > { %3759 = vmatpush1.bf16.msra.mxu1 %v9703_v39  ;;  %v9742_v39 = vld [vmem:[%s11552_s9 + $0x3c8] ss:$24 sps:$4 sm:$0xff]  }
 0xe9b   : > { %3760 = vmatprep.subr.bf16.mxu1 %v9708_v40  ;;  %v9747_v40 = vld [vmem:[%s11552_s9 + $0x394] ss:$24 sps:$4 sm:$0xff]  }
 0xe9e   : > { %3761 = vmatpush1.bf16.msra.mxu1 %v9706_v30  ;;  %v9750_v30 = vld [vmem:[%s11552_s9 + $0x39c] ss:$24 sps:$4 sm:$0xff]  }
 0xe9f   : > { %3762 = vmatprep.subr.bf16.mxu1 %v9711_v7  ;;  %v9745_v7 = vld [vmem:[%s11552_s9 + $0x390] ss:$24 sps:$4 sm:$0xff]  }
 0xea2   : > { %3763 = vmatpush1.bf16.msra.mxu1 %v9709_v41  ;;  %v9748_v41 = vld [vmem:[%s11552_s9 + $0x398] ss:$24 sps:$4 sm:$0xff]  }
 0xea3   : > { %3764 = vmatprep.subr.bf16.mxu1 %v9714_v49  ;;  %v9753_v49 = vld [vmem:[%s11552_s9 + $0x364] ss:$24 sps:$4 sm:$0xff]  }
 0xea6   : > { %3765 = vmatpush1.bf16.msra.mxu1 %v9712_v50  ;;  %v9756_v50 = vld [vmem:[%s11552_s9 + $0x36c] ss:$24 sps:$4 sm:$0xff]  }
 0xea7   : > { %3766 = vmatprep.subr.bf16.mxu1 %v9717_v51  ;;  %v9751_v51 = vld [vmem:[%s11552_s9 + $0x360] ss:$24 sps:$4 sm:$0xff]  }
 0xeaa   : > { %3767 = vmatpush1.bf16.msra.mxu1 %v9715_v25  ;;  %v9754_v25 = vld [vmem:[%s11552_s9 + $0x368] ss:$24 sps:$4 sm:$0xff]  }
 0xeab   : > { %3768 = vmatprep.subr.bf16.mxu1 %v9720_v46  ;;  %v9759_v46 = vld [vmem:[%s11552_s9 + $0x334] ss:$24 sps:$4 sm:$0xff]  }
 0xeae   : > { %3769 = vmatpush1.bf16.msra.mxu1 %v9718_v19  ;;  %v9762_v19 = vld [vmem:[%s11552_s9 + $0x33c] ss:$24 sps:$4 sm:$0xff]  }
 0xeaf   : > { %4520 = vmatprep.subr.bf16.mxu1 %v9726_v29  ;;  %v9787_v29 = vld [vmem:[%s11552_s9 + $0x540] ss:$24 sps:$4 sm:$0xff]  }
 0xf51   : > { %v8931_v24 = vpop.f32.mrf.mxu1 }
 0xf53   : > { %v8932_v53 = vpop.f32.mrf.mxu1 }
 0xf54   : > { %v8933_v55 = vadd.f32 %v8932_v53, %v8931_v24  ;;  %v9757_v24 = vld [vmem:[%s11552_s9 + $0x330] ss:$24 sps:$4 sm:$0xff]  }
 0xf55   : > { %v8934_v60 = vpop.f32.mrf.mxu1  ;;  %v9760_v53 = vld [vmem:[%s11552_s9 + $0x338] ss:$24 sps:$4 sm:$0xff]  }
 0xf56   : > { %v3637_v54 = vadd.f32 %v8933_v55, %v8308_v59  ;;  %v9765_v55 = vld [vmem:[%s11552_s9 + $0x304] ss:$24 sps:$4 sm:$0xff]  }
 0xf57   : > { %v8935_v61 = vpop.f32.mrf.mxu1 }
 0xf58   : > { %v8936_v56 = vadd.f32 %v8935_v61, %v8934_v60  ;;  %v3643_v5 = vmax.f32 %v3637_v54, 0.0  ;;  %v9763_v60 = vld [vmem:[%s11552_s9 + $0x300] ss:$24 sps:$4 sm:$0xff]   ;;  %v9771_v54 = vld [vmem:[%s11552_s9 + $0x5d4] ss:$24 sps:$4 sm:$0xff]  }
 0xf59   : > { %v9766_v61 = vld [vmem:[%s11552_s9 + $0x308] ss:$24 sps:$4 sm:$0xff]  }
 0xf5a   : > { %v3640_v57 = vadd.f32 %v8936_v56, %v8308_v59  ;;  %v9768_v59 = vld [vmem:[%s11552_s9 + $0x30c] ss:$24 sps:$4 sm:$0xff]   ;;  %v9774_v56 = vld [vmem:[%s11552_s9 + $0x5dc] ss:$24 sps:$4 sm:$0xff]  }
 0xf5c   : > { %v3644_v2 = vmax.f32 %v3640_v57, 0.0  ;;  %v9769_v57 = vld [vmem:[%s11552_s9 + $0x5d0] ss:$24 sps:$4 sm:$0xff]  }
 0xf5e   : > { %v3645_v62 = vpack.c.bf16 %v3644_v2, %v3643_v5  ;;  %v9772_v5 = vld [vmem:[%s11552_s9 + $0x5d8] ss:$24 sps:$4 sm:$0xff]  }
 0xf60   : > { %3787 = vmatmul.mubr.bf16.vlgmr.msra.gmra.mxu1 %v3645_v62 }
 0xf61   : > { %4521 = vmatpush1.bf16.msra.mxu1 %v9724_v26  ;;  %v9784_v26 = vld [vmem:[%s11552_s9 + $0x578] ss:$24 sps:$4 sm:$0xff]  }
0x1020   : > { %v3788_v6 = vpop.f32.mrf.mxu1 }
0x1021   : > { %v3789_v58 = vadd.f32 %v3788_v6, %v3667_v1 }
0x1022   : > { %v3790_v63 = vpop.f32.mrf.mxu1 }
0x1023   : > { %v3791_v8 = vadd.f32 %v3790_v63, %v3671_v4  ;;  %v12124_v11 = vadd.f32 %v3789_v58, %v3461_v36  ;;  %v9730_v36 = vld [vmem:[%s11552_s9 + $0x428] ss:$24 sps:$4 sm:$0xff]  }
0x1024   : > { %v3792_v10 = vpop.f32.mrf.mxu1 }
0x1025   : > { %v12126_v12 = vadd.f32 %v3791_v8, %v3462_v28  ;;  %v3793_v14 = vadd.f32 %v3792_v10, %v3667_v1  ;;  %v9732_v28 = vld [vmem:[%s11552_s9 + $0x42c] ss:$24 sps:$4 sm:$0xff]  }
0x1026   : > { %v3794_v13 = vpop.f32.mrf.mxu1  ;;  %4522 = vmatprep.subr.bf16.mxu1 %v9732_v28  ;;  %v9790_v28 = vld [vmem:[%s11552_s9 + $0x548] ss:$24 sps:$4 sm:$0xff]  }
0x1027   : > { %v3795_v17 = vadd.f32 %v3794_v13, %v3671_v4  ;;  %v3803_v15 = vadd.f32 %v12126_v12, %v12124_v11  ;;  %v12131_v20 = vadd.f32 %v3793_v14, %v12099_v32  ;;  %v9735_v32 = vld [vmem:[%s11552_s9 + $0x3f4] ss:$24 sps:$4 sm:$0xff]   ;;  %4523 = vmatpush1.bf16.msra.mxu1 %v9730_v36 }
0x1028   : > { %4524 = vmatprep.subr.bf16.mxu1 %v9738_v33  ;;  %v9795_v36 = vld [vmem:[%s11552_s9 + $0x514] ss:$24 sps:$4 sm:$0xff]   ;;  %v9793_v33 = vld [vmem:[%s11552_s9 + $0x510] ss:$24 sps:$4 sm:$0xff]  }
0x1029   : > { %v12134_v9 = vadd.f32 %v3795_v17, %v12097_v31  ;;  %3804 = vadd.xlane.f32.xlu0 %v3803_v15  ;;  %v9727_v31 = vld [vmem:[%s11552_s9 + $0x420] ss:$24 sps:$4 sm:$0xff]   ;;  %v9777_v17 = vld [vmem:[%s11552_s9 + $0x5a4] ss:$24 sps:$4 sm:$0xff]  }
0x102a   : > { %4480 = vmatpush1.bf16.msra.mxu0 %v9727_v31  ;;  %v9775_v15 = vld [vmem:[%s11552_s9 + $0x5a0] ss:$24 sps:$4 sm:$0xff]   ;;  %v9792_v31 = vld [vmem:[%s11552_s9 + $0x54c] ss:$24 sps:$4 sm:$0xff]  }
0x102b   : > { %v3806_v18 = vadd.f32 %v12134_v9, %v12131_v20  ;;  %4481 = vmatprep.subr.bf16.mxu0 %v9735_v32  ;;  %4525 = vmatpush1.bf16.msra.mxu1 %v9736_v35  ;;  %v9798_v32 = vld [vmem:[%s11552_s9 + $0x51c] ss:$24 sps:$4 sm:$0xff]  }
0x102c   : > { %4526 = vmatprep.subr.bf16.mxu1 %v9744_v37  ;;  %v9801_v35 = vld [vmem:[%s11552_s9 + $0x4e4] ss:$24 sps:$4 sm:$0xff]   ;;  %v9799_v37 = vld [vmem:[%s11552_s9 + $0x4e0] ss:$24 sps:$4 sm:$0xff]  }
0x102d   : > { %3807 = vadd.xlane.f32.xlu1 %v3806_v18  ;;  %v9783_v18 = vld [vmem:[%s11552_s9 + $0x574] ss:$24 sps:$4 sm:$0xff]  }
0x102e   : > { %4482 = vmatpush1.bf16.msra.mxu0 %v9733_v34  ;;  %v9796_v34 = vld [vmem:[%s11552_s9 + $0x518] ss:$24 sps:$4 sm:$0xff]  }
0x102f   : > { %4483 = vmatprep.subr.bf16.mxu0 %v9741_v3  ;;  %4527 = vmatpush1.bf16.msra.mxu1 %v9742_v39  ;;  %v9804_v3 = vld [vmem:[%s11552_s9 + $0x4ec] ss:$24 sps:$4 sm:$0xff]  }
0x1030   : > { %4528 = vmatprep.subr.bf16.mxu1 %v9750_v30  ;;  %v9807_v39 = vld [vmem:[%s11552_s9 + $0x4b4] ss:$24 sps:$4 sm:$0xff]   ;;  %v9805_v30 = vld [vmem:[%s11552_s9 + $0x4b0] ss:$24 sps:$4 sm:$0xff]  }
0x1032   : > { %4484 = vmatpush1.bf16.msra.mxu0 %v9739_v38  ;;  %v9802_v38 = vld [vmem:[%s11552_s9 + $0x4e8] ss:$24 sps:$4 sm:$0xff]  }
0x1033   : > { %4485 = vmatprep.subr.bf16.mxu0 %v9747_v40  ;;  %4529 = vmatpush1.bf16.msra.mxu1 %v9748_v41  ;;  %v9810_v40 = vld [vmem:[%s11552_s9 + $0x4bc] ss:$24 sps:$4 sm:$0xff]  }
0x1034   : > { %4530 = vmatprep.subr.bf16.mxu1 %v9756_v50  ;;  %v9813_v41 = vld [vmem:[%s11552_s9 + $0x484] ss:$24 sps:$4 sm:$0xff]   ;;  %v9811_v50 = vld [vmem:[%s11552_s9 + $0x480] ss:$24 sps:$4 sm:$0xff]  }
0x1036   : > { %4486 = vmatpush1.bf16.msra.mxu0 %v9745_v7  ;;  %v9808_v7 = vld [vmem:[%s11552_s9 + $0x4b8] ss:$24 sps:$4 sm:$0xff]  }
0x1037   : > { %4487 = vmatprep.subr.bf16.mxu0 %v9753_v49  ;;  %4531 = vmatpush1.bf16.msra.mxu1 %v9754_v25  ;;  %v9816_v49 = vld [vmem:[%s11552_s9 + $0x48c] ss:$24 sps:$4 sm:$0xff]  }
0x1038   : > { %4532 = vmatprep.subr.bf16.mxu1 %v9762_v19  ;;  %v9819_v25 = vld [vmem:[%s11552_s9 + $0x464] ss:$24 sps:$4 sm:$0xff]  }
0x103a   : > { %4488 = vmatpush1.bf16.msra.mxu0 %v9751_v51  ;;  %v9814_v51 = vld [vmem:[%s11552_s9 + $0x488] ss:$24 sps:$4 sm:$0xff]  }
0x103b   : > { %4489 = vmatprep.subr.bf16.mxu0 %v9759_v46  ;;  %4533 = vmatpush1.bf16.msra.mxu1 %v9760_v53 }
0x103c   : > { %4534 = vmatprep.subr.bf16.mxu1 %v9768_v59 }
0x103e   : > { %4490 = vmatpush1.bf16.msra.mxu0 %v9757_v24 }
0x103f   : > { %4491 = vmatprep.subr.bf16.mxu0 %v9765_v55  ;;  %4535 = vmatpush1.bf16.msra.mxu1 %v9766_v61 }
0x1040   : > { %4536 = vmatprep.subr.bf16.mxu1 %v9774_v56 }
0x1042   : > { %4492 = vmatpush1.bf16.msra.mxu0 %v9763_v60  ;;  %v3801_v60 = vld [vmem:[%s12983_s23] sm:$0x3] }
0x1043   : > { %4493 = vmatprep.subr.bf16.mxu0 %v9771_v54  ;;  %4537 = vmatpush2.bf16.msra.mxu1 %v9772_v5  ;;  %v3802_v54 = vld [vmem:[%s12984_s3] sm:$0x3]  ;;  %v3843_v5 = vrot.slane %v3801_v60, %v11758_v52 }
0x1046   : > { %4494 = vmatpush2.bf16.msra.mxu0 %v9769_v57  ;;  %v3839_v57 = vrot.slane %v3801_v60, %v11751_v47 }
0x1047   : > { %4495 = vmatprep.subr.bf16.mxu0 %v9777_v17 }
0x104a   : > { %4496 = vmatpush2.bf16.msra.mxu0 %v9775_v15 }
0x104b   : > { %4497 = vmatprep.subr.bf16.mxu0 %v9783_v18  ;;  %v9820_v18 = vld [vmem:[%s11552_s9 + $0x430] ss:$24 sps:$4 sm:$0xff]  }
0x104e   : > { %4498 = vmatpush2.bf16.msra.mxu0 %v9781_v21  ;;  %v9825_v21 = vld [vmem:[%s11552_s9 + $0x404] ss:$24 sps:$4 sm:$0xff]  }
0x104f   : > { %4499 = vmatprep.subr.bf16.mxu0 %v9789_v27  ;;  %v9831_v27 = vld [vmem:[%s11552_s9 + $0x3a4] ss:$24 sps:$4 sm:$0xff]  }
0x1052   : > { %4500 = vmatpush2.bf16.msra.mxu0 %v9787_v29  ;;  %v9826_v29 = vld [vmem:[%s11552_s9 + $0x3d0] ss:$24 sps:$4 sm:$0xff]  }
0x1053   : > { %4501 = vmatprep.subr.bf16.mxu0 %v9795_v36  ;;  %v9832_v36 = vld [vmem:[%s11552_s9 + $0x370] ss:$24 sps:$4 sm:$0xff]  }
0x1056   : > { %4502 = vmatpush2.bf16.msra.mxu0 %v9793_v33  ;;  %v9835_v33 = vld [vmem:[%s11552_s9 + $0x340] ss:$24 sps:$4 sm:$0xff]  }
0x1057   : > { %4503 = vmatprep.subr.bf16.mxu0 %v9801_v35  ;;  %v9838_v35 = vld [vmem:[%s11552_s9 + $0x310] ss:$24 sps:$4 sm:$0xff]  }
0x105a   : > { %4504 = vmatpush2.bf16.msra.mxu0 %v9799_v37  ;;  %v9841_v37 = vld [vmem:[%s11552_s9 + $0x5e0] ss:$24 sps:$4 sm:$0xff]  }
0x105b   : > { %4505 = vmatprep.subr.bf16.mxu0 %v9807_v39  ;;  %v9844_v39 = vld [vmem:[%s11552_s9 + $0x5b0] ss:$24 sps:$4 sm:$0xff]  }
0x105e   : > { %4506 = vmatpush2.bf16.msra.mxu0 %v9805_v30  ;;  %v9847_v30 = vld [vmem:[%s11552_s9 + $0x580] ss:$24 sps:$4 sm:$0xff]  }
0x105f   : > { %4507 = vmatprep.subr.bf16.mxu0 %v9813_v41  ;;  %v9850_v41 = vld [vmem:[%s11552_s9 + $0x550] ss:$24 sps:$4 sm:$0xff]  }
0x1062   : > { %4508 = vmatpush2.bf16.msra.mxu0 %v9811_v50  ;;  %v9853_v50 = vld [vmem:[%s11552_s9 + $0x520] ss:$24 sps:$4 sm:$0xff]  }
0x1063   : > { %4563 = vmatprep.subr.bf16.mxu0 %v9819_v25  ;;  %v9856_v25 = vld [vmem:[%s11552_s9 + $0x4f0] ss:$24 sps:$4 sm:$0xff]  }
0x10b2   : > { %v3805_v2 = vpop.xlane.xlu0 %3804 }
0x10b3   : > { %v3809_v62 = vmul.f32 0.00390625, %v3805_v2 }
0x10b5   : > { %v12175_v0 = vsub.f32 %v12124_v11, %v3809_v62  ;;  %v12178_v1 = vsub.f32 %v12126_v12, %v3809_v62 }
0x10b6   : > { %v3808_v4 = vpop.xlane.xlu1 %3807 }
0x10b7   : > { %v3810_v6 = vmul.f32 0.00390625, %v3808_v4  ;;  %v3815_v58 = vmul.f32 %v12175_v0, %v12175_v0  ;;  %v3816_v63 = vmul.f32 %v12178_v1, %v12178_v1  ;;  %v3854_v4 = vrot.slane %v3802_v54, %v11751_v47 }
0x10b9   : > { %v12185_v8 = vsub.f32 %v12131_v20, %v3810_v6  ;;  %v12188_v10 = vsub.f32 %v12134_v9, %v3810_v6  ;;  %v3819_v11 = vadd.f32 %v3816_v63, %v3815_v58  ;;  %v9780_v20 = vld [vmem:[%s11552_s9 + $0x5ac] ss:$24 sps:$4 sm:$0xff]   ;;  %v9778_v9 = vld [vmem:[%s11552_s9 + $0x5a8] ss:$24 sps:$4 sm:$0xff]   ;;  %v3858_v6 = vrot.slane %v3802_v54, %v11758_v52 }
0x10ba   : > { %4538 = vmatprep.subr.bf16.mxu1 %v9780_v20  ;;  %v9817_v20 = vld [vmem:[%s11552_s9 + $0x460] ss:$24 sps:$4 sm:$0xff]  }
0x10bb   : > { %3820 = vadd.xlane.f32.xlu0 %v3819_v11  ;;  %v3817_v12 = vmul.f32 %v12185_v8, %v12185_v8  ;;  %v3818_v14 = vmul.f32 %v12188_v10, %v12188_v10  ;;  %4539 = vmatpush2.bf16.msra.mxu1 %v9778_v9  ;;  %v9822_v9 = vld [vmem:[%s11552_s9 + $0x434] ss:$24 sps:$4 sm:$0xff]  }
0x10bc   : > { %4540 = vmatprep.subr.bf16.mxu1 %v9786_v22  ;;  %v9823_v22 = vld [vmem:[%s11552_s9 + $0x400] ss:$24 sps:$4 sm:$0xff]  }
0x10bd   : > { %v3822_v13 = vadd.f32 %v3818_v14, %v3817_v12 }
0x10bf   : > { %3823 = vadd.xlane.f32.xlu1 %v3822_v13  ;;  %4541 = vmatpush2.bf16.msra.mxu1 %v9784_v26  ;;  %v9828_v26 = vld [vmem:[%s11552_s9 + $0x3d4] ss:$24 sps:$4 sm:$0xff]  }
0x10c0   : > { %4542 = vmatprep.subr.bf16.mxu1 %v9792_v31  ;;  %v9834_v31 = vld [vmem:[%s11552_s9 + $0x374] ss:$24 sps:$4 sm:$0xff]  }
0x10c3   : > { %4543 = vmatpush2.bf16.msra.mxu1 %v9790_v28  ;;  %v9829_v28 = vld [vmem:[%s11552_s9 + $0x3a0] ss:$24 sps:$4 sm:$0xff]  }
0x10c4   : > { %4544 = vmatprep.subr.bf16.mxu1 %v9798_v32  ;;  %v9837_v32 = vld [vmem:[%s11552_s9 + $0x344] ss:$24 sps:$4 sm:$0xff]  }
0x10c7   : > { %4545 = vmatpush2.bf16.msra.mxu1 %v9796_v34  ;;  %v9840_v34 = vld [vmem:[%s11552_s9 + $0x314] ss:$24 sps:$4 sm:$0xff]  }
0x10c8   : > { %4546 = vmatprep.subr.bf16.mxu1 %v9804_v3  ;;  %v9843_v3 = vld [vmem:[%s11552_s9 + $0x5e4] ss:$24 sps:$4 sm:$0xff]  }
0x10cb   : > { %4547 = vmatpush2.bf16.msra.mxu1 %v9802_v38  ;;  %v9846_v38 = vld [vmem:[%s11552_s9 + $0x5b4] ss:$24 sps:$4 sm:$0xff]  }
0x10cc   : > { %4548 = vmatprep.subr.bf16.mxu1 %v9810_v40  ;;  %v9849_v40 = vld [vmem:[%s11552_s9 + $0x584] ss:$24 sps:$4 sm:$0xff]  }
0x10cf   : > { %4549 = vmatpush2.bf16.msra.mxu1 %v9808_v7  ;;  %v9852_v7 = vld [vmem:[%s11552_s9 + $0x554] ss:$24 sps:$4 sm:$0xff]  }
0x10d0   : > { %4550 = vmatprep.subr.bf16.mxu1 %v9816_v49  ;;  %v9855_v49 = vld [vmem:[%s11552_s9 + $0x524] ss:$24 sps:$4 sm:$0xff]  }
0x10d3   : > { %4551 = vmatpush2.bf16.msra.mxu1 %v9814_v51  ;;  %v9858_v51 = vld [vmem:[%s11552_s9 + $0x4f4] ss:$24 sps:$4 sm:$0xff]  }
0x10d4   : > { %9131 = vmatprep.subr.bf16.mxu1 %v10940_v42 }
0x1144   : > { %v3821_v46 = vpop.xlane.xlu0 %3820 }
0x1145   : > { %v3825_v19 = vmul.f32 0.00390625, %v3821_v46  ;;  %v9861_v46 = vld [vmem:[%s11552_s9 + $0x4c4] ss:$24 sps:$4 sm:$0xff]  }
0x1147   : > { %v3827_v24 = vadd.f32 1e-05, %v3825_v19  ;;  %v9859_v19 = vld [vmem:[%s11552_s9 + $0x4c0] ss:$24 sps:$4 sm:$0xff]  }
0x1148   : > { %v3824_v53 = vpop.xlane.xlu1 %3823 }
0x1149   : > { %10021 = vrsqrt.f32 %v3827_v24  ;;  %v3826_v55 = vmul.f32 0.00390625, %v3824_v53  ;;  %v9864_v24 = vld [vmem:[%s11552_s9 + $0x494] ss:$24 sps:$4 sm:$0xff]   ;;  %v9862_v53 = vld [vmem:[%s11552_s9 + $0x490] ss:$24 sps:$4 sm:$0xff]  }
0x114b   : > { %v3828_v59 = vadd.f32 1e-05, %v3826_v55  ;;  %v12290_v55 = vld [vmem:[%s11559_s18 + $0x6] sm:$0x3f] }
0x114d   : > { %10023 = vrsqrt.f32 %v3828_v59 }
0x1156   : > { %v10022_v61 = vpop.eup %10021 }
0x1157   : > { %v3832_v56 = vmul.f32 %v10022_v61, %v12178_v1  ;;  %v3831_v2 = vmul.f32 %v10022_v61, %v12175_v0  ;;  %v3978_v61 = vrot.slane %v12290_v55, %v1484_v45 }
0x1159   : > { %v3847_v63 = vmul.f32 %v3843_v5, %v3832_v56  ;;  %v3846_v12 = vmul.f32 %v3839_v57, %v3831_v2 }
0x115a   : > { %v10024_v62 = vpop.eup %10023 }
0x115b   : > { %v3834_v58 = vmul.f32 %v10024_v62, %v12188_v10  ;;  %v3833_v11 = vmul.f32 %v10024_v62, %v12185_v8  ;;  %v12236_v13 = vadd.f32 %v3858_v6, %v3847_v63  ;;  %v12240_v0 = vadd.f32 %v3854_v4, %v3846_v12 }
0x115c   : > { %v3970_v62 = vrot.slane %v12290_v55, %v11751_v47 }
0x115d   : > { %v3849_v1 = vmul.f32 %v3843_v5, %v3834_v58  ;;  %v3848_v14 = vmul.f32 %v3839_v57, %v3833_v11  ;;  %v3982_v57 = vrot.slane %v12290_v55, %v1488_v48  ;;  %v3974_v58 = vrot.slane %v12290_v55, %v11758_v52 }
0x115f   : > { %v12238_v17 = vadd.f32 %v3858_v6, %v3849_v1  ;;  %v12242_v15 = vadd.f32 %v3854_v4, %v3848_v14 }
0x1161   : > { %v3866_v10 = vpack.c.bf16 %v12238_v17, %v12236_v13  ;;  %v12249_v8 = vpack.c.bf16 %v12242_v15, %v12240_v0 }
0x1163   : > { %4509 = vmatprep.mubr.bf16.mxu0 %v3866_v10  ;;  %4552 = vmatprep.mubr.bf16.mxu1 %v3866_v10 }
0x1164   : > { %4510 = vmatmul.mubr.bf16.vlgmr.msra.gmra.mxu0 %v12249_v8  ;;  %4553 = vmatmul.mubr.bf16.vlgmr.msra.gmra.mxu1 %v12249_v8 }
0x1165   : > { %4564 = vmatpush1.bf16.msra.mxu0 %v9817_v20  ;;  %4595 = vmatprep.mubr.bf16.mxu0 %v3866_v10 }
0x1166   : > { %4565 = vmatprep.subr.bf16.mxu0 %v9822_v9  ;;  %9133 = vmatprep.mubr.msk.bf16.mxu1 %vm10941_vm0, %v10940_v42 }
0x1169   : > { %4566 = vmatpush1.bf16.msra.mxu0 %v9820_v18 }
0x116a   : > { %4567 = vmatprep.subr.bf16.mxu0 %v9825_v21 }
0x116d   : > { %4568 = vmatpush1.bf16.msra.mxu0 %v9823_v22 }
0x116e   : > { %4569 = vmatprep.subr.bf16.mxu0 %v9828_v26 }
0x1171   : > { %4570 = vmatpush1.bf16.msra.mxu0 %v9826_v29 }
0x1172   : > { %4571 = vmatprep.subr.bf16.mxu0 %v9831_v27 }
0x1175   : > { %4572 = vmatpush1.bf16.msra.mxu0 %v9829_v28 }
0x1176   : > { %4573 = vmatprep.subr.bf16.mxu0 %v9834_v31 }
0x1179   : > { %4574 = vmatpush1.bf16.msra.mxu0 %v9832_v36  ;;  %v3986_v36 = vrot.slane %v12290_v55, %v1492_v16 }
0x117a   : > { %4575 = vmatprep.subr.bf16.mxu0 %v9837_v32 }
0x117d   : > { %4576 = vmatpush1.bf16.msra.mxu0 %v9835_v33 }
0x117e   : > { %4577 = vmatprep.subr.bf16.mxu0 %v9840_v34 }
0x1181   : > { %4578 = vmatpush1.bf16.msra.mxu0 %v9838_v35 }
0x1182   : > { %4579 = vmatprep.subr.bf16.mxu0 %v9843_v3 }
0x1185   : > { %4580 = vmatpush2.bf16.msra.mxu0 %v9841_v37 }
0x1186   : > { %4581 = vmatprep.subr.bf16.mxu0 %v9846_v38 }
0x1189   : > { %4582 = vmatpush2.bf16.msra.mxu0 %v9844_v39  ;;  %v12338_v39 = vld [vmem:[%s12978_s11] sm:$0xff] }
0x118a   : > { %4583 = vmatprep.subr.bf16.mxu0 %v9849_v40 }
0x118d   : > { %4584 = vmatpush2.bf16.msra.mxu0 %v9847_v30 }
0x118e   : > { %4585 = vmatprep.subr.bf16.mxu0 %v9852_v7 }
0x1191   : > { %4586 = vmatpush2.bf16.msra.mxu0 %v9850_v41 }
0x1192   : > { %4587 = vmatprep.subr.bf16.mxu0 %v9855_v49 }
0x1195   : > { %4588 = vmatpush2.bf16.msra.mxu0 %v9853_v50  ;;  %v12347_v50 = vld [vmem:[%s12978_s11 + $0x8] sm:$0xff] }
0x1196   : > { %4589 = vmatprep.subr.bf16.mxu0 %v9858_v51 }
0x1199   : > { %4590 = vmatpush2.bf16.msra.mxu0 %v9856_v25 }
0x119a   : > { %4591 = vmatprep.subr.bf16.mxu0 %v9861_v46 }
0x119d   : > { %4592 = vmatpush2.bf16.msra.mxu0 %v9859_v19 }
0x119e   : > { %4593 = vmatprep.subr.bf16.mxu0 %v9864_v24 }
0x11a1   : > { %4594 = vmatpush2.bf16.msra.mxu0 %v9862_v53 }
0x11a2   : > { %9179 = vmatprep.subr.bf16.mxu0 %v10940_v42 }
0x11a4   : > { %4596 = vmatmul.mubr.bf16.vlgmr.msra.gmra.mxu0 %v12249_v8 }
0x11a5   : > { %9181 = vmatprep.mubr.msk.bf16.mxu0 %vm10941_vm0, %v10940_v42 }
0x1224   : > { %v4511_v59 = vpop.f32.mrf.mxu0  ;;  %v4554_v60 = vpop.f32.mrf.mxu1 }
0x1225   : > { %v4555_v4 = vadd.f32 %v4554_v60, %v3978_v61  ;;  %v4512_v10 = vadd.f32 %v4511_v59, %v3970_v62 }
0x1226   : > { %v4513_v54 = vpop.f32.mrf.mxu0  ;;  %v4556_v56 = vpop.f32.mrf.mxu1 }
0x1227   : > { %v4557_v12 = vadd.f32 %v4556_v56, %v3982_v57  ;;  %v4514_v9 = vadd.f32 %v4513_v54, %v3974_v58  ;;  %v4606_v22 = vmul.f32 0.17677669, %v4512_v10 }
0x1228   : > { %v4515_v5 = vpop.f32.mrf.mxu0  ;;  %v4558_v2 = vpop.f32.mrf.mxu1 }
0x1229   : > { %v4559_v6 = vadd.f32 %v4558_v2, %v3978_v61  ;;  %v4516_v45 = vadd.f32 %v4515_v5, %v3970_v62  ;;  %v4607_v29 = vmul.f32 0.17677669, %v4514_v9 }
0x122a   : > { %v4517_v63 = vpop.f32.mrf.mxu0  ;;  %v4560_v11 = vpop.f32.mrf.mxu1 }
0x122b   : > { %v12302_v1 = vpack.c.bf16 %v4559_v6, %v4555_v4  ;;  %v4561_v14 = vadd.f32 %v4560_v11, %v3982_v57  ;;  %v4518_v20 = vadd.f32 %v4517_v63, %v3974_v58  ;;  %v4608_v18 = vmul.f32 0.17677669, %v4516_v45 }
0x122d   : > { %v12304_v48 = vpack.c.bf16 %v4561_v14, %v4557_v12  ;;  %v4620_v8 = vsel %vm2123_vm1, %v12302_v1, 0  ;;  %v4609_v26 = vmul.f32 0.17677669, %v4518_v20  ;;  %v12312_v27 = vpack.c.bf16 %v4608_v18, %v4606_v22 }
0x122e   : > { %9132 = vmatpush3.bf16.xpose.msra.mxu1 %v4620_v8 }
0x122f   : > { %v5100_v21 = vsel %vm2123_vm1, %v12304_v48, 0  ;;  %9137 = vmatprep.subr.bf16.mxu1 %v10940_v42  ;;  %v12314_v28 = vpack.c.bf16 %v4609_v26, %v4607_v29 }
0x1230   : > { %9180 = vmatpush3.bf16.xpose.msra.mxu0 %v5100_v21 }
0x1231   : > { %9191 = vmatprep.subr.bf16.mxu0 %v10940_v42 }
0x1235   : > { %9134 = vmatmul.mubr.msk.bf16.vlgmr.msra.gmra.mxu1 %vm2123_vm1, %v12312_v27 }
0x1236   : > { %9139 = vmatprep.mubr.msk.bf16.mxu1 %vm10941_vm0, %v10940_v42 }
0x1237   : > { %9182 = vmatmul.mubr.msk.bf16.vlgmr.msra.gmra.mxu0 %vm2123_vm1, %v12314_v28 }
0x1238   : > { %9193 = vmatprep.mubr.msk.bf16.mxu0 %vm10941_vm0, %v10940_v42 }
0x1264   : > { %v4597_v31 = vpop.f32.mrf.mxu0 }
0x1265   : > { %v4598_v34 = vadd.f32 %v4597_v31, %v3986_v36 }
0x1266   : > { %v12327_v32 = vpop.f32.mrf.mxu0 }
0x1268   : > { %v4601_v33 = vpop.f32.mrf.mxu0 }
0x1269   : > { %v4602_v35 = vadd.f32 %v4601_v33, %v3986_v36 }
0x126a   : > { %v12333_v37 = vpop.f32.mrf.mxu0 }
0x126b   : > { %v12329_v3 = vpack.c.bf16 %v4602_v35, %v4598_v34 }
0x126d   : > { %9138 = vmatpush3.bf16.msra.mxu1 %v12329_v3 }
0x126e   : > { %9143 = vmatprep.subr.bf16.mxu1 %v10940_v42 }
0x12f5   : > { %v4656_v38 = vpop.f32.mrf.mxu1 }
0x12f6   : > { %v4657_v16 = vadd.f32 %v12338_v39, %v4656_v38 }
0x12f7   : > { %v9135_v40 = vpop.f32.mrf.mxu1  ;;  %v12341_v30 = vpop.f32.mrf.mxu0 }
0x12f8   : > { %v4663_v7 = vsel %vm2171_vm2, %v4657_v16, -inf }
0x12f9   : > { %v9183_v41 = vpop.f32.mrf.mxu0  ;;  %4664 = vmax.xlane.f32.xlu0 %v4663_v7  ;;  %v4659_v49 = vpop.f32.mrf.mxu1 }
0x12fa   : > { %v4660_v51 = vadd.f32 %v12347_v50, %v4659_v49 }
0x12fb   : > { %v9136_v25 = vpop.f32.mrf.mxu1  ;;  %v12350_v46 = vpop.f32.mrf.mxu0 }
0x12fc   : > { %v4666_v19 = vsel %vm2171_vm2, %v4660_v51, -inf }
0x12fd   : > { %v9184_v24 = vpop.f32.mrf.mxu0  ;;  %4667 = vmax.xlane.f32.xlu1 %v4666_v19 }
0x1382   : > { %v4665_v53 = vpop.xlane.xlu0 %4664 }
0x1383   : > { %v4669_v59 = vsub.f32 %v4657_v16, %v4665_v53 }
0x1385   : > { %v4671_v60 = vmul.f32 1.442695, %v4669_v59 }
0x1386   : > { %v4668_v61 = vpop.xlane.xlu1 %4667 }
0x1387   : > { %10025 = vpow2.f32 %v4671_v60  ;;  %v4670_v54 = vsub.f32 %v4660_v51, %v4668_v61 }
0x1389   : > { %v4673_v56 = vmul.f32 1.442695, %v4670_v54 }
0x138b   : > { %10027 = vpow2.f32 %v4673_v56 }
0x1394   : > { %v10026_v57 = vpop.eup %10025 }
0x1395   : > { %v4675_v5 = vsel %vm2171_vm2, %v10026_v57, 0.0 }
0x1396   : > { %4676 = vadd.xlane.f32.xlu0 %v4675_v5 }
0x1398   : > { %v10028_v2 = vpop.eup %10027 }
0x1399   : > { %v4678_v62 = vsel %vm2171_vm2, %v10028_v2, 0.0 }
0x139a   : > { %4679 = vadd.xlane.f32.xlu1 %v4678_v62 }
0x13ab   : > { %4731 = vrot.lane.b32.xlu1 %v12312_v27, %s10942_s1 }
0x13ac   : > { %4734 = vrot.lane.b32.xlu0 %v12302_v1, %s10942_s1 }
0x141f   : > { %v4677_v4 = vpop.xlane.xlu0 %4676 }
0x1420   : > { %10029 = vrcp.f32 %v4677_v4 }
0x1423   : > { %v4680_v6 = vpop.xlane.xlu1 %4679  ;;  %v4735_v45 = vpop.permute.xlu0 %4734 }
0x1424   : > { %10031 = vrcp.f32 %v4680_v6  ;;  %v4740_v10 = vsel %vm2123_vm1, %v4735_v45, 0 }
0x1427   : > { %v4732_v20 = vpop.permute.xlu1 %4731 }
0x142d   : > { %v10030_v58 = vpop.eup %10029 }
0x142e   : > { %v4683_v11 = vmul.f32 %v10030_v58, %v10026_v57 }
0x1431   : > { %v10032_v63 = vpop.eup %10031 }
0x1432   : > { %v4684_v12 = vmul.f32 %v10032_v63, %v10028_v2 }
0x1434   : > { %v4685_v14 = vpack.c.bf16 %v4684_v12, %v4683_v11 }
0x1436   : > { %9140 = vmatmul.mubr.msk.bf16.vlgmr.msra.gmra.mxu1 %vm2171_vm2, %v4685_v14 }
0x1437   : > { %9144 = vmatpush3.bf16.xpose.msra.mxu1 %v4740_v10  ;;  %9145 = vmatprep.mubr.msk.bf16.mxu1 %vm10941_vm0, %v10940_v42 }
0x1438   : > { %9149 = vmatprep.subr.bf16.mxu1 %v10940_v42 }
0x143e   : > { %9146 = vmatmul.mubr.msk.bf16.vlgmr.msra.gmra.mxu1 %vm2123_vm1, %v4732_v20 }
0x143f   : > { %9151 = vmatprep.mubr.msk.bf16.mxu1 %vm10941_vm0, %v10940_v42 }
0x14f6   : > { %v12367_v8 = vpop.f32.mrf.mxu1 }
0x14f8   : > { %v9141_v9 = vpop.f32.mrf.mxu1 }
0x14fa   : > { %v12369_v18 = vpop.f32.mrf.mxu1 }
0x14fc   : > { %v9142_v21 = vpop.f32.mrf.mxu1 }
0x14fe   : > { %v4776_v22 = vpop.f32.mrf.mxu1 }
0x14ff   : > { %v4777_v26 = vadd.f32 %v12338_v39, %v4776_v22 }
0x1500   : > { %v9147_v29 = vpop.f32.mrf.mxu1 }
0x1501   : > { %v4783_v31 = vsel %vm2171_vm2, %v4777_v26, -inf }
0x1502   : > { %4784 = vmax.xlane.f32.xlu1 %v4783_v31  ;;  %v4779_v36 = vpop.f32.mrf.mxu1 }
0x1503   : > { %v4780_v33 = vadd.f32 %v12347_v50, %v4779_v36 }
0x1504   : > { %v9148_v34 = vpop.f32.mrf.mxu1 }
0x1505   : > { %v4786_v35 = vsel %vm2171_vm2, %v4780_v33, -inf }
0x1506   : > { %4787 = vmax.xlane.f32.xlu0 %v4786_v35 }
0x158b   : > { %v4785_v38 = vpop.xlane.xlu1 %4784 }
0x158c   : > { %v4789_v16 = vsub.f32 %v4777_v26, %v4785_v38 }
0x158e   : > { %v4791_v40 = vmul.f32 1.442695, %v4789_v16 }
0x158f   : > { %v4788_v7 = vpop.xlane.xlu0 %4787 }
0x1590   : > { %10033 = vpow2.f32 %v4791_v40  ;;  %v4790_v41 = vsub.f32 %v4780_v33, %v4788_v7 }
0x1592   : > { %v4793_v49 = vmul.f32 1.442695, %v4790_v41 }
0x1594   : > { %10035 = vpow2.f32 %v4793_v49 }
0x159d   : > { %v10034_v51 = vpop.eup %10033 }
0x159e   : > { %v4795_v25 = vsel %vm2171_vm2, %v10034_v51, 0.0 }
0x159f   : > { %4796 = vadd.xlane.f32.xlu0 %v4795_v25 }
0x15a1   : > { %v10036_v19 = vpop.eup %10035 }
0x15a2   : > { %v4798_v24 = vsel %vm2171_vm2, %v10036_v19, 0.0 }
0x15a3   : > { %4799 = vadd.xlane.f32.xlu1 %v4798_v24 }
0x15b4   : > { %4856 = vrot.lane.b32.xlu1 %v12302_v1, %s10943_s4 }
0x15b5   : > { %4807 = vrot.lane.b32.xlu0 %v12329_v3, %s10942_s1 }
0x15b8   : > { %4854 = vrot.lane.b32.xlu1 %v12312_v27, %s10943_s4 }
0x1628   : > { %v4797_v53 = vpop.xlane.xlu0 %4796 }
0x1629   : > { %10037 = vrcp.f32 %v4797_v53 }
0x162c   : > { %v4800_v59 = vpop.xlane.xlu1 %4799  ;;  %v4808_v60 = vpop.permute.xlu0 %4807 }
0x162d   : > { %10039 = vrcp.f32 %v4800_v59  ;;  %9150 = vmatpush3.bf16.msra.mxu1 %v4808_v60 }
0x162e   : > { %9155 = vmatprep.subr.bf16.mxu1 %v10940_v42 }
0x1630   : > { %v4857_v5 = vpop.permute.xlu1 %4856 }
0x1631   : > { %v4862_v62 = vsel %vm2123_vm1, %v4857_v5, 0 }
0x1634   : > { %v4855_v4 = vpop.permute.xlu1 %4854 }
0x1636   : > { %v10038_v61 = vpop.eup %10037 }
0x1637   : > { %v4803_v56 = vmul.f32 %v10038_v61, %v10034_v51 }
0x163a   : > { %v10040_v54 = vpop.eup %10039 }
0x163b   : > { %v4804_v57 = vmul.f32 %v10040_v54, %v10036_v19 }
0x163d   : > { %v4805_v2 = vpack.c.bf16 %v4804_v57, %v4803_v56 }
0x163f   : > { %9152 = vmatmul.mubr.msk.bf16.vlgmr.msra.gmra.mxu1 %vm2171_vm2, %v4805_v2 }
0x1640   : > { %9156 = vmatpush3.bf16.xpose.msra.mxu1 %v4862_v62  ;;  %9157 = vmatprep.mubr.msk.bf16.mxu1 %vm10941_vm0, %v10940_v42 }
0x1641   : > { %9161 = vmatprep.subr.bf16.mxu1 %v10940_v42 }
0x1647   : > { %9158 = vmatmul.mubr.msk.bf16.vlgmr.msra.gmra.mxu1 %vm2123_vm1, %v4855_v4 }
0x1648   : > { %9163 = vmatprep.mubr.msk.bf16.mxu1 %vm10941_vm0, %v10940_v42 }
0x16ff   : > { %v12392_v6 = vpop.f32.mrf.mxu1 }
0x1701   : > { %v9153_v58 = vpop.f32.mrf.mxu1 }
0x1703   : > { %v12394_v63 = vpop.f32.mrf.mxu1 }
0x1704   : > { %v9459_v11 = vpack.i.bf16 %v12394_v63, %v12392_v6 }
0x1705   : > { %v9154_v12 = vpop.f32.mrf.mxu1 }
0x1707   : > { %v4898_v45 = vpop.f32.mrf.mxu1 }
0x1708   : > { %v4899_v14 = vadd.f32 %v12338_v39, %v4898_v45 }
0x1709   : > { %v9159_v10 = vpop.f32.mrf.mxu1 }
0x170a   : > { %v4905_v20 = vsel %vm2171_vm2, %v4899_v14, -inf }
0x170b   : > { %4906 = vmax.xlane.f32.xlu1 %v4905_v20  ;;  %v4901_v9 = vpop.f32.mrf.mxu1 }
0x170c   : > { %v4902_v21 = vadd.f32 %v12347_v50, %v4901_v9 }
0x170d   : > { %v9160_v22 = vpop.f32.mrf.mxu1 }
0x170e   : > { %v4908_v26 = vsel %vm2171_vm2, %v4902_v21, -inf }
0x170f   : > { %4909 = vmax.xlane.f32.xlu0 %v4908_v26 }
0x171c   : > { %4928 = vrot.lane.b32.xlu1 %v12329_v3, %s10943_s4 }
0x1720   : > { %4975 = vrot.lane.b32.xlu1 %v12312_v27, %s10944_s7 }
0x1724   : > { %5214 = vrot.lane.b32.xlu1 %v12304_v48, %s10942_s1 }
0x1728   : > { %5211 = vrot.lane.b32.xlu1 %v12314_v28, %s10942_s1 }
0x172c   : > { %5334 = vrot.lane.b32.xlu1 %v12314_v28, %s10943_s4 }
0x1730   : > { %5455 = vrot.lane.b32.xlu1 %v12314_v28, %s10944_s7 }
0x1794   : > { %v4907_v29 = vpop.xlane.xlu1 %4906 }
0x1795   : > { %v4911_v31 = vsub.f32 %v4899_v14, %v4907_v29 }
0x1797   : > { %v4913_v36 = vmul.f32 1.442695, %v4911_v31 }
0x1798   : > { %v4929_v33 = vpop.permute.xlu1 %4928  ;;  %v4910_v34 = vpop.xlane.xlu0 %4909 }
0x1799   : > { %10041 = vpow2.f32 %v4913_v36  ;;  %v4912_v35 = vsub.f32 %v4902_v21, %v4910_v34  ;;  %9162 = vmatpush3.bf16.msra.mxu1 %v4929_v33 }
0x179a   : > { %9167 = vmatprep.subr.bf16.mxu1 %v10940_v42 }
0x179b   : > { %v4915_v27 = vmul.f32 1.442695, %v4912_v35 }
0x179c   : > { %v4976_v38 = vpop.permute.xlu1 %4975 }
0x179d   : > { %10043 = vpow2.f32 %v4915_v27 }
0x17a0   : > { %v5215_v16 = vpop.permute.xlu1 %5214 }
0x17a1   : > { %v5220_v40 = vsel %vm2123_vm1, %v5215_v16, 0  ;;  %v5137_v16 = vadd.f32 %v12338_v39, %v12341_v30 }
0x17a2   : > { %9192 = vmatpush3.bf16.xpose.msra.mxu0 %v5220_v40 }
0x17a3   : > { %9203 = vmatprep.subr.bf16.mxu0 %v10940_v42 }
0x17a4   : > { %v5212_v41 = vpop.permute.xlu1 %5211 }
0x17a6   : > { %v10042_v28 = vpop.eup %10041 }
0x17a7   : > { %v4917_v7 = vsel %vm2171_vm2, %v10042_v28, 0.0 }
0x17a8   : > { %4918 = vadd.xlane.f32.xlu0 %v4917_v7  ;;  %v5335_v57 = vpop.permute.xlu1 %5334 }
0x17a9   : > { %9194 = vmatmul.mubr.msk.bf16.vlgmr.msra.gmra.mxu0 %vm2123_vm1, %v5212_v41 }
0x17aa   : > { %v10044_v49 = vpop.eup %10043  ;;  %9205 = vmatprep.mubr.msk.bf16.mxu0 %vm10941_vm0, %v10940_v42 }
0x17ab   : > { %v4920_v51 = vsel %vm2171_vm2, %v10044_v49, 0.0 }
0x17ac   : > { %4921 = vadd.xlane.f32.xlu0 %v4920_v51  ;;  %v5456_v62 = vpop.permute.xlu1 %5455  ;;  %v5140_v51 = vadd.f32 %v12347_v50, %v12350_v46 }
0x17c2   : > { %4977 = vrot.lane.b32.xlu0 %v12302_v1, %s10944_s7 }
0x17c6   : > { %5336 = vrot.lane.b32.xlu0 %v12304_v48, %s10943_s4 }
0x17ca   : > { %5457 = vrot.lane.b32.xlu0 %v12304_v48, %s10944_s7 }
0x1831   : > { %v4919_v25 = vpop.xlane.xlu0 %4918 }
0x1832   : > { %10045 = vrcp.f32 %v4919_v25 }
0x1835   : > { %v4922_v19 = vpop.xlane.xlu0 %4921 }
0x1836   : > { %10047 = vrcp.f32 %v4922_v19  ;;  %v5143_v19 = vsel %vm2171_vm2, %v5137_v16, -inf }
0x1839   : > { %v4978_v24 = vpop.permute.xlu0 %4977 }
0x183a   : > { %v4983_v2 = vsel %vm2123_vm1, %v4978_v24, 0 }
0x183d   : > { %v5337_v53 = vpop.permute.xlu0 %5336 }
0x183e   : > { %v5342_v59 = vsel %vm2123_vm1, %v5337_v53, 0 }
0x183f   : > { %9204 = vmatpush3.bf16.xpose.msra.mxu0 %v5342_v59  ;;  %v10046_v60 = vpop.eup %10045  ;;  %v5146_v59 = vsel %vm2171_vm2, %v5140_v51, -inf }
0x1840   : > { %9215 = vmatprep.subr.bf16.mxu0 %v10940_v42  ;;  %v4925_v54 = vmul.f32 %v10046_v60, %v10042_v28 }
0x1841   : > { %v5458_v1 = vpop.permute.xlu0 %5457 }
0x1842   : > { %v5463_v5 = vsel %vm2123_vm1, %v5458_v1, 0 }
0x1843   : > { %v10048_v61 = vpop.eup %10047 }
0x1844   : > { %v4926_v56 = vmul.f32 %v10048_v61, %v10044_v49 }
0x1846   : > { %9206 = vmatmul.mubr.msk.bf16.vlgmr.msra.gmra.mxu0 %vm2123_vm1, %v5335_v57  ;;  %v4927_v48 = vpack.c.bf16 %v4926_v56, %v4925_v54 }
0x1847   : > { %9216 = vmatpush3.bf16.xpose.msra.mxu0 %v5463_v5  ;;  %9217 = vmatprep.mubr.msk.bf16.mxu0 %vm10941_vm0, %v10940_v42 }
0x1848   : > { %9164 = vmatmul.mubr.msk.bf16.vlgmr.msra.gmra.mxu1 %vm2171_vm2, %v4927_v48 }
0x1849   : > { %9168 = vmatpush3.bf16.xpose.msra.mxu1 %v4983_v2  ;;  %9169 = vmatprep.mubr.msk.bf16.mxu1 %vm10941_vm0, %v10940_v42 }
0x184a   : > { %9173 = vmatprep.subr.bf16.mxu1 %v10940_v42 }
0x184e   : > { %9218 = vmatmul.mubr.msk.bf16.vlgmr.msra.gmra.mxu0 %vm2123_vm1, %v5456_v62 }
0x1850   : > { %9170 = vmatmul.mubr.msk.bf16.vlgmr.msra.gmra.mxu1 %vm2123_vm1, %v4976_v38 }
0x1851   : > { %9175 = vmatprep.mubr.msk.bf16.mxu1 %vm10941_vm0, %v10940_v42 }
0x1869   : > { %v5256_v4 = vpop.f32.mrf.mxu0 }
0x186a   : > { %v5257_v30 = vadd.f32 %v12338_v39, %v5256_v4 }
0x186b   : > { %v9195_v58 = vpop.f32.mrf.mxu0 }
0x186c   : > { %v5263_v1 = vsel %vm2171_vm2, %v5257_v30, -inf }
0x186d   : > { %v5259_v12 = vpop.f32.mrf.mxu0 }
0x186e   : > { %v5260_v25 = vadd.f32 %v12347_v50, %v5259_v12 }
0x186f   : > { %v9196_v45 = vpop.f32.mrf.mxu0 }
0x1870   : > { %v5266_v60 = vsel %vm2171_vm2, %v5260_v25, -inf }
0x1906   : > { %v5378_v14 = vpop.f32.mrf.mxu0 }
0x1907   : > { %v5379_v46 = vadd.f32 %v12338_v39, %v5378_v14 }
0x1908   : > { %v12443_v10 = vpop.f32.mrf.mxu1  ;;  %v9207_v20 = vpop.f32.mrf.mxu0 }
0x1909   : > { %v5385_v57 = vsel %vm2171_vm2, %v5379_v46, -inf }
0x190a   : > { %v9165_v9 = vpop.f32.mrf.mxu1  ;;  %v5381_v21 = vpop.f32.mrf.mxu0 }
0x190b   : > { %v5382_v53 = vadd.f32 %v12347_v50, %v5381_v21 }
0x190c   : > { %v12445_v22 = vpop.f32.mrf.mxu1  ;;  %v9208_v26 = vpop.f32.mrf.mxu0 }
0x190d   : > { %v9464_v29 = vpack.i.bf16 %v12445_v22, %v12443_v10  ;;  %v5388_v54 = vsel %vm2171_vm2, %v5382_v53, -inf }
0x190e   : > { %v9166_v31 = vpop.f32.mrf.mxu1  ;;  %v5499_v36 = vpop.f32.mrf.mxu0 }
0x190f   : > { %v5500_v56 = vadd.f32 %v12338_v39, %v5499_v36 }
0x1910   : > { %v5019_v33 = vpop.f32.mrf.mxu1  ;;  %v9219_v34 = vpop.f32.mrf.mxu0 }
0x1911   : > { %v5020_v35 = vadd.f32 %v12338_v39, %v5019_v33  ;;  %v5506_v48 = vsel %vm2171_vm2, %v5500_v56, -inf }
0x1912   : > { %v9171_v27 = vpop.f32.mrf.mxu1  ;;  %v5502_v38 = vpop.f32.mrf.mxu0 }
0x1913   : > { %v5026_v40 = vsel %vm2171_vm2, %v5020_v35, -inf  ;;  %v5503_v61 = vadd.f32 %v12347_v50, %v5502_v38 }
0x1914   : > { %v9220_v28 = vpop.f32.mrf.mxu0  ;;  %5027 = vmax.xlane.f32.xlu0 %v5026_v40  ;;  %v5022_v7 = vpop.f32.mrf.mxu1 }
0x1915   : > { %v5023_v41 = vadd.f32 %v12347_v50, %v5022_v7  ;;  %v5509_v5 = vsel %vm2171_vm2, %v5503_v61, -inf }
0x1916   : > { %v9172_v49 = vpop.f32.mrf.mxu1 }
0x1917   : > { %v5029_v24 = vsel %vm2171_vm2, %v5023_v41, -inf }
0x1918   : > { %5144 = vmax.xlane.f32.xlu0 %v5143_v19  ;;  %5030 = vmax.xlane.f32.xlu1 %v5029_v24 }
0x191c   : > { %5147 = vmax.xlane.f32.xlu0 %v5146_v59  ;;  %5267 = vmax.xlane.f32.xlu1 %v5266_v60 }
0x1920   : > { %5264 = vmax.xlane.f32.xlu0 %v5263_v1  ;;  %5389 = vmax.xlane.f32.xlu1 %v5388_v54 }
0x1924   : > { %5386 = vmax.xlane.f32.xlu0 %v5385_v57  ;;  %5510 = vmax.xlane.f32.xlu1 %v5509_v5 }
0x1928   : > { %5507 = vmax.xlane.f32.xlu0 %v5506_v48 }
0x199d   : > { %v5028_v2 = vpop.xlane.xlu0 %5027 }
0x199e   : > { %v5032_v33 = vsub.f32 %v5020_v35, %v5028_v2 }
0x19a0   : > { %v5034_v28 = vmul.f32 1.442695, %v5032_v33 }
0x19a1   : > { %v5145_v62 = vpop.xlane.xlu0 %5144  ;;  %v5031_v50 = vpop.xlane.xlu1 %5030 }
0x19a2   : > { %v5149_v4 = vsub.f32 %v5137_v16, %v5145_v62  ;;  %v5033_v34 = vsub.f32 %v5023_v41, %v5031_v50 }
0x19a4   : > { %v5151_v58 = vmul.f32 1.442695, %v5149_v4  ;;  %v5036_v7 = vmul.f32 1.442695, %v5033_v34 }
0x19a5   : > { %v5148_v12 = vpop.xlane.xlu0 %5147  ;;  %v5268_v45 = vpop.xlane.xlu1 %5267 }
0x19a6   : > { %10049 = vpow2.f32 %v5151_v58  ;;  %v5150_v14 = vsub.f32 %v5140_v51, %v5148_v12  ;;  %v5270_v20 = vsub.f32 %v5260_v25, %v5268_v45 }
0x19a8   : > { %v5153_v39 = vmul.f32 1.442695, %v5150_v14  ;;  %v5273_v9 = vmul.f32 1.442695, %v5270_v20  ;;  %v3990_v20 = vrot.slane %v12290_v55, %v1496_v43 }
0x19a9   : > { %v5265_v21 = vpop.xlane.xlu0 %5264  ;;  %v5390_v26 = vpop.xlane.xlu1 %5389 }
0x19aa   : > { %10051 = vpow2.f32 %v5153_v39  ;;  %v5269_v31 = vsub.f32 %v5257_v30, %v5265_v21  ;;  %v5392_v36 = vsub.f32 %v5382_v53, %v5390_v26  ;;  %v4604_v39 = vadd.f32 %v12333_v37, %v3990_v20 }
0x19ab   : > { %10053 = vpow2.f32 %v5273_v9  ;;  %v4600_v9 = vadd.f32 %v12327_v32, %v3990_v20  ;;  %v9885_v20 = vld [vmem:[%s11611_s5 + $0x114] ss:$8 sps:$4 sm:$0xff]  }
0x19ac   : > { %v5271_v27 = vmul.f32 1.442695, %v5269_v31  ;;  %v5395_v38 = vmul.f32 1.442695, %v5392_v36 }
0x19ad   : > { %v5387_v40 = vpop.xlane.xlu0 %5386  ;;  %v5511_v51 = vpop.xlane.xlu1 %5510  ;;  %v4615_v21 = vpack.c.bf16 %v4604_v39, %v4600_v9  ;;  %v9883_v39 = vld [vmem:[%s11611_s5 + $0x110] ss:$8 sps:$4 sm:$0xff]   ;;  %v9888_v9 = vld [vmem:[%s11611_s5 + $0x104] ss:$8 sps:$4 sm:$0xff]  }
0x19ae   : > { %10055 = vpow2.f32 %v5271_v27  ;;  %v5391_v16 = vsub.f32 %v5379_v46, %v5387_v40  ;;  %v5513_v35 = vsub.f32 %v5503_v61, %v5511_v51 }
0x19af   : > { %10057 = vpow2.f32 %v5395_v38 }
0x19b0   : > { %v5393_v49 = vmul.f32 1.442695, %v5391_v16  ;;  %v5516_v59 = vmul.f32 1.442695, %v5513_v35 }
0x19b1   : > { %v5508_v25 = vpop.xlane.xlu0 %5507 }
0x19b2   : > { %10059 = vpow2.f32 %v5393_v49  ;;  %v5512_v19 = vsub.f32 %v5500_v56, %v5508_v25 }
0x19b3   : > { %v12471_v24 = vpop.eup %10049  ;;  %10061 = vpow2.f32 %v5034_v28 }
0x19b4   : > { %10063 = vpow2.f32 %v5036_v7  ;;  %v5514_v41 = vmul.f32 1.442695, %v5512_v19  ;;  %v5155_v30 = vsel %vm2171_vm2, %v12471_v24, 0.0 }
0x19b5   : > { %5156 = vadd.xlane.f32.xlu0 %v5155_v30 }
0x19b6   : > { %10065 = vpow2.f32 %v5514_v41 }
0x19b7   : > { %v12475_v53 = vpop.eup %10051  ;;  %10067 = vpow2.f32 %v5516_v59 }
0x19b8   : > { %v5158_v60 = vsel %vm2171_vm2, %v12475_v53, 0.0  ;;  %v12479_v46 = vpop.eup %10053 }
0x19b9   : > { %5159 = vadd.xlane.f32.xlu1 %v5158_v60  ;;  %v5278_v54 = vsel %vm2171_vm2, %v12479_v46, 0.0 }
0x19bb   : > { %v12481_v1 = vpop.eup %10055 }
0x19bc   : > { %v5275_v61 = vsel %vm2171_vm2, %v12481_v1, 0.0  ;;  %v12487_v56 = vpop.eup %10057 }
0x19bd   : > { %5276 = vadd.xlane.f32.xlu0 %v5275_v61  ;;  %5279 = vadd.xlane.f32.xlu1 %v5278_v54  ;;  %v5400_v2 = vsel %vm2171_vm2, %v12487_v56, 0.0 }
0x19bf   : > { %v12489_v57 = vpop.eup %10059 }
0x19c0   : > { %v10062_v5 = vpop.eup %10061  ;;  %v5397_v48 = vsel %vm2171_vm2, %v12489_v57, 0.0 }
0x19c1   : > { %v10064_v62 = vpop.eup %10063  ;;  %5398 = vadd.xlane.f32.xlu0 %v5397_v48  ;;  %5401 = vadd.xlane.f32.xlu1 %v5400_v2  ;;  %v5038_v50 = vsel %vm2171_vm2, %v10062_v5, 0.0  ;;  %v9870_v48 = vld [vmem:[%s11611_s5 + $0x164] ss:$8 sps:$4 sm:$0xff]   ;;  %v9868_v2 = vld [vmem:[%s11611_s5 + $0x160] ss:$8 sps:$4 sm:$0xff]  }
0x19c2   : > { %v5041_v4 = vsel %vm2171_vm2, %v10064_v62, 0.0 }
0x19c3   : > { %v12497_v58 = vpop.eup %10065 }
0x19c4   : > { %v5518_v12 = vsel %vm2171_vm2, %v12497_v58, 0.0  ;;  %v12501_v45 = vpop.eup %10067 }
0x19c5   : > { %5039 = vadd.xlane.f32.xlu0 %v5038_v50  ;;  %5042 = vadd.xlane.f32.xlu1 %v5041_v4  ;;  %v5521_v14 = vsel %vm2171_vm2, %v12501_v45, 0.0  ;;  %v9876_v50 = vld [vmem:[%s11611_s5 + $0x144] ss:$8 sps:$4 sm:$0xff]   ;;  %v9874_v4 = vld [vmem:[%s11611_s5 + $0x140] ss:$8 sps:$4 sm:$0xff]  }
0x19c9   : > { %5519 = vadd.xlane.f32.xlu1 %v5518_v12  ;;  %v9877_v12 = vld [vmem:[%s11611_s5 + $0x130] ss:$8 sps:$4 sm:$0xff]  }
0x19cd   : > { %5522 = vadd.xlane.f32.xlu1 %v5521_v14  ;;  %v9880_v14 = vld [vmem:[%s11611_s5 + $0x120] ss:$8 sps:$4 sm:$0xff]  }
0x19db   : > { %5049 = vrot.lane.b32.xlu0 %v12329_v3, %s10944_s7 }
0x19de   : > { %5287 = vrot.lane.b32.xlu1 %v4615_v21, %s10942_s1 }
0x19df   : > { %5408 = vrot.lane.b32.xlu0 %v4615_v21, %s10943_s4 }
0x19e2   : > { %5529 = vrot.lane.b32.xlu1 %v4615_v21, %s10944_s7 }
0x19e6   : > { %9460 = vrot.lane.b32.xlu1 %v9459_v11, %s10944_s7 }
0x19ea   : > { %9465 = vrot.lane.b32.xlu1 %v9464_v29, %s10943_s4 }
0x1a3e   : > { %v5157_v44 = vpop.xlane.xlu0 %5156 }
0x1a42   : > { %v5160_v43 = vpop.xlane.xlu1 %5159 }
0x1a46   : > { %v5277_v55 = vpop.xlane.xlu0 %5276  ;;  %v5280_v32 = vpop.xlane.xlu1 %5279 }
0x1a4a   : > { %v5399_v3 = vpop.xlane.xlu0 %5398  ;;  %v5402_v37 = vpop.xlane.xlu1 %5401 }
0x1a4e   : > { %v5040_v26 = vpop.xlane.xlu0 %5039  ;;  %v5043_v31 = vpop.xlane.xlu1 %5042 }
0x1a4f   : > { %10069 = vrcp.f32 %v5040_v26  ;;  %v9897_v26 = vld [vmem:[%s11611_s5 + $0x1d4] ss:$8 sps:$4 sm:$0xff]  }
0x1a50   : > { %10071 = vrcp.f32 %v5043_v31 }
0x1a51   : > { %10073 = vrcp.f32 %v5160_v43  ;;  %v9889_v43 = vld [vmem:[%s11611_s5 + $0x1f0] ss:$8 sps:$4 sm:$0xff]  }
0x1a52   : > { %v5050_v36 = vpop.permute.xlu0 %5049  ;;  %10075 = vrcp.f32 %v5157_v44  ;;  %v5520_v10 = vpop.xlane.xlu1 %5519  ;;  %v9891_v44 = vld [vmem:[%s11611_s5 + $0x1f4] ss:$8 sps:$4 sm:$0xff]  }
0x1a53   : > { %9174 = vmatpush3.bf16.msra.mxu1 %v5050_v36  ;;  %10077 = vrcp.f32 %v5277_v55  ;;  %v9894_v55 = vld [vmem:[%s11611_s5 + $0x1e4] ss:$8 sps:$4 sm:$0xff]  }
0x1a54   : > { %9185 = vmatprep.subr.bf16.mxu1 %v10940_v42  ;;  %10079 = vrcp.f32 %v5280_v32 }
0x1a55   : > { %10081 = vrcp.f32 %v5399_v3 }
0x1a56   : > { %10083 = vrcp.f32 %v5402_v37  ;;  %v5523_v27 = vpop.xlane.xlu1 %5522  ;;  %v5409_v41 = vpop.permute.xlu0 %5408  ;;  %v9892_v37 = vld [vmem:[%s11611_s5 + $0x1e0] ss:$8 sps:$4 sm:$0xff]  }
0x1a57   : > { %10085 = vrcp.f32 %v5523_v27 }
0x1a58   : > { %10087 = vrcp.f32 %v5520_v10 }
0x1a5a   : > { %v5288_v49 = vpop.permute.xlu1 %5287 }
0x1a5c   : > { %v10070_v6 = vpop.eup %10069 }
0x1a5d   : > { %v10072_v63 = vpop.eup %10071  ;;  %v5046_v11 = vmul.f32 %v10070_v6, %v10062_v5  ;;  %v9867_v5 = vld [vmem:[%s11611_s5 + $0x174] ss:$8 sps:$4 sm:$0xff]  }
0x1a5e   : > { %v5047_v22 = vmul.f32 %v10072_v63, %v10064_v62  ;;  %v10074_v33 = vpop.eup %10073  ;;  %5844 = vmatprep.subr.bf16.mxu0 %v9867_v5  ;;  %v9871_v62 = vld [vmem:[%s11611_s5 + $0x150] ss:$8 sps:$4 sm:$0xff]  }
0x1a5f   : > { %v10076_v34 = vpop.eup %10075  ;;  %v5164_v38 = vmul.f32 %v10074_v33, %v12475_v53  ;;  %v9895_v63 = vld [vmem:[%s11611_s5 + $0x1d0] ss:$8 sps:$4 sm:$0xff]   ;;  %v9898_v33 = vld [vmem:[%s11611_s5 + $0x1c0] ss:$8 sps:$4 sm:$0xff]  }
0x1a60   : > { %v5048_v29 = vpack.c.bf16 %v5047_v22, %v5046_v11  ;;  %v5163_v40 = vmul.f32 %v10076_v34, %v12471_v24  ;;  %v10078_v16 = vpop.eup %10077  ;;  %v9900_v22 = vld [vmem:[%s11611_s5 + $0x1c4] ss:$8 sps:$4 sm:$0xff]   ;;  %v9903_v34 = vld [vmem:[%s11611_s5 + $0x1b4] ss:$8 sps:$4 sm:$0xff]  }
0x1a61   : > { %v10080_v7 = vpop.eup %10079  ;;  %v5283_v51 = vmul.f32 %v10078_v16, %v12481_v1 }
0x1a62   : > { %9176 = vmatmul.mubr.msk.bf16.vlgmr.msra.gmra.mxu1 %vm2171_vm2, %v5048_v29  ;;  %v5165_v28 = vpack.c.bf16 %v5164_v38, %v5163_v40  ;;  %v5284_v25 = vmul.f32 %v10080_v7, %v12479_v46  ;;  %v10082_v19 = vpop.eup %10081  ;;  %v5530_v46 = vpop.permute.xlu1 %5529  ;;  %v9901_v38 = vld [vmem:[%s11611_s5 + $0x1b0] ss:$8 sps:$4 sm:$0xff]  }
0x1a63   : > { %9186 = vmatpush3.bf16.msra.mxu1 %v4615_v21  ;;  %9187 = vmatprep.mubr.msk.bf16.mxu1 %vm10941_vm0, %v10940_v42  ;;  %v10084_v35 = vpop.eup %10083  ;;  %v5405_v30 = vmul.f32 %v10082_v19, %v12489_v57  ;;  %v9865_v57 = vld [vmem:[%s11611_s5 + $0x170] ss:$8 sps:$4 sm:$0xff]   ;;  %v9886_v21 = vld [vmem:[%s11611_s5 + $0x100] ss:$8 sps:$4 sm:$0xff]  }
0x1a64   : > { %9197 = vmatprep.subr.bf16.mxu1 %v10940_v42  ;;  %v5285_v24 = vpack.c.bf16 %v5284_v25, %v5283_v51  ;;  %v5406_v53 = vmul.f32 %v10084_v35, %v12487_v56  ;;  %v10086_v60 = vpop.eup %10085  ;;  %5845 = vmatpush1.bf16.msra.mxu0 %v9865_v57  ;;  %v9909_v51 = vld [vmem:[%s11611_s5 + $0x194] ss:$8 sps:$4 sm:$0xff]  }
0x1a65   : > { %v10088_v1 = vpop.eup %10087  ;;  %v5527_v61 = vmul.f32 %v10086_v60, %v12501_v45  ;;  %5846 = vmatprep.subr.bf16.mxu0 %v9870_v48  ;;  %v9882_v45 = vld [vmem:[%s11611_s5 + $0x124] ss:$8 sps:$4 sm:$0xff]  }
0x1a66   : > { %v5407_v59 = vpack.c.bf16 %v5406_v53, %v5405_v30  ;;  %v5526_v54 = vmul.f32 %v10088_v1, %v12497_v58  ;;  %v9879_v58 = vld [vmem:[%s11611_s5 + $0x134] ss:$8 sps:$4 sm:$0xff]   ;;  %v9910_v30 = vld [vmem:[%s11611_s5 + $0x180] ss:$8 sps:$4 sm:$0xff]   ;;  %v9912_v53 = vld [vmem:[%s11611_s5 + $0x184] ss:$8 sps:$4 sm:$0xff]   ;;  %v9461_v5 = vpop.permute.xlu1 %9460 }
0x1a68   : > { %v5528_v56 = vpack.c.bf16 %v5527_v61, %v5526_v54  ;;  %5847 = vmatpush1.bf16.msra.mxu0 %v9868_v2 }
0x1a6a   : > { %9188 = vmatmul.mubr.msk.bf16.vlgmr.msra.gmra.mxu1 %vm2171_vm2, %v5165_v28  ;;  %v9906_v28 = vld [vmem:[%s11611_s5 + $0x1a4] ss:$8 sps:$4 sm:$0xff]   ;;  %v9466_v48 = vpop.permute.xlu1 %9465 }
0x1a6b   : > { %9198 = vmatpush3.bf16.msra.mxu1 %v5288_v49  ;;  %9199 = vmatprep.mubr.msk.bf16.mxu1 %vm10941_vm0, %v10940_v42  ;;  %v9904_v49 = vld [vmem:[%s11611_s5 + $0x1a0] ss:$8 sps:$4 sm:$0xff]  }
0x1a6c   : > { %9209 = vmatprep.subr.bf16.mxu1 %v10940_v42 }
0x1a72   : > { %9200 = vmatmul.mubr.msk.bf16.vlgmr.msra.gmra.mxu1 %vm2171_vm2, %v5285_v24  ;;  %v9907_v24 = vld [vmem:[%s11611_s5 + $0x190] ss:$8 sps:$4 sm:$0xff]  }
0x1a73   : > { %9210 = vmatpush3.bf16.msra.mxu1 %v5409_v41  ;;  %9211 = vmatprep.mubr.msk.bf16.mxu1 %vm10941_vm0, %v10940_v42 }
0x1a74   : > { %9221 = vmatprep.subr.bf16.mxu1 %v10940_v42 }
0x1a7a   : > { %9212 = vmatmul.mubr.msk.bf16.vlgmr.msra.gmra.mxu1 %vm2171_vm2, %v5407_v59 }
0x1a7b   : > { %9222 = vmatpush3.bf16.msra.mxu1 %v5530_v46  ;;  %9223 = vmatprep.mubr.msk.bf16.mxu1 %vm10941_vm0, %v10940_v42  ;;  %v9873_v42 = vld [vmem:[%s11611_s5 + $0x154] ss:$8 sps:$4 sm:$0xff]   ;;  %s12985_s5 = smov %s12979_s26 }
0x1a7c   : > { %5848 = vmatprep.subr.bf16.mxu0 %v9873_v42  ;;  %v9463_v42 = vunpack.i.h.bf16 %v9461_v5 }
0x1a7d   : > { %5849 = vmatpush1.bf16.msra.mxu0 %v9871_v62  ;;  %v9462_v62 = vunpack.i.l.bf16 %v9461_v5 }
0x1a7e   : > { %5850 = vmatprep.subr.bf16.mxu0 %v9876_v50 }
0x1a81   : > { %5851 = vmatpush1.bf16.msra.mxu0 %v9874_v4 }
0x1a82   : > { %9224 = vmatmul.mubr.msk.bf16.vlgmr.msra.gmra.mxu1 %vm2171_vm2, %v5528_v56  ;;  %5852 = vmatprep.subr.bf16.mxu0 %v9879_v58  ;;  %v9468_v58 = vunpack.i.h.bf16 %v9466_v48 }
0x1a85   : > { %5853 = vmatpush1.bf16.msra.mxu0 %v9877_v12  ;;  %v9467_v12 = vunpack.i.l.bf16 %v9466_v48 }
0x1a86   : > { %5854 = vmatprep.subr.bf16.mxu0 %v9882_v45 }
0x1a89   : > { %5855 = vmatpush1.bf16.msra.mxu0 %v9880_v14 }
0x1a8a   : > { %5856 = vmatprep.subr.bf16.mxu0 %v9885_v20 }
0x1a8d   : > { %5857 = vmatpush1.bf16.msra.mxu0 %v9883_v39 }
0x1a8e   : > { %5858 = vmatprep.subr.bf16.mxu0 %v9888_v9 }
0x1a91   : > { %5859 = vmatpush1.bf16.msra.mxu0 %v9886_v21 }
0x1a92   : > { %5860 = vmatprep.subr.bf16.mxu0 %v9891_v44  ;;  %v5625_v44 = vsel %vm2123_vm1, %v12369_v18, %v9463_v42  ;;  %v9914_v42 = vld [vmem:[%s11616_s10 + $0xb8] sm:$0xff]  }
0x1a95   : > { %5861 = vmatpush2.bf16.msra.mxu0 %v9889_v43  ;;  %v5624_v43 = vsel %vm2123_vm1, %v12367_v8, %v9462_v62  ;;  %v9915_v62 = vld [vmem:[%s11616_s10 + $0xf0] sm:$0xff]  }
0x1a96   : > { %5862 = vmatprep.subr.bf16.mxu0 %v9894_v55  ;;  %v5626_v55 = vsel %vm3135_vm3, %v5624_v43, %v9467_v12  ;;  %v9919_v12 = vld [vmem:[%s11616_s10 + $0xe0] sm:$0xff]  }
0x1a97   : > { %v9927_v43 = vld [vmem:[%s11616_s10 + $0xc0] sm:$0xff]  }
0x1a99   : > { %5863 = vmatpush2.bf16.msra.mxu0 %v9892_v37 }
0x1a9a   : > { %5864 = vmatprep.subr.bf16.mxu0 %v9897_v26 }
0x1a9d   : > { %5865 = vmatpush2.bf16.msra.mxu0 %v9895_v63 }
0x1a9e   : > { %5866 = vmatprep.subr.bf16.mxu0 %v9900_v22 }
0x1aa1   : > { %5867 = vmatpush2.bf16.msra.mxu0 %v9898_v33 }
0x1aa2   : > { %5868 = vmatprep.subr.bf16.mxu0 %v9903_v34 }
0x1aa5   : > { %5869 = vmatpush2.bf16.msra.mxu0 %v9901_v38 }
0x1aa6   : > { %5870 = vmatprep.subr.bf16.mxu0 %v9906_v28 }
0x1aa9   : > { %5871 = vmatpush2.bf16.msra.mxu0 %v9904_v49 }
0x1aaa   : > { %5872 = vmatprep.subr.bf16.mxu0 %v9909_v51 }
0x1aad   : > { %5873 = vmatpush2.bf16.msra.mxu0 %v9907_v24 }
0x1aae   : > { %5874 = vmatprep.subr.bf16.mxu0 %v9912_v53 }
0x1ab1   : > { %5875 = vmatpush2.bf16.msra.mxu0 %v9910_v30 }
0x1b22   : > { %v5089_v32 = vpop.f32.mrf.mxu1 }
0x1b24   : > { %v9177_v3 = vpop.f32.mrf.mxu1 }
0x1b26   : > { %v5092_v31 = vpop.f32.mrf.mxu1 }
0x1b27   : > { %v9484_v36 = vpack.i.bf16 %v5092_v31, %v5089_v32  ;;  %v5627_v32 = vsel %vm3135_vm3, %v5625_v44, %v9468_v58  ;;  %v9918_v58 = vld [vmem:[%s11616_s10 + $0xa8] sm:$0xff]  }
0x1b28   : > { %v9178_v6 = vpop.f32.mrf.mxu1  ;;  %v9926_v44 = vld [vmem:[%s11616_s10 + $0x88] sm:$0xff]  }
0x1b29   : > { %9485 = vrot.lane.b32.xlu1 %v9484_v36, %s10942_s1 }
0x1b2a   : > { %v12571_v11 = vpop.f32.mrf.mxu1 }
0x1b2c   : > { %v9189_v10 = vpop.f32.mrf.mxu1 }
0x1b2e   : > { %v5206_v29 = vpop.f32.mrf.mxu1 }
0x1b30   : > { %v9190_v27 = vpop.f32.mrf.mxu1 }
0x1b32   : > { %v5327_v40 = vpop.f32.mrf.mxu1 }
0x1b34   : > { %v9201_v16 = vpop.f32.mrf.mxu1 }
0x1b36   : > { %v5330_v7 = vpop.f32.mrf.mxu1 }
0x1b37   : > { %v9469_v25 = vpack.i.bf16 %v5330_v7, %v5327_v40 }
0x1b38   : > { %v9202_v19 = vpop.f32.mrf.mxu1 }
0x1b39   : > { %9470 = vrot.lane.b32.xlu0 %v9469_v25, %s10944_s7  ;;  %s12992_s7 = sld [smem:[#allocation64_spill]] (!%p8702_p4) }
0x1b3a   : > { %v5448_v35 = vpop.f32.mrf.mxu1 }
0x1b3c   : > { %v9213_v41 = vpop.f32.mrf.mxu1 }
0x1b3e   : > { %v5451_v59 = vpop.f32.mrf.mxu1 }
0x1b3f   : > { %v9474_v60 = vpack.i.bf16 %v5451_v59, %v5448_v35  ;;  %v9913_v59 = vld [vmem:[%s11616_s10 + $0xf8] sm:$0xff]   ;;  %s12993_s26 = smov (!%p8702_p4), %s12992_s7 }
0x1b40   : > { %v9214_v46 = vpop.f32.mrf.mxu1  ;;  %8969 = vmatprep.subr.bf16.mxu1 %v9913_v59  ;;  %v9932_v59 = vld [vmem:[%s11621_s0 + $0xe0] ss:$8 sps:$4 sm:$0xff]  }
0x1b41   : > { %9475 = vrot.lane.b32.xlu0 %v9474_v60, %s10943_s4  ;;  %8970 = vmatpush3.bf16.msra.mxu1 %v9914_v42  ;;  %v8650_v42 = vld [vmem:[%s11574_s8 + $0x1] ss:$0 sm:$0xff]  ;;  %s12990_s8 = smov %s12984_s3 }
0x1b42   : > { %v5569_v1 = vpop.f32.mrf.mxu1  ;;  %8971 = vmatprep.subr.bf16.mxu1 %v9915_v62 }
0x1b44   : > { %v9225_v61 = vpop.f32.mrf.mxu1 }
0x1b46   : > { %v5572_v54 = vpop.f32.mrf.mxu1 }
0x1b47   : > { %v9479_v56 = vpack.i.bf16 %v5572_v54, %v5569_v1 }
0x1b48   : > { %v9226_v57 = vpop.f32.mrf.mxu1 }
0x1b49   : > { %9480 = vrot.lane.b32.xlu0 %v9479_v56, %s10942_s1 }
0x1b9b   : > { %v9486_v50 = vpop.permute.xlu1 %9485 }
0x1b9c   : > { %v9488_v20 = vunpack.i.h.bf16 %v9486_v50  ;;  %v9487_v39 = vunpack.i.l.bf16 %v9486_v50  ;;  %v9916_v50 = vld [vmem:[%s11616_s10 + $0xb0] sm:$0xff]  }
0x1b9d   : > { %8972 = vmatpush3.bf16.msra.mxu1 %v9916_v50 }
0x1b9e   : > { %v5629_v6 = vsel %vm3138_vm4, %v5627_v32, %v9488_v20  ;;  %v5628_v18 = vsel %vm3138_vm4, %v5626_v55, %v9487_v39  ;;  %v9922_v20 = vld [vmem:[%s11616_s10 + $0x98] sm:$0xff]   ;;  %v9923_v39 = vld [vmem:[%s11616_s10 + $0xd0] sm:$0xff]   ;;  %v9928_v55 = vld [vmem:[%s11616_s10 + $0x80] sm:$0xff]  }
0x1b9f   : > { %v5636_v34 = vpack.c.bf16 %v5629_v6, %v5628_v18  ;;  %v9931_v32 = vld [vmem:[%s11621_s0 + $0xf4] ss:$8 sps:$4 sm:$0xff]   ;;  %v8615_v18 = vld [vmem:[%s12986_s28 + $0x2] sm:$0x3] }
0x1bab   : > { %v9471_v2 = vpop.permute.xlu0 %9470 }
0x1bac   : > { %v9473_v45 = vunpack.i.h.bf16 %v9471_v2  ;;  %v9472_v14 = vunpack.i.l.bf16 %v9471_v2 }
0x1bae   : > { %v5631_v37 = vsel %vm2123_vm1, %v5206_v29, %v9473_v45  ;;  %v5630_v26 = vsel %vm2123_vm1, %v12571_v11, %v9472_v14  ;;  %v8582_v11 = vld [vmem:[%s12985_s5 + $0x2] sm:$0x3]  ;;  %v9921_v14 = vld [vmem:[%s11616_s10 + $0xd8] sm:$0xff]   ;;  %s12995_s5 = sld [smem:[#allocation69_spill]] (!%p8702_p4) }
0x1baf   : > { %v5677_v29 = vrot.slane %v8582_v11, %v11751_v47  ;;  %v5681_v27 = vrot.slane %v8582_v11, %v11758_v52  ;;  %v9920_v45 = vld [vmem:[%s11616_s10 + $0xa0] sm:$0xff]  }
0x1bb3   : > { %v9476_v4 = vpop.permute.xlu0 %9475 }
0x1bb4   : > { %v9478_v9 = vunpack.i.h.bf16 %v9476_v4  ;;  %v9477_v21 = vunpack.i.l.bf16 %v9476_v4  ;;  %v9917_v4 = vld [vmem:[%s11616_s10 + $0xe8] sm:$0xff]  }
0x1bb5   : > { %8973 = vmatprep.subr.bf16.mxu1 %v9917_v4 }
0x1bb6   : > { %v5633_v63 = vsel %vm3135_vm3, %v5631_v37, %v9478_v9  ;;  %v5632_v8 = vsel %vm3135_vm3, %v5630_v26, %v9477_v21  ;;  %8974 = vmatpush3.bf16.msra.mxu1 %v9918_v58  ;;  %v9924_v9 = vld [vmem:[%s11616_s10 + $0x90] sm:$0xff]   ;;  %v9925_v21 = vld [vmem:[%s11616_s10 + $0xc8] sm:$0xff]   ;;  %s12988_s10 = smov %s12982_s19 }
0x1bb7   : > { %8975 = vmatprep.subr.bf16.mxu1 %v9919_v12 }
0x1bba   : > { %8976 = vmatpush3.bf16.msra.mxu1 %v9920_v45 }
0x1bbb   : > { %v9481_v3 = vpop.permute.xlu0 %9480  ;;  %8977 = vmatprep.subr.bf16.mxu1 %v9921_v14 }
0x1bbc   : > { %v9483_v31 = vunpack.i.h.bf16 %v9481_v3  ;;  %v9482_v36 = vunpack.i.l.bf16 %v9481_v3 }
0x1bbe   : > { %v5634_v10 = vsel %vm3138_vm4, %v5632_v8, %v9482_v36  ;;  %v5635_v22 = vsel %vm3138_vm4, %v5633_v63, %v9483_v31  ;;  %8978 = vmatpush3.bf16.msra.mxu1 %v9922_v20 }
0x1bbf   : > { %v5637_v33 = vpack.c.bf16 %v5635_v22, %v5634_v10  ;;  %8979 = vmatprep.subr.bf16.mxu1 %v9923_v39  ;;  %v8616_v10 = vld [vmem:[%s12987_s24 + $0x2] sm:$0x3] }
0x1bc0   : > { %v8683_v39 = vld [vmem:[%s12988_s10 + $0x2] sm:$0x3] }
0x1bc1   : > { %5876 = vmatprep.mubr.bf16.mxu0 %v5637_v33  ;;  %v5931_v33 = vrot.slane %v8615_v18, %v11751_v47 }
0x1bc2   : > { %5877 = vmatmul.mubr.bf16.vlgmr.msra.gmra.mxu0 %v5636_v34  ;;  %8980 = vmatpush3.bf16.msra.mxu1 %v9924_v9  ;;  %v5935_v34 = vrot.slane %v8615_v18, %v11758_v52  ;;  %v6163_v9 = vrot.slane %v8683_v39, %v11751_v47 }
0x1bc3   : > { %8981 = vmatprep.subr.bf16.mxu1 %v9925_v21  ;;  %v6167_v21 = vrot.slane %v8683_v39, %v11758_v52 }
0x1bc6   : > { %8982 = vmatpush3.bf16.msra.mxu1 %v9926_v44 }
0x1bc7   : > { %8983 = vmatprep.subr.bf16.mxu1 %v9927_v43 }
0x1bca   : > { %8984 = vmatpush3.bf16.msra.mxu1 %v9928_v55 }
0x1bcb   : > { %6250 = vmatprep.subr.bf16.mxu1 %v9931_v32 }
0x1c82   : > { %v5878_v38 = vpop.f32.mrf.mxu0 }
0x1c83   : > { %v5879_v40 = vadd.f32 %v5878_v38, %v5677_v29 }
0x1c84   : > { %v5880_v16 = vpop.f32.mrf.mxu0 }
0x1c85   : > { %v5881_v28 = vadd.f32 %v5880_v16, %v5681_v27  ;;  %v5887_v49 = vadd.f32 %v5879_v40, %v12240_v0 }
0x1c86   : > { %v5882_v7 = vpop.f32.mrf.mxu0 }
0x1c87   : > { %v5888_v51 = vadd.f32 %v5881_v28, %v12236_v13  ;;  %v5883_v25 = vadd.f32 %v5882_v7, %v5677_v29  ;;  %v5946_v29 = vrot.slane %v8616_v10, %v11751_v47 }
0x1c88   : > { %v5884_v19 = vpop.f32.mrf.mxu0 }
0x1c89   : > { %v5885_v24 = vadd.f32 %v5884_v19, %v5681_v27  ;;  %v5895_v35 = vadd.f32 %v5888_v51, %v5887_v49  ;;  %v5889_v41 = vadd.f32 %v5883_v25, %v12242_v15  ;;  %v5950_v27 = vrot.slane %v8616_v10, %v11758_v52 }
0x1c8b   : > { %v5890_v30 = vadd.f32 %v5885_v24, %v12238_v17  ;;  %5896 = vadd.xlane.f32.xlu0 %v5895_v35 }
0x1c8d   : > { %v5898_v53 = vadd.f32 %v5890_v30, %v5889_v41 }
0x1c8f   : > { %5899 = vadd.xlane.f32.xlu1 %v5898_v53  ;;  %v9934_v53 = vld [vmem:[%s11621_s0 + $0xe4] ss:$8 sps:$4 sm:$0xff]  }
0x1d14   : > { %v5897_v60 = vpop.xlane.xlu0 %5896 }
0x1d15   : > { %v5901_v46 = vmul.f32 0.00390625, %v5897_v60  ;;  %v9937_v60 = vld [vmem:[%s11621_s0 + $0xd4] ss:$8 sps:$4 sm:$0xff]  }
0x1d17   : > { %v5903_v1 = vsub.f32 %v5887_v49, %v5901_v46  ;;  %v5904_v0 = vsub.f32 %v5888_v51, %v5901_v46  ;;  %v9935_v46 = vld [vmem:[%s11621_s0 + $0xd0] ss:$8 sps:$4 sm:$0xff]  }
0x1d18   : > { %v5900_v13 = vpop.xlane.xlu1 %5899 }
0x1d19   : > { %v5907_v61 = vmul.f32 %v5903_v1, %v5903_v1  ;;  %v5908_v54 = vmul.f32 %v5904_v0, %v5904_v0  ;;  %v5902_v56 = vmul.f32 0.00390625, %v5900_v13  ;;  %v9943_v13 = vld [vmem:[%s11621_s0 + $0xb4] ss:$8 sps:$4 sm:$0xff]  }
0x1d1b   : > { %v5905_v15 = vsub.f32 %v5889_v41, %v5902_v56  ;;  %v5906_v17 = vsub.f32 %v5890_v30, %v5902_v56  ;;  %v5911_v57 = vadd.f32 %v5908_v54, %v5907_v61  ;;  %v9929_v30 = vld [vmem:[%s11621_s0 + $0xf0] ss:$8 sps:$4 sm:$0xff]   ;;  %v9944_v54 = vld [vmem:[%s11621_s0 + $0xa0] ss:$8 sps:$4 sm:$0xff]   ;;  %v9949_v56 = vld [vmem:[%s11621_s0 + $0x94] ss:$8 sps:$4 sm:$0xff]  }
0x1d1c   : > { %v9941_v61 = vld [vmem:[%s11621_s0 + $0xb0] ss:$8 sps:$4 sm:$0xff]  }
0x1d1d   : > { %v5909_v5 = vmul.f32 %v5905_v15, %v5905_v15  ;;  %v5910_v48 = vmul.f32 %v5906_v17, %v5906_v17  ;;  %5912 = vadd.xlane.f32.xlu0 %v5911_v57  ;;  %v9950_v57 = vld [vmem:[%s11621_s0 + $0x80] ss:$8 sps:$4 sm:$0xff]  }
0x1d1f   : > { %v5914_v2 = vadd.f32 %v5910_v48, %v5909_v5 }
0x1d21   : > { %5915 = vadd.xlane.f32.xlu0 %v5914_v2 }
0x1da6   : > { %v5913_v3 = vpop.xlane.xlu0 %5912 }
0x1da7   : > { %v5917_v37 = vmul.f32 0.00390625, %v5913_v3 }
0x1da9   : > { %v5919_v26 = vadd.f32 1e-05, %v5917_v37 }
0x1daa   : > { %v5916_v31 = vpop.xlane.xlu0 %5915 }
0x1dab   : > { %10089 = vrsqrt.f32 %v5919_v26  ;;  %v5918_v36 = vmul.f32 0.00390625, %v5916_v31 }
0x1dad   : > { %v5920_v6 = vadd.f32 1e-05, %v5918_v36 }
0x1daf   : > { %10091 = vrsqrt.f32 %v5920_v6 }
0x1db8   : > { %v10090_v63 = vpop.eup %10089 }
0x1db9   : > { %v5923_v8 = vmul.f32 %v10090_v63, %v5903_v1  ;;  %v5924_v22 = vmul.f32 %v10090_v63, %v5904_v0  ;;  %v9940_v1 = vld [vmem:[%s11621_s0 + $0xc4] ss:$8 sps:$4 sm:$0xff]   ;;  %v9938_v0 = vld [vmem:[%s11621_s0 + $0xc0] ss:$8 sps:$4 sm:$0xff]  }
0x1dbb   : > { %v5938_v16 = vmul.f32 %v5931_v33, %v5923_v8  ;;  %v5939_v28 = vmul.f32 %v5935_v34, %v5924_v22 }
0x1dbc   : > { %v10092_v11 = vpop.eup %10091 }
0x1dbd   : > { %v5925_v38 = vmul.f32 %v10092_v11, %v5905_v15  ;;  %v5926_v40 = vmul.f32 %v10092_v11, %v5906_v17  ;;  %v5953_v51 = vadd.f32 %v5946_v29, %v5938_v16  ;;  %v5954_v25 = vadd.f32 %v5950_v27, %v5939_v28  ;;  %v9947_v15 = vld [vmem:[%s11621_s0 + $0x90] ss:$8 sps:$4 sm:$0xff]   ;;  %v9952_v17 = vld [vmem:[%s11621_s0 + $0x84] ss:$8 sps:$4 sm:$0xff]  }
0x1dbf   : > { %v5940_v7 = vmul.f32 %v5931_v33, %v5925_v38  ;;  %v5941_v49 = vmul.f32 %v5935_v34, %v5926_v40 }
0x1dc1   : > { %v12634_v19 = vadd.f32 %v5946_v29, %v5940_v7  ;;  %v12636_v24 = vadd.f32 %v5950_v27, %v5941_v49 }
0x1dc3   : > { %v5958_v35 = vpack.c.bf16 %v12636_v24, %v5954_v25  ;;  %v5957_v41 = vpack.c.bf16 %v12634_v19, %v5953_v51 }
0x1dc5   : > { %6128 = vmatprep.mubr.bf16.mxu1 %v5958_v35 }
0x1dc6   : > { %6129 = vmatmul.mubr.bf16.vlgmr.msra.gmra.mxu1 %v5957_v41 }
0x1dc7   : > { %6251 = vmatpush1.bf16.msra.mxu1 %v9929_v30  ;;  %6282 = vmatprep.mubr.bf16.mxu1 %v10945_v23  ;;  %v9946_v23 = vld [vmem:[%s11621_s0 + $0xa4] ss:$8 sps:$4 sm:$0xff]   ;;  %s12989_s0 = smov %s12983_s23 }
0x1dc8   : > { %6252 = vmatprep.subr.bf16.mxu1 %v9934_v53 }
0x1dcb   : > { %6253 = vmatpush1.bf16.msra.mxu1 %v9932_v59  ;;  %v8700_v59 = vld [vmem:[%s12989_s0 + $0x2] sm:$0x3]  ;;  %s12994_s0 = sld [smem:[#allocation68_spill]] (!%p8702_p4) }
0x1dcc   : > { %6254 = vmatprep.subr.bf16.mxu1 %v9937_v60  ;;  %v8701_v60 = vld [vmem:[%s12990_s8 + $0x2] sm:$0x3] }
0x1dcf   : > { %6255 = vmatpush1.bf16.msra.mxu1 %v9935_v46  ;;  %v6337_v46 = vrot.slane %v8700_v59, %v11751_v47 }
0x1dd0   : > { %6256 = vmatprep.subr.bf16.mxu1 %v9940_v1  ;;  %v6341_v1 = vrot.slane %v8700_v59, %v11758_v52 }
0x1dd3   : > { %6257 = vmatpush1.bf16.msra.mxu1 %v9938_v0 }
0x1dd4   : > { %6258 = vmatprep.subr.bf16.mxu1 %v9943_v13  ;;  %v6352_v13 = vrot.slane %v8701_v60, %v11751_v47 }
0x1dd7   : > { %6259 = vmatpush1.bf16.msra.mxu1 %v9941_v61  ;;  %v6356_v61 = vrot.slane %v8701_v60, %v11758_v52 }
0x1dd8   : > { %6260 = vmatprep.subr.bf16.mxu1 %v9946_v23 }
0x1ddb   : > { %6261 = vmatpush1.bf16.msra.mxu1 %v9944_v54 }
0x1ddc   : > { %6262 = vmatprep.subr.bf16.mxu1 %v9949_v56 }
0x1ddf   : > { %6263 = vmatpush1.bf16.msra.mxu1 %v9947_v15 }
0x1de0   : > { %6264 = vmatprep.subr.bf16.mxu1 %v9952_v17 }
0x1de3   : > { %6265 = vmatpush1.bf16.msra.mxu1 %v9950_v57 }
0x1e86   : > { %v8985_v5 = vpop.f32.mrf.mxu1 }
0x1e88   : > { %v8986_v48 = vpop.f32.mrf.mxu1 }
0x1e89   : > { %v8987_v2 = vadd.f32 %v8986_v48, %v8985_v5 }
0x1e8a   : > { %v8988_v62 = vpop.f32.mrf.mxu1 }
0x1e8b   : > { %v6131_v4 = vadd.f32 %v8987_v2, %v8650_v42 }
0x1e8c   : > { %v8989_v50 = vpop.f32.mrf.mxu1 }
0x1e8d   : > { %v8990_v58 = vadd.f32 %v8989_v50, %v8988_v62  ;;  %v6137_v45 = vmax.f32 %v6131_v4, 0.0 }
0x1e8f   : > { %v6134_v12 = vadd.f32 %v8990_v58, %v8650_v42 }
0x1e91   : > { %v6138_v14 = vmax.f32 %v6134_v12, 0.0 }
0x1e93   : > { %v6139_v20 = vpack.c.bf16 %v6138_v14, %v6137_v45 }
0x1e95   : > { %6283 = vmatmul.mubr.bf16.vlgmr.msra.gmra.mxu1 %v6139_v20 }
0x1f55   : > { %v6284_v44 = vpop.f32.mrf.mxu1 }
0x1f56   : > { %v6285_v43 = vadd.f32 %v6284_v44, %v6163_v9 }
0x1f57   : > { %v6286_v55 = vpop.f32.mrf.mxu1 }
0x1f58   : > { %v6287_v32 = vadd.f32 %v6286_v55, %v6167_v21  ;;  %v6293_v37 = vadd.f32 %v6285_v43, %v5953_v51 }
0x1f59   : > { %v6288_v3 = vpop.f32.mrf.mxu1 }
0x1f5a   : > { %v6294_v26 = vadd.f32 %v6287_v32, %v5954_v25  ;;  %v6289_v31 = vadd.f32 %v6288_v3, %v6163_v9 }
0x1f5b   : > { %v6290_v36 = vpop.f32.mrf.mxu1 }
0x1f5c   : > { %v6291_v6 = vadd.f32 %v6290_v36, %v6167_v21  ;;  %v6301_v18 = vadd.f32 %v6294_v26, %v6293_v37  ;;  %v6295_v63 = vadd.f32 %v6289_v31, %v12634_v19 }
0x1f5e   : > { %v6296_v8 = vadd.f32 %v6291_v6, %v12636_v24  ;;  %6302 = vadd.xlane.f32.xlu0 %v6301_v18 }
0x1f60   : > { %v6304_v10 = vadd.f32 %v6296_v8, %v6295_v63 }
0x1f62   : > { %6305 = vadd.xlane.f32.xlu1 %v6304_v10 }
0x1fe7   : > { %v6303_v22 = vpop.xlane.xlu0 %6302 }
0x1fe8   : > { %v6307_v33 = vmul.f32 0.00390625, %v6303_v22 }
0x1fea   : > { %v6309_v34 = vsub.f32 %v6293_v37, %v6307_v33  ;;  %v6310_v11 = vsub.f32 %v6294_v26, %v6307_v33 }
0x1feb   : > { %v6306_v29 = vpop.xlane.xlu1 %6305 }
0x1fec   : > { %v6313_v27 = vmul.f32 %v6309_v34, %v6309_v34  ;;  %v6314_v38 = vmul.f32 %v6310_v11, %v6310_v11  ;;  %v6308_v40 = vmul.f32 0.00390625, %v6306_v29 }
0x1fee   : > { %v6311_v16 = vsub.f32 %v6295_v63, %v6308_v40  ;;  %v6312_v28 = vsub.f32 %v6296_v8, %v6308_v40  ;;  %v6317_v7 = vadd.f32 %v6314_v38, %v6313_v27 }
0x1ff0   : > { %v6315_v49 = vmul.f32 %v6311_v16, %v6311_v16  ;;  %v6316_v51 = vmul.f32 %v6312_v28, %v6312_v28  ;;  %6318 = vadd.xlane.f32.xlu0 %v6317_v7 }
0x1ff2   : > { %v6320_v25 = vadd.f32 %v6316_v51, %v6315_v49 }
0x1ff4   : > { %6321 = vadd.xlane.f32.xlu1 %v6320_v25 }
0x2079   : > { %v6319_v19 = vpop.xlane.xlu0 %6318 }
0x207a   : > { %v6323_v24 = vmul.f32 0.00390625, %v6319_v19 }
0x207c   : > { %v6325_v35 = vadd.f32 1e-05, %v6323_v24 }
0x207d   : > { %v6322_v41 = vpop.xlane.xlu1 %6321 }
0x207e   : > { %10093 = vrsqrt.f32 %v6325_v35  ;;  %v6324_v30 = vmul.f32 0.00390625, %v6322_v41 }
0x2080   : > { %v6326_v53 = vadd.f32 1e-05, %v6324_v30 }
0x2082   : > { %10095 = vrsqrt.f32 %v6326_v53 }
0x208b   : > { %v10094_v0 = vpop.eup %10093 }
0x208c   : > { %v6329_v23 = vmul.f32 %v10094_v0, %v6309_v34  ;;  %v6330_v54 = vmul.f32 %v10094_v0, %v6310_v11 }
0x208e   : > { %v6344_v56 = vmul.f32 %v6337_v46, %v6329_v23  ;;  %v6345_v15 = vmul.f32 %v6341_v1, %v6330_v54 }
0x208f   : > { %v10096_v17 = vpop.eup %10095 }
0x2090   : > { %v12671_v57 = vadd.f32 %v6352_v13, %v6344_v56  ;;  %v6360_v5 = vadd.f32 %v6356_v61, %v6345_v15  ;;  %v6331_v48 = vmul.f32 %v10096_v17, %v6311_v16  ;;  %v6332_v2 = vmul.f32 %v10096_v17, %v6312_v28 }
0x2092   : > { %6363 = vst [vmem:[#allocation2 + $0x10] sm:$0xff] %v12671_v57  ;;  %6364 = vst [vmem:[#allocation2] sm:$0xff] %v6360_v5  ;;  %v6346_v42 = vmul.f32 %v6337_v46, %v6331_v48  ;;  %v6347_v62 = vmul.f32 %v6341_v1, %v6332_v2  ;;  %6370 = sbr.rel (%p8702_p4) target bundleno = 9294 (0x244e), region = 208 }
0x2094   : > { %v12674_v50 = vadd.f32 %v6352_v13, %v6346_v42  ;;  %v6362_v4 = vadd.f32 %v6356_v61, %v6347_v62 }
0x2096   : > { %6365 = vst [vmem:[#allocation2 + $0x18] sm:$0xff] %v12674_v50  ;;  %6366 = vst [vmem:[#allocation2 + $0x8] sm:$0xff] %v6362_v4 }
0x2097   : > { %v10103_v58 = vld [vmem:[#allocation17 + $0x74] ss:$8 sps:$4 sm:$0xff]   ;;  %v12678_v12 = vpack.c.bf16 %v6362_v4, %v6360_v5  ;;  %v10105_v45 = vld [vmem:[#allocation17 + $0x70] ss:$8 sps:$4 sm:$0xff]   ;;  %v10106_v14 = vld [vmem:[#allocation17 + $0x64] ss:$8 sps:$4 sm:$0xff]   ;;  %v12683_v2 = vpack.c.bf16 %v12674_v50, %v12671_v57 }
0x2098   : > { %6577 = vmatprep.subr.bf16.mxu0 %v10103_v58  ;;  %v10108_v20 = vld [vmem:[#allocation17 + $0x60] ss:$8 sps:$4 sm:$0xff]   ;;  %v10109_v39 = vld [vmem:[#allocation17 + $0x54] ss:$8 sps:$4 sm:$0xff]   ;;  %v10111_v9 = vld [vmem:[#allocation17 + $0x50] ss:$8 sps:$4 sm:$0xff]  }
0x2099   : > { %6609 = vmatprep.mubr.bf16.mxu0 %v12678_v12  ;;  %6578 = vmatpush1.bf16.msra.mxu0 %v10105_v45  ;;  %v10112_v21 = vld [vmem:[#allocation17 + $0x44] ss:$8 sps:$4 sm:$0xff]   ;;  %v10114_v44 = vld [vmem:[#allocation17 + $0x40] ss:$8 sps:$4 sm:$0xff]   ;;  %v10115_v43 = vld [vmem:[#allocation17 + $0x34] ss:$8 sps:$4 sm:$0xff]  }
0x209a   : > { %6579 = vmatprep.subr.bf16.mxu0 %v10106_v14  ;;  %v10117_v55 = vld [vmem:[#allocation17 + $0x30] ss:$8 sps:$4 sm:$0xff]   ;;  %v10118_v32 = vld [vmem:[#allocation17 + $0x24] ss:$8 sps:$4 sm:$0xff]   ;;  %v10120_v3 = vld [vmem:[#allocation17 + $0x20] ss:$8 sps:$4 sm:$0xff]  }
0x209b   : > { %v10121_v37 = vld [vmem:[#allocation17 + $0x14] ss:$8 sps:$4 sm:$0xff]   ;;  %v10123_v36 = vld [vmem:[#allocation17 + $0x10] ss:$8 sps:$4 sm:$0xff]   ;;  %v10124_v18 = vld [vmem:[#allocation17 + $0x4] ss:$8 sps:$4 sm:$0xff]  }
0x209c   : > { %v10151_v26 = vld [vmem:[#allocation20 + $0x74] ss:$8 sps:$4 sm:$0xff]   ;;  %v10153_v31 = vld [vmem:[#allocation20 + $0x70] ss:$8 sps:$4 sm:$0xff]   ;;  %v10154_v6 = vld [vmem:[#allocation20 + $0x64] ss:$8 sps:$4 sm:$0xff]  }
0x209d   : > { %6580 = vmatpush1.bf16.msra.mxu0 %v10108_v20  ;;  %6830 = vmatprep.subr.bf16.mxu1 %v10151_v26  ;;  %v10156_v63 = vld [vmem:[#allocation20 + $0x60] ss:$8 sps:$4 sm:$0xff]   ;;  %v10157_v8 = vld [vmem:[#allocation20 + $0x54] ss:$8 sps:$4 sm:$0xff]   ;;  %v10159_v33 = vld [vmem:[#allocation20 + $0x50] ss:$8 sps:$4 sm:$0xff]  }
0x209e   : > { %6581 = vmatprep.subr.bf16.mxu0 %v10109_v39  ;;  %6831 = vmatpush1.bf16.msra.mxu1 %v10153_v31  ;;  %v10126_v10 = vld [vmem:[#allocation17] ss:$8 sps:$4 sm:$0xff]   ;;  %v10127_v22 = vld [vmem:[#allocation17 + $0xf4] ss:$8 sps:$4 sm:$0xff]   ;;  %v10129_v11 = vld [vmem:[#allocation17 + $0xf0] ss:$8 sps:$4 sm:$0xff]  }
0x209f   : > { %6832 = vmatprep.subr.bf16.mxu1 %v10154_v6  ;;  %v10160_v34 = vld [vmem:[#allocation20 + $0x44] ss:$8 sps:$4 sm:$0xff]   ;;  %v10162_v27 = vld [vmem:[#allocation20 + $0x40] ss:$8 sps:$4 sm:$0xff]   ;;  %v10163_v38 = vld [vmem:[#allocation20 + $0x34] ss:$8 sps:$4 sm:$0xff]  }
0x20a0   : > { %v10130_v29 = vld [vmem:[#allocation17 + $0xe4] ss:$8 sps:$4 sm:$0xff]   ;;  %v10132_v40 = vld [vmem:[#allocation17 + $0xe0] ss:$8 sps:$4 sm:$0xff]   ;;  %v10133_v16 = vld [vmem:[#allocation17 + $0xd4] ss:$8 sps:$4 sm:$0xff]  }
0x20a1   : > { %6582 = vmatpush1.bf16.msra.mxu0 %v10111_v9  ;;  %v10165_v28 = vld [vmem:[#allocation20 + $0x30] ss:$8 sps:$4 sm:$0xff]   ;;  %v10136_v49 = vld [vmem:[#allocation17 + $0xc4] ss:$8 sps:$4 sm:$0xff]   ;;  %v10169_v19 = vld [vmem:[#allocation20 + $0x14] ss:$8 sps:$4 sm:$0xff]  }
0x20a2   : > { %6583 = vmatprep.subr.bf16.mxu0 %v10112_v21  ;;  %6833 = vmatpush1.bf16.msra.mxu1 %v10156_v63  ;;  %v10135_v7 = vld [vmem:[#allocation17 + $0xd0] ss:$8 sps:$4 sm:$0xff]   ;;  %v10168_v25 = vld [vmem:[#allocation20 + $0x20] ss:$8 sps:$4 sm:$0xff]   ;;  %v10139_v35 = vld [vmem:[#allocation17 + $0xb4] ss:$8 sps:$4 sm:$0xff]  }
0x20a3   : > { %6834 = vmatprep.subr.bf16.mxu1 %v10157_v8  ;;  %v10166_v51 = vld [vmem:[#allocation20 + $0x24] ss:$8 sps:$4 sm:$0xff]   ;;  %v10171_v41 = vld [vmem:[#allocation20 + $0x10] ss:$8 sps:$4 sm:$0xff]   ;;  %v10174_v60 = vld [vmem:[#allocation20] ss:$8 sps:$4 sm:$0xff]  }
0x20a4   : > { %v10138_v24 = vld [vmem:[#allocation17 + $0xc0] ss:$8 sps:$4 sm:$0xff]   ;;  %v10141_v53 = vld [vmem:[#allocation17 + $0xb0] ss:$8 sps:$4 sm:$0xff]   ;;  %v10142_v59 = vld [vmem:[#allocation17 + $0xa4] ss:$8 sps:$4 sm:$0xff]  }
0x20a5   : > { %6584 = vmatpush1.bf16.msra.mxu0 %v10114_v44  ;;  %v10172_v30 = vld [vmem:[#allocation20 + $0x4] ss:$8 sps:$4 sm:$0xff]   ;;  %v10175_v46 = vld [vmem:[#allocation20 + $0xf4] ss:$8 sps:$4 sm:$0xff]   ;;  %v10177_v13 = vld [vmem:[#allocation20 + $0xf0] ss:$8 sps:$4 sm:$0xff]  }
0x20a6   : > { %6585 = vmatprep.subr.bf16.mxu0 %v10115_v43  ;;  %6835 = vmatpush1.bf16.msra.mxu1 %v10159_v33  ;;  %v10144_v1 = vld [vmem:[#allocation17 + $0xa0] ss:$8 sps:$4 sm:$0xff]   ;;  %v10145_v0 = vld [vmem:[#allocation17 + $0x94] ss:$8 sps:$4 sm:$0xff]   ;;  %v10147_v23 = vld [vmem:[#allocation17 + $0x90] ss:$8 sps:$4 sm:$0xff]  }
0x20a7   : > { %6836 = vmatprep.subr.bf16.mxu1 %v10160_v34  ;;  %v10178_v61 = vld [vmem:[#allocation20 + $0xe4] ss:$8 sps:$4 sm:$0xff]   ;;  %v10180_v56 = vld [vmem:[#allocation20 + $0xe0] ss:$8 sps:$4 sm:$0xff]   ;;  %v10181_v15 = vld [vmem:[#allocation20 + $0xd4] ss:$8 sps:$4 sm:$0xff]  }
0x20a8   : > { %v10148_v54 = vld [vmem:[#allocation17 + $0x84] ss:$8 sps:$4 sm:$0xff]   ;;  %v10150_v17 = vld [vmem:[#allocation17 + $0x80] ss:$8 sps:$4 sm:$0xff]   ;;  %v10183_v5 = vld [vmem:[#allocation20 + $0xd0] ss:$8 sps:$4 sm:$0xff]  }
0x20a9   : > { %6586 = vmatpush1.bf16.msra.mxu0 %v10117_v55  ;;  %v10184_v48 = vld [vmem:[#allocation20 + $0xc4] ss:$8 sps:$4 sm:$0xff]   ;;  %v10186_v42 = vld [vmem:[#allocation20 + $0xc0] ss:$8 sps:$4 sm:$0xff]   ;;  %v10187_v62 = vld [vmem:[#allocation20 + $0xb4] ss:$8 sps:$4 sm:$0xff]  }
0x20aa   : > { %6587 = vmatprep.subr.bf16.mxu0 %v10118_v32  ;;  %6837 = vmatpush1.bf16.msra.mxu1 %v10162_v27  ;;  %v10189_v4 = vld [vmem:[#allocation20 + $0xb0] ss:$8 sps:$4 sm:$0xff]   ;;  %v10190_v58 = vld [vmem:[#allocation20 + $0xa4] ss:$8 sps:$4 sm:$0xff]   ;;  %v10192_v45 = vld [vmem:[#allocation20 + $0xa0] ss:$8 sps:$4 sm:$0xff]  }
0x20ab   : > { %6838 = vmatprep.subr.bf16.mxu1 %v10163_v38  ;;  %v10193_v14 = vld [vmem:[#allocation20 + $0x94] ss:$8 sps:$4 sm:$0xff]   ;;  %v10195_v20 = vld [vmem:[#allocation20 + $0x90] ss:$8 sps:$4 sm:$0xff]   ;;  %v10196_v57 = vld [vmem:[#allocation20 + $0x84] ss:$8 sps:$4 sm:$0xff]  }
0x20ac   : > { %v10198_v50 = vld [vmem:[#allocation20 + $0x80] ss:$8 sps:$4 sm:$0xff]   ;;  %vm7055_vm5 = vcmask 72704  }
0x20ad   : > { %6588 = vmatpush1.bf16.msra.mxu0 %v10120_v3  ;;  %v10201_v39 = vld [vmem:[#allocation25 + $0x74] ss:$8 sps:$4 sm:$0xff]   ;;  %v10247_v9 = vld [vmem:[%s12992_s7 + $0x78] sm:$0xff]  }
0x20ae   : > { %6589 = vmatprep.subr.bf16.mxu0 %v10121_v37  ;;  %6839 = vmatpush1.bf16.msra.mxu1 %v10165_v28  ;;  %v10248_v21 = vld [vmem:[%s12993_s26 + $0x38] sm:$0xff]   ;;  %v10249_v44 = vld [vmem:[%s12993_s26 + $0x70] sm:$0xff]   ;;  %v10251_v55 = vld [vmem:[%s12993_s26 + $0x68] sm:$0xff]  }
0x20af   : > { %6840 = vmatprep.subr.bf16.mxu1 %v10166_v51  ;;  %v10250_v43 = vld [vmem:[%s12993_s26 + $0x30] sm:$0xff]   ;;  %v10252_v32 = vld [vmem:[%s12993_s26 + $0x28] sm:$0xff]   ;;  %v10253_v3 = vld [vmem:[%s12993_s26 + $0x60] sm:$0xff]  }
0x20b0   : > { %v10254_v37 = vld [vmem:[%s12993_s26 + $0x20] sm:$0xff]   ;;  %v10255_v26 = vld [vmem:[%s12993_s26 + $0x58] sm:$0xff]  }
0x20b1   : > { %6590 = vmatpush1.bf16.msra.mxu0 %v10123_v36  ;;  %v10256_v31 = vld [vmem:[%s12993_s26 + $0x18] sm:$0xff]   ;;  %v6405_v36 = vld [vmem:[#allocation19] sm:$0x3] }
0x20b2   : > { %6591 = vmatprep.subr.bf16.mxu0 %v10124_v18  ;;  %6841 = vmatpush1.bf16.msra.mxu1 %v10168_v25  ;;  %v6414_v18 = vrot.slane %v6405_v36, %v11758_v52  ;;  %v6410_v63 = vrot.slane %v6405_v36, %v11751_v47  ;;  %v10204_v51 = vld [vmem:[#allocation25 + $0x64] ss:$8 sps:$4 sm:$0xff]   ;;  %v10202_v25 = vld [vmem:[#allocation25 + $0x60] ss:$8 sps:$4 sm:$0xff]  }
0x20b3   : > { %6842 = vmatprep.subr.bf16.mxu1 %v10169_v19  ;;  %v10207_v19 = vld [vmem:[#allocation25 + $0x54] ss:$8 sps:$4 sm:$0xff]  }
0x20b5   : > { %6592 = vmatpush1.bf16.msra.mxu0 %v10126_v10 }
0x20b6   : > { %6593 = vmatprep.subr.bf16.mxu0 %v10127_v22  ;;  %6843 = vmatpush1.bf16.msra.mxu1 %v10171_v41  ;;  %v10208_v41 = vld [vmem:[#allocation25 + $0x40] ss:$8 sps:$4 sm:$0xff]  }
0x20b7   : > { %6844 = vmatprep.subr.bf16.mxu1 %v10172_v30  ;;  %v10213_v30 = vld [vmem:[#allocation25 + $0x34] ss:$8 sps:$4 sm:$0xff]  }
0x20b9   : > { %6594 = vmatpush2.bf16.msra.mxu0 %v10129_v11 }
0x20ba   : > { %6595 = vmatprep.subr.bf16.mxu0 %v10130_v29  ;;  %6845 = vmatpush1.bf16.msra.mxu1 %v10174_v60  ;;  %v10214_v60 = vld [vmem:[#allocation25 + $0x20] ss:$8 sps:$4 sm:$0xff]  }
0x20bb   : > { %6846 = vmatprep.subr.bf16.mxu1 %v10175_v46  ;;  %v10219_v46 = vld [vmem:[#allocation25 + $0x14] ss:$8 sps:$4 sm:$0xff]  }
0x20bd   : > { %6596 = vmatpush2.bf16.msra.mxu0 %v10132_v40 }
0x20be   : > { %6597 = vmatprep.subr.bf16.mxu0 %v10133_v16  ;;  %6847 = vmatpush2.bf16.msra.mxu1 %v10177_v13  ;;  %v10225_v13 = vld [vmem:[#allocation25 + $0xf4] ss:$8 sps:$4 sm:$0xff]  }
0x20bf   : > { %6848 = vmatprep.subr.bf16.mxu1 %v10178_v61  ;;  %v10223_v61 = vld [vmem:[#allocation25 + $0xf0] ss:$8 sps:$4 sm:$0xff]  }
0x20c1   : > { %6598 = vmatpush2.bf16.msra.mxu0 %v10135_v7  ;;  %v10199_v7 = vld [vmem:[#allocation25 + $0x70] ss:$8 sps:$4 sm:$0xff]  }
0x20c2   : > { %6599 = vmatprep.subr.bf16.mxu0 %v10136_v49  ;;  %6849 = vmatpush2.bf16.msra.mxu1 %v10180_v56  ;;  %v10231_v56 = vld [vmem:[#allocation25 + $0xd4] ss:$8 sps:$4 sm:$0xff]  }
0x20c3   : > { %6850 = vmatprep.subr.bf16.mxu1 %v10181_v15  ;;  %v10229_v15 = vld [vmem:[#allocation25 + $0xd0] ss:$8 sps:$4 sm:$0xff]  }
0x20c5   : > { %6600 = vmatpush2.bf16.msra.mxu0 %v10138_v24  ;;  %v10205_v24 = vld [vmem:[#allocation25 + $0x50] ss:$8 sps:$4 sm:$0xff]  }
0x20c6   : > { %6601 = vmatprep.subr.bf16.mxu0 %v10139_v35  ;;  %6851 = vmatpush2.bf16.msra.mxu1 %v10183_v5  ;;  %v10210_v35 = vld [vmem:[#allocation25 + $0x44] ss:$8 sps:$4 sm:$0xff]   ;;  %v10232_v5 = vld [vmem:[#allocation25 + $0xc0] ss:$8 sps:$4 sm:$0xff]  }
0x20c7   : > { %6852 = vmatprep.subr.bf16.mxu1 %v10184_v48  ;;  %v10237_v48 = vld [vmem:[#allocation25 + $0xb4] ss:$8 sps:$4 sm:$0xff]  }
0x20c9   : > { %6602 = vmatpush2.bf16.msra.mxu0 %v10141_v53  ;;  %v10211_v53 = vld [vmem:[#allocation25 + $0x30] ss:$8 sps:$4 sm:$0xff]  }
0x20ca   : > { %6603 = vmatprep.subr.bf16.mxu0 %v10142_v59  ;;  %6853 = vmatpush2.bf16.msra.mxu1 %v10186_v42  ;;  %v10216_v59 = vld [vmem:[#allocation25 + $0x24] ss:$8 sps:$4 sm:$0xff]   ;;  %v10235_v42 = vld [vmem:[#allocation25 + $0xb0] ss:$8 sps:$4 sm:$0xff]  }
0x20cb   : > { %6854 = vmatprep.subr.bf16.mxu1 %v10187_v62  ;;  %v10240_v62 = vld [vmem:[#allocation25 + $0xa4] ss:$8 sps:$4 sm:$0xff]  }
0x20cd   : > { %6604 = vmatpush2.bf16.msra.mxu0 %v10144_v1  ;;  %v10222_v1 = vld [vmem:[#allocation25 + $0x4] ss:$8 sps:$4 sm:$0xff]  }
0x20ce   : > { %6605 = vmatprep.subr.bf16.mxu0 %v10145_v0  ;;  %6855 = vmatpush2.bf16.msra.mxu1 %v10189_v4  ;;  %v10220_v0 = vld [vmem:[#allocation25] ss:$8 sps:$4 sm:$0xff]  }
0x20cf   : > { %6856 = vmatprep.subr.bf16.mxu1 %v10190_v58  ;;  %v10238_v4 = vld [vmem:[#allocation25 + $0xa0] ss:$8 sps:$4 sm:$0xff]   ;;  %v10243_v58 = vld [vmem:[#allocation25 + $0x94] ss:$8 sps:$4 sm:$0xff]  }
0x20d1   : > { %6606 = vmatpush2.bf16.msra.mxu0 %v10147_v23  ;;  %v10228_v23 = vld [vmem:[#allocation25 + $0xe4] ss:$8 sps:$4 sm:$0xff]  }
0x20d2   : > { %6607 = vmatprep.subr.bf16.mxu0 %v10148_v54  ;;  %6857 = vmatpush2.bf16.msra.mxu1 %v10192_v45  ;;  %v10226_v54 = vld [vmem:[#allocation25 + $0xe0] ss:$8 sps:$4 sm:$0xff]   ;;  %v10241_v45 = vld [vmem:[#allocation25 + $0x90] ss:$8 sps:$4 sm:$0xff]  }
0x20d3   : > { %6858 = vmatprep.subr.bf16.mxu1 %v10193_v14  ;;  %v10246_v14 = vld [vmem:[#allocation25 + $0x84] ss:$8 sps:$4 sm:$0xff]  }
0x20d5   : > { %6608 = vmatpush2.bf16.msra.mxu0 %v10150_v17  ;;  %v10234_v17 = vld [vmem:[#allocation25 + $0xc4] ss:$8 sps:$4 sm:$0xff]  }
0x20d6   : > { %6859 = vmatpush2.bf16.msra.mxu1 %v10195_v20  ;;  %8991 = vmatprep.subr.bf16.mxu0 %v10247_v9  ;;  %v10244_v20 = vld [vmem:[#allocation25 + $0x80] ss:$8 sps:$4 sm:$0xff]   ;;  %v10260_v9 = vld [vmem:[%s12993_s26 + $0x8] sm:$0xff]  }
0x20d7   : > { %6860 = vmatprep.subr.bf16.mxu1 %v10196_v57  ;;  %v10257_v57 = vld [vmem:[%s12993_s26 + $0x50] sm:$0xff]  }
0x20d8   : > { %6610 = vmatmul.mubr.bf16.vlgmr.msra.gmra.mxu0 %v12683_v2 }
0x20d9   : > { %8992 = vmatpush3.bf16.msra.mxu0 %v10248_v21  ;;  %v10262_v21 = vld [vmem:[%s12993_s26] sm:$0xff]  }
0x20da   : > { %6861 = vmatpush2.bf16.msra.mxu1 %v10198_v50  ;;  %8993 = vmatprep.subr.bf16.mxu0 %v10249_v44  ;;  %v10258_v50 = vld [vmem:[%s12993_s26 + $0x10] sm:$0xff]  }
0x20db   : > { %7262 = vmatprep.subr.bf16.mxu1 %v10201_v39  ;;  %v10259_v39 = vld [vmem:[%s12993_s26 + $0x48] sm:$0xff]  }
0x20dc   : > { %v10265_v44 = vld [vmem:[#allocation28 + $0x74] ss:$8 sps:$4 sm:$0xff]  }
0x20dd   : > { %8994 = vmatpush3.bf16.msra.mxu0 %v10250_v43  ;;  %v6658_v43 = vld [vmem:[#allocation22] sm:$0x3] }
0x20de   : > { %8995 = vmatprep.subr.bf16.mxu0 %v10251_v55 }
0x20e1   : > { %8996 = vmatpush3.bf16.msra.mxu0 %v10252_v32  ;;  %v6667_v32 = vrot.slane %v6658_v43, %v11758_v52 }
0x20e2   : > { %8997 = vmatprep.subr.bf16.mxu0 %v10253_v3  ;;  %v6663_v3 = vrot.slane %v6658_v43, %v11751_v47 }
0x20e5   : > { %8998 = vmatpush3.bf16.msra.mxu0 %v10254_v37 }
0x20e6   : > { %8999 = vmatprep.subr.bf16.mxu0 %v10255_v26 }
0x20e9   : > { %9000 = vmatpush3.bf16.msra.mxu0 %v10256_v31 }
0x20ea   : > { %9001 = vmatprep.subr.bf16.mxu0 %v10257_v57 }
0x20ed   : > { %9002 = vmatpush3.bf16.msra.mxu0 %v10258_v50 }
0x20ee   : > { %9003 = vmatprep.subr.bf16.mxu0 %v10259_v39 }
0x20f1   : > { %9004 = vmatpush3.bf16.msra.mxu0 %v10260_v9  ;;  %v10308_v9 = vld [vmem:[#allocation28 + $0x80] ss:$8 sps:$4 sm:$0xff]  }
0x2198   : > { %v6611_v6 = vpop.f32.mrf.mxu0 }
0x2199   : > { %v6612_v34 = vadd.f32 %v6611_v6, %v6410_v63 }
0x219a   : > { %v6613_v8 = vpop.f32.mrf.mxu0 }
0x219b   : > { %v6614_v22 = vadd.f32 %v6613_v8, %v6414_v18  ;;  %v6620_v16 = vmax.f32 %v6612_v34, 0.0 }
0x219c   : > { %v6615_v10 = vpop.f32.mrf.mxu0 }
0x219d   : > { %v6616_v33 = vadd.f32 %v6615_v10, %v6410_v63  ;;  %v6621_v38 = vmax.f32 %v6614_v22, 0.0 }
0x219e   : > { %v6617_v11 = vpop.f32.mrf.mxu0 }
0x219f   : > { %v6618_v29 = vadd.f32 %v6617_v11, %v6414_v18  ;;  %v6622_v27 = vmax.f32 %v6616_v33, 0.0  ;;  %v10263_v11 = vld [vmem:[#allocation28 + $0x70] ss:$8 sps:$4 sm:$0xff]  }
0x21a1   : > { %v6623_v40 = vmax.f32 %v6618_v29, 0.0  ;;  %v6624_v49 = vpack.c.bf16 %v6622_v27, %v6620_v16  ;;  %v10268_v27 = vld [vmem:[#allocation28 + $0x64] ss:$8 sps:$4 sm:$0xff]   ;;  %v10269_v16 = vld [vmem:[#allocation28 + $0x50] ss:$8 sps:$4 sm:$0xff]  }
0x21a3   : > { %v6625_v28 = vpack.c.bf16 %v6623_v40, %v6621_v38  ;;  %v10266_v38 = vld [vmem:[#allocation28 + $0x60] ss:$8 sps:$4 sm:$0xff]   ;;  %v10271_v40 = vld [vmem:[#allocation28 + $0x54] ss:$8 sps:$4 sm:$0xff]  }
0x21a5   : > { %6862 = vmatprep.mubr.bf16.mxu1 %v6625_v28  ;;  %v10274_v28 = vld [vmem:[#allocation28 + $0x44] ss:$8 sps:$4 sm:$0xff]  }
0x21a6   : > { %6863 = vmatmul.mubr.bf16.vlgmr.msra.gmra.mxu1 %v6624_v49  ;;  %v10277_v49 = vld [vmem:[#allocation28 + $0x34] ss:$8 sps:$4 sm:$0xff]  }
0x21a7   : > { %7263 = vmatpush1.bf16.msra.mxu1 %v10199_v7  ;;  %7294 = vmatprep.mubr.bf16.mxu1 %v12678_v12  ;;  %v10217_v12 = vld [vmem:[#allocation25 + $0x10] ss:$8 sps:$4 sm:$0xff]   ;;  %v10272_v7 = vld [vmem:[#allocation28 + $0x40] ss:$8 sps:$4 sm:$0xff]  }
0x21a8   : > { %7264 = vmatprep.subr.bf16.mxu1 %v10204_v51  ;;  %v10275_v51 = vld [vmem:[#allocation28 + $0x30] ss:$8 sps:$4 sm:$0xff]  }
0x21ab   : > { %7265 = vmatpush1.bf16.msra.mxu1 %v10202_v25  ;;  %v10280_v25 = vld [vmem:[#allocation28 + $0x24] ss:$8 sps:$4 sm:$0xff]  }
0x21ac   : > { %7266 = vmatprep.subr.bf16.mxu1 %v10207_v19  ;;  %v10278_v19 = vld [vmem:[#allocation28 + $0x20] ss:$8 sps:$4 sm:$0xff]  }
0x21af   : > { %7267 = vmatpush1.bf16.msra.mxu1 %v10205_v24  ;;  %v10283_v24 = vld [vmem:[#allocation28 + $0x14] ss:$8 sps:$4 sm:$0xff]  }
0x21b0   : > { %7268 = vmatprep.subr.bf16.mxu1 %v10210_v35  ;;  %v10281_v35 = vld [vmem:[#allocation28 + $0x10] ss:$8 sps:$4 sm:$0xff]  }
0x21b3   : > { %7269 = vmatpush1.bf16.msra.mxu1 %v10208_v41  ;;  %v10286_v41 = vld [vmem:[#allocation28 + $0x4] ss:$8 sps:$4 sm:$0xff]  }
0x21b4   : > { %7270 = vmatprep.subr.bf16.mxu1 %v10213_v30  ;;  %v10284_v30 = vld [vmem:[#allocation28] ss:$8 sps:$4 sm:$0xff]  }
0x21b7   : > { %7271 = vmatpush1.bf16.msra.mxu1 %v10211_v53  ;;  %v10289_v53 = vld [vmem:[#allocation28 + $0xf4] ss:$8 sps:$4 sm:$0xff]  }
0x21b8   : > { %7272 = vmatprep.subr.bf16.mxu1 %v10216_v59  ;;  %v10287_v59 = vld [vmem:[#allocation28 + $0xf0] ss:$8 sps:$4 sm:$0xff]  }
0x21bb   : > { %7273 = vmatpush1.bf16.msra.mxu1 %v10214_v60  ;;  %v10292_v60 = vld [vmem:[#allocation28 + $0xe4] ss:$8 sps:$4 sm:$0xff]  }
0x21bc   : > { %7274 = vmatprep.subr.bf16.mxu1 %v10219_v46  ;;  %v10290_v46 = vld [vmem:[#allocation28 + $0xe0] ss:$8 sps:$4 sm:$0xff]  }
0x21bf   : > { %7275 = vmatpush1.bf16.msra.mxu1 %v10217_v12  ;;  %v10295_v12 = vld [vmem:[#allocation28 + $0xd4] ss:$8 sps:$4 sm:$0xff]  }
0x21c0   : > { %7276 = vmatprep.subr.bf16.mxu1 %v10222_v1  ;;  %v10293_v1 = vld [vmem:[#allocation28 + $0xd0] ss:$8 sps:$4 sm:$0xff]  }
0x21c3   : > { %7277 = vmatpush1.bf16.msra.mxu1 %v10220_v0  ;;  %v10298_v0 = vld [vmem:[#allocation28 + $0xc4] ss:$8 sps:$4 sm:$0xff]  }
0x21c4   : > { %7278 = vmatprep.subr.bf16.mxu1 %v10225_v13  ;;  %v10296_v13 = vld [vmem:[#allocation28 + $0xc0] ss:$8 sps:$4 sm:$0xff]  }
0x21c7   : > { %7279 = vmatpush2.bf16.msra.mxu1 %v10223_v61  ;;  %v10301_v61 = vld [vmem:[#allocation28 + $0xb4] ss:$8 sps:$4 sm:$0xff]  }
0x21c8   : > { %7280 = vmatprep.subr.bf16.mxu1 %v10228_v23  ;;  %v10299_v23 = vld [vmem:[#allocation28 + $0xb0] ss:$8 sps:$4 sm:$0xff]  }
0x21cb   : > { %7281 = vmatpush2.bf16.msra.mxu1 %v10226_v54  ;;  %v10304_v54 = vld [vmem:[#allocation28 + $0xa4] ss:$8 sps:$4 sm:$0xff]  }
0x21cc   : > { %7282 = vmatprep.subr.bf16.mxu1 %v10231_v56  ;;  %v7090_v56 = vld [vmem:[#allocation26] sm:$0x3] }
0x21cf   : > { %7283 = vmatpush2.bf16.msra.mxu1 %v10229_v15  ;;  %v10302_v15 = vld [vmem:[#allocation28 + $0xa0] ss:$8 sps:$4 sm:$0xff]  }
0x21d0   : > { %7284 = vmatprep.subr.bf16.mxu1 %v10234_v17 }
0x21d3   : > { %7285 = vmatpush2.bf16.msra.mxu1 %v10232_v5  ;;  %v10307_v5 = vld [vmem:[#allocation28 + $0x94] ss:$8 sps:$4 sm:$0xff]  }
0x21d4   : > { %7286 = vmatprep.subr.bf16.mxu1 %v10237_v48  ;;  %v7099_v48 = vrot.slane %v7090_v56, %v11758_v52 }
0x21d7   : > { %7287 = vmatpush2.bf16.msra.mxu1 %v10235_v42  ;;  %v7095_v42 = vrot.slane %v7090_v56, %v11751_v47 }
0x21d8   : > { %7288 = vmatprep.subr.bf16.mxu1 %v10240_v62 }
0x21db   : > { %7289 = vmatpush2.bf16.msra.mxu1 %v10238_v4  ;;  %v10305_v4 = vld [vmem:[#allocation28 + $0x90] ss:$8 sps:$4 sm:$0xff]  }
0x21dc   : > { %7290 = vmatprep.subr.bf16.mxu1 %v10243_v58 }
0x21df   : > { %7291 = vmatpush2.bf16.msra.mxu1 %v10241_v45  ;;  %v10310_v45 = vld [vmem:[#allocation28 + $0x84] ss:$8 sps:$4 sm:$0xff]  }
0x21e0   : > { %7292 = vmatprep.subr.bf16.mxu1 %v10246_v14 }
0x21e3   : > { %7293 = vmatpush2.bf16.msra.mxu1 %v10244_v20 }
0x21e6   : > { %7295 = vmatmul.mubr.bf16.vlgmr.msra.gmra.mxu1 %v12683_v2  ;;  %v10261_v2 = vld [vmem:[%s12993_s26 + $0x40] sm:$0xff]  }
0x21e7   : > { %9005 = vmatprep.subr.bf16.mxu0 %v10261_v2 }
0x21e8   : > { %9006 = vmatpush3.bf16.msra.mxu0 %v10262_v21 }
0x21e9   : > { %7515 = vmatprep.subr.bf16.mxu0 %v10265_v44 }
0x2266   : > { %v6864_v55 = vpop.f32.mrf.mxu1 }
0x2267   : > { %v6865_v6 = vadd.f32 %v6864_v55, %v6663_v3 }
0x2268   : > { %v6866_v37 = vpop.f32.mrf.mxu1 }
0x2269   : > { %v6867_v31 = vadd.f32 %v6866_v37, %v6667_v32  ;;  %v6873_v33 = vmax.f32 %v6865_v6, 0.0  ;;  %v10312_v37 = vld [vmem:[%s12994_s0 + $0x38] sm:$0xff]   ;;  %v10316_v6 = vld [vmem:[%s12994_s0 + $0x28] sm:$0xff]  }
0x226a   : > { %v6868_v26 = vpop.f32.mrf.mxu1 }
0x226b   : > { %v6869_v36 = vadd.f32 %v6868_v26, %v6663_v3  ;;  %v6874_v10 = vmax.f32 %v6867_v31, 0.0  ;;  %v10311_v3 = vld [vmem:[%s12994_s0 + $0x78] sm:$0xff]   ;;  %v10313_v26 = vld [vmem:[%s12994_s0 + $0x70] sm:$0xff]  }
0x226c   : > { %v6870_v18 = vpop.f32.mrf.mxu1  ;;  %9013 = vmatprep.subr.bf16.mxu1 %v10311_v3  ;;  %v10314_v31 = vld [vmem:[%s12994_s0 + $0x30] sm:$0xff]  }
0x226d   : > { %v6871_v63 = vadd.f32 %v6870_v18, %v6667_v32  ;;  %v6875_v8 = vmax.f32 %v6869_v36, 0.0  ;;  %9014 = vmatpush3.bf16.msra.mxu1 %v10312_v37  ;;  %v10315_v36 = vld [vmem:[%s12994_s0 + $0x68] sm:$0xff]   ;;  %v10317_v18 = vld [vmem:[%s12994_s0 + $0x60] sm:$0xff]  }
0x226e   : > { %9015 = vmatprep.subr.bf16.mxu1 %v10313_v26 }
0x226f   : > { %v6876_v22 = vmax.f32 %v6871_v63, 0.0  ;;  %v6877_v29 = vpack.c.bf16 %v6875_v8, %v6873_v33  ;;  %v10318_v63 = vld [vmem:[%s12994_s0 + $0x20] sm:$0xff]   ;;  %v10319_v8 = vld [vmem:[%s12994_s0 + $0x58] sm:$0xff]   ;;  %v10322_v33 = vld [vmem:[%s12994_s0 + $0x10] sm:$0xff]  }
0x2271   : > { %v6878_v34 = vpack.c.bf16 %v6876_v22, %v6874_v10  ;;  %9016 = vmatpush3.bf16.msra.mxu1 %v10314_v31  ;;  %v10320_v10 = vld [vmem:[%s12994_s0 + $0x18] sm:$0xff]   ;;  %v10321_v22 = vld [vmem:[%s12994_s0 + $0x50] sm:$0xff]  }
0x2272   : > { %9017 = vmatprep.subr.bf16.mxu1 %v10315_v36 }
0x2273   : > { %7046 = vmatprep.mubr.bf16.mxu0 %v6878_v34  ;;  %v10323_v34 = vld [vmem:[%s12994_s0 + $0x48] sm:$0xff]  }
0x2274   : > { %7047 = vmatmul.mubr.bf16.vlgmr.msra.gmra.mxu0 %v6877_v29  ;;  %v10325_v29 = vld [vmem:[%s12994_s0 + $0x40] sm:$0xff]  }
0x2275   : > { %7516 = vmatpush1.bf16.msra.mxu0 %v10263_v11  ;;  %9018 = vmatpush3.bf16.msra.mxu1 %v10316_v6  ;;  %v10324_v11 = vld [vmem:[%s12994_s0 + $0x8] sm:$0xff]  }
0x2276   : > { %7517 = vmatprep.subr.bf16.mxu0 %v10268_v27  ;;  %9019 = vmatprep.subr.bf16.mxu1 %v10317_v18  ;;  %v10326_v27 = vld [vmem:[%s12994_s0] sm:$0xff]  }
0x2279   : > { %7518 = vmatpush1.bf16.msra.mxu0 %v10266_v38  ;;  %9020 = vmatpush3.bf16.msra.mxu1 %v10318_v63 }
0x227a   : > { %7519 = vmatprep.subr.bf16.mxu0 %v10271_v40  ;;  %9021 = vmatprep.subr.bf16.mxu1 %v10319_v8  ;;  %v8767_v40 = vld [vmem:[#allocation23] ss:$0 sm:$0xff] }
0x227d   : > { %7520 = vmatpush1.bf16.msra.mxu0 %v10269_v16  ;;  %9022 = vmatpush3.bf16.msra.mxu1 %v10320_v10 }
0x227e   : > { %7521 = vmatprep.subr.bf16.mxu0 %v10274_v28  ;;  %9023 = vmatprep.subr.bf16.mxu1 %v10321_v22 }
0x2281   : > { %7522 = vmatpush1.bf16.msra.mxu0 %v10272_v7  ;;  %9024 = vmatpush3.bf16.msra.mxu1 %v10322_v33 }
0x2282   : > { %7523 = vmatprep.subr.bf16.mxu0 %v10277_v49  ;;  %9025 = vmatprep.subr.bf16.mxu1 %v10323_v34 }
0x2285   : > { %7524 = vmatpush1.bf16.msra.mxu0 %v10275_v51  ;;  %9026 = vmatpush3.bf16.msra.mxu1 %v10324_v11 }
0x2286   : > { %7525 = vmatprep.subr.bf16.mxu0 %v10280_v25  ;;  %9027 = vmatprep.subr.bf16.mxu1 %v10325_v29 }
0x2289   : > { %7526 = vmatpush1.bf16.msra.mxu0 %v10278_v19  ;;  %9028 = vmatpush3.bf16.msra.mxu1 %v10326_v27 }
0x228a   : > { %7527 = vmatprep.subr.bf16.mxu0 %v10283_v24  ;;  %v7343_v24 = vld [vmem:[#allocation29] sm:$0x3] }
0x228d   : > { %7528 = vmatpush1.bf16.msra.mxu0 %v10281_v35 }
0x228e   : > { %7529 = vmatprep.subr.bf16.mxu0 %v10286_v41  ;;  %v7352_v41 = vrot.slane %v7343_v24, %v11758_v52 }
0x2291   : > { %7530 = vmatpush1.bf16.msra.mxu0 %v10284_v30  ;;  %v7348_v30 = vrot.slane %v7343_v24, %v11751_v47 }
0x2292   : > { %7531 = vmatprep.subr.bf16.mxu0 %v10289_v53 }
0x2295   : > { %7532 = vmatpush2.bf16.msra.mxu0 %v10287_v59 }
0x2296   : > { %7533 = vmatprep.subr.bf16.mxu0 %v10292_v60 }
0x2299   : > { %7534 = vmatpush2.bf16.msra.mxu0 %v10290_v46 }
0x229a   : > { %7535 = vmatprep.subr.bf16.mxu0 %v10295_v12 }
0x229d   : > { %7536 = vmatpush2.bf16.msra.mxu0 %v10293_v1 }
0x229e   : > { %7537 = vmatprep.subr.bf16.mxu0 %v10298_v0 }
0x22a1   : > { %7538 = vmatpush2.bf16.msra.mxu0 %v10296_v13 }
0x22a2   : > { %7539 = vmatprep.subr.bf16.mxu0 %v10301_v61 }
0x22a5   : > { %7540 = vmatpush2.bf16.msra.mxu0 %v10299_v23 }
0x22a6   : > { %v7296_v17 = vpop.f32.mrf.mxu1  ;;  %7541 = vmatprep.subr.bf16.mxu0 %v10304_v54 }
0x22a7   : > { %v7297_v57 = vadd.f32 %v7296_v17, %v7095_v42 }
0x22a8   : > { %v7298_v62 = vpop.f32.mrf.mxu1 }
0x22a9   : > { %7542 = vmatpush2.bf16.msra.mxu0 %v10302_v15  ;;  %v7299_v14 = vadd.f32 %v7298_v62, %v7099_v48  ;;  %v7305_v43 = vmax.f32 %v7297_v57, 0.0 }
0x22aa   : > { %v7300_v58 = vpop.f32.mrf.mxu1  ;;  %7543 = vmatprep.subr.bf16.mxu0 %v10307_v5  ;;  %v8848_v5 = vld [vmem:[#allocation31] ss:$0 sm:$0xff] }
0x22ab   : > { %v7301_v20 = vadd.f32 %v7300_v58, %v7095_v42  ;;  %v7306_v21 = vmax.f32 %v7299_v14, 0.0 }
0x22ac   : > { %v7302_v50 = vpop.f32.mrf.mxu1 }
0x22ad   : > { %v7303_v39 = vadd.f32 %v7302_v50, %v7099_v48  ;;  %7544 = vmatpush2.bf16.msra.mxu0 %v10305_v4  ;;  %v7307_v2 = vmax.f32 %v7301_v20, 0.0 }
0x22ae   : > { %7545 = vmatprep.subr.bf16.mxu0 %v10310_v45 }
0x22af   : > { %v7308_v44 = vmax.f32 %v7303_v39, 0.0  ;;  %v7309_v32 = vpack.c.bf16 %v7307_v2, %v7305_v43 }
0x22b1   : > { %v7310_v55 = vpack.c.bf16 %v7308_v44, %v7306_v21  ;;  %7546 = vmatpush2.bf16.msra.mxu0 %v10308_v9 }
0x22b3   : > { %7547 = vmatprep.mubr.bf16.mxu0 %v7310_v55 }
0x22b4   : > { %7548 = vmatmul.mubr.bf16.vlgmr.msra.gmra.mxu0 %v7309_v32 }
0x2334   : > { %v9007_v38 = vpop.f32.mrf.mxu0 }
0x2336   : > { %v9008_v16 = vpop.f32.mrf.mxu0 }
0x2337   : > { %v9009_v28 = vadd.f32 %v9008_v16, %v9007_v38 }
0x2338   : > { %v9010_v7 = vpop.f32.mrf.mxu0 }
0x2339   : > { %v7049_v49 = vadd.f32 %v9009_v28, %v8767_v40 }
0x233a   : > { %v9011_v51 = vpop.f32.mrf.mxu0 }
0x233b   : > { %7056 = vst.msk [vmem:[%s12995_s5] sm:$0xff] %vm7055_vm5, %v7049_v49  ;;  %v9012_v25 = vadd.f32 %v9011_v51, %v9010_v7 }
0x233d   : > { %v7052_v19 = vadd.f32 %v9012_v25, %v8767_v40 }
0x233f   : > { %7057 = vst.msk [vmem:[%s12995_s5 + $0x8] sm:$0xff] %vm7055_vm5, %v7052_v19 }
0x2374   : > { %v7549_v35 = vpop.f32.mrf.mxu0 }
0x2375   : > { %v7550_v12 = vadd.f32 %v7549_v35, %v7348_v30 }
0x2376   : > { %v7551_v53 = vpop.f32.mrf.mxu0 }
0x2377   : > { %v7552_v60 = vadd.f32 %v7551_v53, %v7352_v41  ;;  %v7558_v54 = vmax.f32 %v7550_v12, 0.0 }
0x2378   : > { %v7553_v59 = vpop.f32.mrf.mxu0 }
0x2379   : > { %v7554_v46 = vadd.f32 %v7553_v59, %v7348_v30  ;;  %v7559_v61 = vmax.f32 %v7552_v60, 0.0 }
0x237a   : > { %v7555_v1 = vpop.f32.mrf.mxu0 }
0x237b   : > { %v7556_v0 = vadd.f32 %v7555_v1, %v7352_v41  ;;  %v7560_v13 = vmax.f32 %v7554_v46, 0.0 }
0x237d   : > { %v7561_v23 = vmax.f32 %v7556_v0, 0.0  ;;  %v7562_v15 = vpack.c.bf16 %v7560_v13, %v7558_v54 }
0x237f   : > { %v7563_v56 = vpack.c.bf16 %v7561_v23, %v7559_v61 }
0x2381   : > { %7731 = vmatprep.mubr.bf16.mxu1 %v7563_v56 }
0x2382   : > { %7732 = vmatmul.mubr.bf16.vlgmr.msra.gmra.mxu1 %v7562_v15 }
0x2442   : > { %v9029_v17 = vpop.f32.mrf.mxu1 }
0x2444   : > { %v9030_v52 = vpop.f32.mrf.mxu1 }
0x2445   : > { %v9031_v48 = vadd.f32 %v9030_v52, %v9029_v17 }
0x2446   : > { %v9032_v47 = vpop.f32.mrf.mxu1 }
0x2447   : > { %v7734_v42 = vadd.f32 %v9031_v48, %v8848_v5 }
0x2448   : > { %v9033_v62 = vpop.f32.mrf.mxu1 }
0x2449   : > { %7740 = vst.msk [vmem:[%s12996_s29] sm:$0xff] %vm7055_vm5, %v7734_v42  ;;  %v9034_v4 = vadd.f32 %v9033_v62, %v9032_v47 }
0x244b   : > { %v7737_v58 = vadd.f32 %v9034_v4, %v8848_v5 }
0x244d   : > { %7741 = vst.msk [vmem:[%s12996_s29 + $0x8] sm:$0xff] %vm7055_vm5, %v7737_v58 }
0x244e PF: > { %s12997_s30 = sld [smem:[#allocation46_spill]] }
0x244f   : > { %s12998_s7 = sld [smem:[#allocation42_spill]] }
0x2450   : > { %s12999_s4 = sld [smem:[#allocation43_spill]] }
0x2451   : > { %s13000_s8 = sld [smem:[#allocation47_spill]] }
0x2454   : > { %p55_p7 = scmp.ge.s32.totalorder %s12997_s30, 6  }
0x2456   :  { %57 = sbr.rel (!%p55_p7) target bundleno = 39 (0x27), region = 333 }
0x245b   :  { %7759 = vsyncpa [#allocation4], 1 }
0x245c   :  { %7761 = vsyncpa [#allocation4 + $0x1], 1 }
0x245d   :  { %7762 = vsyncpa [#allocation6], 1 }
0x245e   :  { %7764 = vsyncpa [#allocation6 + $0x1], 1 }
0x245f   :  { %7765 = vsyncpa [#allocation9], 1 }
0x2460   :  { %7767 = vsyncpa [#allocation9 + $0x1], 1 }
0x2461   :  { %7768 = vsyncpa [#allocation12], 1 }
0x2462   :  { %7770 = vsyncpa [#allocation12 + $0x1], 1 }
0x2463   :  { %7771 = vsyncpa [#allocation15], 1 }
0x2464   :  { %7773 = vsyncpa [#allocation15 + $0x1], 1 }
0x2465   :  { %7774 = vsyncpa [#allocation18], 1 }
0x2466   :  { %7775 = vsyncpa [#allocation21], 1 }
0x2467   :  { %7776 = vsyncpa [#allocation24], 1 }
0x2468   :  { %7777 = vsyncpa [#allocation27], 1 }
0x2469   :  { %7778 = vsyncpa [#allocation30], 1 }

</bundles_post_ra>
